<compile_context>
chip_gen: v6e
topology: v6e:2x2x1
jax: 0.10.0
libtpu: 0.0.40
codegen_flags: <defaults>
</compile_context>

<pallas_src>
import math
import jax
import jax.numpy as jnp
from jax.experimental import pallas as pl
from jax.experimental.pallas import tpu as pltpu

# ---------------- problem sizes (small, deterministic) ----------------
C_IN, C_OUT = 6, 16
N, D, H, W = 2, 4, 16, 16

ND = N * D                         # depth-kernel extent is 1 everywhere -> fuse N and D
HO, WO = H - 4, W - 4              # depthwise conv output (k=4, dil=2, pad=1) -> 12 x 12
H2, W2 = HO + 4, WO + 4            # 1x1x1 conv output with padding (2, 2)     -> 16 x 16
PAD = 3                            # wrapper-side pad so the conv is evaluated on the full
HPAD, WPAD = H + 2 * PAD, W + 2 * PAD  # 16x16 output frame (border masked later) -> 22 x 22
LANES = W2 * ND                    # 128: lane axis = w * ND + (n * D + d)
M1 = ND * HO * WO                  # BN1 population per channel (interior only)  = 1152
M2 = ND * H2 * W2                  # BN2 population per channel (incl. border)   = 2048
EPS = 1e-5


# ---------------- fused kernel ----------------
def conv_block_kernel(x_ref, w1_ref, bn1_ref, w2_ref, bn2_ref, o_ref):
    # x_ref   : (C_IN, HPAD, WPAD*ND)    VMEM  padded input, lane = w*ND + nd
    # w1_ref  : (16, C_IN, 1, LANES)     VMEM  depthwise taps (t = kh*4+kw), lane-broadcast
    # bn1_ref : (3, C_IN, 1, LANES)      VMEM  rows = conv1 bias, bn1 gamma, bn1 beta
    # w2_ref  : (C_OUT*H2, C_IN*H2)      VMEM  kron(w2, I_H2) lift of the 1x1x1 conv
    # bn2_ref : (3, C_OUT, 1, LANES)     VMEM  rows = conv2 bias, bn2 gamma, bn2 beta
    # o_ref   : (C_OUT, H2, LANES)       VMEM  output frame, same lane axis as the input
    inv_m1 = 1.0 / float(M1)
    inv_m2 = 1.0 / float(M2)

    def sum_hw(t):  # reduce (H2, LANES) per channel row, keepdims (two single-axis reduces)
        return jnp.sum(jnp.sum(t, axis=2, keepdims=True), axis=1, keepdims=True)

    # Interior mask: frame positions p_h, p_w in [2, 2+HO) hold real conv-1 outputs; the
    # 2-wide border is the (2,2) zero padding of the second conv.
    h_idx = jax.lax.broadcasted_iota(jnp.int32, (1, H2, LANES), 1)
    l_idx = jax.lax.broadcasted_iota(jnp.int32, (1, H2, LANES), 2)
    interior = ((h_idx >= 2) & (h_idx < 2 + HO) &
                (l_idx >= 2 * ND) & (l_idx < (2 + WO) * ND))

    # ---- phase 1: depthwise (1,4,4) dilated conv, all channels at once ---------------
    acc = None
    for kw in range(4):
        # hoist the lane (W) offset: one offset load per kw, cheap sublane slices per kh
        col = x_ref[:, :, 2 * kw * ND: 2 * kw * ND + LANES]     # (C_IN, HPAD, LANES)
        for kh in range(4):
            term = w1_ref[kh * 4 + kw] * col[:, 2 * kh: 2 * kh + H2, :]
            acc = term if acc is None else acc + term
    acc = acc + bn1_ref[0]                                       # conv1 bias

    # ---- BatchNorm1: training-mode batch stats over the interior, two-pass variance --
    mean1 = sum_hw(jnp.where(interior, acc, 0.0)) * inv_m1       # (C_IN, 1, 1)
    d1 = jnp.where(interior, acc - mean1, 0.0)
    var1 = sum_hw(d1 * d1) * inv_m1
    scale1 = jax.lax.rsqrt(var1 + EPS) * bn1_ref[1]
    shift1 = bn1_ref[2] - mean1 * scale1
    # zero border == the spatial zero-padding of the 1x1x1 conv
    y1 = jnp.where(interior, acc * scale1 + shift1, 0.0)         # (C_IN, H2, LANES)

    # ---- phase 2: 1x1x1 conv as one MXU matmul ----------------------------------------
    # (C_IN, H2, LANES) -> (C_IN*H2, LANES) is a pure leading-dim merge (no relayout);
    # kron(w2, I_H2) applies w2 across channels for every frame row in a single dot.
    y1m = y1.reshape(C_IN * H2, LANES)
    z = jnp.dot(w2_ref[...], y1m,
                precision=jax.lax.Precision.HIGHEST,
                preferred_element_type=jnp.float32)               # (C_OUT*H2, LANES)
    z = z.reshape(C_OUT, H2, LANES) + bn2_ref[0]                  # + conv2 bias

    # ---- BatchNorm2 (stats include the bias-only border) + ReLU -----------------------
    mean2 = sum_hw(z) * inv_m2                                    # (C_OUT, 1, 1)
    d2 = z - mean2
    var2 = sum_hw(d2 * d2) * inv_m2
    scale2 = jax.lax.rsqrt(var2 + EPS) * bn2_ref[1]
    shift2 = bn2_ref[2] - mean2 * scale2
    o_ref[...] = jnp.maximum(z * scale2 + shift2, 0.0)            # one lane-dense store


# ---------------- wrapper ----------------
@jax.jit
def conv_block_forward(x, params):
    """x: (N, C_IN, D, H, W) float32 -> (N, C_OUT, D, H, W) float32."""
    w1, b1, g1, be1, w2, b2, g2, be2 = params

    # layout plumbing only (per perf review): NCDHW -> padded, lane-dense (lane = w*ND + nd)
    xc = jnp.transpose(x, (1, 0, 2, 3, 4)).reshape(C_IN, ND, H, W)
    xp = jnp.pad(xc, ((0, 0), (0, 0), (PAD, PAD), (PAD, PAD)))            # (C_IN, ND, HPAD, WPAD)
    xk = jnp.transpose(xp, (0, 2, 3, 1)).reshape(C_IN, HPAD, WPAD * ND)   # (C_IN, HPAD, 176)

    w1k = jnp.broadcast_to(w1.reshape(C_IN, 16).T.reshape(16, C_IN, 1, 1),
                           (16, C_IN, 1, LANES))
    bn1k = jnp.broadcast_to(jnp.stack([b1, g1, be1]).reshape(3, C_IN, 1, 1),
                            (3, C_IN, 1, LANES))
    # kron(w2, I_H2): lifts the (C_OUT, C_IN) pointwise conv to one matmul over the
    # (C_IN*H2, LANES) activation slab without any in-kernel lane<->sublane reshape.
    w2k = jnp.kron(w2.reshape(C_OUT, C_IN), jnp.eye(H2, dtype=jnp.float32))  # (256, 96)
    bn2k = jnp.broadcast_to(jnp.stack([b2, g2, be2]).reshape(3, C_OUT, 1, 1),
                            (3, C_OUT, 1, LANES))

    out = pl.pallas_call(
        conv_block_kernel,
        out_shape=jax.ShapeDtypeStruct((C_OUT, H2, LANES), jnp.float32),
        in_specs=[pl.BlockSpec(memory_space=pltpu.MemorySpace.VMEM) for _ in range(5)],
        out_specs=pl.BlockSpec(memory_space=pltpu.MemorySpace.VMEM),
    )(xk, w1k, bn1k, w2k, bn2k)

    # lane axis is (w, n, d); un-flatten and return NCDHW
    out = out.reshape(C_OUT, H2, W2, N, D)
    return jnp.transpose(out, (3, 0, 4, 1, 2))


# ---------------- pure-JAX reference (for self-check) ----------------
def ref_forward(x, params):
    w1, b1, g1, be1, w2, b2, g2, be2 = params
    dn = ("NCDHW", "OIDHW", "NCDHW")
    y = jax.lax.conv_general_dilated(
        x, w1, window_strides=(1, 1, 1), padding=[(0, 0), (1, 1), (1, 1)],
        rhs_dilation=(1, 2, 2), dimension_numbers=dn, feature_group_count=C_IN,
        precision=jax.lax.Precision.HIGHEST)
    y = y + b1[None, :, None, None, None]
    m = y.mean(axis=(0, 2, 3, 4), keepdims=True)
    v = ((y - m) ** 2).mean(axis=(0, 2, 3, 4), keepdims=True)
    y = (y - m) * jax.lax.rsqrt(v + EPS) * g1[None, :, None, None, None] \
        + be1[None, :, None, None, None]
    z = jax.lax.conv_general_dilated(
        y, w2, window_strides=(1, 1, 1), padding=[(0, 0), (2, 2), (2, 2)],
        dimension_numbers=dn, precision=jax.lax.Precision.HIGHEST)
    z = z + b2[None, :, None, None, None]
    m2 = z.mean(axis=(0, 2, 3, 4), keepdims=True)
    v2 = ((z - m2) ** 2).mean(axis=(0, 2, 3, 4), keepdims=True)
    z = (z - m2) * jax.lax.rsqrt(v2 + EPS) * g2[None, :, None, None, None] \
        + be2[None, :, None, None, None]
    return jnp.maximum(z, 0.0)


# ---------------- deterministic parameter init ----------------
def make_params(key):
    k1, k2, k3, k4 = jax.random.split(key, 4)
    fan1 = 1 * 1 * 4 * 4                              # in_ch/groups * prod(kernel)
    bnd1 = math.sqrt(3.0 / fan1)                      # kaiming_uniform, gain=1 (linear)
    w1 = jax.random.uniform(k1, (C_IN, 1, 1, 4, 4), jnp.float32, -bnd1, bnd1)
    b1 = jax.random.uniform(k2, (C_IN,), jnp.float32,
                            -1.0 / math.sqrt(fan1), 1.0 / math.sqrt(fan1))
    fan2 = C_IN
    bnd2 = math.sqrt(2.0) * math.sqrt(3.0 / fan2)     # kaiming_uniform, relu gain
    w2 = jax.random.uniform(k3, (C_OUT, C_IN, 1, 1, 1), jnp.float32, -bnd2, bnd2)
    b2 = jax.random.uniform(k4, (C_OUT,), jnp.float32,
                            -1.0 / math.sqrt(fan2), 1.0 / math.sqrt(fan2))
    g1, be1 = jnp.ones((C_IN,), jnp.float32), jnp.zeros((C_IN,), jnp.float32)
    g2, be2 = jnp.ones((C_OUT,), jnp.float32), jnp.zeros((C_OUT,), jnp.float32)
    return (w1, b1, g1, be1, w2, b2, g2, be2)


if __name__ == "__main__":
    key = jax.random.PRNGKey(0)
    kx, kp = jax.random.split(key)
    x = jax.random.normal(kx, (N, C_IN, D, H, W), dtype=jnp.float32)
    params = make_params(kp)

    out = jax.block_until_ready(conv_block_forward(x, params))
    assert out.shape == (N, C_OUT, D, H2, W2), out.shape

    ref = jax.block_until_ready(ref_forward(x, params))
    max_err = float(jnp.max(jnp.abs(out - ref)))
    assert max_err < 1e-3, f"mismatch vs reference: max abs err {max_err}"

    # TODO(synk): BatchNorm running-stat (momentum) updates are training-side state and
    # do not affect the forward output; they are not emulated.
    print("KERNEL_OK")
</pallas_src>

<mosaic_0001>
module attributes {stable_mosaic.version = 11 : i64} {
  func.func @conv_block_kernel(%arg0: memref<6x22x176xf32, #tpu.memory_space<vmem>>, %arg1: memref<16x6x1x128xf32, #tpu.memory_space<vmem>>, %arg2: memref<3x6x1x128xf32, #tpu.memory_space<vmem>>, %arg3: memref<256x96xf32, #tpu.memory_space<vmem>>, %arg4: memref<3x16x1x128xf32, #tpu.memory_space<vmem>>, %arg5: memref<16x16x128xf32, #tpu.memory_space<vmem>>) attributes {dimension_semantics = [], scalar_prefetch = 0 : i64, scratch_operands = 0 : i64, tpu.core_type = #tpu.core_type<tc>} {
    %0 = tpu.iota {dimensions = array<i32: 1>} : vector<1x16x128xi32>
    %1 = tpu.iota {dimensions = array<i32: 2>} : vector<1x16x128xi32>
    %c2_i32 = arith.constant 2 : i32
    %2 = vector.broadcast %c2_i32 : i32 to vector<1x16x128xi32>
    %3 = arith.cmpi sge, %0, %2 : vector<1x16x128xi32>
    %c14_i32 = arith.constant 14 : i32
    %4 = vector.broadcast %c14_i32 : i32 to vector<1x16x128xi32>
    %5 = arith.cmpi slt, %0, %4 : vector<1x16x128xi32>
    %6 = arith.andi %3, %5 : vector<1x16x128xi1>
    %c16_i32 = arith.constant 16 : i32
    %7 = vector.broadcast %c16_i32 : i32 to vector<1x16x128xi32>
    %8 = arith.cmpi sge, %1, %7 : vector<1x16x128xi32>
    %9 = arith.andi %6, %8 : vector<1x16x128xi1>
    %c112_i32 = arith.constant 112 : i32
    %10 = vector.broadcast %c112_i32 : i32 to vector<1x16x128xi32>
    %11 = arith.cmpi slt, %1, %10 : vector<1x16x128xi32>
    %12 = arith.andi %9, %11 : vector<1x16x128xi1>
    %c0 = arith.constant 0 : index
    %c0_0 = arith.constant 0 : index
    %c0_1 = arith.constant 0 : index
    %13 = vector.load %arg0[%c0, %c0_0, %c0_1] : memref<6x22x176xf32, #tpu.memory_space<vmem>>, vector<6x22x128xf32>
    %c0_2 = arith.constant 0 : index
    %c0_3 = arith.constant 0 : index
    %c0_4 = arith.constant 0 : index
    %c0_5 = arith.constant 0 : index
    %14 = vector.load %arg1[%c0_2, %c0_3, %c0_4, %c0_5] : memref<16x6x1x128xf32, #tpu.memory_space<vmem>>, vector<1x6x1x128xf32>
    %15 = vector.shape_cast %14 : vector<1x6x1x128xf32> to vector<6x1x128xf32>
    %16 = vector.extract_strided_slice %13 {offsets = [0, 0, 0], sizes = [6, 16, 128], strides = [1, 1, 1]} : vector<6x22x128xf32> to vector<6x16x128xf32>
    %17 = vector.broadcast %15 : vector<6x1x128xf32> to vector<6x16x128xf32>
    %18 = arith.mulf %17, %16 : vector<6x16x128xf32>
    %c4 = arith.constant 4 : index
    %c0_6 = arith.constant 0 : index
    %c0_7 = arith.constant 0 : index
    %c0_8 = arith.constant 0 : index
    %19 = vector.load %arg1[%c4, %c0_6, %c0_7, %c0_8] : memref<16x6x1x128xf32, #tpu.memory_space<vmem>>, vector<1x6x1x128xf32>
    %20 = vector.shape_cast %19 : vector<1x6x1x128xf32> to vector<6x1x128xf32>
    %21 = vector.extract_strided_slice %13 {offsets = [0, 2, 0], sizes = [6, 16, 128], strides = [1, 1, 1]} : vector<6x22x128xf32> to vector<6x16x128xf32>
    %22 = vector.broadcast %20 : vector<6x1x128xf32> to vector<6x16x128xf32>
    %23 = arith.mulf %22, %21 : vector<6x16x128xf32>
    %24 = arith.addf %18, %23 : vector<6x16x128xf32>
    %c8 = arith.constant 8 : index
    %c0_9 = arith.constant 0 : index
    %c0_10 = arith.constant 0 : index
    %c0_11 = arith.constant 0 : index
    %25 = vector.load %arg1[%c8, %c0_9, %c0_10, %c0_11] : memref<16x6x1x128xf32, #tpu.memory_space<vmem>>, vector<1x6x1x128xf32>
    %26 = vector.shape_cast %25 : vector<1x6x1x128xf32> to vector<6x1x128xf32>
    %27 = vector.extract_strided_slice %13 {offsets = [0, 4, 0], sizes = [6, 16, 128], strides = [1, 1, 1]} : vector<6x22x128xf32> to vector<6x16x128xf32>
    %28 = vector.broadcast %26 : vector<6x1x128xf32> to vector<6x16x128xf32>
    %29 = arith.mulf %28, %27 : vector<6x16x128xf32>
    %30 = arith.addf %24, %29 : vector<6x16x128xf32>
    %c12 = arith.constant 12 : index
    %c0_12 = arith.constant 0 : index
    %c0_13 = arith.constant 0 : index
    %c0_14 = arith.constant 0 : index
    %31 = vector.load %arg1[%c12, %c0_12, %c0_13, %c0_14] : memref<16x6x1x128xf32, #tpu.memory_space<vmem>>, vector<1x6x1x128xf32>
    %32 = vector.shape_cast %31 : vector<1x6x1x128xf32> to vector<6x1x128xf32>
    %33 = vector.extract_strided_slice %13 {offsets = [0, 6, 0], sizes = [6, 16, 128], strides = [1, 1, 1]} : vector<6x22x128xf32> to vector<6x16x128xf32>
    %34 = vector.broadcast %32 : vector<6x1x128xf32> to vector<6x16x128xf32>
    %35 = arith.mulf %34, %33 : vector<6x16x128xf32>
    %36 = arith.addf %30, %35 : vector<6x16x128xf32>
    %c0_15 = arith.constant 0 : index
    %c0_16 = arith.constant 0 : index
    %c16 = arith.constant 16 : index
    %37 = vector.load %arg0[%c0_15, %c0_16, %c16] : memref<6x22x176xf32, #tpu.memory_space<vmem>>, vector<6x22x128xf32>
    %c1 = arith.constant 1 : index
    %c0_17 = arith.constant 0 : index
    %c0_18 = arith.constant 0 : index
    %c0_19 = arith.constant 0 : index
    %38 = vector.load %arg1[%c1, %c0_17, %c0_18, %c0_19] : memref<16x6x1x128xf32, #tpu.memory_space<vmem>>, vector<1x6x1x128xf32>
    %39 = vector.shape_cast %38 : vector<1x6x1x128xf32> to vector<6x1x128xf32>
    %40 = vector.extract_strided_slice %37 {offsets = [0, 0, 0], sizes = [6, 16, 128], strides = [1, 1, 1]} : vector<6x22x128xf32> to vector<6x16x128xf32>
    %41 = vector.broadcast %39 : vector<6x1x128xf32> to vector<6x16x128xf32>
    %42 = arith.mulf %41, %40 : vector<6x16x128xf32>
    %43 = arith.addf %36, %42 : vector<6x16x128xf32>
    %c5 = arith.constant 5 : index
    %c0_20 = arith.constant 0 : index
    %c0_21 = arith.constant 0 : index
    %c0_22 = arith.constant 0 : index
    %44 = vector.load %arg1[%c5, %c0_20, %c0_21, %c0_22] : memref<16x6x1x128xf32, #tpu.memory_space<vmem>>, vector<1x6x1x128xf32>
    %45 = vector.shape_cast %44 : vector<1x6x1x128xf32> to vector<6x1x128xf32>
    %46 = vector.extract_strided_slice %37 {offsets = [0, 2, 0], sizes = [6, 16, 128], strides = [1, 1, 1]} : vector<6x22x128xf32> to vector<6x16x128xf32>
    %47 = vector.broadcast %45 : vector<6x1x128xf32> to vector<6x16x128xf32>
    %48 = arith.mulf %47, %46 : vector<6x16x128xf32>
    %49 = arith.addf %43, %48 : vector<6x16x128xf32>
    %c9 = arith.constant 9 : index
    %c0_23 = arith.constant 0 : index
    %c0_24 = arith.constant 0 : index
    %c0_25 = arith.constant 0 : index
    %50 = vector.load %arg1[%c9, %c0_23, %c0_24, %c0_25] : memref<16x6x1x128xf32, #tpu.memory_space<vmem>>, vector<1x6x1x128xf32>
    %51 = vector.shape_cast %50 : vector<1x6x1x128xf32> to vector<6x1x128xf32>
    %52 = vector.extract_strided_slice %37 {offsets = [0, 4, 0], sizes = [6, 16, 128], strides = [1, 1, 1]} : vector<6x22x128xf32> to vector<6x16x128xf32>
    %53 = vector.broadcast %51 : vector<6x1x128xf32> to vector<6x16x128xf32>
    %54 = arith.mulf %53, %52 : vector<6x16x128xf32>
    %55 = arith.addf %49, %54 : vector<6x16x128xf32>
    %c13 = arith.constant 13 : index
    %c0_26 = arith.constant 0 : index
    %c0_27 = arith.constant 0 : index
    %c0_28 = arith.constant 0 : index
    %56 = vector.load %arg1[%c13, %c0_26, %c0_27, %c0_28] : memref<16x6x1x128xf32, #tpu.memory_space<vmem>>, vector<1x6x1x128xf32>
    %57 = vector.shape_cast %56 : vector<1x6x1x128xf32> to vector<6x1x128xf32>
    %58 = vector.extract_strided_slice %37 {offsets = [0, 6, 0], sizes = [6, 16, 128], strides = [1, 1, 1]} : vector<6x22x128xf32> to vector<6x16x128xf32>
    %59 = vector.broadcast %57 : vector<6x1x128xf32> to vector<6x16x128xf32>
    %60 = arith.mulf %59, %58 : vector<6x16x128xf32>
    %61 = arith.addf %55, %60 : vector<6x16x128xf32>
    %c0_29 = arith.constant 0 : index
    %c0_30 = arith.constant 0 : index
    %c32 = arith.constant 32 : index
    %62 = vector.load %arg0[%c0_29, %c0_30, %c32] : memref<6x22x176xf32, #tpu.memory_space<vmem>>, vector<6x22x128xf32>
    %c2 = arith.constant 2 : index
    %c0_31 = arith.constant 0 : index
    %c0_32 = arith.constant 0 : index
    %c0_33 = arith.constant 0 : index
    %63 = vector.load %arg1[%c2, %c0_31, %c0_32, %c0_33] : memref<16x6x1x128xf32, #tpu.memory_space<vmem>>, vector<1x6x1x128xf32>
    %64 = vector.shape_cast %63 : vector<1x6x1x128xf32> to vector<6x1x128xf32>
    %65 = vector.extract_strided_slice %62 {offsets = [0, 0, 0], sizes = [6, 16, 128], strides = [1, 1, 1]} : vector<6x22x128xf32> to vector<6x16x128xf32>
    %66 = vector.broadcast %64 : vector<6x1x128xf32> to vector<6x16x128xf32>
    %67 = arith.mulf %66, %65 : vector<6x16x128xf32>
    %68 = arith.addf %61, %67 : vector<6x16x128xf32>
    %c6 = arith.constant 6 : index
    %c0_34 = arith.constant 0 : index
    %c0_35 = arith.constant 0 : index
    %c0_36 = arith.constant 0 : index
    %69 = vector.load %arg1[%c6, %c0_34, %c0_35, %c0_36] : memref<16x6x1x128xf32, #tpu.memory_space<vmem>>, vector<1x6x1x128xf32>
    %70 = vector.shape_cast %69 : vector<1x6x1x128xf32> to vector<6x1x128xf32>
    %71 = vector.extract_strided_slice %62 {offsets = [0, 2, 0], sizes = [6, 16, 128], strides = [1, 1, 1]} : vector<6x22x128xf32> to vector<6x16x128xf32>
    %72 = vector.broadcast %70 : vector<6x1x128xf32> to vector<6x16x128xf32>
    %73 = arith.mulf %72, %71 : vector<6x16x128xf32>
    %74 = arith.addf %68, %73 : vector<6x16x128xf32>
    %c10 = arith.constant 10 : index
    %c0_37 = arith.constant 0 : index
    %c0_38 = arith.constant 0 : index
    %c0_39 = arith.constant 0 : index
    %75 = vector.load %arg1[%c10, %c0_37, %c0_38, %c0_39] : memref<16x6x1x128xf32, #tpu.memory_space<vmem>>, vector<1x6x1x128xf32>
    %76 = vector.shape_cast %75 : vector<1x6x1x128xf32> to vector<6x1x128xf32>
    %77 = vector.extract_strided_slice %62 {offsets = [0, 4, 0], sizes = [6, 16, 128], strides = [1, 1, 1]} : vector<6x22x128xf32> to vector<6x16x128xf32>
    %78 = vector.broadcast %76 : vector<6x1x128xf32> to vector<6x16x128xf32>
    %79 = arith.mulf %78, %77 : vector<6x16x128xf32>
    %80 = arith.addf %74, %79 : vector<6x16x128xf32>
    %c14 = arith.constant 14 : index
    %c0_40 = arith.constant 0 : index
    %c0_41 = arith.constant 0 : index
    %c0_42 = arith.constant 0 : index
    %81 = vector.load %arg1[%c14, %c0_40, %c0_41, %c0_42] : memref<16x6x1x128xf32, #tpu.memory_space<vmem>>, vector<1x6x1x128xf32>
    %82 = vector.shape_cast %81 : vector<1x6x1x128xf32> to vector<6x1x128xf32>
    %83 = vector.extract_strided_slice %62 {offsets = [0, 6, 0], sizes = [6, 16, 128], strides = [1, 1, 1]} : vector<6x22x128xf32> to vector<6x16x128xf32>
    %84 = vector.broadcast %82 : vector<6x1x128xf32> to vector<6x16x128xf32>
    %85 = arith.mulf %84, %83 : vector<6x16x128xf32>
    %86 = arith.addf %80, %85 : vector<6x16x128xf32>
    %c0_43 = arith.constant 0 : index
    %c0_44 = arith.constant 0 : index
    %c48 = arith.constant 48 : index
    %87 = vector.load %arg0[%c0_43, %c0_44, %c48] : memref<6x22x176xf32, #tpu.memory_space<vmem>>, vector<6x22x128xf32>
    %c3 = arith.constant 3 : index
    %c0_45 = arith.constant 0 : index
    %c0_46 = arith.constant 0 : index
    %c0_47 = arith.constant 0 : index
    %88 = vector.load %arg1[%c3, %c0_45, %c0_46, %c0_47] : memref<16x6x1x128xf32, #tpu.memory_space<vmem>>, vector<1x6x1x128xf32>
    %89 = vector.shape_cast %88 : vector<1x6x1x128xf32> to vector<6x1x128xf32>
    %90 = vector.extract_strided_slice %87 {offsets = [0, 0, 0], sizes = [6, 16, 128], strides = [1, 1, 1]} : vector<6x22x128xf32> to vector<6x16x128xf32>
    %91 = vector.broadcast %89 : vector<6x1x128xf32> to vector<6x16x128xf32>
    %92 = arith.mulf %91, %90 : vector<6x16x128xf32>
    %93 = arith.addf %86, %92 : vector<6x16x128xf32>
    %c7 = arith.constant 7 : index
    %c0_48 = arith.constant 0 : index
    %c0_49 = arith.constant 0 : index
    %c0_50 = arith.constant 0 : index
    %94 = vector.load %arg1[%c7, %c0_48, %c0_49, %c0_50] : memref<16x6x1x128xf32, #tpu.memory_space<vmem>>, vector<1x6x1x128xf32>
    %95 = vector.shape_cast %94 : vector<1x6x1x128xf32> to vector<6x1x128xf32>
    %96 = vector.extract_strided_slice %87 {offsets = [0, 2, 0], sizes = [6, 16, 128], strides = [1, 1, 1]} : vector<6x22x128xf32> to vector<6x16x128xf32>
    %97 = vector.broadcast %95 : vector<6x1x128xf32> to vector<6x16x128xf32>
    %98 = arith.mulf %97, %96 : vector<6x16x128xf32>
    %99 = arith.addf %93, %98 : vector<6x16x128xf32>
    %c11 = arith.constant 11 : index
    %c0_51 = arith.constant 0 : index
    %c0_52 = arith.constant 0 : index
    %c0_53 = arith.constant 0 : index
    %100 = vector.load %arg1[%c11, %c0_51, %c0_52, %c0_53] : memref<16x6x1x128xf32, #tpu.memory_space<vmem>>, vector<1x6x1x128xf32>
    %101 = vector.shape_cast %100 : vector<1x6x1x128xf32> to vector<6x1x128xf32>
    %102 = vector.extract_strided_slice %87 {offsets = [0, 4, 0], sizes = [6, 16, 128], strides = [1, 1, 1]} : vector<6x22x128xf32> to vector<6x16x128xf32>
    %103 = vector.broadcast %101 : vector<6x1x128xf32> to vector<6x16x128xf32>
    %104 = arith.mulf %103, %102 : vector<6x16x128xf32>
    %105 = arith.addf %99, %104 : vector<6x16x128xf32>
    %c15 = arith.constant 15 : index
    %c0_54 = arith.constant 0 : index
    %c0_55 = arith.constant 0 : index
    %c0_56 = arith.constant 0 : index
    %106 = vector.load %arg1[%c15, %c0_54, %c0_55, %c0_56] : memref<16x6x1x128xf32, #tpu.memory_space<vmem>>, vector<1x6x1x128xf32>
    %107 = vector.shape_cast %106 : vector<1x6x1x128xf32> to vector<6x1x128xf32>
    %108 = vector.extract_strided_slice %87 {offsets = [0, 6, 0], sizes = [6, 16, 128], strides = [1, 1, 1]} : vector<6x22x128xf32> to vector<6x16x128xf32>
    %109 = vector.broadcast %107 : vector<6x1x128xf32> to vector<6x16x128xf32>
    %110 = arith.mulf %109, %108 : vector<6x16x128xf32>
    %111 = arith.addf %105, %110 : vector<6x16x128xf32>
    %c0_57 = arith.constant 0 : index
    %c0_58 = arith.constant 0 : index
    %c0_59 = arith.constant 0 : index
    %c0_60 = arith.constant 0 : index
    %112 = vector.load %arg2[%c0_57, %c0_58, %c0_59, %c0_60] : memref<3x6x1x128xf32, #tpu.memory_space<vmem>>, vector<1x6x1x128xf32>
    %113 = vector.shape_cast %112 : vector<1x6x1x128xf32> to vector<6x1x128xf32>
    %114 = vector.broadcast %113 : vector<6x1x128xf32> to vector<6x16x128xf32>
    %115 = arith.addf %111, %114 : vector<6x16x128xf32>
    %cst = arith.constant 0.000000e+00 : f32
    %116 = vector.shape_cast %12 : vector<1x16x128xi1> to vector<1x16x128xi1>
    %117 = vector.broadcast %116 : vector<1x16x128xi1> to vector<6x16x128xi1>
    %118 = vector.broadcast %cst : f32 to vector<6x16x128xf32>
    %119 = arith.select %117, %115, %118 : vector<6x16x128xi1>, vector<6x16x128xf32>
    %cst_61 = arith.constant dense<0.000000e+00> : vector<6x16xf32>
    %120 = vector.multi_reduction <add>, %119, %cst_61 [2] : vector<6x16x128xf32> to vector<6x16xf32>
    %121 = vector.shape_cast %120 : vector<6x16xf32> to vector<6x16x1xf32>
    %cst_62 = arith.constant dense<0.000000e+00> : vector<6x1xf32>
    %122 = vector.multi_reduction <add>, %121, %cst_62 [1] : vector<6x16x1xf32> to vector<6x1xf32>
    %123 = vector.shape_cast %122 : vector<6x1xf32> to vector<6x1x1xf32>
    %cst_63 = arith.constant 8.68055562E-4 : f32
    %124 = vector.broadcast %cst_63 : f32 to vector<6x1x1xf32>
    %125 = arith.mulf %123, %124 : vector<6x1x1xf32>
    %126 = vector.broadcast %125 : vector<6x1x1xf32> to vector<6x16x128xf32>
    %127 = arith.subf %115, %126 : vector<6x16x128xf32>
    %cst_64 = arith.constant 0.000000e+00 : f32
    %128 = vector.shape_cast %12 : vector<1x16x128xi1> to vector<1x16x128xi1>
    %129 = vector.broadcast %128 : vector<1x16x128xi1> to vector<6x16x128xi1>
    %130 = vector.broadcast %cst_64 : f32 to vector<6x16x128xf32>
    %131 = arith.select %129, %127, %130 : vector<6x16x128xi1>, vector<6x16x128xf32>
    %132 = arith.mulf %131, %131 : vector<6x16x128xf32>
    %cst_65 = arith.constant dense<0.000000e+00> : vector<6x16xf32>
    %133 = vector.multi_reduction <add>, %132, %cst_65 [2] : vector<6x16x128xf32> to vector<6x16xf32>
    %134 = vector.shape_cast %133 : vector<6x16xf32> to vector<6x16x1xf32>
    %cst_66 = arith.constant dense<0.000000e+00> : vector<6x1xf32>
    %135 = vector.multi_reduction <add>, %134, %cst_66 [1] : vector<6x16x1xf32> to vector<6x1xf32>
    %136 = vector.shape_cast %135 : vector<6x1xf32> to vector<6x1x1xf32>
    %cst_67 = arith.constant 8.68055562E-4 : f32
    %137 = vector.broadcast %cst_67 : f32 to vector<6x1x1xf32>
    %138 = arith.mulf %136, %137 : vector<6x1x1xf32>
    %cst_68 = arith.constant 9.99999974E-6 : f32
    %139 = vector.broadcast %cst_68 : f32 to vector<6x1x1xf32>
    %140 = arith.addf %138, %139 : vector<6x1x1xf32>
    %141 = math.rsqrt %140 : vector<6x1x1xf32>
    %c1_69 = arith.constant 1 : index
    %c0_70 = arith.constant 0 : index
    %c0_71 = arith.constant 0 : index
    %c0_72 = arith.constant 0 : index
    %142 = vector.load %arg2[%c1_69, %c0_70, %c0_71, %c0_72] : memref<3x6x1x128xf32, #tpu.memory_space<vmem>>, vector<1x6x1x128xf32>
    %143 = vector.shape_cast %142 : vector<1x6x1x128xf32> to vector<6x1x128xf32>
    %144 = vector.broadcast %141 : vector<6x1x1xf32> to vector<6x1x128xf32>
    %145 = arith.mulf %144, %143 : vector<6x1x128xf32>
    %c2_73 = arith.constant 2 : index
    %c0_74 = arith.constant 0 : index
    %c0_75 = arith.constant 0 : index
    %c0_76 = arith.constant 0 : index
    %146 = vector.load %arg2[%c2_73, %c0_74, %c0_75, %c0_76] : memref<3x6x1x128xf32, #tpu.memory_space<vmem>>, vector<1x6x1x128xf32>
    %147 = vector.shape_cast %146 : vector<1x6x1x128xf32> to vector<6x1x128xf32>
    %148 = vector.broadcast %125 : vector<6x1x1xf32> to vector<6x1x128xf32>
    %149 = arith.mulf %148, %145 : vector<6x1x128xf32>
    %150 = arith.subf %147, %149 : vector<6x1x128xf32>
    %151 = vector.broadcast %145 : vector<6x1x128xf32> to vector<6x16x128xf32>
    %152 = arith.mulf %115, %151 : vector<6x16x128xf32>
    %153 = vector.broadcast %150 : vector<6x1x128xf32> to vector<6x16x128xf32>
    %154 = arith.addf %152, %153 : vector<6x16x128xf32>
    %cst_77 = arith.constant 0.000000e+00 : f32
    %155 = vector.shape_cast %12 : vector<1x16x128xi1> to vector<1x16x128xi1>
    %156 = vector.broadcast %155 : vector<1x16x128xi1> to vector<6x16x128xi1>
    %157 = vector.broadcast %cst_77 : f32 to vector<6x16x128xf32>
    %158 = arith.select %156, %154, %157 : vector<6x16x128xi1>, vector<6x16x128xf32>
    %159 = vector.shape_cast %158 : vector<6x16x128xf32> to vector<96x128xf32>
    %c0_78 = arith.constant 0 : index
    %c0_79 = arith.constant 0 : index
    %160 = vector.load %arg3[%c0_78, %c0_79] : memref<256x96xf32, #tpu.memory_space<vmem>>, vector<256x96xf32>
    %cst_80 = arith.constant dense<0.000000e+00> : vector<256x128xf32>
    %161 = tpu.matmul %160, %159, %cst_80 {dimension_numbers = #tpu.dot_dimension_numbers<[1], [0], [0], [1], [0, 0, 1, 1], [], []>, precision = #tpu.contract_precision<fp32>} : vector<256x96xf32>, vector<96x128xf32>, vector<256x128xf32> -> vector<256x128xf32>
    %162 = vector.shape_cast %161 : vector<256x128xf32> to vector<16x16x128xf32>
    %c0_81 = arith.constant 0 : index
    %c0_82 = arith.constant 0 : index
    %c0_83 = arith.constant 0 : index
    %c0_84 = arith.constant 0 : index
    %163 = vector.load %arg4[%c0_81, %c0_82, %c0_83, %c0_84] : memref<3x16x1x128xf32, #tpu.memory_space<vmem>>, vector<1x16x1x128xf32>
    %164 = vector.shape_cast %163 : vector<1x16x1x128xf32> to vector<16x1x128xf32>
    %165 = vector.broadcast %164 : vector<16x1x128xf32> to vector<16x16x128xf32>
    %166 = arith.addf %162, %165 : vector<16x16x128xf32>
    %cst_85 = arith.constant dense<0.000000e+00> : vector<16x16xf32>
    %167 = vector.multi_reduction <add>, %166, %cst_85 [2] : vector<16x16x128xf32> to vector<16x16xf32>
    %168 = vector.shape_cast %167 : vector<16x16xf32> to vector<16x16x1xf32>
    %cst_86 = arith.constant dense<0.000000e+00> : vector<16x1xf32>
    %169 = vector.multi_reduction <add>, %168, %cst_86 [1] : vector<16x16x1xf32> to vector<16x1xf32>
    %170 = vector.shape_cast %169 : vector<16x1xf32> to vector<16x1x1xf32>
    %cst_87 = arith.constant 4.8828125E-4 : f32
    %171 = vector.broadcast %cst_87 : f32 to vector<16x1x1xf32>
    %172 = arith.mulf %170, %171 : vector<16x1x1xf32>
    %173 = vector.broadcast %172 : vector<16x1x1xf32> to vector<16x16x128xf32>
    %174 = arith.subf %166, %173 : vector<16x16x128xf32>
    %175 = arith.mulf %174, %174 : vector<16x16x128xf32>
    %cst_88 = arith.constant dense<0.000000e+00> : vector<16x16xf32>
    %176 = vector.multi_reduction <add>, %175, %cst_88 [2] : vector<16x16x128xf32> to vector<16x16xf32>
    %177 = vector.shape_cast %176 : vector<16x16xf32> to vector<16x16x1xf32>
    %cst_89 = arith.constant dense<0.000000e+00> : vector<16x1xf32>
    %178 = vector.multi_reduction <add>, %177, %cst_89 [1] : vector<16x16x1xf32> to vector<16x1xf32>
    %179 = vector.shape_cast %178 : vector<16x1xf32> to vector<16x1x1xf32>
    %cst_90 = arith.constant 4.8828125E-4 : f32
    %180 = vector.broadcast %cst_90 : f32 to vector<16x1x1xf32>
    %181 = arith.mulf %179, %180 : vector<16x1x1xf32>
    %cst_91 = arith.constant 9.99999974E-6 : f32
    %182 = vector.broadcast %cst_91 : f32 to vector<16x1x1xf32>
    %183 = arith.addf %181, %182 : vector<16x1x1xf32>
    %184 = math.rsqrt %183 : vector<16x1x1xf32>
    %c1_92 = arith.constant 1 : index
    %c0_93 = arith.constant 0 : index
    %c0_94 = arith.constant 0 : index
    %c0_95 = arith.constant 0 : index
    %185 = vector.load %arg4[%c1_92, %c0_93, %c0_94, %c0_95] : memref<3x16x1x128xf32, #tpu.memory_space<vmem>>, vector<1x16x1x128xf32>
    %186 = vector.shape_cast %185 : vector<1x16x1x128xf32> to vector<16x1x128xf32>
    %187 = vector.broadcast %184 : vector<16x1x1xf32> to vector<16x1x128xf32>
    %188 = arith.mulf %187, %186 : vector<16x1x128xf32>
    %c2_96 = arith.constant 2 : index
    %c0_97 = arith.constant 0 : index
    %c0_98 = arith.constant 0 : index
    %c0_99 = arith.constant 0 : index
    %189 = vector.load %arg4[%c2_96, %c0_97, %c0_98, %c0_99] : memref<3x16x1x128xf32, #tpu.memory_space<vmem>>, vector<1x16x1x128xf32>
    %190 = vector.shape_cast %189 : vector<1x16x1x128xf32> to vector<16x1x128xf32>
    %191 = vector.broadcast %172 : vector<16x1x1xf32> to vector<16x1x128xf32>
    %192 = arith.mulf %191, %188 : vector<16x1x128xf32>
    %193 = arith.subf %190, %192 : vector<16x1x128xf32>
    %194 = vector.broadcast %188 : vector<16x1x128xf32> to vector<16x16x128xf32>
    %195 = arith.mulf %166, %194 : vector<16x16x128xf32>
    %196 = vector.broadcast %193 : vector<16x1x128xf32> to vector<16x16x128xf32>
    %197 = arith.addf %195, %196 : vector<16x16x128xf32>
    %cst_100 = arith.constant 0.000000e+00 : f32
    %198 = vector.broadcast %cst_100 : f32 to vector<16x16x128xf32>
    %199 = arith.maximumf %197, %198 : vector<16x16x128xf32>
    %c0_101 = arith.constant 0 : index
    %c0_102 = arith.constant 0 : index
    %c0_103 = arith.constant 0 : index
    %200 = vector.load %arg5[%c0_101, %c0_102, %c0_103] : memref<16x16x128xf32, #tpu.memory_space<vmem>>, vector<16x16x128xf32>
    tpu.vector_store %arg5[%c0_101, %c0_102, %c0_103], %199 {strides = array<i32>} : memref<16x16x128xf32, #tpu.memory_space<vmem>>, vector<16x16x128xf32>,
    return
  }
}

</mosaic_0001>

<bundles_post_ra>
// kernel: conv_block_forward.1
= control target key start
LH: loop header
LB: loop body
LE: loop exit
PB: predicated region body
PF: predicated region fallthrough
CT: control target
= control target key end

     0   :  { %s6911_s24 = smov 112   ;;  %vm188_vm0 = vcmask 1045504   ;;  %vm322_vm1 = vcmask 1043456   ;;  %vm456_vm2 = vcmask 1041408   ;;  %s6912_s27 = smov 96   ;;  %vm644_vm3 = vcmask 916480   ;;  %s11458_s0 = inlined_call_operand.vmem [shape: f32[6,22,176], index: 0, kind: input, shape index: {}]   ;;  %s11459_s1 = inlined_call_operand.vmem [shape: f32[16,6,1,128], index: 1, kind: input, shape index: {}]   ;;  %s11460_s2 = inlined_call_operand.vmem [shape: f32[3,6,1,128], index: 2, kind: input, shape index: {}]   ;;  %s11461_s3 = inlined_call_operand.vmem [shape: f32[256,96], index: 3, kind: input, shape index: {}]   ;;  %s11462_s4 = inlined_call_operand.vmem [shape: f32[3,16,1,128], index: 4, kind: input, shape index: {}]   ;;  %s11463_s5 = inlined_call_operand.vmem [shape: f32[16,16,128], index: 5, kind: output, shape index: {}]  }
   0x1   :  { %v6947_v0 = vld [vmem:[%s11458_s0 + $0x100] sm:$0xff]  ;;  %v6952_v1 = vld [vmem:[%s11458_s0 + $0xf0] sm:$0xff]  ;;  %v6957_v2 = vld [vmem:[%s11458_s0 + $0x108] sm:$0xff]  ;;  %s6913_s29 = smov 80   ;;  %vm1393_vm4 = vcmask 785408   ;;  %vm1950_vm5 = vcmask 654336  }
   0x2   :  { %640 = vrot.lane.b32.xlu1 %v6947_v0, %s6911_s24  ;;  %636 = vrot.lane.b32.xlu0 %v6952_v1, %s6911_s24  ;;  %v6966_v3 = vld [vmem:[%s11458_s0 + $0xf8] sm:$0xff]  ;;  %v802_v5 = vrot.slane %v6957_v2, 2  ;;  %v798_v6 = vrot.slane %v6952_v1, 2  ;;  %v799_v7 = vrot.slane %v6947_v0, 2  ;;  %v6980_v9 = vld [vmem:[%s11458_s0 + $0x110] sm:$0x3f] }
   0x3   :  { %v801_v4 = vrot.slane %v6966_v3, 2  ;;  %v6975_v8 = vld [vmem:[%s11458_s0 + $0x118] sm:$0x3f]  ;;  %v804_v13 = vrot.slane %v6980_v9, 2  ;;  %v7011_v16 = vld [vmem:[%s11458_s0 + $0xc8] sm:$0xff]  ;;  %v7016_v17 = vld [vmem:[%s11458_s0 + $0xc0] sm:$0xff] }
   0x4   :  { %v6990_v11 = vsel %vm188_vm0, %v798_v6, %v799_v7  ;;  %v806_v12 = vrot.slane %v6975_v8, 2  ;;  %v7025_v18 = vld [vmem:[%s11458_s0 + $0xd8] sm:$0xff]  ;;  %v7030_v19 = vld [vmem:[%s11458_s0 + $0xd0] sm:$0xff]  ;;  %v1000_v20 = vrot.slane %v6966_v3, 4  ;;  %v1001_v21 = vrot.slane %v6957_v2, 4  ;;  %v7141_v54 = vld [vmem:[%s11458_s0 + $0xa8] sm:$0xff] }
   0x5   :  { %v6987_v10 = vsel %vm188_vm0, %v801_v4, %v802_v5  ;;  %v7002_v15 = vsel %vm188_vm0, %v799_v7, %v804_v13  ;;  %v997_v22 = vrot.slane %v6952_v1, 4  ;;  %v998_v23 = vrot.slane %v6947_v0, 4  ;;  %v7065_v34 = vld [vmem:[%s11458_s0 + $0xe8] sm:$0x3f]  ;;  %v7070_v35 = vld [vmem:[%s11458_s0 + $0xe0] sm:$0x3f] }
   0x6   :  { %642 = vrot.lane.b32.xlu1 %v6957_v2, %s6911_s24  ;;  %638 = vrot.lane.b32.xlu0 %v6966_v3, %s6911_s24  ;;  %v6999_v14 = vsel %vm188_vm0, %v802_v5, %v806_v12  ;;  %v7041_v24 = vsel %vm322_vm1, %v1000_v20, %v1001_v21  ;;  %v1005_v26 = vrot.slane %v6975_v8, 4  ;;  %v1003_v27 = vrot.slane %v6980_v9, 4  ;;  %v7127_v52 = vld [vmem:[%s11458_s0 + $0x98] sm:$0xff]  ;;  %v7132_v53 = vld [vmem:[%s11458_s0 + $0x90] sm:$0xff] }
   0x7   :  { %v7044_v25 = vsel %vm322_vm1, %v997_v22, %v998_v23  ;;  %v791_v28 = vrot.slane %v7011_v16, 2  ;;  %v792_v29 = vrot.slane %v7025_v18, 2  ;;  %v788_v32 = vrot.slane %v7016_v17, 2  ;;  %v7146_v55 = vld [vmem:[%s11458_s0 + $0xa0] sm:$0xff]  ;;  %v7189_v12 = vld [vmem:[%s11458_s0 + $0xb8] sm:$0x3f] }
   0x8   :  { %v7055_v30 = vsel %vm322_vm1, %v1001_v21, %v1005_v26  ;;  %v7058_v31 = vsel %vm322_vm1, %v998_v23, %v1003_v27  ;;  %v789_v33 = vrot.slane %v7030_v19, 2  ;;  %v796_v38 = vrot.slane %v7065_v34, 2  ;;  %v7194_v13 = vld [vmem:[%s11458_s0 + $0xb0] sm:$0x3f] }
   0x9   :  { %11613 = vst [vmem:[#allocation2_spill] sm:$0xff] %v7058_v31  ;;  %v7077_v36 = vsel %vm188_vm0, %v791_v28, %v792_v29  ;;  %v794_v39 = vrot.slane %v7070_v35, 2  ;;  %v1199_v40 = vrot.slane %v6966_v3, 6  ;;  %v1200_v41 = vrot.slane %v6957_v2, 6 }
   0xa   :  { %850 = vrot.lane.b32.xlu1 %v6987_v10, %s6911_s24  ;;  %848 = vrot.lane.b32.xlu0 %v6990_v11, %s6911_s24  ;;  %v7080_v37 = vsel %vm188_vm0, %v788_v32, %v789_v33  ;;  %v7091_v42 = vsel %vm188_vm0, %v792_v29, %v796_v38  ;;  %v1196_v44 = vrot.slane %v6952_v1, 6  ;;  %v1197_v45 = vrot.slane %v6947_v0, 6 }
   0xb   :  { %11614 = vst [vmem:[#allocation3_spill] sm:$0xff] %v7080_v37  ;;  %11615 = vst [vmem:[#allocation4_spill] sm:$0xff] %v7091_v42  ;;  %v7094_v43 = vsel %vm188_vm0, %v789_v33, %v794_v39  ;;  %v7103_v46 = vsel %vm456_vm2, %v1199_v40, %v1200_v41  ;;  %v1204_v48 = vrot.slane %v6975_v8, 6  ;;  %v1202_v49 = vrot.slane %v6980_v9, 6 }
   0xc   :  { %11616 = vst [vmem:[#allocation5_spill] sm:$0xff] %v7094_v43  ;;  %11617 = vst [vmem:[#allocation6_spill] sm:$0xff] %v7103_v46  ;;  %v7106_v47 = vsel %vm456_vm2, %v1196_v44, %v1197_v45  ;;  %v990_v56 = vrot.slane %v7011_v16, 4  ;;  %v991_v57 = vrot.slane %v7025_v18, 4  ;;  %v987_v58 = vrot.slane %v7016_v17, 4 }
   0xd   :  { %11618 = vst [vmem:[#allocation7_spill] sm:$0xff] %v7106_v47  ;;  %v7115_v50 = vsel %vm456_vm2, %v1200_v41, %v1204_v48  ;;  %v7118_v51 = vsel %vm456_vm2, %v1197_v45, %v1202_v49  ;;  %v988_v59 = vrot.slane %v7030_v19, 4  ;;  %v995_v62 = vrot.slane %v7065_v34, 4  ;;  %v7273_v48 = vld [vmem:[%s11458_s0 + $0x78] sm:$0xff]  ;;  %v7278_v49 = vld [vmem:[%s11458_s0 + $0x70] sm:$0xff] }
   0xe   :  { %854 = vrot.lane.b32.xlu1 %v6999_v14, %s6911_s24  ;;  %852 = vrot.lane.b32.xlu0 %v7002_v15, %s6911_s24  ;;  %11619 = vst [vmem:[#allocation8_spill] sm:$0xff] %v7115_v50  ;;  %11620 = vst [vmem:[#allocation9_spill] sm:$0xff] %v7118_v51  ;;  %v7157_v60 = vsel %vm322_vm1, %v990_v56, %v991_v57  ;;  %v993_v63 = vrot.slane %v7070_v35, 4  ;;  %v781_v6 = vrot.slane %v7127_v52, 2  ;;  %v782_v7 = vrot.slane %v7141_v54, 2 }
   0xf   :  { %v7160_v61 = vsel %vm322_vm1, %v987_v58, %v988_v59  ;;  %v7169_v4 = vsel %vm322_vm1, %v991_v57, %v995_v62  ;;  %v778_v8 = vrot.slane %v7132_v53, 2  ;;  %v779_v9 = vrot.slane %v7146_v55, 2 }
  0x10   :  { %11621 = vst [vmem:[#allocation10_spill] sm:$0xff] %v7160_v61  ;;  %11622 = vst [vmem:[#allocation11_spill] sm:$0xff] %v7169_v4  ;;  %v7172_v5 = vsel %vm322_vm1, %v988_v59, %v993_v63  ;;  %v7201_v20 = vsel %vm188_vm0, %v781_v6, %v782_v7  ;;  %v786_v22 = vrot.slane %v7189_v12, 2  ;;  %v784_v23 = vrot.slane %v7194_v13, 2 }
  0x11   :  { %11623 = vst [vmem:[#allocation12_spill] sm:$0xff] %v7172_v5  ;;  %v7204_v21 = vsel %vm188_vm0, %v778_v8, %v779_v9  ;;  %v1189_v26 = vrot.slane %v7011_v16, 6  ;;  %v1190_v27 = vrot.slane %v7025_v18, 6  ;;  %v1186_v32 = vrot.slane %v7016_v17, 6 }
  0x12   :  { %630 = vrot.lane.b32.xlu1 %v7011_v16, %s6911_s24  ;;  %628 = vrot.lane.b32.xlu0 %v7016_v17, %s6911_s24  ;;  %v7215_v28 = vsel %vm188_vm0, %v782_v7, %v786_v22  ;;  %v7218_v29 = vsel %vm188_vm0, %v779_v9, %v784_v23  ;;  %v1187_v33 = vrot.slane %v7030_v19, 6  ;;  %v1194_v40 = vrot.slane %v7065_v34, 6  ;;  %v7259_v34 = vld [vmem:[%s11458_s0 + $0x68] sm:$0xff] }
  0x13   :  { %v7227_v38 = vsel %vm456_vm2, %v1189_v26, %v1190_v27  ;;  %v1192_v41 = vrot.slane %v7070_v35, 6  ;;  %v7264_v35 = vld [vmem:[%s11458_s0 + $0x60] sm:$0xff]  ;;  %v980_v56 = vrot.slane %v7127_v52, 4  ;;  %v981_v57 = vrot.slane %v7141_v54, 4 }
  0x14   :  { %v7230_v39 = vsel %vm456_vm2, %v1186_v32, %v1187_v33  ;;  %v7239_v44 = vsel %vm456_vm2, %v1190_v27, %v1194_v40  ;;  %v977_v58 = vrot.slane %v7132_v53, 4  ;;  %v978_v59 = vrot.slane %v7146_v55, 4  ;;  %v7333_v32 = vld [vmem:[%s11458_s0 + $0x88] sm:$0x3f] }
  0x15   :  { %11624 = vst [vmem:[#allocation13_spill] sm:$0xff] %v7230_v39  ;;  %11625 = vst [vmem:[#allocation14_spill] sm:$0xff] %v7239_v44  ;;  %v7242_v45 = vsel %vm456_vm2, %v1187_v33, %v1192_v41  ;;  %v7289_v62 = vsel %vm322_vm1, %v980_v56, %v981_v57  ;;  %v985_v6 = vrot.slane %v7189_v12, 4  ;;  %v983_v7 = vrot.slane %v7194_v13, 4 }
  0x16   :  { %634 = vrot.lane.b32.xlu1 %v7025_v18, %s6911_s24  ;;  %632 = vrot.lane.b32.xlu0 %v7030_v19, %s6911_s24  ;;  %11626 = vst [vmem:[#allocation15_spill] sm:$0xff] %v7242_v45  ;;  %v7292_v63 = vsel %vm322_vm1, %v977_v58, %v978_v59  ;;  %v771_v33 = vrot.slane %v7259_v34, 2  ;;  %v772_v40 = vrot.slane %v7273_v48, 2  ;;  %v768_v41 = vrot.slane %v7264_v35, 2 }
  0x17   :  { %v7301_v8 = vsel %vm322_vm1, %v981_v57, %v985_v6  ;;  %v7304_v9 = vsel %vm322_vm1, %v978_v59, %v983_v7  ;;  %v769_v56 = vrot.slane %v7278_v49, 2  ;;  %v7342_v57 = vld [vmem:[%s11458_s0 + $0x80] sm:$0x3f]  ;;  %v776_v6 = vrot.slane %v7333_v32, 2 }
  0x18   :  { %v774_v7 = vrot.slane %v7342_v57, 2 }
  0x1a   :  { %1049 = vrot.lane.b32.xlu1 %v7041_v24, %s6911_s24  ;;  %1047 = vrot.lane.b32.xlu0 %v7044_v25, %s6911_s24 }
  0x1e   :  { %1053 = vrot.lane.b32.xlu1 %v7055_v30, %s6911_s24  ;;  %1051 = vrot.lane.b32.xlu0 %v7058_v31, %s6911_s24 }
  0x22   :  { %842 = vrot.lane.b32.xlu1 %v7077_v36, %s6911_s24  ;;  %840 = vrot.lane.b32.xlu0 %v7080_v37, %s6911_s24 }
  0x26   :  { %846 = vrot.lane.b32.xlu1 %v7091_v42, %s6911_s24  ;;  %844 = vrot.lane.b32.xlu0 %v7094_v43, %s6911_s24 }
  0x2a   :  { %1248 = vrot.lane.b32.xlu1 %v7103_v46, %s6911_s24  ;;  %1246 = vrot.lane.b32.xlu0 %v7106_v47, %s6911_s24 }
  0x2e   :  { %1252 = vrot.lane.b32.xlu1 %v7115_v50, %s6911_s24  ;;  %1250 = vrot.lane.b32.xlu0 %v7118_v51, %s6911_s24 }
  0x32   :  { %622 = vrot.lane.b32.xlu1 %v7127_v52, %s6911_s24  ;;  %620 = vrot.lane.b32.xlu0 %v7132_v53, %s6911_s24 }
  0x36   :  { %626 = vrot.lane.b32.xlu1 %v7141_v54, %s6911_s24  ;;  %624 = vrot.lane.b32.xlu0 %v7146_v55, %s6911_s24 }
  0x3a   :  { %1041 = vrot.lane.b32.xlu1 %v7157_v60, %s6911_s24  ;;  %1039 = vrot.lane.b32.xlu0 %v7160_v61, %s6911_s24 }
  0x3e   :  { %1045 = vrot.lane.b32.xlu1 %v7169_v4, %s6911_s24  ;;  %1043 = vrot.lane.b32.xlu0 %v7172_v5, %s6911_s24 }
  0x42   :  { %1387 = vrot.lane.b32.xlu1 %v6966_v3, %s6912_s27  ;;  %1385 = vrot.lane.b32.xlu0 %v6952_v1, %s6912_s27 }
  0x46   :  { %1391 = vrot.lane.b32.xlu1 %v6957_v2, %s6912_s27  ;;  %1389 = vrot.lane.b32.xlu0 %v6947_v0, %s6912_s27 }
  0x4a   :  { %834 = vrot.lane.b32.xlu1 %v7201_v20, %s6911_s24  ;;  %832 = vrot.lane.b32.xlu0 %v7204_v21, %s6911_s24 }
  0x4e   :  { %838 = vrot.lane.b32.xlu1 %v7215_v28, %s6911_s24  ;;  %836 = vrot.lane.b32.xlu0 %v7218_v29, %s6911_s24 }
  0x52   :  { %1240 = vrot.lane.b32.xlu1 %v7227_v38, %s6911_s24  ;;  %1238 = vrot.lane.b32.xlu0 %v7230_v39, %s6911_s24 }
  0x56   :  { %1244 = vrot.lane.b32.xlu1 %v7239_v44, %s6911_s24  ;;  %1242 = vrot.lane.b32.xlu0 %v7242_v45, %s6911_s24 }
  0x5a   :  { %1527 = vrot.lane.b32.xlu1 %v6987_v10, %s6912_s27  ;;  %1525 = vrot.lane.b32.xlu0 %v6990_v11, %s6912_s27 }
  0x5e   :  { %1531 = vrot.lane.b32.xlu1 %v6999_v14, %s6912_s27  ;;  %1529 = vrot.lane.b32.xlu0 %v7002_v15, %s6912_s27 }
  0x62   :  { %614 = vrot.lane.b32.xlu1 %v7259_v34, %s6911_s24  ;;  %612 = vrot.lane.b32.xlu0 %v7264_v35, %s6911_s24 }
  0x66   :  { %618 = vrot.lane.b32.xlu1 %v7273_v48, %s6911_s24  ;;  %616 = vrot.lane.b32.xlu0 %v7278_v49, %s6911_s24 }
  0x6a   :  { %1033 = vrot.lane.b32.xlu1 %v7289_v62, %s6911_s24  ;;  %1031 = vrot.lane.b32.xlu0 %v7292_v63, %s6911_s24 }
  0x6e   :  { %1037 = vrot.lane.b32.xlu1 %v7301_v8, %s6911_s24  ;;  %1035 = vrot.lane.b32.xlu0 %v7304_v9, %s6911_s24 }
  0x72   :  { %1379 = vrot.lane.b32.xlu1 %v7011_v16, %s6912_s27  ;;  %1377 = vrot.lane.b32.xlu0 %v7016_v17, %s6912_s27 }
  0x74   :  { %v7314_v22 = vpop.permute.xlu1 %640  ;;  %v7316_v23 = vpop.permute.xlu0 %636 }
  0x75   :  { %11627 = vst [vmem:[#allocation16_spill] sm:$0xff] %v7314_v22  ;;  %11628 = vst [vmem:[#allocation17_spill] sm:$0xff] %v7316_v23  ;;  %v7355_v22 = vsel %vm188_vm0, %v771_v33, %v772_v40  ;;  %v1179_v33 = vrot.slane %v7127_v52, 6 }
  0x76   :  { %1383 = vrot.lane.b32.xlu1 %v7025_v18, %s6912_s27  ;;  %1381 = vrot.lane.b32.xlu0 %v7030_v19, %s6912_s27  ;;  %11633 = vst [vmem:[#allocation22_spill] sm:$0xff] %v7355_v22 }
  0x78   :  { %v7322_v26 = vpop.permute.xlu1 %642  ;;  %v7324_v27 = vpop.permute.xlu0 %638 }
  0x79   :  { %11629 = vst [vmem:[#allocation18_spill] sm:$0xff] %v7322_v26  ;;  %11630 = vst [vmem:[#allocation19_spill] sm:$0xff] %v7324_v27  ;;  %v7358_v26 = vsel %vm188_vm0, %v768_v41, %v769_v56  ;;  %v7372_v27 = vsel %vm188_vm0, %v769_v56, %v774_v7  ;;  %v1180_v41 = vrot.slane %v7141_v54, 6  ;;  %v1182_v7 = vrot.slane %v7194_v13, 6 }
  0x7a   :  { %1666 = vrot.lane.b32.xlu1 %v7041_v24, %s6912_s27  ;;  %1664 = vrot.lane.b32.xlu0 %v7044_v25, %s6912_s27  ;;  %11634 = vst [vmem:[#allocation23_spill] sm:$0xff] %v7358_v26  ;;  %11637 = vst [vmem:[#allocation26_spill] sm:$0xff] %v7372_v27 }
  0x7c   :  { %v7344_v58 = vpop.permute.xlu1 %850  ;;  %v7346_v59 = vpop.permute.xlu0 %848 }
  0x7d   :  { %11631 = vst [vmem:[#allocation20_spill] sm:$0xff] %v7344_v58  ;;  %11632 = vst [vmem:[#allocation21_spill] sm:$0xff] %v7346_v59  ;;  %v7369_v59 = vsel %vm188_vm0, %v772_v40, %v776_v6  ;;  %v7387_v40 = vsel %vm456_vm2, %v1179_v33, %v1180_v41  ;;  %v1184_v6 = vrot.slane %v7189_v12, 6 }
  0x7e   :  { %1670 = vrot.lane.b32.xlu1 %v7055_v30, %s6912_s27  ;;  %1668 = vrot.lane.b32.xlu0 %v7058_v31, %s6912_s27  ;;  %11640 = vst [vmem:[#allocation29_spill] sm:$0xff] %v7387_v40 }
  0x7f   :  { %v7403_v33 = vsel %vm456_vm2, %v1180_v41, %v1184_v6 }
  0x80   :  { %v7360_v23 = vpop.permute.xlu1 %854  ;;  %v7362_v58 = vpop.permute.xlu0 %852  ;;  %11644 = vst [vmem:[#allocation33_spill] sm:$0xff] %v7403_v33 }
  0x81   :  { %11635 = vst [vmem:[#allocation24_spill] sm:$0xff] %v7360_v23  ;;  %11636 = vst [vmem:[#allocation25_spill] sm:$0xff] %v7362_v58  ;;  %v1176_v23 = vrot.slane %v7132_v53, 6  ;;  %v1177_v58 = vrot.slane %v7146_v55, 6 }
  0x82   :  { %826 = vrot.lane.b32.xlu1 %v7355_v22, %s6911_s24  ;;  %824 = vrot.lane.b32.xlu0 %v7358_v26, %s6911_s24 }
  0x83   :  { %v7390_v56 = vsel %vm456_vm2, %v1176_v23, %v1177_v58  ;;  %v7406_v23 = vsel %vm456_vm2, %v1177_v58, %v1182_v7 }
  0x84   :  { %v7378_v31 = vpop.permute.xlu1 %630  ;;  %v7380_v22 = vpop.permute.xlu0 %628  ;;  %11641 = vst [vmem:[#allocation30_spill] sm:$0xff] %v7390_v56  ;;  %11645 = vst [vmem:[#allocation34_spill] sm:$0xff] %v7406_v23 }
  0x85   :  { %11638 = vst [vmem:[#allocation27_spill] sm:$0xff] %v7378_v31  ;;  %11639 = vst [vmem:[#allocation28_spill] sm:$0xff] %v7380_v22 }
  0x86   :  { %830 = vrot.lane.b32.xlu1 %v7369_v59, %s6911_s24  ;;  %828 = vrot.lane.b32.xlu0 %v7372_v27, %s6911_s24 }
  0x88   :  { %v7394_v26 = vpop.permute.xlu1 %634  ;;  %v7396_v31 = vpop.permute.xlu0 %632 }
  0x89   :  { %11642 = vst [vmem:[#allocation31_spill] sm:$0xff] %v7394_v26  ;;  %11643 = vst [vmem:[#allocation32_spill] sm:$0xff] %v7396_v31 }
  0x8a   :  { %1232 = vrot.lane.b32.xlu1 %v7387_v40, %s6911_s24  ;;  %1230 = vrot.lane.b32.xlu0 %v7390_v56, %s6911_s24 }
  0x8c   :  { %v7408_v22 = vpop.permute.xlu1 %1049  ;;  %v7410_v12 = vpop.permute.xlu0 %1047 }
  0x8d   :  { %11646 = vst [vmem:[#allocation35_spill] sm:$0xff] %v7408_v22  ;;  %11647 = vst [vmem:[#allocation36_spill] sm:$0xff] %v7410_v12  ;;  %v967_v12 = vrot.slane %v7264_v35, 4  ;;  %v968_v22 = vrot.slane %v7278_v49, 4 }
  0x8e   :  { %1236 = vrot.lane.b32.xlu1 %v7403_v33, %s6911_s24  ;;  %1234 = vrot.lane.b32.xlu0 %v7406_v23, %s6911_s24 }
  0x90   :  { %v7416_v13 = vpop.permute.xlu1 %1053  ;;  %v7418_v31 = vpop.permute.xlu0 %1051 }
  0x91   :  { %11648 = vst [vmem:[#allocation37_spill] sm:$0xff] %v7416_v13  ;;  %11649 = vst [vmem:[#allocation38_spill] sm:$0xff] %v7418_v31  ;;  %v7474_v13 = vld [vmem:[%s11458_s0 + $0x40] sm:$0xff] }
  0x92   :  { %1519 = vrot.lane.b32.xlu1 %v7077_v36, %s6912_s27  ;;  %1517 = vrot.lane.b32.xlu0 %v7080_v37, %s6912_s27 }
  0x94   :  { %v7424_v58 = vpop.permute.xlu1 %842  ;;  %v7426_v41 = vpop.permute.xlu0 %840 }
  0x95   :  { %11650 = vst [vmem:[#allocation39_spill] sm:$0xff] %v7424_v58  ;;  %11651 = vst [vmem:[#allocation40_spill] sm:$0xff] %v7426_v41 }
  0x96   :  { %1523 = vrot.lane.b32.xlu1 %v7091_v42, %s6912_s27  ;;  %1521 = vrot.lane.b32.xlu0 %v7094_v43, %s6912_s27  ;;  %v973_v43 = vrot.slane %v7342_v57, 4 }
  0x98   :  { %v7432_v6 = vpop.permute.xlu1 %846  ;;  %v7434_v7 = vpop.permute.xlu0 %844 }
  0x99   :  { %11652 = vst [vmem:[#allocation41_spill] sm:$0xff] %v7432_v6  ;;  %11653 = vst [vmem:[#allocation42_spill] sm:$0xff] %v7434_v7  ;;  %v7451_v7 = vld [vmem:[%s11458_s0 + $0x38] sm:$0xff]  ;;  %v7456_v6 = vld [vmem:[%s11458_s0 + $0x30] sm:$0xff] }
  0x9a   :  { %1805 = vrot.lane.b32.xlu1 %v7103_v46, %s6912_s27  ;;  %1803 = vrot.lane.b32.xlu0 %v7106_v47, %s6912_s27  ;;  %v7492_v47 = vsel %vm322_vm1, %v967_v12, %v968_v22  ;;  %v975_v46 = vrot.slane %v7333_v32, 4  ;;  %v7508_v12 = vsel %vm322_vm1, %v968_v22, %v973_v43 }
  0x9c   :  { %v7440_v31 = vpop.permute.xlu1 %1248  ;;  %v7442_v58 = vpop.permute.xlu0 %1246 }
  0x9d   :  { %11654 = vst [vmem:[#allocation43_spill] sm:$0xff] %v7440_v31  ;;  %11655 = vst [vmem:[#allocation44_spill] sm:$0xff] %v7442_v58  ;;  %v7469_v58 = vld [vmem:[%s11458_s0 + $0x48] sm:$0xff] }
  0x9e   :  { %1809 = vrot.lane.b32.xlu1 %v7115_v50, %s6912_s27  ;;  %1807 = vrot.lane.b32.xlu0 %v7118_v51, %s6912_s27 }
  0xa0   :  { %v7458_v41 = vpop.permute.xlu1 %1252  ;;  %v7460_v31 = vpop.permute.xlu0 %1250 }
  0xa1   :  { %11656 = vst [vmem:[#allocation45_spill] sm:$0xff] %v7458_v41  ;;  %11657 = vst [vmem:[#allocation46_spill] sm:$0xff] %v7460_v31  ;;  %v970_v41 = vrot.slane %v7259_v34, 4  ;;  %v971_v31 = vrot.slane %v7273_v48, 4 }
  0xa2   :  { %606 = vrot.lane.b32.xlu1 %v7451_v7, %s6911_s24  ;;  %604 = vrot.lane.b32.xlu0 %v7456_v6, %s6911_s24 }
  0xa3   :  { %v7489_v50 = vsel %vm322_vm1, %v970_v41, %v971_v31  ;;  %v7505_v41 = vsel %vm322_vm1, %v971_v31, %v975_v46 }
  0xa4   :  { %v7480_v26 = vpop.permute.xlu1 %622  ;;  %v7482_v51 = vpop.permute.xlu0 %620 }
  0xa5   :  { %11658 = vst [vmem:[#allocation47_spill] sm:$0xff] %v7480_v26  ;;  %11659 = vst [vmem:[#allocation48_spill] sm:$0xff] %v7482_v51 }
  0xa6   :  { %610 = vrot.lane.b32.xlu1 %v7469_v58, %s6911_s24  ;;  %608 = vrot.lane.b32.xlu0 %v7474_v13, %s6911_s24 }
  0xa8   :  { %v7496_v42 = vpop.permute.xlu1 %626  ;;  %v7498_v26 = vpop.permute.xlu0 %624 }
  0xa9   :  { %11660 = vst [vmem:[#allocation49_spill] sm:$0xff] %v7496_v42  ;;  %11661 = vst [vmem:[#allocation50_spill] sm:$0xff] %v7498_v26 }
  0xaa   :  { %1025 = vrot.lane.b32.xlu1 %v7489_v50, %s6911_s24  ;;  %1023 = vrot.lane.b32.xlu0 %v7492_v47, %s6911_s24 }
  0xac   :  { %v7510_v51 = vpop.permute.xlu1 %1041  ;;  %v7512_v37 = vpop.permute.xlu0 %1039 }
  0xad   :  { %11662 = vst [vmem:[#allocation51_spill] sm:$0xff] %v7510_v51  ;;  %11663 = vst [vmem:[#allocation52_spill] sm:$0xff] %v7512_v37 }
  0xae   :  { %1029 = vrot.lane.b32.xlu1 %v7505_v41, %s6911_s24  ;;  %1027 = vrot.lane.b32.xlu0 %v7508_v12, %s6911_s24 }
  0xb0   :  { %v7518_v26 = vpop.permute.xlu1 %1045  ;;  %v7520_v42 = vpop.permute.xlu0 %1043 }
  0xb1   :  { %11664 = vst [vmem:[#allocation53_spill] sm:$0xff] %v7518_v26  ;;  %11665 = vst [vmem:[#allocation54_spill] sm:$0xff] %v7520_v42  ;;  %v759_v26 = vrot.slane %v7474_v13, 2 }
  0xb2   :  { %1371 = vrot.lane.b32.xlu1 %v7127_v52, %s6912_s27  ;;  %1369 = vrot.lane.b32.xlu0 %v7132_v53, %s6912_s27 }
  0xb4   :  { %v7526_v31 = vpop.permute.xlu1 %1387  ;;  %v7528_v43 = vpop.permute.xlu0 %1385 }
  0xb5   :  { %11666 = vst [vmem:[#allocation55_spill] sm:$0xff] %v7526_v31  ;;  %11667 = vst [vmem:[#allocation56_spill] sm:$0xff] %v7528_v43 }
  0xb6   :  { %1375 = vrot.lane.b32.xlu1 %v7141_v54, %s6912_s27  ;;  %1373 = vrot.lane.b32.xlu0 %v7146_v55, %s6912_s27 }
  0xb8   :  { %v7534_v46 = vpop.permute.xlu1 %1391  ;;  %v7536_v22 = vpop.permute.xlu0 %1389 }
  0xb9   :  { %11668 = vst [vmem:[#allocation57_spill] sm:$0xff] %v7534_v46  ;;  %11669 = vst [vmem:[#allocation58_spill] sm:$0xff] %v7536_v22  ;;  %v758_v22 = vrot.slane %v7456_v6, 2 }
  0xba   :  { %1658 = vrot.lane.b32.xlu1 %v7157_v60, %s6912_s27  ;;  %1656 = vrot.lane.b32.xlu0 %v7160_v61, %s6912_s27 }
  0xbc   :  { %v7542_v42 = vpop.permute.xlu1 %834  ;;  %v7544_v31 = vpop.permute.xlu0 %832 }
  0xbd   :  { %11670 = vst [vmem:[#allocation59_spill] sm:$0xff] %v7542_v42  ;;  %11671 = vst [vmem:[#allocation60_spill] sm:$0xff] %v7544_v31  ;;  %v761_v42 = vrot.slane %v7451_v7, 2  ;;  %v762_v31 = vrot.slane %v7469_v58, 2 }
  0xbe   :  { %1662 = vrot.lane.b32.xlu1 %v7169_v4, %s6912_s27  ;;  %1660 = vrot.lane.b32.xlu0 %v7172_v5, %s6912_s27  ;;  %v7586_v4 = vsel %vm188_vm0, %v758_v22, %v759_v26  ;;  %v1170_v22 = vrot.slane %v7273_v48, 6 }
  0xbf   :  { %v7583_v5 = vsel %vm188_vm0, %v761_v42, %v762_v31  ;;  %11677 = vst [vmem:[#allocation66_spill] sm:$0xff] %v7586_v4  ;;  %v1169_v42 = vrot.slane %v7259_v34, 6 }
  0xc0   :  { %v7550_v43 = vpop.permute.xlu1 %838  ;;  %v7552_v46 = vpop.permute.xlu0 %836  ;;  %11676 = vst [vmem:[#allocation65_spill] sm:$0xff] %v7583_v5 }
  0xc1   :  { %11672 = vst [vmem:[#allocation61_spill] sm:$0xff] %v7550_v43  ;;  %11673 = vst [vmem:[#allocation62_spill] sm:$0xff] %v7552_v46  ;;  %v7565_v43 = vld [vmem:[%s11458_s0 + $0x58] sm:$0x3f] }
  0xc2   :  { %1944 = vrot.lane.b32.xlu1 %v6966_v3, %s6913_s29  ;;  %1942 = vrot.lane.b32.xlu0 %v6952_v1, %s6913_s29  ;;  %v7570_v3 = vld [vmem:[%s11458_s0 + $0x50] sm:$0x3f]  ;;  %v766_v37 = vrot.slane %v7565_v43, 2 }
  0xc3   :  { %v764_v51 = vrot.slane %v7570_v3, 2 }
  0xc4   :  { %v7572_v46 = vpop.permute.xlu1 %1240  ;;  %v7574_v1 = vpop.permute.xlu0 %1238 }
  0xc5   :  { %11674 = vst [vmem:[#allocation63_spill] sm:$0xff] %v7572_v46  ;;  %11675 = vst [vmem:[#allocation64_spill] sm:$0xff] %v7574_v1 }
  0xc6   :  { %1948 = vrot.lane.b32.xlu1 %v6957_v2, %s6913_s29  ;;  %1946 = vrot.lane.b32.xlu0 %v6947_v0, %s6913_s29  ;;  %v7597_v0 = vsel %vm188_vm0, %v762_v31, %v766_v37  ;;  %v7600_v2 = vsel %vm188_vm0, %v759_v26, %v764_v51  ;;  %v7615_v37 = vsel %vm456_vm2, %v1169_v42, %v1170_v22  ;;  %v1174_v26 = vrot.slane %v7333_v32, 6 }
  0xc7   :  { %v1172_v31 = vrot.slane %v7342_v57, 6 }
  0xc8   :  { %v7588_v61 = vpop.permute.xlu1 %1244  ;;  %v7590_v46 = vpop.permute.xlu0 %1242  ;;  %v7631_v42 = vsel %vm456_vm2, %v1170_v22, %v1174_v26 }
  0xc9   :  { %11678 = vst [vmem:[#allocation67_spill] sm:$0xff] %v7588_v61  ;;  %11679 = vst [vmem:[#allocation68_spill] sm:$0xff] %v7590_v46  ;;  %v1166_v61 = vrot.slane %v7264_v35, 6  ;;  %v1167_v46 = vrot.slane %v7278_v49, 6 }
  0xca   :  { %818 = vrot.lane.b32.xlu1 %v7583_v5, %s6911_s24  ;;  %816 = vrot.lane.b32.xlu0 %v7586_v4, %s6911_s24 }
  0xcb   :  { %v7618_v51 = vsel %vm456_vm2, %v1166_v61, %v1167_v46  ;;  %v7634_v61 = vsel %vm456_vm2, %v1167_v46, %v1172_v31 }
  0xcc   :  { %v7606_v1 = vpop.permute.xlu1 %1527  ;;  %v7608_v5 = vpop.permute.xlu0 %1525 }
  0xcd   :  { %11680 = vst [vmem:[#allocation69_spill] sm:$0xff] %v7606_v1  ;;  %11681 = vst [vmem:[#allocation70_spill] sm:$0xff] %v7608_v5 }
  0xce   :  { %822 = vrot.lane.b32.xlu1 %v7597_v0, %s6911_s24  ;;  %820 = vrot.lane.b32.xlu0 %v7600_v2, %s6911_s24 }
  0xd0   :  { %v7622_v4 = vpop.permute.xlu1 %1531  ;;  %v7624_v1 = vpop.permute.xlu0 %1529 }
  0xd1   :  { %11682 = vst [vmem:[#allocation71_spill] sm:$0xff] %v7622_v4  ;;  %11683 = vst [vmem:[#allocation72_spill] sm:$0xff] %v7624_v1  ;;  %v965_v4 = vrot.slane %v7565_v43, 4 }
  0xd2   :  { %1224 = vrot.lane.b32.xlu1 %v7615_v37, %s6911_s24  ;;  %1222 = vrot.lane.b32.xlu0 %v7618_v51, %s6911_s24 }
  0xd4   :  { %v7636_v5 = vpop.permute.xlu1 %614  ;;  %v7638_v32 = vpop.permute.xlu0 %612 }
  0xd5   :  { %11684 = vst [vmem:[#allocation73_spill] sm:$0xff] %v7636_v5  ;;  %11685 = vst [vmem:[#allocation74_spill] sm:$0xff] %v7638_v32 }
  0xd6   :  { %1228 = vrot.lane.b32.xlu1 %v7631_v42, %s6911_s24  ;;  %1226 = vrot.lane.b32.xlu0 %v7634_v61, %s6911_s24 }
  0xd8   :  { %v7644_v57 = vpop.permute.xlu1 %618  ;;  %v7646_v1 = vpop.permute.xlu0 %616 }
  0xd9   :  { %11686 = vst [vmem:[#allocation75_spill] sm:$0xff] %v7644_v57  ;;  %11687 = vst [vmem:[#allocation76_spill] sm:$0xff] %v7646_v1 }
  0xda   :  { %1511 = vrot.lane.b32.xlu1 %v7201_v20, %s6912_s27  ;;  %1509 = vrot.lane.b32.xlu0 %v7204_v21, %s6912_s27 }
  0xdc   :  { %v7652_v46 = vpop.permute.xlu1 %1033  ;;  %v7654_v22 = vpop.permute.xlu0 %1031 }
  0xdd   :  { %11688 = vst [vmem:[#allocation77_spill] sm:$0xff] %v7652_v46  ;;  %11689 = vst [vmem:[#allocation78_spill] sm:$0xff] %v7654_v22 }
  0xde   :  { %1515 = vrot.lane.b32.xlu1 %v7215_v28, %s6912_s27  ;;  %1513 = vrot.lane.b32.xlu0 %v7218_v29, %s6912_s27 }
  0xe0   :  { %v7660_v26 = vpop.permute.xlu1 %1037  ;;  %v7662_v31 = vpop.permute.xlu0 %1035 }
  0xe1   :  { %11690 = vst [vmem:[#allocation79_spill] sm:$0xff] %v7660_v26  ;;  %11691 = vst [vmem:[#allocation80_spill] sm:$0xff] %v7662_v31 }
  0xe2   :  { %1797 = vrot.lane.b32.xlu1 %v7227_v38, %s6912_s27  ;;  %1795 = vrot.lane.b32.xlu0 %v7230_v39, %s6912_s27 }
  0xe4   :  { %v7668_v1 = vpop.permute.xlu1 %1379  ;;  %v7670_v57 = vpop.permute.xlu0 %1377 }
  0xe5   :  { %11692 = vst [vmem:[#allocation81_spill] sm:$0xff] %v7668_v1  ;;  %11693 = vst [vmem:[#allocation82_spill] sm:$0xff] %v7670_v57 }
  0xe6   :  { %1801 = vrot.lane.b32.xlu1 %v7239_v44, %s6912_s27  ;;  %1799 = vrot.lane.b32.xlu0 %v7242_v45, %s6912_s27  ;;  %v963_v45 = vrot.slane %v7570_v3, 4 }
  0xe8   :  { %v7676_v32 = vpop.permute.xlu1 %1383  ;;  %v7678_v5 = vpop.permute.xlu0 %1381 }
  0xe9   :  { %11694 = vst [vmem:[#allocation83_spill] sm:$0xff] %v7676_v32  ;;  %11695 = vst [vmem:[#allocation84_spill] sm:$0xff] %v7678_v5  ;;  %v7695_v5 = vld [vmem:[%s11458_s0 + $0x8] sm:$0xff]  ;;  %v958_v32 = vrot.slane %v7474_v13, 4 }
  0xea   :  { %2084 = vrot.lane.b32.xlu1 %v6987_v10, %s6913_s29  ;;  %2082 = vrot.lane.b32.xlu0 %v6990_v11, %s6913_s29  ;;  %v7700_v10 = vld [vmem:[%s11458_s0] sm:$0xff] }
  0xec   :  { %v7684_v31 = vpop.permute.xlu1 %1666  ;;  %v7686_v1 = vpop.permute.xlu0 %1664 }
  0xed   :  { %11696 = vst [vmem:[#allocation85_spill] sm:$0xff] %v7684_v31  ;;  %11697 = vst [vmem:[#allocation86_spill] sm:$0xff] %v7686_v1  ;;  %v957_v1 = vrot.slane %v7456_v6, 4 }
  0xee   :  { %2088 = vrot.lane.b32.xlu1 %v6999_v14, %s6913_s29  ;;  %2086 = vrot.lane.b32.xlu0 %v7002_v15, %s6913_s29  ;;  %v7713_v14 = vld [vmem:[%s11458_s0 + $0x18] sm:$0xff]  ;;  %v7718_v15 = vld [vmem:[%s11458_s0 + $0x10] sm:$0xff] }
  0xef   :  { %v7736_v46 = vsel %vm322_vm1, %v957_v1, %v958_v32  ;;  %v7752_v1 = vsel %vm322_vm1, %v958_v32, %v963_v45 }
  0xf0   :  { %v7702_v11 = vpop.permute.xlu1 %1670  ;;  %v7704_v31 = vpop.permute.xlu0 %1668 }
  0xf1   :  { %11698 = vst [vmem:[#allocation87_spill] sm:$0xff] %v7702_v11  ;;  %11699 = vst [vmem:[#allocation88_spill] sm:$0xff] %v7704_v31  ;;  %v960_v11 = vrot.slane %v7451_v7, 4  ;;  %v961_v31 = vrot.slane %v7469_v58, 4 }
  0xf2   :  { %598 = vrot.lane.b32.xlu1 %v7695_v5, %s6911_s24  ;;  %596 = vrot.lane.b32.xlu0 %v7700_v10, %s6911_s24 }
  0xf3   :  { %v7733_v22 = vsel %vm322_vm1, %v960_v11, %v961_v31  ;;  %v7749_v11 = vsel %vm322_vm1, %v961_v31, %v965_v4 }
  0xf4   :  { %v7724_v57 = vpop.permute.xlu1 %826  ;;  %v7726_v26 = vpop.permute.xlu0 %824 }
  0xf5   :  { %11700 = vst [vmem:[#allocation89_spill] sm:$0xff] %v7724_v57  ;;  %11701 = vst [vmem:[#allocation90_spill] sm:$0xff] %v7726_v26 }
  0xf6   :  { %602 = vrot.lane.b32.xlu1 %v7713_v14, %s6911_s24  ;;  %600 = vrot.lane.b32.xlu0 %v7718_v15, %s6911_s24 }
  0xf8   :  { %v7740_v44 = vpop.permute.xlu1 %830  ;;  %v7742_v57 = vpop.permute.xlu0 %828 }
  0xf9   :  { %11702 = vst [vmem:[#allocation91_spill] sm:$0xff] %v7740_v44  ;;  %11703 = vst [vmem:[#allocation92_spill] sm:$0xff] %v7742_v57 }
  0xfa   :  { %1017 = vrot.lane.b32.xlu1 %v7733_v22, %s6911_s24  ;;  %1015 = vrot.lane.b32.xlu0 %v7736_v46, %s6911_s24 }
  0xfc   :  { %v7754_v26 = vpop.permute.xlu1 %1232  ;;  %v7756_v39 = vpop.permute.xlu0 %1230 }
  0xfd   :  { %11704 = vst [vmem:[#allocation93_spill] sm:$0xff] %v7754_v26  ;;  %11705 = vst [vmem:[#allocation94_spill] sm:$0xff] %v7756_v39 }
  0xfe   :  { %1021 = vrot.lane.b32.xlu1 %v7749_v11, %s6911_s24  ;;  %1019 = vrot.lane.b32.xlu0 %v7752_v1, %s6911_s24 }
 0x100   :  { %v7762_v57 = vpop.permute.xlu1 %1236  ;;  %v7764_v44 = vpop.permute.xlu0 %1234 }
 0x101   :  { %11706 = vst [vmem:[#allocation95_spill] sm:$0xff] %v7762_v57  ;;  %11707 = vst [vmem:[#allocation96_spill] sm:$0xff] %v7764_v44 }
 0x102   :  { %1363 = vrot.lane.b32.xlu1 %v7259_v34, %s6912_s27  ;;  %1361 = vrot.lane.b32.xlu0 %v7264_v35, %s6912_s27 }
 0x104   :  { %v7770_v4 = vpop.permute.xlu1 %1519  ;;  %v7772_v45 = vpop.permute.xlu0 %1517 }
 0x105   :  { %11708 = vst [vmem:[#allocation97_spill] sm:$0xff] %v7770_v4  ;;  %11709 = vst [vmem:[#allocation98_spill] sm:$0xff] %v7772_v45 }
 0x106   :  { %1367 = vrot.lane.b32.xlu1 %v7273_v48, %s6912_s27  ;;  %1365 = vrot.lane.b32.xlu0 %v7278_v49, %s6912_s27 }
 0x108   :  { %v7778_v32 = vpop.permute.xlu1 %1523  ;;  %v7780_v31 = vpop.permute.xlu0 %1521 }
 0x109   :  { %11710 = vst [vmem:[#allocation99_spill] sm:$0xff] %v7778_v32  ;;  %11711 = vst [vmem:[#allocation100_spill] sm:$0xff] %v7780_v31 }
 0x10a   :  { %1650 = vrot.lane.b32.xlu1 %v7289_v62, %s6912_s27  ;;  %1648 = vrot.lane.b32.xlu0 %v7292_v63, %s6912_s27 }
 0x10c   :  { %v7786_v44 = vpop.permute.xlu1 %1805  ;;  %v7788_v4 = vpop.permute.xlu0 %1803 }
 0x10d   :  { %11712 = vst [vmem:[#allocation101_spill] sm:$0xff] %v7786_v44  ;;  %11713 = vst [vmem:[#allocation102_spill] sm:$0xff] %v7788_v4 }
 0x10e   :  { %1654 = vrot.lane.b32.xlu1 %v7301_v8, %s6912_s27  ;;  %1652 = vrot.lane.b32.xlu0 %v7304_v9, %s6912_s27 }
 0x110   :  { %v7794_v45 = vpop.permute.xlu1 %1809  ;;  %v7796_v32 = vpop.permute.xlu0 %1807 }
 0x111   :  { %11714 = vst [vmem:[#allocation103_spill] sm:$0xff] %v7794_v45  ;;  %11715 = vst [vmem:[#allocation104_spill] sm:$0xff] %v7796_v32 }
 0x112   :  { %1936 = vrot.lane.b32.xlu1 %v7011_v16, %s6913_s29  ;;  %1934 = vrot.lane.b32.xlu0 %v7016_v17, %s6913_s29  ;;  %v751_v16 = vrot.slane %v7695_v5, 2  ;;  %v752_v17 = vrot.slane %v7713_v14, 2 }
 0x114   :  { %v7802_v31 = vpop.permute.xlu1 %606  ;;  %v7804_v44 = vpop.permute.xlu0 %604  ;;  %v7843_v57 = vsel %vm188_vm0, %v751_v16, %v752_v17  ;;  %v1159_v16 = vrot.slane %v7451_v7, 6 }
 0x115   :  { %11716 = vst [vmem:[#allocation105_spill] sm:$0xff] %v7802_v31  ;;  %11717 = vst [vmem:[#allocation106_spill] sm:$0xff] %v7804_v44  ;;  %v748_v44 = vrot.slane %v7700_v10, 2 }
 0x116   :  { %1940 = vrot.lane.b32.xlu1 %v7025_v18, %s6913_s29  ;;  %1938 = vrot.lane.b32.xlu0 %v7030_v19, %s6913_s29  ;;  %v749_v18 = vrot.slane %v7718_v15, 2  ;;  %v7825_v19 = vld [vmem:[%s11458_s0 + $0x28] sm:$0x3f] }
 0x117   :  { %v756_v31 = vrot.slane %v7825_v19, 2 }
 0x118   :  { %v7810_v4 = vpop.permute.xlu1 %610  ;;  %v7812_v45 = vpop.permute.xlu0 %608  ;;  %v7846_v39 = vsel %vm188_vm0, %v748_v44, %v749_v18  ;;  %v1160_v44 = vrot.slane %v7469_v58, 6 }
 0x119   :  { %11718 = vst [vmem:[#allocation107_spill] sm:$0xff] %v7810_v4  ;;  %11719 = vst [vmem:[#allocation108_spill] sm:$0xff] %v7812_v45  ;;  %v11722_v4 = vld [vmem:[#allocation2_spill] sm:$0xff] }
 0x11a   :  { %2223 = vrot.lane.b32.xlu1 %v7041_v24, %s6913_s29  ;;  %2221 = vrot.lane.b32.xlu0 %v7044_v25, %s6913_s29  ;;  %v7830_v24 = vld [vmem:[%s11458_s0 + $0x20] sm:$0x3f]  ;;  %11723 = vst [vmem:[#allocation2_spill] sm:$0xff] %v7843_v57  ;;  %11724 = vst [vmem:[#allocation111_spill] sm:$0xff] %v7846_v39 }
 0x11b   :  { %v754_v32 = vrot.slane %v7830_v24, 2 }
 0x11c   :  { %v7832_v45 = vpop.permute.xlu1 %1025  ;;  %v7834_v25 = vpop.permute.xlu0 %1023 }
 0x11d   :  { %11720 = vst [vmem:[#allocation109_spill] sm:$0xff] %v7832_v45  ;;  %11721 = vst [vmem:[#allocation110_spill] sm:$0xff] %v7834_v25 }
 0x11e   :  { %2227 = vrot.lane.b32.xlu1 %v7055_v30, %s6913_s29  ;;  %2225 = vrot.lane.b32.xlu0 %v11722_v4, %s6913_s29  ;;  %v7857_v30 = vsel %vm188_vm0, %v752_v17, %v756_v31  ;;  %v7860_v4 = vsel %vm188_vm0, %v749_v18, %v754_v32  ;;  %v7875_v32 = vsel %vm456_vm2, %v1159_v16, %v1160_v44  ;;  %v1164_v17 = vrot.slane %v7565_v43, 6 }
 0x11f   :  { %v1162_v18 = vrot.slane %v7570_v3, 6 }
 0x120   :  { %v7848_v26 = vpop.permute.xlu1 %1029  ;;  %v7850_v45 = vpop.permute.xlu0 %1027  ;;  %v7891_v16 = vsel %vm456_vm2, %v1160_v44, %v1164_v17  ;;  %v11735_v44 = vld [vmem:[#allocation22_spill] sm:$0xff] }
 0x121   :  { %11725 = vst [vmem:[#allocation112_spill] sm:$0xff] %v7848_v26  ;;  %11726 = vst [vmem:[#allocation113_spill] sm:$0xff] %v7850_v45  ;;  %v1156_v26 = vrot.slane %v7456_v6, 6  ;;  %v1157_v45 = vrot.slane %v7474_v13, 6 }
 0x122   :  { %810 = vrot.lane.b32.xlu1 %v7843_v57, %s6911_s24  ;;  %808 = vrot.lane.b32.xlu0 %v7846_v39, %s6911_s24 }
 0x123   :  { %v7878_v31 = vsel %vm456_vm2, %v1156_v26, %v1157_v45  ;;  %v7894_v26 = vsel %vm456_vm2, %v1157_v45, %v1162_v18  ;;  %v11736_v45 = vld [vmem:[#allocation23_spill] sm:$0xff] }
 0x124   :  { %v7866_v25 = vpop.permute.xlu1 %1371  ;;  %v7868_v57 = vpop.permute.xlu0 %1369 }
 0x125   :  { %11727 = vst [vmem:[#allocation114_spill] sm:$0xff] %v7866_v25  ;;  %11728 = vst [vmem:[#allocation115_spill] sm:$0xff] %v7868_v57 }
 0x126   :  { %814 = vrot.lane.b32.xlu1 %v7857_v30, %s6911_s24  ;;  %812 = vrot.lane.b32.xlu0 %v7860_v4, %s6911_s24 }
 0x128   :  { %v7882_v39 = vpop.permute.xlu1 %1375  ;;  %v7884_v25 = vpop.permute.xlu0 %1373 }
 0x129   :  { %11729 = vst [vmem:[#allocation116_spill] sm:$0xff] %v7882_v39  ;;  %11730 = vst [vmem:[#allocation117_spill] sm:$0xff] %v7884_v25  ;;  %v11749_v39 = vld [vmem:[#allocation5_spill] sm:$0xff] }
 0x12a   :  { %1216 = vrot.lane.b32.xlu1 %v7875_v32, %s6911_s24  ;;  %1214 = vrot.lane.b32.xlu0 %v7878_v31, %s6911_s24 }
 0x12c   :  { %v7896_v57 = vpop.permute.xlu1 %1658  ;;  %v7898_v43 = vpop.permute.xlu0 %1656 }
 0x12d   :  { %11731 = vst [vmem:[#allocation118_spill] sm:$0xff] %v7896_v57  ;;  %11732 = vst [vmem:[#allocation119_spill] sm:$0xff] %v7898_v43 }
 0x12e   :  { %1220 = vrot.lane.b32.xlu1 %v7891_v16, %s6911_s24  ;;  %1218 = vrot.lane.b32.xlu0 %v7894_v26, %s6911_s24 }
 0x130   :  { %v7904_v3 = vpop.permute.xlu1 %1662  ;;  %v7906_v25 = vpop.permute.xlu0 %1660 }
 0x131   :  { %11733 = vst [vmem:[#allocation120_spill] sm:$0xff] %v7904_v3  ;;  %11734 = vst [vmem:[#allocation121_spill] sm:$0xff] %v7906_v25 }
 0x132   :  { %1503 = vrot.lane.b32.xlu1 %v11735_v44, %s6912_s27  ;;  %1501 = vrot.lane.b32.xlu0 %v11736_v45, %s6912_s27 }
 0x134   :  { %v7912_v17 = vpop.permute.xlu1 %1944  ;;  %v7914_v18 = vpop.permute.xlu0 %1942 }
 0x135   :  { %11737 = vst [vmem:[#allocation22_spill] sm:$0xff] %v7912_v17  ;;  %11738 = vst [vmem:[#allocation23_spill] sm:$0xff] %v7914_v18 }
 0x136   :  { %1507 = vrot.lane.b32.xlu1 %v7369_v59, %s6912_s27  ;;  %1505 = vrot.lane.b32.xlu0 %v7372_v27, %s6912_s27 }
 0x138   :  { %v7920_v43 = vpop.permute.xlu1 %1948  ;;  %v7922_v3 = vpop.permute.xlu0 %1946 }
 0x139   :  { %11739 = vst [vmem:[#allocation122_spill] sm:$0xff] %v7920_v43  ;;  %11740 = vst [vmem:[#allocation123_spill] sm:$0xff] %v7922_v3  ;;  %v11745_v3 = vld [vmem:[#allocation3_spill] sm:$0xff] }
 0x13a   :  { %1789 = vrot.lane.b32.xlu1 %v7387_v40, %s6912_s27  ;;  %1787 = vrot.lane.b32.xlu0 %v7390_v56, %s6912_s27  ;;  %v955_v56 = vrot.slane %v7825_v19, 4  ;;  %v953_v40 = vrot.slane %v7830_v24, 4 }
 0x13c   :  { %v7928_v25 = vpop.permute.xlu1 %818  ;;  %v7930_v17 = vpop.permute.xlu0 %816 }
 0x13d   :  { %11741 = vst [vmem:[#allocation124_spill] sm:$0xff] %v7928_v25  ;;  %11742 = vst [vmem:[#allocation125_spill] sm:$0xff] %v7930_v17  ;;  %v11748_v17 = vld [vmem:[#allocation4_spill] sm:$0xff] }
 0x13e   :  { %1793 = vrot.lane.b32.xlu1 %v7403_v33, %s6912_s27  ;;  %1791 = vrot.lane.b32.xlu0 %v7406_v23, %s6912_s27 }
 0x140   :  { %v7936_v18 = vpop.permute.xlu1 %822  ;;  %v7938_v43 = vpop.permute.xlu0 %820 }
 0x141   :  { %11743 = vst [vmem:[#allocation126_spill] sm:$0xff] %v7936_v18  ;;  %11744 = vst [vmem:[#allocation127_spill] sm:$0xff] %v7938_v43  ;;  %v11752_v43 = vld [vmem:[#allocation6_spill] sm:$0xff] }
 0x142   :  { %2076 = vrot.lane.b32.xlu1 %v7077_v36, %s6913_s29  ;;  %2074 = vrot.lane.b32.xlu0 %v11745_v3, %s6913_s29  ;;  %v11753_v36 = vld [vmem:[#allocation7_spill] sm:$0xff]  ;;  %v950_v3 = vrot.slane %v7695_v5, 4 }
 0x144   :  { %v7944_v57 = vpop.permute.xlu1 %1224  ;;  %v7946_v25 = vpop.permute.xlu0 %1222 }
 0x145   :  { %11746 = vst [vmem:[#allocation3_spill] sm:$0xff] %v7944_v57  ;;  %11747 = vst [vmem:[#allocation128_spill] sm:$0xff] %v7946_v25  ;;  %v951_v25 = vrot.slane %v7713_v14, 4  ;;  %v947_v57 = vrot.slane %v7700_v10, 4 }
 0x146   :  { %2080 = vrot.lane.b32.xlu1 %v11748_v17, %s6913_s29  ;;  %2078 = vrot.lane.b32.xlu0 %v11749_v39, %s6913_s29  ;;  %v948_v17 = vrot.slane %v7718_v15, 4 }
 0x148   :  { %v7952_v23 = vpop.permute.xlu1 %1228  ;;  %v7954_v18 = vpop.permute.xlu0 %1226 }
 0x149   :  { %11750 = vst [vmem:[#allocation4_spill] sm:$0xff] %v7952_v23  ;;  %11751 = vst [vmem:[#allocation5_spill] sm:$0xff] %v7954_v18  ;;  %v11756_v18 = vld [vmem:[#allocation8_spill] sm:$0xff]  ;;  %v7976_v23 = vsel %vm322_vm1, %v947_v57, %v948_v17  ;;  %v7992_v57 = vsel %vm322_vm1, %v948_v17, %v953_v40 }
 0x14a   :  { %2362 = vrot.lane.b32.xlu1 %v11752_v43, %s6913_s29  ;;  %2360 = vrot.lane.b32.xlu0 %v11753_v36, %s6913_s29  ;;  %v11757_v43 = vld [vmem:[#allocation9_spill] sm:$0xff]  ;;  %v7973_v36 = vsel %vm322_vm1, %v950_v3, %v951_v25  ;;  %11761 = vst [vmem:[#allocation130_spill] sm:$0xff] %v7992_v57 }
 0x14c   :  { %v7964_v33 = vpop.permute.xlu1 %1511  ;;  %v7966_v39 = vpop.permute.xlu0 %1509 }
 0x14d   :  { %11754 = vst [vmem:[#allocation6_spill] sm:$0xff] %v7964_v33  ;;  %11755 = vst [vmem:[#allocation7_spill] sm:$0xff] %v7966_v39 }
 0x14e   :  { %2366 = vrot.lane.b32.xlu1 %v11756_v18, %s6913_s29  ;;  %2364 = vrot.lane.b32.xlu0 %v11757_v43, %s6913_s29  ;;  %v7989_v18 = vsel %vm322_vm1, %v951_v25, %v955_v56 }
 0x14f   :  { %11760 = vst [vmem:[#allocation129_spill] sm:$0xff] %v7989_v18 }
 0x150   :  { %v7980_v27 = vpop.permute.xlu1 %1515  ;;  %v7982_v33 = vpop.permute.xlu0 %1513 }
 0x151   :  { %11758 = vst [vmem:[#allocation8_spill] sm:$0xff] %v7980_v27  ;;  %11759 = vst [vmem:[#allocation9_spill] sm:$0xff] %v7982_v33 }
 0x152   :  { %1009 = vrot.lane.b32.xlu1 %v7973_v36, %s6911_s24  ;;  %1007 = vrot.lane.b32.xlu0 %v7976_v23, %s6911_s24 }
 0x154   :  { %v7994_v3 = vpop.permute.xlu1 %1797  ;;  %v7996_v43 = vpop.permute.xlu0 %1795 }
 0x155   :  { %11762 = vst [vmem:[#allocation131_spill] sm:$0xff] %v7994_v3  ;;  %11763 = vst [vmem:[#allocation132_spill] sm:$0xff] %v7996_v43  ;;  %v1152_v43 = vrot.slane %v7830_v24, 6 }
 0x156   :  { %1013 = vrot.lane.b32.xlu1 %v7989_v18, %s6911_s24  ;;  %1011 = vrot.lane.b32.xlu0 %v7992_v57, %s6911_s24 }
 0x158   :  { %v8002_v33 = vpop.permute.xlu1 %1801  ;;  %v8004_v27 = vpop.permute.xlu0 %1799 }
 0x159   :  { %11764 = vst [vmem:[#allocation133_spill] sm:$0xff] %v8002_v33  ;;  %11765 = vst [vmem:[#allocation134_spill] sm:$0xff] %v8004_v27  ;;  %v1154_v33 = vrot.slane %v7825_v19, 6 }
 0x15a   :  { %1355 = vrot.lane.b32.xlu1 %v7451_v7, %s6912_s27  ;;  %1353 = vrot.lane.b32.xlu0 %v7456_v6, %s6912_s27 }
 0x15c   :  { %v8010_v40 = vpop.permute.xlu1 %2084  ;;  %v8012_v56 = vpop.permute.xlu0 %2082 }
 0x15d   :  { %11766 = vst [vmem:[#allocation135_spill] sm:$0xff] %v8010_v40  ;;  %11767 = vst [vmem:[#allocation136_spill] sm:$0xff] %v8012_v56 }
 0x15e   :  { %1359 = vrot.lane.b32.xlu1 %v7469_v58, %s6912_s27  ;;  %1357 = vrot.lane.b32.xlu0 %v7474_v13, %s6912_s27 }
 0x160   :  { %v8018_v25 = vpop.permute.xlu1 %2088  ;;  %v8020_v17 = vpop.permute.xlu0 %2086 }
 0x161   :  { %11768 = vst [vmem:[#allocation137_spill] sm:$0xff] %v8018_v25  ;;  %11769 = vst [vmem:[#allocation138_spill] sm:$0xff] %v8020_v17 }
 0x162   :  { %1642 = vrot.lane.b32.xlu1 %v7489_v50, %s6912_s27  ;;  %1640 = vrot.lane.b32.xlu0 %v7492_v47, %s6912_s27 }
 0x164   :  { %v8026_v27 = vpop.permute.xlu1 %598  ;;  %v8028_v40 = vpop.permute.xlu0 %596 }
 0x165   :  { %11770 = vst [vmem:[#allocation139_spill] sm:$0xff] %v8026_v27  ;;  %11771 = vst [vmem:[#allocation140_spill] sm:$0xff] %v8028_v40 }
 0x166   :  { %1646 = vrot.lane.b32.xlu1 %v7505_v41, %s6912_s27  ;;  %1644 = vrot.lane.b32.xlu0 %v7508_v12, %s6912_s27 }
 0x168   :  { %v8034_v56 = vpop.permute.xlu1 %602  ;;  %v8036_v25 = vpop.permute.xlu0 %600 }
 0x169   :  { %11772 = vst [vmem:[#allocation141_spill] sm:$0xff] %v8034_v56  ;;  %11773 = vst [vmem:[#allocation142_spill] sm:$0xff] %v8036_v25  ;;  %v1150_v25 = vrot.slane %v7713_v14, 6 }
 0x16a   :  { %1928 = vrot.lane.b32.xlu1 %v7127_v52, %s6913_s29  ;;  %1926 = vrot.lane.b32.xlu0 %v7132_v53, %s6913_s29  ;;  %v11778_v52 = vld [vmem:[#allocation10_spill] sm:$0xff]  ;;  %v1149_v53 = vrot.slane %v7695_v5, 6 }
 0x16c   :  { %v8042_v17 = vpop.permute.xlu1 %1017  ;;  %v8044_v27 = vpop.permute.xlu0 %1015 }
 0x16d   :  { %11774 = vst [vmem:[#allocation143_spill] sm:$0xff] %v8042_v17  ;;  %11775 = vst [vmem:[#allocation144_spill] sm:$0xff] %v8044_v27  ;;  %v1146_v27 = vrot.slane %v7700_v10, 6 }
 0x16e   :  { %1932 = vrot.lane.b32.xlu1 %v7141_v54, %s6913_s29  ;;  %1930 = vrot.lane.b32.xlu0 %v7146_v55, %s6913_s29  ;;  %v1147_v54 = vrot.slane %v7718_v15, 6 }
 0x170   :  { %v8050_v40 = vpop.permute.xlu1 %1021  ;;  %v8052_v56 = vpop.permute.xlu0 %1019 }
 0x171   :  { %11776 = vst [vmem:[#allocation145_spill] sm:$0xff] %v8050_v40  ;;  %11777 = vst [vmem:[#allocation146_spill] sm:$0xff] %v8052_v56  ;;  %v11781_v56 = vld [vmem:[#allocation11_spill] sm:$0xff]  ;;  %v8074_v40 = vsel %vm456_vm2, %v1146_v27, %v1147_v54  ;;  %v8090_v27 = vsel %vm456_vm2, %v1147_v54, %v1152_v43  ;;  %v11794_v43 = vld [vmem:[#allocation66_spill] sm:$0xff] }
 0x172   :  { %2215 = vrot.lane.b32.xlu1 %v7157_v60, %s6913_s29  ;;  %2213 = vrot.lane.b32.xlu0 %v11778_v52, %s6913_s29  ;;  %v11782_v60 = vld [vmem:[#allocation12_spill] sm:$0xff]  ;;  %v8071_v52 = vsel %vm456_vm2, %v1149_v53, %v1150_v25  ;;  %11788 = vst [vmem:[#allocation151_spill] sm:$0xff] %v8090_v27 }
 0x173   :  { %11783 = vst [vmem:[#allocation11_spill] sm:$0xff] %v8071_v52  ;;  %11784 = vst [vmem:[#allocation12_spill] sm:$0xff] %v8074_v40 }
 0x174   :  { %v8062_v17 = vpop.permute.xlu1 %1363  ;;  %v8064_v55 = vpop.permute.xlu0 %1361 }
 0x175   :  { %11779 = vst [vmem:[#allocation10_spill] sm:$0xff] %v8062_v17  ;;  %11780 = vst [vmem:[#allocation147_spill] sm:$0xff] %v8064_v55 }
 0x176   :  { %2219 = vrot.lane.b32.xlu1 %v11781_v56, %s6913_s29  ;;  %2217 = vrot.lane.b32.xlu0 %v11782_v60, %s6913_s29  ;;  %v8087_v56 = vsel %vm456_vm2, %v1150_v25, %v1154_v33  ;;  %v11793_v33 = vld [vmem:[#allocation65_spill] sm:$0xff] }
 0x177   :  { %11787 = vst [vmem:[#allocation150_spill] sm:$0xff] %v8087_v56 }
 0x178   :  { %v8078_v3 = vpop.permute.xlu1 %1367  ;;  %v8080_v17 = vpop.permute.xlu0 %1365 }
 0x179   :  { %11785 = vst [vmem:[#allocation148_spill] sm:$0xff] %v8078_v3  ;;  %11786 = vst [vmem:[#allocation149_spill] sm:$0xff] %v8080_v17 }
 0x17a   :  { %1208 = vrot.lane.b32.xlu1 %v8071_v52, %s6911_s24  ;;  %1206 = vrot.lane.b32.xlu0 %v8074_v40, %s6911_s24 }
 0x17c   :  { %v8092_v53 = vpop.permute.xlu1 %1650  ;;  %v8094_v19 = vpop.permute.xlu0 %1648 }
 0x17d   :  { %11789 = vst [vmem:[#allocation152_spill] sm:$0xff] %v8092_v53  ;;  %11790 = vst [vmem:[#allocation153_spill] sm:$0xff] %v8094_v19 }
 0x17e   :  { %1212 = vrot.lane.b32.xlu1 %v8087_v56, %s6911_s24  ;;  %1210 = vrot.lane.b32.xlu0 %v8090_v27, %s6911_s24 }
 0x180   :  { %v8100_v24 = vpop.permute.xlu1 %1654  ;;  %v8102_v60 = vpop.permute.xlu0 %1652 }
 0x181   :  { %11791 = vst [vmem:[#allocation154_spill] sm:$0xff] %v8100_v24  ;;  %11792 = vst [vmem:[#allocation155_spill] sm:$0xff] %v8102_v60 }
 0x182   :  { %1495 = vrot.lane.b32.xlu1 %v11793_v33, %s6912_s27  ;;  %1493 = vrot.lane.b32.xlu0 %v11794_v43, %s6912_s27 }
 0x184   :  { %v8108_v25 = vpop.permute.xlu1 %1936  ;;  %v8110_v54 = vpop.permute.xlu0 %1934 }
 0x185   :  { %11795 = vst [vmem:[#allocation65_spill] sm:$0xff] %v8108_v25  ;;  %11796 = vst [vmem:[#allocation66_spill] sm:$0xff] %v8110_v54 }
 0x186   :  { %1499 = vrot.lane.b32.xlu1 %v7597_v0, %s6912_s27  ;;  %1497 = vrot.lane.b32.xlu0 %v7600_v2, %s6912_s27 }
 0x188   :  { %v8116_v17 = vpop.permute.xlu1 %1940  ;;  %v8118_v3 = vpop.permute.xlu0 %1938 }
 0x189   :  { %11797 = vst [vmem:[#allocation156_spill] sm:$0xff] %v8116_v17  ;;  %11798 = vst [vmem:[#allocation157_spill] sm:$0xff] %v8118_v3 }
 0x18a   :  { %1781 = vrot.lane.b32.xlu1 %v7615_v37, %s6912_s27  ;;  %1779 = vrot.lane.b32.xlu0 %v7618_v51, %s6912_s27 }
 0x18c   :  { %v8124_v55 = vpop.permute.xlu1 %2223  ;;  %v8126_v25 = vpop.permute.xlu0 %2221 }
 0x18d   :  { %11799 = vst [vmem:[#allocation158_spill] sm:$0xff] %v8124_v55  ;;  %11800 = vst [vmem:[#allocation159_spill] sm:$0xff] %v8126_v25 }
 0x18e   :  { %1785 = vrot.lane.b32.xlu1 %v7631_v42, %s6912_s27  ;;  %1783 = vrot.lane.b32.xlu0 %v7634_v61, %s6912_s27 }
 0x190   :  { %v8132_v54 = vpop.permute.xlu1 %2227  ;;  %v8134_v17 = vpop.permute.xlu0 %2225 }
 0x191   :  { %11801 = vst [vmem:[#allocation160_spill] sm:$0xff] %v8132_v54  ;;  %11802 = vst [vmem:[#allocation161_spill] sm:$0xff] %v8134_v17 }
 0x192   :  { %2068 = vrot.lane.b32.xlu1 %v7201_v20, %s6913_s29  ;;  %2066 = vrot.lane.b32.xlu0 %v7204_v21, %s6913_s29  ;;  %v11807_v20 = vld [vmem:[#allocation13_spill] sm:$0xff] }
 0x194   :  { %v8140_v3 = vpop.permute.xlu1 %810  ;;  %v8142_v55 = vpop.permute.xlu0 %808 }
 0x195   :  { %11803 = vst [vmem:[#allocation162_spill] sm:$0xff] %v8140_v3  ;;  %11804 = vst [vmem:[#allocation163_spill] sm:$0xff] %v8142_v55  ;;  %v11810_v55 = vld [vmem:[#allocation14_spill] sm:$0xff] }
 0x196   :  { %2072 = vrot.lane.b32.xlu1 %v7215_v28, %s6913_s29  ;;  %2070 = vrot.lane.b32.xlu0 %v7218_v29, %s6913_s29  ;;  %v11811_v28 = vld [vmem:[#allocation15_spill] sm:$0xff] }
 0x198   :  { %v8148_v25 = vpop.permute.xlu1 %814  ;;  %v8150_v54 = vpop.permute.xlu0 %812 }
 0x199   :  { %11805 = vst [vmem:[#allocation164_spill] sm:$0xff] %v8148_v25  ;;  %11806 = vst [vmem:[#allocation165_spill] sm:$0xff] %v8150_v54 }
 0x19a   :  { %2354 = vrot.lane.b32.xlu1 %v7227_v38, %s6913_s29  ;;  %2352 = vrot.lane.b32.xlu0 %v11807_v20, %s6913_s29 }
 0x19c   :  { %v8156_v21 = vpop.permute.xlu1 %1216  ;;  %v8158_v3 = vpop.permute.xlu0 %1214 }
 0x19d   :  { %11808 = vst [vmem:[#allocation13_spill] sm:$0xff] %v8156_v21  ;;  %11809 = vst [vmem:[#allocation166_spill] sm:$0xff] %v8158_v3 }
 0x19e   :  { %2358 = vrot.lane.b32.xlu1 %v11810_v55, %s6913_s29  ;;  %2356 = vrot.lane.b32.xlu0 %v11811_v28, %s6913_s29 }
 0x1a0   :  { %v8164_v29 = vpop.permute.xlu1 %1220  ;;  %v8166_v25 = vpop.permute.xlu0 %1218 }
 0x1a1   :  { %11812 = vst [vmem:[#allocation14_spill] sm:$0xff] %v8164_v29  ;;  %11813 = vst [vmem:[#allocation15_spill] sm:$0xff] %v8166_v25 }
 0x1a2   :  { %1347 = vrot.lane.b32.xlu1 %v7695_v5, %s6912_s27  ;;  %1345 = vrot.lane.b32.xlu0 %v7700_v10, %s6912_s27 }
 0x1a4   :  { %v8172_v38 = vpop.permute.xlu1 %1503  ;;  %v8174_v20 = vpop.permute.xlu0 %1501 }
 0x1a5   :  { %11814 = vst [vmem:[#allocation167_spill] sm:$0xff] %v8172_v38  ;;  %11815 = vst [vmem:[#allocation168_spill] sm:$0xff] %v8174_v20  ;;  %v11830_v38 = vld [vmem:[#allocation2_spill] sm:$0xff] }
 0x1a6   :  { %1351 = vrot.lane.b32.xlu1 %v7713_v14, %s6912_s27  ;;  %1349 = vrot.lane.b32.xlu0 %v7718_v15, %s6912_s27 }
 0x1a8   :  { %v8180_v55 = vpop.permute.xlu1 %1507  ;;  %v8182_v28 = vpop.permute.xlu0 %1505 }
 0x1a9   :  { %11816 = vst [vmem:[#allocation169_spill] sm:$0xff] %v8180_v55  ;;  %11817 = vst [vmem:[#allocation170_spill] sm:$0xff] %v8182_v28 }
 0x1aa   :  { %1634 = vrot.lane.b32.xlu1 %v7733_v22, %s6912_s27  ;;  %1632 = vrot.lane.b32.xlu0 %v7736_v46, %s6912_s27 }
 0x1ac   :  { %v8188_v54 = vpop.permute.xlu1 %1789  ;;  %v8190_v25 = vpop.permute.xlu0 %1787 }
 0x1ad   :  { %11818 = vst [vmem:[#allocation171_spill] sm:$0xff] %v8188_v54  ;;  %11819 = vst [vmem:[#allocation172_spill] sm:$0xff] %v8190_v25 }
 0x1ae   :  { %1638 = vrot.lane.b32.xlu1 %v7749_v11, %s6912_s27  ;;  %1636 = vrot.lane.b32.xlu0 %v7752_v1, %s6912_s27 }
 0x1b0   :  { %v8196_v29 = vpop.permute.xlu1 %1793  ;;  %v8198_v3 = vpop.permute.xlu0 %1791 }
 0x1b1   :  { %11820 = vst [vmem:[#allocation173_spill] sm:$0xff] %v8196_v29  ;;  %11821 = vst [vmem:[#allocation174_spill] sm:$0xff] %v8198_v3 }
 0x1b2   :  { %1920 = vrot.lane.b32.xlu1 %v7259_v34, %s6913_s29  ;;  %1918 = vrot.lane.b32.xlu0 %v7264_v35, %s6913_s29 }
 0x1b4   :  { %v8204_v21 = vpop.permute.xlu1 %2076  ;;  %v8206_v28 = vpop.permute.xlu0 %2074 }
 0x1b5   :  { %11822 = vst [vmem:[#allocation175_spill] sm:$0xff] %v8204_v21  ;;  %11823 = vst [vmem:[#allocation176_spill] sm:$0xff] %v8206_v28 }
 0x1b6   :  { %1924 = vrot.lane.b32.xlu1 %v7273_v48, %s6913_s29  ;;  %1922 = vrot.lane.b32.xlu0 %v7278_v49, %s6913_s29 }
 0x1b8   :  { %v8212_v55 = vpop.permute.xlu1 %2080  ;;  %v8214_v20 = vpop.permute.xlu0 %2078 }
 0x1b9   :  { %11824 = vst [vmem:[#allocation177_spill] sm:$0xff] %v8212_v55  ;;  %11825 = vst [vmem:[#allocation178_spill] sm:$0xff] %v8214_v20 }
 0x1ba   :  { %2207 = vrot.lane.b32.xlu1 %v7289_v62, %s6913_s29  ;;  %2205 = vrot.lane.b32.xlu0 %v7292_v63, %s6913_s29  ;;  %v11831_v62 = vld [vmem:[#allocation111_spill] sm:$0xff] }
 0x1bc   :  { %v8220_v34 = vpop.permute.xlu1 %2362  ;;  %v8222_v35 = vpop.permute.xlu0 %2360 }
 0x1bd   :  { %11826 = vst [vmem:[#allocation179_spill] sm:$0xff] %v8220_v34  ;;  %11827 = vst [vmem:[#allocation180_spill] sm:$0xff] %v8222_v35 }
 0x1be   :  { %2211 = vrot.lane.b32.xlu1 %v7301_v8, %s6913_s29  ;;  %2209 = vrot.lane.b32.xlu0 %v7304_v9, %s6913_s29 }
 0x1c0   :  { %v8228_v48 = vpop.permute.xlu1 %2366  ;;  %v8230_v49 = vpop.permute.xlu0 %2364 }
 0x1c1   :  { %11828 = vst [vmem:[#allocation181_spill] sm:$0xff] %v8228_v48  ;;  %11829 = vst [vmem:[#allocation182_spill] sm:$0xff] %v8230_v49 }
 0x1c2   :  { %1487 = vrot.lane.b32.xlu1 %v11830_v38, %s6912_s27  ;;  %1485 = vrot.lane.b32.xlu0 %v11831_v62, %s6912_s27 }
 0x1c4   :  { %v8236_v63 = vpop.permute.xlu1 %1009  ;;  %v8238_v20 = vpop.permute.xlu0 %1007 }
 0x1c5   :  { %11832 = vst [vmem:[#allocation2_spill] sm:$0xff] %v8236_v63  ;;  %11833 = vst [vmem:[#allocation111_spill] sm:$0xff] %v8238_v20 }
 0x1c6   :  { %1491 = vrot.lane.b32.xlu1 %v7857_v30, %s6912_s27  ;;  %1489 = vrot.lane.b32.xlu0 %v7860_v4, %s6912_s27 }
 0x1c8   :  { %v8244_v8 = vpop.permute.xlu1 %1013  ;;  %v8246_v9 = vpop.permute.xlu0 %1011 }
 0x1c9   :  { %11834 = vst [vmem:[#allocation183_spill] sm:$0xff] %v8244_v8  ;;  %11835 = vst [vmem:[#allocation184_spill] sm:$0xff] %v8246_v9 }
 0x1ca   :  { %1773 = vrot.lane.b32.xlu1 %v7875_v32, %s6912_s27  ;;  %1771 = vrot.lane.b32.xlu0 %v7878_v31, %s6912_s27 }
 0x1cc   :  { %v8252_v49 = vpop.permute.xlu1 %1355  ;;  %v8254_v63 = vpop.permute.xlu0 %1353 }
 0x1cd   :  { %11836 = vst [vmem:[#allocation185_spill] sm:$0xff] %v8252_v49  ;;  %11837 = vst [vmem:[#allocation186_spill] sm:$0xff] %v8254_v63  ;;  %v11842_v63 = vld [vmem:[#allocation26_spill] sm:$0xff] }
 0x1ce   :  { %1777 = vrot.lane.b32.xlu1 %v7891_v16, %s6912_s27  ;;  %1775 = vrot.lane.b32.xlu0 %v7894_v26, %s6912_s27 }
 0x1d0   :  { %v8260_v20 = vpop.permute.xlu1 %1359  ;;  %v8262_v8 = vpop.permute.xlu0 %1357 }
 0x1d1   :  { %11838 = vst [vmem:[#allocation187_spill] sm:$0xff] %v8260_v20  ;;  %11839 = vst [vmem:[#allocation188_spill] sm:$0xff] %v8262_v8  ;;  %v11845_v8 = vld [vmem:[#allocation29_spill] sm:$0xff] }
 0x1d2   :  { %2060 = vrot.lane.b32.xlu1 %v11735_v44, %s6913_s29  ;;  %2058 = vrot.lane.b32.xlu0 %v11736_v45, %s6913_s29  ;;  %v11846_v44 = vld [vmem:[#allocation30_spill] sm:$0xff] }
 0x1d4   :  { %v8268_v9 = vpop.permute.xlu1 %1642  ;;  %v8270_v49 = vpop.permute.xlu0 %1640 }
 0x1d5   :  { %11840 = vst [vmem:[#allocation189_spill] sm:$0xff] %v8268_v9  ;;  %11841 = vst [vmem:[#allocation190_spill] sm:$0xff] %v8270_v49  ;;  %v11849_v49 = vld [vmem:[#allocation33_spill] sm:$0xff] }
 0x1d6   :  { %2064 = vrot.lane.b32.xlu1 %v7369_v59, %s6913_s29  ;;  %2062 = vrot.lane.b32.xlu0 %v11842_v63, %s6913_s29  ;;  %v11850_v59 = vld [vmem:[#allocation34_spill] sm:$0xff] }
 0x1d8   :  { %v8276_v48 = vpop.permute.xlu1 %1646  ;;  %v8278_v20 = vpop.permute.xlu0 %1644 }
 0x1d9   :  { %11843 = vst [vmem:[#allocation26_spill] sm:$0xff] %v8276_v48  ;;  %11844 = vst [vmem:[#allocation191_spill] sm:$0xff] %v8278_v20 }
 0x1da   :  { %2346 = vrot.lane.b32.xlu1 %v11845_v8, %s6913_s29  ;;  %2344 = vrot.lane.b32.xlu0 %v11846_v44, %s6913_s29 }
 0x1dc   :  { %v8284_v45 = vpop.permute.xlu1 %1928  ;;  %v8286_v9 = vpop.permute.xlu0 %1926 }
 0x1dd   :  { %11847 = vst [vmem:[#allocation29_spill] sm:$0xff] %v8284_v45  ;;  %11848 = vst [vmem:[#allocation30_spill] sm:$0xff] %v8286_v9 }
 0x1de   :  { %2350 = vrot.lane.b32.xlu1 %v11849_v49, %s6913_s29  ;;  %2348 = vrot.lane.b32.xlu0 %v11850_v59, %s6913_s29 }
 0x1e0   :  { %v8292_v63 = vpop.permute.xlu1 %1932  ;;  %v8294_v48 = vpop.permute.xlu0 %1930 }
 0x1e1   :  { %11851 = vst [vmem:[#allocation33_spill] sm:$0xff] %v8292_v63  ;;  %11852 = vst [vmem:[#allocation34_spill] sm:$0xff] %v8294_v48 }
 0x1e2   :  { %1626 = vrot.lane.b32.xlu1 %v7973_v36, %s6912_s27  ;;  %1624 = vrot.lane.b32.xlu0 %v7976_v23, %s6912_s27 }
 0x1e4   :  { %v8300_v8 = vpop.permute.xlu1 %2215  ;;  %v8302_v44 = vpop.permute.xlu0 %2213 }
 0x1e5   :  { %11853 = vst [vmem:[#allocation192_spill] sm:$0xff] %v8300_v8  ;;  %11854 = vst [vmem:[#allocation193_spill] sm:$0xff] %v8302_v44 }
 0x1e6   :  { %1630 = vrot.lane.b32.xlu1 %v7989_v18, %s6912_s27  ;;  %1628 = vrot.lane.b32.xlu0 %v7992_v57, %s6912_s27 }
 0x1e8   :  { %v8308_v49 = vpop.permute.xlu1 %2219  ;;  %v8310_v59 = vpop.permute.xlu0 %2217 }
 0x1e9   :  { %11855 = vst [vmem:[#allocation194_spill] sm:$0xff] %v8308_v49  ;;  %11856 = vst [vmem:[#allocation195_spill] sm:$0xff] %v8310_v59 }
 0x1ea   :  { %1912 = vrot.lane.b32.xlu1 %v7451_v7, %s6913_s29  ;;  %1910 = vrot.lane.b32.xlu0 %v7456_v6, %s6913_s29 }
 0x1ec   :  { %v8316_v20 = vpop.permute.xlu1 %1208  ;;  %v8318_v48 = vpop.permute.xlu0 %1206 }
 0x1ed   :  { %11857 = vst [vmem:[#allocation196_spill] sm:$0xff] %v8316_v20  ;;  %11858 = vst [vmem:[#allocation197_spill] sm:$0xff] %v8318_v48  ;;  %v5927_v20 = vld [vmem:[%s11459_s1 + $0x35] ss:$0 sm:$0xff] }
 0x1ee   :  { %1916 = vrot.lane.b32.xlu1 %v7469_v58, %s6913_s29  ;;  %1914 = vrot.lane.b32.xlu0 %v7474_v13, %s6913_s29 }
 0x1f0   :  { %v8324_v63 = vpop.permute.xlu1 %1212  ;;  %v8326_v49 = vpop.permute.xlu0 %1210 }
 0x1f1   :  { %11859 = vst [vmem:[#allocation198_spill] sm:$0xff] %v8324_v63  ;;  %11860 = vst [vmem:[#allocation199_spill] sm:$0xff] %v8326_v49  ;;  %v6893_v63 = vld [vmem:[%s11458_s0 + $0x110] sm:$0x3f] }
 0x1f2   :  { %2199 = vrot.lane.b32.xlu1 %v7489_v50, %s6913_s29  ;;  %2197 = vrot.lane.b32.xlu0 %v7492_v47, %s6913_s29 }
 0x1f4   :  { %v8332_v6 = vpop.permute.xlu1 %1495  ;;  %v8334_v7 = vpop.permute.xlu0 %1493 }
 0x1f5   :  { %11861 = vst [vmem:[#allocation200_spill] sm:$0xff] %v8332_v6  ;;  %11862 = vst [vmem:[#allocation201_spill] sm:$0xff] %v8334_v7  ;;  %v5939_v7 = vld [vmem:[%s11459_s1 + $0x4d] ss:$0 sm:$0xff] }
 0x1f6   :  { %2203 = vrot.lane.b32.xlu1 %v7505_v41, %s6913_s29  ;;  %2201 = vrot.lane.b32.xlu0 %v7508_v12, %s6913_s29  ;;  %v5915_v41 = vld [vmem:[%s11459_s1 + $0x1d] ss:$0 sm:$0xff] }
 0x1f7   :  { %v169_v48 = vmul.f32 %v6893_v63, %v5915_v41 }
 0x1f8   :  { %v8340_v13 = vpop.permute.xlu1 %1499  ;;  %v8342_v58 = vpop.permute.xlu0 %1497 }
 0x1f9   :  { %11863 = vst [vmem:[#allocation202_spill] sm:$0xff] %v8340_v13  ;;  %11864 = vst [vmem:[#allocation203_spill] sm:$0xff] %v8342_v58  ;;  %v6894_v58 = vld [vmem:[%s11458_s0 + $0x100] sm:$0xff]  ;;  %v217_v59 = vrot.slane %v169_v48, 2  ;;  %v5914_v48 = vld [vmem:[%s11459_s1 + $0x1c] ss:$0 sm:$0xff] }
 0x1fa   :  { %1765 = vrot.lane.b32.xlu1 %v8071_v52, %s6912_s27  ;;  %1763 = vrot.lane.b32.xlu0 %v8074_v40, %s6912_s27  ;;  %v8372_v13 = vmul.f32 %v6894_v58, %v5915_v41 }
 0x1fc   :  { %v8348_v47 = vpop.permute.xlu1 %1781  ;;  %v8350_v50 = vpop.permute.xlu0 %1779 }
 0x1fd   :  { %11865 = vst [vmem:[#allocation204_spill] sm:$0xff] %v8348_v47  ;;  %11866 = vst [vmem:[#allocation205_spill] sm:$0xff] %v8350_v50  ;;  %v8385_v50 = vmul.f32 %v6894_v58, %v5927_v20  ;;  %v5903_v47 = vld [vmem:[%s11459_s1 + $0x5] ss:$0 sm:$0xff] }
 0x1fe   :  { %1769 = vrot.lane.b32.xlu1 %v8087_v56, %s6912_s27  ;;  %1767 = vrot.lane.b32.xlu0 %v8090_v27, %s6912_s27  ;;  %v108_v45 = vmul.f32 %v6894_v58, %v5903_v47 }
 0x1ff   :  { %v11875_v34 = vrot.slane %v8385_v50, 4 }
 0x200   :  { %v8359_v12 = vpop.permute.xlu1 %1785  ;;  %v8361_v49 = vpop.permute.xlu0 %1783 }
 0x201   :  { %11867 = vst [vmem:[#allocation206_spill] sm:$0xff] %v8359_v12  ;;  %11868 = vst [vmem:[#allocation207_spill] sm:$0xff] %v8361_v49  ;;  %v303_v12 = vmul.f32 %v6893_v63, %v5927_v20 }
 0x202   :  { %2052 = vrot.lane.b32.xlu1 %v11793_v33, %s6913_s29  ;;  %2050 = vrot.lane.b32.xlu0 %v11794_v43, %s6913_s29  ;;  %v215_v33 = vrot.slane %v8372_v13, 2  ;;  %v8395_v43 = vmul.f32 %v6893_v63, %v5939_v7 }
 0x204   :  { %v8381_v6 = vpop.permute.xlu1 %2068  ;;  %v8383_v49 = vpop.permute.xlu0 %2066  ;;  %v218_v44 = vsel %vm188_vm0, %v215_v33, %v217_v59  ;;  %v6897_v59 = vld [vmem:[%s11458_s0 + $0xc0] sm:$0xff] }
 0x205   :  { %11869 = vst [vmem:[#allocation208_spill] sm:$0xff] %v8381_v6  ;;  %11870 = vst [vmem:[#allocation209_spill] sm:$0xff] %v8383_v49  ;;  %v8397_v6 = vmul.f32 %v6894_v58, %v5939_v7  ;;  %v6895_v49 = vld [vmem:[%s11458_s0 + $0xf0] sm:$0xff]  ;;  %v6898_v58 = vld [vmem:[%s11458_s0 + $0xe0] sm:$0x3f]  ;;  %v8442_v35 = vadd.f32 %v218_v44, %v108_v45 }
 0x206   :  { %2056 = vrot.lane.b32.xlu1 %v7597_v0, %s6913_s29  ;;  %2054 = vrot.lane.b32.xlu0 %v7600_v2, %s6913_s29  ;;  %v167_v55 = vmul.f32 %v6895_v49, %v5915_v41  ;;  %v351_v0 = vrot.slane %v303_v12, 4  ;;  %v8410_v63 = vmul.f32 %v6895_v49, %v5927_v20  ;;  %v8413_v8 = vmul.f32 %v6895_v49, %v5939_v7  ;;  %v5926_v41 = vld [vmem:[%s11459_s1 + $0x34] ss:$0 sm:$0xff]  ;;  %v5913_v2 = vld [vmem:[%s11459_s1 + $0x1b] ss:$0 sm:$0xff] }
 0x207   :  { %v6896_v20 = vld [vmem:[%s11458_s0 + $0xd0] sm:$0xff]  ;;  %v164_v7 = vmul.f32 %v6897_v59, %v5914_v48  ;;  %v6899_v44 = vld [vmem:[%s11458_s0 + $0xa0] sm:$0xff]  ;;  %v298_v25 = vmul.f32 %v6897_v59, %v5926_v41  ;;  %v300_v54 = vmul.f32 %v6898_v58, %v5926_v41 }
 0x208   :  { %v8405_v13 = vpop.permute.xlu1 %2072  ;;  %v8407_v9 = vpop.permute.xlu0 %2070  ;;  %v165_v12 = vmul.f32 %v6896_v20, %v5914_v48  ;;  %v8447_v3 = vsel %vm322_vm1, %v11875_v34, %v351_v0  ;;  %v162_v34 = vmul.f32 %v6899_v44, %v5913_v2  ;;  %v5925_v0 = vld [vmem:[%s11459_s1 + $0x33] ss:$0 sm:$0xff] }
 0x209   :  { %11871 = vst [vmem:[#allocation210_spill] sm:$0xff] %v8405_v13  ;;  %11872 = vst [vmem:[#allocation211_spill] sm:$0xff] %v8407_v9  ;;  %v8433_v9 = vmul.f32 %v6895_v49, %v5903_v47  ;;  %v166_v13 = vmul.f32 %v6898_v58, %v5914_v48  ;;  %v348_v49 = vrot.slane %v8410_v63, 4  ;;  %v8453_v47 = vmul.f32 %v6896_v20, %v5926_v41  ;;  %v5938_v48 = vld [vmem:[%s11459_s1 + $0x4c] ss:$0 sm:$0xff]  ;;  %v6900_v63 = vld [vmem:[%s11458_s0 + $0x90] sm:$0xff] }
 0x20a   :  { %2338 = vrot.lane.b32.xlu1 %v7615_v37, %s6913_s29  ;;  %2336 = vrot.lane.b32.xlu0 %v7618_v51, %s6913_s29  ;;  %v214_v51 = vrot.slane %v167_v55, 2  ;;  %v5902_v55 = vld [vmem:[%s11459_s1 + $0x4] ss:$0 sm:$0xff]  ;;  %v161_v37 = vmul.f32 %v6900_v63, %v5913_v2  ;;  %v210_v45 = vrot.slane %v165_v12, 2  ;;  %v209_v29 = vrot.slane %v164_v7, 2 }
 0x20b   :  { %v8476_v60 = vmul.f32 %v6896_v20, %v5938_v48  ;;  %v105_v24 = vmul.f32 %v6897_v59, %v5902_v55  ;;  %v212_v19 = vrot.slane %v166_v13, 2  ;;  %v296_v12 = vmul.f32 %v6899_v44, %v5925_v0 }
 0x20c   :  { %v8438_v28 = vpop.permute.xlu1 %2354  ;;  %v8440_v21 = vpop.permute.xlu0 %2352  ;;  %v216_v17 = vsel %vm188_vm0, %v214_v51, %v215_v33  ;;  %v5937_v33 = vld [vmem:[%s11459_s1 + $0x4b] ss:$0 sm:$0xff]  ;;  %v295_v41 = vmul.f32 %v6900_v63, %v5925_v0  ;;  %v205_v7 = vrot.slane %v162_v34, 2  ;;  %v204_v51 = vrot.slane %v161_v37, 2 }
 0x20d   :  { %11873 = vst [vmem:[#allocation212_spill] sm:$0xff] %v8438_v28  ;;  %11874 = vst [vmem:[#allocation213_spill] sm:$0xff] %v8440_v21  ;;  %v6901_v21 = vld [vmem:[%s11458_s0 + $0xb0] sm:$0x3f]  ;;  %v213_v56 = vsel %vm188_vm0, %v210_v45, %v212_v19  ;;  %v434_v40 = vmul.f32 %v6898_v58, %v5938_v48  ;;  %v430_v52 = vmul.f32 %v6899_v44, %v5937_v33 }
 0x20e   :  { %v163_v28 = vmul.f32 %v6901_v21, %v5913_v2  ;;  %2342 = vrot.lane.b32.xlu1 %v7631_v42, %s6913_s29  ;;  %2340 = vrot.lane.b32.xlu0 %v7634_v61, %s6913_s29  ;;  %v344_v2 = vrot.slane %v8453_v47, 4  ;;  %v432_v42 = vmul.f32 %v6897_v59, %v5938_v48  ;;  %v5901_v61 = vld [vmem:[%s11459_s1 + $0x3] ss:$0 sm:$0xff]  ;;  %v297_v27 = vmul.f32 %v6901_v21, %v5925_v0 }
 0x20f   :  { %v211_v59 = vsel %vm188_vm0, %v209_v29, %v210_v45  ;;  %v343_v47 = vrot.slane %v298_v25, 4  ;;  %v103_v34 = vmul.f32 %v6900_v63, %v5901_v61  ;;  %v339_v0 = vrot.slane %v296_v12, 4 }
 0x210   :  { %v8478_v53 = vpop.permute.xlu1 %2358  ;;  %v8480_v39 = vpop.permute.xlu0 %2356  ;;  %v207_v13 = vrot.slane %v163_v28, 2  ;;  %v429_v57 = vmul.f32 %v6900_v63, %v5937_v33  ;;  %v104_v18 = vmul.f32 %v6899_v44, %v5901_v61  ;;  %v341_v25 = vrot.slane %v297_v27, 4 }
 0x211   :  { %11876 = vst [vmem:[#allocation214_spill] sm:$0xff] %v8478_v53  ;;  %11877 = vst [vmem:[#allocation215_spill] sm:$0xff] %v8480_v39  ;;  %v106_v39 = vmul.f32 %v6896_v20, %v5902_v55  ;;  %v346_v53 = vrot.slane %v300_v54, 4  ;;  %v431_v20 = vmul.f32 %v6901_v21, %v5937_v33  ;;  %v241_v19 = vadd.f32 %v216_v17, %v8433_v9 }
 0x212   :  { %1904 = vrot.lane.b32.xlu1 %v7695_v5, %s6913_s29  ;;  %1902 = vrot.lane.b32.xlu0 %v7700_v10, %s6913_s29  ;;  %v338_v5 = vrot.slane %v295_v41, 4  ;;  %v206_v10 = vsel %vm188_vm0, %v204_v51, %v205_v7  ;;  %v208_v29 = vsel %vm188_vm0, %v205_v7, %v207_v13  ;;  %v11880_v54 = vrot.slane %v8385_v50, 4  ;;  %v8519_v50 = vld [vmem:[%s11459_s1 + $0x1a] ss:$0 sm:$0xff]  ;;  %v5951_v13 = vld [vmem:[%s11459_s1 + $0xb] ss:$0 sm:$0xff] }
 0x213   :  { %v478_v55 = vrot.slane %v8476_v60, 6  ;;  %v239_v48 = vadd.f32 %v211_v59, %v105_v24  ;;  %v345_v45 = vsel %vm322_vm1, %v343_v47, %v344_v2  ;;  %v477_v44 = vrot.slane %v432_v42, 6  ;;  %v11889_v59 = vld [vmem:[#allocation19_spill] sm:$0xff]  ;;  %v11890_v47 = vld [vmem:[#allocation17_spill] sm:$0xff] }
 0x214   :  { %v8495_v37 = vpop.permute.xlu1 %1347  ;;  %v8497_v28 = vpop.permute.xlu0 %1345  ;;  %v350_v58 = vsel %vm322_vm1, %v348_v49, %v11880_v54  ;;  %v240_v27 = vadd.f32 %v213_v56, %v106_v39  ;;  %v347_v21 = vsel %vm322_vm1, %v344_v2, %v346_v53  ;;  %v473_v61 = vrot.slane %v430_v52, 6  ;;  %v11892_v54 = vld [vmem:[#allocation16_spill] sm:$0xff] }
 0x215   :  { %11878 = vst [vmem:[#allocation216_spill] sm:$0xff] %v8495_v37  ;;  %11879 = vst [vmem:[#allocation217_spill] sm:$0xff] %v8497_v28  ;;  %v237_v17 = vadd.f32 %v206_v10, %v103_v34  ;;  %v238_v9 = vadd.f32 %v208_v29, %v104_v18  ;;  %v340_v24 = vsel %vm322_vm1, %v338_v5, %v339_v0  ;;  %v472_v60 = vrot.slane %v429_v57, 6  ;;  %v11992_v37 = vld [vmem:[#allocation9_spill] sm:$0xff] }
 0x216   :  { %1908 = vrot.lane.b32.xlu1 %v7713_v14, %s6913_s29  ;;  %1906 = vrot.lane.b32.xlu0 %v7718_v15, %s6913_s29  ;;  %v480_v15 = vrot.slane %v434_v40, 6  ;;  %v342_v39 = vsel %vm322_vm1, %v339_v0, %v341_v25  ;;  %v475_v56 = vrot.slane %v431_v20, 6  ;;  %v376_v18 = vadd.f32 %v8447_v3, %v8442_v35  ;;  %v8552_v35 = vld [vmem:[%s11458_s0 + $0x60] sm:$0xff] }
 0x217   :  { %v11883_v40 = vrot.slane %v8395_v43, 6  ;;  %v11884_v52 = vrot.slane %v8397_v6, 6  ;;  %v375_v49 = vadd.f32 %v350_v58, %v241_v19  ;;  %v373_v57 = vadd.f32 %v345_v45, %v239_v48  ;;  %v5963_v25 = vld [vmem:[%s11459_s1 + $0x23] ss:$0 sm:$0xff]  ;;  %v11894_v48 = vld [vmem:[#allocation21_spill] sm:$0xff] }
 0x218   :  { %v8512_v63 = vpop.permute.xlu1 %1351  ;;  %v8514_v14 = vpop.permute.xlu0 %1349  ;;  %v11886_v42 = vrot.slane %v8413_v8, 6  ;;  %v479_v12 = vsel %vm456_vm2, %v477_v44, %v478_v55  ;;  %v158_v8 = vmul.f32 %v8552_v35, %v8519_v50  ;;  %v374_v33 = vadd.f32 %v347_v21, %v240_v27  ;;  %v11891_v19 = vld [vmem:[#allocation18_spill] sm:$0xff]  ;;  %v8591_v44 = vld [vmem:[%s11459_s1 + $0x32] ss:$0 sm:$0xff] }
 0x219   :  { %11881 = vst [vmem:[#allocation218_spill] sm:$0xff] %v8512_v63  ;;  %11882 = vst [vmem:[#allocation219_spill] sm:$0xff] %v8514_v14  ;;  %v486_v53 = vsel %vm456_vm2, %v11884_v52, %v11883_v40  ;;  %v11885_v2 = vmov %v11884_v52  ;;  %v481_v41 = vsel %vm456_vm2, %v478_v55, %v480_v15  ;;  %v371_v7 = vadd.f32 %v340_v24, %v237_v17  ;;  %v11893_v55 = vld [vmem:[#allocation20_spill] sm:$0xff]  ;;  %v5950_v40 = vld [vmem:[%s11459_s1 + $0xa] ss:$0 sm:$0xff] }
 0x21a   :  { %2191 = vrot.lane.b32.xlu1 %v7733_v22, %s6913_s29  ;;  %2189 = vrot.lane.b32.xlu0 %v7736_v46, %s6913_s29  ;;  %v484_v22 = vsel %vm456_vm2, %v11886_v42, %v11885_v2  ;;  %v8543_v46 = vld [vmem:[%s11458_s0 + $0x70] sm:$0xff]  ;;  %v372_v51 = vadd.f32 %v342_v39, %v238_v9  ;;  %v655_v34 = vsel %vm644_vm3, %v11890_v47, %v11889_v59  ;;  %v199_v27 = vrot.slane %v158_v8, 2  ;;  %v11899_v52 = vld [vmem:[#allocation27_spill] sm:$0xff] }
 0x21b   :  { %v8547_v3 = vmul.f32 %v8543_v46, %v8519_v50  ;;  %v474_v0 = vsel %vm456_vm2, %v472_v60, %v473_v61  ;;  %v476_v5 = vsel %vm456_vm2, %v473_v61, %v475_v56  ;;  %v510_v10 = vadd.f32 %v486_v53, %v376_v18  ;;  %v8604_v60 = vld [vmem:[%s11459_s1 + $0x4a] ss:$0 sm:$0xff]  ;;  %v11897_v39 = vld [vmem:[#allocation24_spill] sm:$0xff]  ;;  %v11898_v56 = vld [vmem:[#allocation25_spill] sm:$0xff] }
 0x21c   :  { %v8556_v6 = vpop.permute.xlu1 %1634  ;;  %v8558_v43 = vpop.permute.xlu0 %1632  ;;  %v509_v29 = vadd.f32 %v484_v22, %v375_v49  ;;  %v507_v20 = vadd.f32 %v479_v12, %v373_v57  ;;  %v656_v58 = vsel %vm644_vm3, %v11892_v54, %v11891_v19  ;;  %v866_v45 = vsel %vm644_vm3, %v11894_v48, %v11893_v55  ;;  %v11900_v53 = vld [vmem:[#allocation28_spill] sm:$0xff]  ;;  %v11901_v57 = vld [vmem:[#allocation31_spill] sm:$0xff]  ;;  %v11906_v55 = vld [vmem:[#allocation38_spill] sm:$0xff] }
 0x21d   :  { %11887 = vst [vmem:[#allocation220_spill] sm:$0xff] %v8556_v6  ;;  %11888 = vst [vmem:[#allocation221_spill] sm:$0xff] %v8558_v43  ;;  %v679_v61 = vmul.f32 %v5951_v13, %v655_v34  ;;  %v508_v17 = vadd.f32 %v481_v41, %v374_v33  ;;  %v8597_v9 = vadd.f32 %v474_v0, %v371_v7  ;;  %v11902_v2 = vld [vmem:[#allocation32_spill] sm:$0xff]  ;;  %v5975_v41 = vld [vmem:[%s11459_s1 + $0x3b] ss:$0 sm:$0xff] }
 0x21e   :  { %2195 = vrot.lane.b32.xlu1 %v7749_v11, %s6913_s29  ;;  %2193 = vrot.lane.b32.xlu0 %v7752_v1, %s6913_s29  ;;  %v8585_v11 = vld [vmem:[%s11459_s1 + $0x2] ss:$0 sm:$0xff]  ;;  %v11501_v1 = vrot.slane %v8547_v3, 2  ;;  %v8599_v24 = vadd.f32 %v476_v5, %v372_v51  ;;  %v867_v18 = vsel %vm644_vm3, %v11898_v56, %v11897_v39  ;;  %v653_v49 = vsel %vm644_vm3, %v11900_v53, %v11899_v52  ;;  %v11903_v7 = vld [vmem:[#allocation35_spill] sm:$0xff]  ;;  %v11904_v51 = vld [vmem:[#allocation36_spill] sm:$0xff] }
 0x21f   :  { %v654_v42 = vsel %vm644_vm3, %v11902_v2, %v11901_v57  ;;  %v680_v22 = vmul.f32 %v5951_v13, %v656_v58  ;;  %v890_v12 = vmul.f32 %v5963_v25, %v866_v45  ;;  %v8624_v8 = vmul.f32 %v8543_v46, %v8591_v44  ;;  %v11905_v58 = vld [vmem:[#allocation37_spill] sm:$0xff]  ;;  %v5962_v45 = vld [vmem:[%s11459_s1 + $0x22] ss:$0 sm:$0xff]  ;;  %v11908_v39 = vld [vmem:[#allocation40_spill] sm:$0xff] }
 0x220   :  { %v8593_v21 = vpop.permute.xlu1 %1638  ;;  %v8595_v15 = vpop.permute.xlu0 %1636  ;;  %v101_v33 = vmul.f32 %v8552_v35, %v8585_v11  ;;  %v201_v13 = vsel %vm188_vm0, %v199_v27, %v11501_v1  ;;  %v8643_v59 = vmul.f32 %v8552_v35, %v8591_v44  ;;  %v691_v0 = vadd.f32 %v679_v61, %v509_v29  ;;  %v11907_v27 = vld [vmem:[#allocation39_spill] sm:$0xff]  ;;  %v11909_v52 = vld [vmem:[#allocation41_spill] sm:$0xff]  ;;  %v11910_v53 = vld [vmem:[#allocation42_spill] sm:$0xff] }
 0x221   :  { %11895 = vst [vmem:[#allocation19_spill] sm:$0xff] %v8593_v21  ;;  %11896 = vst [vmem:[#allocation17_spill] sm:$0xff] %v8595_v15  ;;  %v891_v5 = vmul.f32 %v5963_v25, %v867_v18  ;;  %v677_v19 = vmul.f32 %v5950_v40, %v653_v49  ;;  %v678_v54 = vmul.f32 %v5950_v40, %v654_v42  ;;  %v5987_v18 = vld [vmem:[%s11459_s1 + $0x53] ss:$0 sm:$0xff]  ;;  %v11911_v40 = vld [vmem:[#allocation43_spill] sm:$0xff] }
 0x222   :  { %2044 = vrot.lane.b32.xlu1 %v11830_v38, %s6913_s29  ;;  %2042 = vrot.lane.b32.xlu0 %v11831_v62, %s6913_s29  ;;  %v1065_v38 = vsel %vm644_vm3, %v11904_v51, %v11903_v7  ;;  %v8636_v62 = vmul.f32 %v8543_v46, %v8604_v60  ;;  %v1066_v48 = vsel %vm644_vm3, %v11906_v55, %v11905_v58  ;;  %v11912_v49 = vld [vmem:[#allocation44_spill] sm:$0xff]  ;;  %v11913_v42 = vld [vmem:[#allocation45_spill] sm:$0xff]  ;;  %v11914_v7 = vld [vmem:[#allocation46_spill] sm:$0xff] }
 0x223   :  { %v864_v56 = vsel %vm644_vm3, %v11908_v39, %v11907_v27  ;;  %v865_v57 = vsel %vm644_vm3, %v11910_v53, %v11909_v52  ;;  %v692_v29 = vadd.f32 %v680_v22, %v510_v10  ;;  %v902_v25 = vadd.f32 %v890_v12, %v691_v0  ;;  %v11916_v10 = vld [vmem:[#allocation48_spill] sm:$0xff]  ;;  %v11917_v12 = vld [vmem:[#allocation49_spill] sm:$0xff]  ;;  %v11919_v55 = vld [vmem:[#allocation51_spill] sm:$0xff] }
 0x224   :  { %v8645_v47 = vpop.permute.xlu1 %1920  ;;  %v8647_v34 = vpop.permute.xlu0 %1918  ;;  %v1089_v61 = vmul.f32 %v5975_v41, %v1065_v38  ;;  %v1264_v2 = vsel %vm644_vm3, %v11912_v49, %v11911_v40  ;;  %v1265_v51 = vsel %vm644_vm3, %v11914_v7, %v11913_v42  ;;  %v11918_v38 = vld [vmem:[#allocation50_spill] sm:$0xff]  ;;  %v5974_v58 = vld [vmem:[%s11459_s1 + $0x3a] ss:$0 sm:$0xff]  ;;  %v11920_v27 = vld [vmem:[#allocation52_spill] sm:$0xff]  ;;  %v1090_v49 = vmul.f32 %v5975_v41, %v1066_v48 }
 0x225   :  { %v652_v0 = vsel %vm644_vm3, %v11918_v38, %v11917_v12  ;;  %v1063_v39 = vsel %vm644_vm3, %v11920_v27, %v11919_v55  ;;  %v903_v40 = vadd.f32 %v891_v5, %v692_v29  ;;  %v888_v42 = vmul.f32 %v5962_v45, %v864_v56  ;;  %v11922_v48 = vld [vmem:[#allocation54_spill] sm:$0xff]  ;;  %v5999_v56 = vld [vmem:[%s11459_s1 + $0x11] ss:$0 sm:$0xff] }
 0x226   :  { %2048 = vrot.lane.b32.xlu1 %v7857_v30, %s6913_s29  ;;  %2046 = vrot.lane.b32.xlu0 %v7860_v4, %s6913_s29  ;;  %v5949_v30 = vld [vmem:[%s11459_s1 + $0x9] ss:$0 sm:$0xff]  ;;  %v889_v7 = vmul.f32 %v5962_v45, %v865_v57  ;;  %v1288_v1 = vmul.f32 %v5987_v18, %v1264_v2  ;;  %v1289_v38 = vmul.f32 %v5987_v18, %v1265_v51  ;;  %v11924_v29 = vld [vmem:[#allocation56_spill] sm:$0xff]  ;;  %v11952_v12 = vld [vmem:[#allocation130_spill] sm:$0xff] }
 0x227   :  { %v11915_v4 = vld [vmem:[#allocation47_spill] sm:$0xff]  ;;  %v676_v27 = vmul.f32 %v5949_v30, %v652_v0  ;;  %v1087_v14 = vmul.f32 %v5974_v58, %v1063_v39  ;;  %v1101_v63 = vadd.f32 %v1089_v61, %v902_v25  ;;  %v8698_v5 = vadd.f32 %v201_v13, %v101_v33  ;;  %v11925_v25 = vld [vmem:[#allocation57_spill] sm:$0xff]  ;;  %v11926_v61 = vld [vmem:[#allocation58_spill] sm:$0xff] }
 0x228   :  { %v651_v22 = vsel %vm644_vm3, %v11916_v10, %v11915_v4  ;;  %v8689_v52 = vpop.permute.xlu1 %1924  ;;  %v8691_v53 = vpop.permute.xlu0 %1922  ;;  %v689_v4 = vadd.f32 %v677_v19, %v507_v20  ;;  %v690_v10 = vadd.f32 %v678_v54, %v508_v17  ;;  %v8702_v20 = vmul.f32 %v8552_v35, %v8604_v60  ;;  %v8707_v17 = vld [vmem:[%s11458_s0 + $0x80] sm:$0x3f]  ;;  %v11921_v54 = vld [vmem:[#allocation53_spill] sm:$0xff]  ;;  %v11923_v57 = vld [vmem:[#allocation55_spill] sm:$0xff] }
 0x229   :  { %v675_v55 = vmul.f32 %v5949_v30, %v651_v22  ;;  %v1102_v19 = vadd.f32 %v1090_v49, %v903_v40  ;;  %v1064_v35 = vsel %vm644_vm3, %v11922_v48, %v11921_v54  ;;  %v1300_v45 = vadd.f32 %v1288_v1, %v1101_v63  ;;  %v5961_v0 = vld [vmem:[%s11459_s1 + $0x21] ss:$0 sm:$0xff]  ;;  %v11927_v39 = vld [vmem:[#allocation59_spill] sm:$0xff]  ;;  %v11928_v40 = vld [vmem:[#allocation60_spill] sm:$0xff] }
 0x22a   :  { %2330 = vrot.lane.b32.xlu1 %v7875_v32, %s6913_s29  ;;  %2328 = vrot.lane.b32.xlu0 %v7878_v31, %s6913_s29  ;;  %v8711_v32 = vmul.f32 %v8707_v17, %v8519_v50  ;;  %v900_v33 = vadd.f32 %v888_v42, %v689_v4  ;;  %v901_v13 = vadd.f32 %v889_v7, %v690_v10  ;;  %v11929_v42 = vld [vmem:[#allocation61_spill] sm:$0xff]  ;;  %v11936_v48 = vld [vmem:[#allocation70_spill] sm:$0xff] }
 0x22b   :  { %v1404_v50 = vsel %vm1393_vm4, %v11924_v29, %v11923_v57  ;;  %v1405_v18 = vsel %vm1393_vm4, %v11926_v61, %v11925_v25  ;;  %v1301_v63 = vadd.f32 %v1289_v38, %v1102_v19  ;;  %v687_v1 = vadd.f32 %v675_v55, %v8597_v9  ;;  %v11931_v9 = vld [vmem:[#allocation63_spill] sm:$0xff]  ;;  %v11935_v54 = vld [vmem:[#allocation69_spill] sm:$0xff]  ;;  %v11938_v29 = vld [vmem:[#allocation72_spill] sm:$0xff] }
 0x22c   :  { %v8713_v31 = vpop.permute.xlu1 %2207  ;;  %v8715_v41 = vpop.permute.xlu0 %2205  ;;  %v688_v51 = vadd.f32 %v676_v27, %v8599_v24  ;;  %v1099_v30 = vadd.f32 %v1087_v14, %v900_v33  ;;  %v1088_v22 = vmul.f32 %v5974_v58, %v1064_v35  ;;  %v862_v49 = vsel %vm644_vm3, %v11928_v40, %v11927_v39  ;;  %v11932_v24 = vld [vmem:[#allocation64_spill] sm:$0xff]  ;;  %v11933_v55 = vld [vmem:[#allocation67_spill] sm:$0xff]  ;;  %v11951_v61 = vld [vmem:[#allocation129_spill] sm:$0xff] }
 0x22d   :  { %v1262_v14 = vsel %vm644_vm3, %v11932_v24, %v11931_v9  ;;  %v1428_v10 = vmul.f32 %v5999_v56, %v1404_v50  ;;  %v1429_v38 = vmul.f32 %v5999_v56, %v1405_v18  ;;  %v11934_v27 = vld [vmem:[#allocation68_spill] sm:$0xff]  ;;  %v6011_v33 = vld [vmem:[%s11459_s1 + $0x29] ss:$0 sm:$0xff]  ;;  %v1543_v35 = vsel %vm1393_vm4, %v11936_v48, %v11935_v54  ;;  %v5973_v56 = vld [vmem:[%s11459_s1 + $0x39] ss:$0 sm:$0xff] }
 0x22e   :  { %2334 = vrot.lane.b32.xlu1 %v7891_v16, %s6913_s29  ;;  %2332 = vrot.lane.b32.xlu0 %v7894_v26, %s6913_s29  ;;  %v11930_v16 = vld [vmem:[#allocation62_spill] sm:$0xff]  ;;  %v5986_v26 = vld [vmem:[%s11459_s1 + $0x52] ss:$0 sm:$0xff]  ;;  %v1263_v19 = vsel %vm644_vm3, %v11934_v27, %v11933_v55  ;;  %v11937_v57 = vld [vmem:[#allocation71_spill] sm:$0xff]  ;;  %v886_v9 = vmul.f32 %v5961_v0, %v862_v49  ;;  %v1100_v2 = vadd.f32 %v1088_v22, %v901_v13 }
 0x22f   :  { %v863_v7 = vsel %vm644_vm3, %v11930_v16, %v11929_v42  ;;  %v1544_v25 = vsel %vm1393_vm4, %v11938_v29, %v11937_v57  ;;  %v11939_v50 = vld [vmem:[#allocation77_spill] sm:$0xff]  ;;  %v11940_v18 = vld [vmem:[#allocation78_spill] sm:$0xff]  ;;  %v11941_v40 = vld [vmem:[#allocation79_spill] sm:$0xff]  ;;  %v1286_v55 = vmul.f32 %v5986_v26, %v1262_v14  ;;  %v1287_v29 = vmul.f32 %v5986_v26, %v1263_v19 }
 0x230   :  { %v8751_v58 = vpop.permute.xlu1 %2211  ;;  %v8753_v4 = vpop.permute.xlu0 %2209  ;;  %v1061_v39 = vsel %vm644_vm3, %v11940_v18, %v11939_v50  ;;  %v11942_v42 = vld [vmem:[#allocation80_spill] sm:$0xff]  ;;  %v887_v24 = vmul.f32 %v5961_v0, %v863_v7  ;;  %v11943_v54 = vld [vmem:[#allocation81_spill] sm:$0xff]  ;;  %v11944_v48 = vld [vmem:[#allocation82_spill] sm:$0xff]  ;;  %v1567_v50 = vmul.f32 %v6011_v33, %v1543_v35  ;;  %v1440_v35 = vadd.f32 %v1428_v10, %v1300_v45 }
 0x231   :  { %v1062_v16 = vsel %vm644_vm3, %v11942_v42, %v11941_v40  ;;  %v5998_v27 = vld [vmem:[%s11459_s1 + $0x10] ss:$0 sm:$0xff]  ;;  %v1402_v57 = vsel %vm1393_vm4, %v11944_v48, %v11943_v54  ;;  %v11945_v18 = vld [vmem:[#allocation83_spill] sm:$0xff]  ;;  %v11947_v0 = vld [vmem:[#allocation85_spill] sm:$0xff]  ;;  %v1568_v54 = vmul.f32 %v6011_v33, %v1544_v25  ;;  %v1085_v26 = vmul.f32 %v5973_v56, %v1061_v39 }
 0x232   :  { %2183 = vrot.lane.b32.xlu1 %v7973_v36, %s6913_s29  ;;  %2181 = vrot.lane.b32.xlu0 %v7976_v23, %s6913_s29  ;;  %v11946_v40 = vld [vmem:[#allocation84_spill] sm:$0xff]  ;;  %v6023_v23 = vld [vmem:[%s11459_s1 + $0x41] ss:$0 sm:$0xff]  ;;  %v1086_v19 = vmul.f32 %v5973_v56, %v1062_v16  ;;  %v1441_v48 = vadd.f32 %v1429_v38, %v1301_v63  ;;  %v1299_v13 = vadd.f32 %v1287_v29, %v1100_v2  ;;  %v11953_v33 = vld [vmem:[#allocation87_spill] sm:$0xff] }
 0x233   :  { %v1403_v36 = vsel %vm1393_vm4, %v11946_v40, %v11945_v18  ;;  %v11948_v49 = vld [vmem:[#allocation86_spill] sm:$0xff]  ;;  %v1426_v40 = vmul.f32 %v5998_v27, %v1402_v57  ;;  %v1579_v22 = vadd.f32 %v1567_v50, %v1440_v35  ;;  %v11954_v25 = vld [vmem:[#allocation88_spill] sm:$0xff]  ;;  %v11959_v39 = vld [vmem:[#allocation95_spill] sm:$0xff] }
 0x234   :  { %v1682_v7 = vsel %vm1393_vm4, %v11948_v49, %v11947_v0  ;;  %v8796_v14 = vpop.permute.xlu1 %1487  ;;  %v8798_v42 = vpop.permute.xlu0 %1485  ;;  %v898_v0 = vadd.f32 %v886_v9, %v687_v1  ;;  %v899_v49 = vadd.f32 %v887_v24, %v688_v51  ;;  %v1683_v45 = vsel %vm1393_vm4, %v11954_v25, %v11953_v33  ;;  %v11957_v1 = vld [vmem:[#allocation93_spill] sm:$0xff]  ;;  %v11958_v51 = vld [vmem:[#allocation94_spill] sm:$0xff]  ;;  %v11960_v16 = vld [vmem:[#allocation96_spill] sm:$0xff] }
 0x235   :  { %11949 = vst [vmem:[#allocation18_spill] sm:$0xff] %v8796_v14  ;;  %11950 = vst [vmem:[#allocation16_spill] sm:$0xff] %v8798_v42  ;;  %v1427_v14 = vmul.f32 %v5998_v27, %v1403_v36  ;;  %v1706_v28 = vmul.f32 %v6023_v23, %v1682_v7  ;;  %v1298_v42 = vadd.f32 %v1286_v55, %v1099_v30  ;;  %v6010_v24 = vld [vmem:[%s11459_s1 + $0x28] ss:$0 sm:$0xff]  ;;  %v11961_v55 = vld [vmem:[#allocation97_spill] sm:$0xff] }
 0x236   :  { %2187 = vrot.lane.b32.xlu1 %v11951_v61, %s6913_s29  ;;  %2185 = vrot.lane.b32.xlu0 %v11952_v12, %s6913_s29  ;;  %v1580_v38 = vadd.f32 %v1568_v54, %v1441_v48  ;;  %v1097_v61 = vadd.f32 %v1085_v26, %v898_v0  ;;  %v1098_v56 = vadd.f32 %v1086_v19, %v899_v49  ;;  %v5985_v12 = vld [vmem:[%s11459_s1 + $0x51] ss:$0 sm:$0xff]  ;;  %v11962_v27 = vld [vmem:[#allocation98_spill] sm:$0xff]  ;;  %v11963_v29 = vld [vmem:[#allocation11_spill] sm:$0xff] }
 0x237   :  { %v1260_v2 = vsel %vm644_vm3, %v11958_v51, %v11957_v1  ;;  %v1438_v30 = vadd.f32 %v1426_v40, %v1298_v42  ;;  %v1261_v9 = vsel %vm644_vm3, %v11960_v16, %v11959_v39  ;;  %v1541_v57 = vsel %vm1393_vm4, %v11962_v27, %v11961_v55  ;;  %v11964_v50 = vld [vmem:[#allocation12_spill] sm:$0xff]  ;;  %v11965_v54 = vld [vmem:[#allocation99_spill] sm:$0xff]  ;;  %v6035_v48 = vld [vmem:[%s11459_s1 + $0x59] ss:$0 sm:$0xff] }
 0x238   :  { %v8808_v63 = vpop.permute.xlu1 %1491  ;;  %v8810_v10 = vpop.permute.xlu0 %1489  ;;  %v1439_v36 = vadd.f32 %v1427_v14, %v1299_v13  ;;  %v1718_v7 = vadd.f32 %v1706_v28, %v1579_v22  ;;  %v1707_v42 = vmul.f32 %v6023_v23, %v1683_v45  ;;  %v11966_v26 = vld [vmem:[#allocation100_spill] sm:$0xff]  ;;  %v1284_v35 = vmul.f32 %v5985_v12, %v1260_v2  ;;  %v11967_v40 = vld [vmem:[#allocation101_spill] sm:$0xff]  ;;  %v11968_v0 = vld [vmem:[#allocation102_spill] sm:$0xff] }
 0x239   :  { %11955 = vst [vmem:[#allocation20_spill] sm:$0xff] %v8808_v63  ;;  %11956 = vst [vmem:[#allocation21_spill] sm:$0xff] %v8810_v10  ;;  %v1542_v19 = vsel %vm1393_vm4, %v11966_v26, %v11965_v54  ;;  %v1821_v49 = vsel %vm1393_vm4, %v11968_v0, %v11967_v40  ;;  %v11969_v33 = vld [vmem:[#allocation103_spill] sm:$0xff]  ;;  %v11970_v25 = vld [vmem:[#allocation104_spill] sm:$0xff]  ;;  %v1285_v51 = vmul.f32 %v5985_v12, %v1261_v9 }
 0x23a   :  { %2322 = vrot.lane.b32.xlu1 %v11963_v29, %s6913_s29  ;;  %2320 = vrot.lane.b32.xlu0 %v11964_v50, %s6913_s29  ;;  %v1822_v1 = vsel %vm1393_vm4, %v11970_v25, %v11969_v33  ;;  %v5997_v28 = vld [vmem:[%s11459_s1 + $0xf] ss:$0 sm:$0xff]  ;;  %v11971_v23 = vld [vmem:[#allocation114_spill] sm:$0xff]  ;;  %v1565_v2 = vmul.f32 %v6010_v24, %v1541_v57  ;;  %v11975_v39 = vld [vmem:[#allocation116_spill] sm:$0xff]  ;;  %v1566_v40 = vmul.f32 %v6010_v24, %v1542_v19 }
 0x23b   :  { %v11972_v14 = vld [vmem:[#allocation115_spill] sm:$0xff]  ;;  %v11976_v16 = vld [vmem:[#allocation117_spill] sm:$0xff]  ;;  %v6022_v27 = vld [vmem:[%s11459_s1 + $0x40] ss:$0 sm:$0xff]  ;;  %v1846_v24 = vmul.f32 %v6035_v48, %v1822_v1  ;;  %v1296_v18 = vadd.f32 %v1284_v35, %v1097_v61  ;;  %v1297_v61 = vadd.f32 %v1285_v51, %v1098_v56 }
 0x23c   :  { %v1400_v13 = vsel %vm1393_vm4, %v11972_v14, %v11971_v23  ;;  %v8849_v22 = vpop.permute.xlu1 %1773  ;;  %v8851_v45 = vpop.permute.xlu0 %1771  ;;  %v1401_v55 = vsel %vm1393_vm4, %v11976_v16, %v11975_v39  ;;  %v11977_v29 = vld [vmem:[#allocation118_spill] sm:$0xff]  ;;  %v11978_v50 = vld [vmem:[#allocation119_spill] sm:$0xff]  ;;  %v11979_v0 = vld [vmem:[#allocation120_spill] sm:$0xff]  ;;  %v1845_v16 = vmul.f32 %v6035_v48, %v1821_v49 }
 0x23d   :  { %11973 = vst [vmem:[#allocation24_spill] sm:$0xff] %v8849_v22  ;;  %11974 = vst [vmem:[#allocation25_spill] sm:$0xff] %v8851_v45  ;;  %v1680_v54 = vsel %vm1393_vm4, %v11978_v50, %v11977_v29  ;;  %v11980_v33 = vld [vmem:[#allocation121_spill] sm:$0xff]  ;;  %v6047_v9 = vld [vmem:[%s11459_s1 + $0x17] ss:$0 sm:$0xff]  ;;  %v1424_v19 = vmul.f32 %v5997_v28, %v1400_v13  ;;  %v1425_v26 = vmul.f32 %v5997_v28, %v1401_v55 }
 0x23e   :  { %v1681_v12 = vsel %vm1393_vm4, %v11980_v33, %v11979_v0  ;;  %v11981_v57 = vld [vmem:[#allocation22_spill] sm:$0xff]  ;;  %v11982_v25 = vld [vmem:[#allocation23_spill] sm:$0xff]  ;;  %v1719_v33 = vadd.f32 %v1707_v42, %v1580_v38  ;;  %v1704_v10 = vmul.f32 %v6022_v27, %v1680_v54  ;;  %v8891_v38 = vmul.f32 %v8707_v17, %v8591_v44  ;;  %v6034_v56 = vld [vmem:[%s11459_s1 + $0x58] ss:$0 sm:$0xff] }
 0x23f   :  { %v1961_v23 = vsel %vm1950_vm5, %v11982_v25, %v11981_v57  ;;  %v11983_v14 = vld [vmem:[#allocation150_spill] sm:$0xff]  ;;  %v11984_v39 = vld [vmem:[#allocation151_spill] sm:$0xff]  ;;  %v1705_v25 = vmul.f32 %v6022_v27, %v1681_v12  ;;  %v1577_v42 = vadd.f32 %v1565_v2, %v1438_v30  ;;  %v1578_v28 = vadd.f32 %v1566_v40, %v1439_v36  ;;  %v11994_v36 = vld [vmem:[#allocation132_spill] sm:$0xff] }
 0x240   :  { %2326 = vrot.lane.b32.xlu1 %v11983_v14, %s6913_s29  ;;  %2324 = vrot.lane.b32.xlu0 %v11984_v39, %s6913_s29  ;;  %v11985_v29 = vld [vmem:[#allocation122_spill] sm:$0xff]  ;;  %v11986_v50 = vld [vmem:[#allocation123_spill] sm:$0xff]  ;;  %v8879_v63 = vpop.permute.xlu1 %1777  ;;  %v8881_v57 = vpop.permute.xlu0 %1775  ;;  %v1985_v14 = vmul.f32 %v6047_v9, %v1961_v23  ;;  %v20_v39 = vlaneseq  ;;  %v1857_v55 = vadd.f32 %v1845_v16, %v1718_v7  ;;  %v1858_v27 = vadd.f32 %v1846_v24, %v1719_v33  ;;  %v11996_v51 = vld [vmem:[#allocation133_spill] sm:$0xff] }
 0x241   :  { %v1962_v0 = vsel %vm1950_vm5, %v11986_v50, %v11985_v29  ;;  %11987 = vst [vmem:[#allocation27_spill] sm:$0xff] %v8879_v63  ;;  %11988 = vst [vmem:[#allocation28_spill] sm:$0xff] %v8881_v57  ;;  %v6009_v49 = vld [vmem:[%s11459_s1 + $0x27] ss:$0 sm:$0xff]  ;;  %v11990_v1 = vld [vmem:[#allocation7_spill] sm:$0xff]  ;;  %v1436_v54 = vadd.f32 %v1424_v19, %v1296_v18  ;;  %v1437_v12 = vadd.f32 %v1425_v26, %v1297_v61 }
 0x242   :  { %v11989_v48 = vld [vmem:[#allocation6_spill] sm:$0xff]  ;;  %v1986_v35 = vmul.f32 %v6047_v9, %v1962_v0  ;;  %v1716_v23 = vadd.f32 %v1704_v10, %v1577_v42  ;;  %v11991_v50 = vld [vmem:[#allocation8_spill] sm:$0xff]  ;;  %v1717_v44 = vadd.f32 %v1705_v25, %v1578_v28  ;;  %v1997_v63 = vadd.f32 %v1985_v14, %v1857_v55  ;;  %v11993_v30 = vld [vmem:[#allocation131_spill] sm:$0xff] }
 0x243   :  { %v1539_v13 = vsel %vm1393_vm4, %v11990_v1, %v11989_v48  ;;  %v1540_v57 = vsel %vm1393_vm4, %v11992_v37, %v11991_v50  ;;  %v1819_v18 = vsel %vm1393_vm4, %v11994_v36, %v11993_v30  ;;  %v8906_v10 = vshrl.u32 %v20_v39, 7  ;;  %v11997_v2 = vld [vmem:[#allocation134_spill] sm:$0xff]  ;;  %v6059_v26 = vld [vmem:[%s11459_s1 + $0x2f] ss:$0 sm:$0xff]  ;;  %v11999_v9 = vld [vmem:[#allocation136_spill] sm:$0xff] }
 0x244   :  { %v1563_v29 = vmul.f32 %v6009_v49, %v1539_v13  ;;  %v8896_v48 = vpop.permute.xlu1 %2060  ;;  %v8898_v1 = vpop.permute.xlu0 %2058  ;;  %v1998_v7 = vadd.f32 %v1986_v35, %v1858_v27  ;;  %v1820_v37 = vsel %vm1393_vm4, %v11997_v2, %v11996_v51  ;;  %v11998_v40 = vld [vmem:[#allocation135_spill] sm:$0xff]  ;;  %v8917_v24 = vand.u32 127, %v20_v39  ;;  %v12000_v0 = vld [vmem:[#allocation137_spill] sm:$0xff]  ;;  %v12001_v33 = vld [vmem:[#allocation138_spill] sm:$0xff] }
 0x245   :  { %11995 = vst [vmem:[#allocation31_spill] sm:$0xff] %v8906_v10  ;;  %v2100_v16 = vsel %vm1950_vm5, %v11999_v9, %v11998_v40  ;;  %v1564_v19 = vmul.f32 %v6009_v49, %v1540_v57  ;;  %v2101_v25 = vsel %vm1950_vm5, %v12001_v33, %v12000_v0  ;;  %v6021_v14 = vld [vmem:[%s11459_s1 + $0x3f] ss:$0 sm:$0xff]  ;;  %v12002_v13 = vld [vmem:[#allocation152_spill] sm:$0xff]  ;;  %v8929_v35 = vadd.s32 8, %v8906_v10  ;;  %v12004_v39 = vld [vmem:[#allocation154_spill] sm:$0xff] }
 0x246   :  { %v12003_v61 = vld [vmem:[#allocation153_spill] sm:$0xff]  ;;  %v1575_v28 = vadd.f32 %v1563_v29, %v1436_v54  ;;  %v1843_v55 = vmul.f32 %v6034_v56, %v1819_v18  ;;  %v12005_v27 = vld [vmem:[#allocation155_spill] sm:$0xff]  ;;  %v6046_v49 = vld [vmem:[%s11459_s1 + $0x16] ss:$0 sm:$0xff]  ;;  %v1844_v40 = vmul.f32 %v6034_v56, %v1820_v37  ;;  %v2124_v9 = vmul.f32 %v6059_v26, %v2100_v16 }
 0x247   :  { %v1678_v42 = vsel %vm1393_vm4, %v12003_v61, %v12002_v13  ;;  %v1679_v57 = vsel %vm1393_vm4, %v12005_v27, %v12004_v39  ;;  %v12006_v50 = vld [vmem:[#allocation65_spill] sm:$0xff]  ;;  %v12007_v30 = vld [vmem:[#allocation66_spill] sm:$0xff]  ;;  %v12009_v54 = vld [vmem:[#allocation156_spill] sm:$0xff]  ;;  %v2125_v39 = vmul.f32 %v6059_v26, %v2101_v25  ;;  %vm25_vm6 = vcmp.ge.s32.totalorder %v8906_v10, 2 }
 0x248   :  { %v1959_v36 = vsel %vm1950_vm5, %v12007_v30, %v12006_v50  ;;  %v8940_v51 = vpop.permute.xlu1 %2064  ;;  %v8942_v2 = vpop.permute.xlu0 %2062  ;;  %v12010_v29 = vld [vmem:[#allocation157_spill] sm:$0xff]  ;;  %v6071_v0 = vld [vmem:[%s11459_s1 + $0x47] ss:$0 sm:$0xff]  ;;  %v12012_v13 = vld [vmem:[#allocation159_spill] sm:$0xff]  ;;  %v1702_v27 = vmul.f32 %v6021_v14, %v1678_v42  ;;  %vm31_vm7 = vcmp.ge.s32.totalorder %v8917_v24, 16  ;;  %vm34_vm8 = vcmp.lt.s32.totalorder %v8917_v24, 112 }
 0x249   :  { %12008 = vst [vmem:[#allocation32_spill] sm:$0xff] %v8942_v2  ;;  %v1960_v18 = vsel %vm1950_vm5, %v12010_v29, %v12009_v54  ;;  %v12011_v33 = vld [vmem:[#allocation158_spill] sm:$0xff]  ;;  %v12013_v50 = vld [vmem:[#allocation160_spill] sm:$0xff]  ;;  %v12014_v30 = vld [vmem:[#allocation161_spill] sm:$0xff]  ;;  %v1576_v29 = vadd.f32 %v1564_v19, %v1437_v12  ;;  %v1983_v26 = vmul.f32 %v6046_v49, %v1959_v36  ;;  %v1856_v12 = vadd.f32 %v1844_v40, %v1717_v44 }
 0x24a   :  { %v2239_v61 = vsel %vm1950_vm5, %v12012_v13, %v12011_v33  ;;  %v2240_v15 = vsel %vm1950_vm5, %v12014_v30, %v12013_v50  ;;  %v6033_v56 = vld [vmem:[%s11459_s1 + $0x57] ss:$0 sm:$0xff]  ;;  %v12015_v37 = vld [vmem:[#allocation171_spill] sm:$0xff]  ;;  %v1703_v33 = vmul.f32 %v6021_v14, %v1679_v57  ;;  %v12017_v25 = vld [vmem:[#allocation173_spill] sm:$0xff]  ;;  %v1855_v50 = vadd.f32 %v1843_v55, %v1716_v23 }
 0x24b   :  { %v12016_v16 = vld [vmem:[#allocation172_spill] sm:$0xff]  ;;  %v12018_v42 = vld [vmem:[#allocation174_spill] sm:$0xff]  ;;  %v1984_v30 = vmul.f32 %v6046_v49, %v1960_v18  ;;  %v2263_v21 = vmul.f32 %v6071_v0, %v2239_v61  ;;  %v6083_v45 = vld [vmem:[%s11459_s1 + $0x5f] ss:$0 sm:$0xff]  ;;  %v2264_v19 = vmul.f32 %v6071_v0, %v2240_v15  ;;  %v2136_v36 = vadd.f32 %v2124_v9, %v1997_v63 }
 0x24c   :  { %v1817_v54 = vsel %vm1393_vm4, %v12016_v16, %v12015_v37  ;;  %v1818_v13 = vsel %vm1393_vm4, %v12018_v42, %v12017_v25  ;;  %v12019_v22 = vld [vmem:[#allocation179_spill] sm:$0xff]  ;;  %v12020_v37 = vld [vmem:[#allocation180_spill] sm:$0xff]  ;;  %v2347_v43 = vpop.permute.xlu1 %2346  ;;  %v2345_v6 = vpop.permute.xlu0 %2344  ;;  %v2137_v18 = vadd.f32 %v2125_v39, %v1998_v7  ;;  %v1714_v61 = vadd.f32 %v1702_v27, %v1575_v28  ;;  %v6070_v15 = vld [vmem:[%s11459_s1 + $0x46] ss:$0 sm:$0xff] }
 0x24d   :  { %v2378_v16 = vsel %vm1950_vm5, %v12020_v37, %v12019_v22  ;;  %v1841_v14 = vmul.f32 %v6033_v56, %v1817_v54  ;;  %v6058_v57 = vld [vmem:[%s11459_s1 + $0x2e] ss:$0 sm:$0xff]  ;;  %v12022_v55 = vld [vmem:[#allocation176_spill] sm:$0xff]  ;;  %v1842_v25 = vmul.f32 %v6033_v56, %v1818_v13  ;;  %v1715_v22 = vadd.f32 %v1703_v33, %v1576_v29  ;;  %v12024_v40 = vld [vmem:[#allocation193_spill] sm:$0xff] }
 0x24e   :  { %v12021_v23 = vld [vmem:[#allocation175_spill] sm:$0xff]  ;;  %v1995_v42 = vadd.f32 %v1983_v26, %v1855_v50  ;;  %v2402_v37 = vmul.f32 %v6083_v45, %v2378_v16  ;;  %v12023_v44 = vld [vmem:[#allocation192_spill] sm:$0xff]  ;;  %v1996_v54 = vadd.f32 %v1984_v30, %v1856_v12  ;;  %v2275_v2 = vadd.f32 %v2263_v21, %v2136_v36  ;;  %v12025_v7 = vld [vmem:[#allocation29_spill] sm:$0xff] }
 0x24f   :  { %v2098_v49 = vsel %vm1950_vm5, %v12022_v55, %v12021_v23  ;;  %v2237_v0 = vsel %vm1950_vm5, %v12024_v40, %v12023_v44  ;;  %v6045_v63 = vld [vmem:[%s11459_s1 + $0x15] ss:$0 sm:$0xff]  ;;  %v12026_v28 = vld [vmem:[#allocation30_spill] sm:$0xff]  ;;  %vm28_vm9 = vcmp.lt.s32.totalorder %v8929_v35, 14  ;;  %v2276_v56 = vadd.f32 %v2264_v19, %v2137_v18  ;;  %v12027_v33 = vld [vmem:[#allocation177_spill] sm:$0xff] }
 0x250   :  { %v2122_v23 = vmul.f32 %v6058_v57, %v2098_v49  ;;  %v1957_v9 = vsel %vm1950_vm5, %v12026_v28, %v12025_v7  ;;  %v2351_v39 = vpop.permute.xlu1 %2350  ;;  %v2349_v27 = vpop.permute.xlu0 %2348  ;;  %v1853_v29 = vadd.f32 %v1841_v14, %v1714_v61  ;;  %v12028_v26 = vld [vmem:[#allocation178_spill] sm:$0xff]  ;;  %v6082_v21 = vld [vmem:[%s11459_s1 + $0x5e] ss:$0 sm:$0xff]  ;;  %v12029_v50 = vld [vmem:[#allocation212_spill] sm:$0xff]  ;;  %v1854_v12 = vadd.f32 %v1842_v25, %v1715_v22 }
 0x251   :  { %v2099_v13 = vsel %vm1950_vm5, %v12028_v26, %v12027_v33  ;;  %v12030_v30 = vld [vmem:[#allocation213_spill] sm:$0xff]  ;;  %v12032_v49 = vld [vmem:[#allocation182_spill] sm:$0xff]  ;;  %v2261_v44 = vmul.f32 %v6070_v15, %v2237_v0  ;;  %v6057_v19 = vld [vmem:[%s11459_s1 + $0x2d] ss:$0 sm:$0xff]  ;;  %v2414_v40 = vadd.f32 %v2402_v37, %v2275_v2  ;;  %v1981_v7 = vmul.f32 %v6045_v63, %v1957_v9 }
 0x252   :  { %v2376_v16 = vsel %vm1950_vm5, %v12030_v30, %v12029_v50  ;;  %v12031_v55 = vld [vmem:[#allocation181_spill] sm:$0xff]  ;;  %v12033_v14 = vld [vmem:[#allocation208_spill] sm:$0xff]  ;;  %v12036_v33 = vld [vmem:[#allocation34_spill] sm:$0xff]  ;;  %v2134_v30 = vadd.f32 %v2122_v23, %v1995_v42  ;;  %v2123_v0 = vmul.f32 %v6058_v57, %v2099_v13  ;;  %v2235_v2 = vsel %vm1950_vm5, %v8715_v41, %v8713_v31 }
 0x253   :  { %v2379_v36 = vsel %vm1950_vm5, %v12032_v49, %v12031_v55  ;;  %v12034_v18 = vld [vmem:[#allocation209_spill] sm:$0xff]  ;;  %v12037_v25 = vld [vmem:[#allocation194_spill] sm:$0xff]  ;;  %v12038_v22 = vld [vmem:[#allocation195_spill] sm:$0xff]  ;;  %v2400_v55 = vmul.f32 %v6082_v21, %v2376_v16  ;;  %v336_v35 = vrot.slane %v8891_v38, 4 }
 0x254   :  { %v2096_v61 = vsel %vm1950_vm5, %v12034_v18, %v12033_v14  ;;  %v12035_v28 = vld [vmem:[#allocation33_spill] sm:$0xff]  ;;  %v2238_v50 = vsel %vm1950_vm5, %v12038_v22, %v12037_v25  ;;  %v6069_v49 = vld [vmem:[%s11459_s1 + $0x45] ss:$0 sm:$0xff]  ;;  %v9023_v37 = vpop.permute.xlu1 %1626  ;;  %v9025_v9 = vpop.permute.xlu0 %1624  ;;  %v2403_v18 = vmul.f32 %v6083_v45, %v2379_v36  ;;  %v12041_v23 = vld [vmem:[#allocation211_spill] sm:$0xff]  ;;  %v2273_v25 = vadd.f32 %v2261_v44, %v2134_v30 }
 0x255   :  { %v1958_v26 = vsel %vm1950_vm5, %v12036_v33, %v12035_v28  ;;  %12039 = vst [vmem:[#allocation35_spill] sm:$0xff] %v9025_v9  ;;  %v6089_v14 = vld [vmem:[%s11460_s2 + $0x5] ss:$0 sm:$0xff]  ;;  %v2120_v42 = vmul.f32 %v6057_v19, %v2096_v61  ;;  %v12043_v28 = vld [vmem:[#allocation215_spill] sm:$0xff]  ;;  %vm9040_vm10 = vmand %vm25_vm6, %vm31_vm7  ;;  %v2262_v45 = vmul.f32 %v6070_v15, %v2238_v50  ;;  %v2374_v61 = vsel %vm1950_vm5, %v2345_v6, %v2347_v43 }
 0x256   :  { %v12040_v57 = vld [vmem:[#allocation210_spill] sm:$0xff]  ;;  %v1982_v41 = vmul.f32 %v6045_v63, %v1958_v26  ;;  %v6081_v36 = vld [vmem:[%s11459_s1 + $0x5d] ss:$0 sm:$0xff]  ;;  %v1993_v22 = vadd.f32 %v1981_v7, %v1853_v29  ;;  %v2412_v9 = vadd.f32 %v2400_v55, %v2273_v25  ;;  %vm9061_vm11 = vmand %vm9040_vm10, %vm34_vm8  ;;  %v2415_v43 = vadd.f32 %v2403_v18, %v2276_v56 }
 0x257   :  { %v2097_v13 = vsel %vm1950_vm5, %v12041_v23, %v12040_v57  ;;  %v12042_v16 = vld [vmem:[#allocation214_spill] sm:$0xff]  ;;  %v2259_v57 = vmul.f32 %v6069_v49, %v2235_v2  ;;  %v2236_v23 = vsel %vm1950_vm5, %v8753_v4, %v8751_v58  ;;  %v2398_v4 = vmul.f32 %v6081_v36, %v2374_v61  ;;  %vm9090_vm12 = vmand %vm28_vm9, %vm31_vm7  ;;  %v5923_v24 = vld [vmem:[%s11459_s1 + $0x31] ss:$0 sm:$0xff] }
 0x258   :  { %v2377_v33 = vsel %vm1950_vm5, %v12043_v28, %v12042_v16  ;;  %v9051_v16 = vadd.f32 %v6089_v14, %v2414_v40  ;;  %v2135_v28 = vadd.f32 %v2123_v0, %v1996_v54  ;;  %v2121_v10 = vmul.f32 %v6057_v19, %v2097_v13  ;;  %v9053_v44 = vpop.permute.xlu1 %1630  ;;  %v9055_v15 = vpop.permute.xlu0 %1628  ;;  %v6088_v29 = vld [vmem:[%s11460_s2 + $0x4] ss:$0 sm:$0xff]  ;;  %vm9125_vm13 = vmand %vm9090_vm12, %vm34_vm8  ;;  %v2827_v6 = vld [vmem:[%s11461_s3 + $0x48] sm:$0xff] }
 0x259   :  { %v2401_v63 = vmul.f32 %v6082_v21, %v2377_v33  ;;  %v2132_v58 = vadd.f32 %v2120_v42, %v1993_v22  ;;  %v2375_v54 = vsel %vm1950_vm5, %v2349_v27, %v2351_v39  ;;  %v102_v21 = vmul.f32 %v8543_v46, %v8585_v11  ;;  %v9081_v39 = vld [vmem:[%s11459_s1 + $0x19] ss:$0 sm:$0xff]  ;;  %v6087_v33 = vld [vmem:[%s11460_s2 + $0x3] ss:$0 sm:$0xff] }
 0x25a   :  { %12046 = vst [vmem:[#allocation36_spill] sm:$0xff] %v9051_v16  ;;  %v1994_v19 = vadd.f32 %v1982_v41, %v1854_v12  ;;  %v2274_v40 = vadd.f32 %v2262_v45, %v2135_v28  ;;  %v2260_v7 = vmul.f32 %v6069_v49, %v2236_v23  ;;  %v12049_v26 = vrot.slane %v8624_v8, 4  ;;  %v9168_v8 = vld [vmem:[%s11459_s1 + $0x49] ss:$0 sm:$0xff] }
 0x25b   :  { %v12050_v50 = vrot.slane %v8643_v59, 4  ;;  %v428_v30 = vmul.f32 %v8707_v17, %v8604_v60  ;;  %v2271_v27 = vadd.f32 %v2259_v57, %v2132_v58  ;;  %v2484_v46 = vsel %vm9061_vm11, %v9051_v16, 0.0 }
 0x25c   :  { %v2133_v59 = vadd.f32 %v2121_v10, %v1994_v19  ;;  %v2413_v60 = vadd.f32 %v2401_v63, %v2274_v40  ;;  %v2399_v17 = vmul.f32 %v6081_v36, %v2375_v54  ;;  %v9094_v12 = vpop.permute.xlu1 %1912  ;;  %v9096_v0 = vpop.permute.xlu0 %1910  ;;  %v9098_v55 = vadd.f32 %v6088_v29, %v2412_v9  ;;  %v9111_v10 = vld [vmem:[%s11458_s0 + $0x40] sm:$0xff]  ;;  %v5948_v40 = vld [vmem:[%s11459_s1 + $0x8] ss:$0 sm:$0xff] }
 0x25d   :  { %v335_v56 = vsel %vm322_vm1, %v12050_v50, %v12049_v26  ;;  %v12054_v49 = vrot.slane %v8711_v32, 2  ;;  %v12055_v2 = vrot.slane %v8547_v3, 2  ;;  %v2410_v42 = vadd.f32 %v2398_v4, %v2271_v27  ;;  %v6906_v3 = vld [vmem:[%s11458_s0 + $0x30] sm:$0xff]  ;;  %v5899_v4 = vld [vmem:[%s11459_s1 + $0x1] ss:$0 sm:$0xff] }
 0x25e   :  { %12053 = vst [vmem:[#allocation37_spill] sm:$0xff] %v9098_v55  ;;  %v9106_v13 = vadd.f32 %v6089_v14, %v2415_v43  ;;  %v9115_v9 = vmul.f32 %v9111_v10, %v9081_v39  ;;  %v155_v32 = vmul.f32 %v6906_v3, %v9081_v39  ;;  %v2272_v38 = vadd.f32 %v2260_v7, %v2133_v59  ;;  %v12065_v50 = vld [vmem:[#allocation74_spill] sm:$0xff] }
 0x25f   :  { %v203_v18 = vsel %vm188_vm0, %v12055_v2, %v12054_v49  ;;  %2506 = vadd.xlane.f32.xlu0 %v2484_v46  ;;  %v369_v31 = vadd.f32 %v335_v56, %v8698_v5  ;;  %v12059_v41 = vrot.slane %v8636_v62, 6  ;;  %v12060_v25 = vrot.slane %v8702_v20, 6  ;;  %v5960_v49 = vld [vmem:[%s11459_s1 + $0x20] ss:$0 sm:$0xff]  ;;  %v12068_v2 = vld [vmem:[#allocation89_spill] sm:$0xff] }
 0x260   :  { %12056 = vst [vmem:[#allocation38_spill] sm:$0xff] %v9106_v13  ;;  %v470_v36 = vrot.slane %v428_v30, 6  ;;  %v236_v61 = vadd.f32 %v203_v18, %v102_v21  ;;  %v2411_v22 = vadd.f32 %v2399_v17, %v2272_v38  ;;  %v9141_v57 = vpop.permute.xlu1 %1916  ;;  %v9143_v23 = vpop.permute.xlu0 %1914  ;;  %v2482_v5 = vsel %vm9061_vm11, %v9098_v55, 0.0  ;;  %v12069_v18 = vld [vmem:[#allocation90_spill] sm:$0xff] }
 0x261   :  { %v469_v45 = vsel %vm456_vm2, %v12060_v25, %v12059_v41  ;;  %v9148_v28 = vadd.f32 %v6088_v29, %v2413_v60  ;;  %v12062_v20 = vmov %v12049_v26  ;;  %v2485_v43 = vsel %vm9125_vm13, %v9106_v13, 0.0  ;;  %v12064_v26 = vld [vmem:[#allocation73_spill] sm:$0xff]  ;;  %v12070_v25 = vld [vmem:[#allocation75_spill] sm:$0xff] }
 0x262   :  { %v337_v63 = vsel %vm322_vm1, %v12062_v20, %v336_v35  ;;  %v9156_v58 = vadd.f32 %v6087_v33, %v2410_v42  ;;  %v11503_v54 = vrot.slane %v9115_v9, 2  ;;  %v9163_v29 = vmul.f32 %v9111_v10, %v5923_v24 }
 0x263   :  { %12061 = vst [vmem:[#allocation39_spill] sm:$0xff] %v9148_v28  ;;  %2502 = vadd.xlane.f32.xlu0 %v2482_v5  ;;  %v194_v21 = vrot.slane %v155_v32, 2  ;;  %v289_v19 = vmul.f32 %v6906_v3, %v5923_v24  ;;  %v503_v7 = vadd.f32 %v469_v45, %v369_v31  ;;  %v649_v56 = vsel %vm644_vm3, %v12065_v50, %v12064_v26  ;;  %v12071_v45 = vld [vmem:[#allocation76_spill] sm:$0xff]  ;;  %v12073_v5 = vld [vmem:[#allocation110_spill] sm:$0xff] }
 0x264   :  { %12063 = vst [vmem:[#allocation40_spill] sm:$0xff] %v9156_v58  ;;  %2508 = vadd.xlane.f32.xlu1 %v2485_v43  ;;  %v370_v30 = vadd.f32 %v337_v63, %v236_v61  ;;  %v12066_v27 = vmov %v12059_v41  ;;  %v9179_v11 = vpop.permute.xlu1 %2199  ;;  %v9181_v59 = vpop.permute.xlu0 %2197  ;;  %v2483_v60 = vsel %vm9125_vm13, %v9148_v28, 0.0  ;;  %v9186_v17 = vadd.f32 %v6087_v33, %v2411_v22  ;;  %v5972_v61 = vld [vmem:[%s11459_s1 + $0x38] ss:$0 sm:$0xff] }
 0x265   :  { %v471_v46 = vsel %vm456_vm2, %v12066_v27, %v470_v36  ;;  %v860_v62 = vsel %vm644_vm3, %v12069_v18, %v12068_v2  ;;  %v9196_v35 = vmul.f32 %v9111_v10, %v9168_v8  ;;  %v99_v42 = vmul.f32 %v6906_v3, %v5899_v4  ;;  %v12072_v22 = vld [vmem:[#allocation109_spill] sm:$0xff]  ;;  %v12075_v27 = vld [vmem:[#allocation92_spill] sm:$0xff] }
 0x266   :  { %12067 = vst [vmem:[#allocation41_spill] sm:$0xff] %v9186_v17  ;;  %v2480_v32 = vsel %vm9061_vm11, %v9156_v58, 0.0  ;;  %v673_v38 = vmul.f32 %v5948_v40, %v649_v56  ;;  %v11504_v33 = vrot.slane %v9163_v29, 4  ;;  %v196_v31 = vsel %vm188_vm0, %v194_v21, %v11503_v54  ;;  %v12074_v56 = vld [vmem:[#allocation91_spill] sm:$0xff]  ;;  %v12086_v58 = vld [vmem:[#allocation148_spill] sm:$0xff] }
 0x267   :  { %2504 = vadd.xlane.f32.xlu0 %v2483_v60  ;;  %v328_v41 = vrot.slane %v289_v19, 4  ;;  %v650_v36 = vsel %vm644_vm3, %v12071_v45, %v12070_v25  ;;  %v1059_v20 = vsel %vm644_vm3, %v12073_v5, %v12072_v22  ;;  %v504_v63 = vadd.f32 %v471_v46, %v370_v30  ;;  %v5984_v30 = vld [vmem:[%s11459_s1 + $0x50] ss:$0 sm:$0xff] }
 0x268   :  { %2498 = vadd.xlane.f32.xlu1 %v2480_v32  ;;  %v884_v43 = vmul.f32 %v5960_v49, %v860_v62  ;;  %v423_v26 = vmul.f32 %v6906_v3, %v9168_v8  ;;  %v9215_v50 = vpop.permute.xlu1 %2203  ;;  %v9217_v21 = vpop.permute.xlu0 %2201  ;;  %v2481_v19 = vsel %vm9125_vm13, %v9186_v17, 0.0  ;;  %v861_v60 = vsel %vm644_vm3, %v12075_v27, %v12074_v56  ;;  %v12076_v3 = vld [vmem:[#allocation3_spill] sm:$0xff]  ;;  %v12077_v46 = vld [vmem:[#allocation128_spill] sm:$0xff]  ;;  %v12079_v27 = vld [vmem:[#allocation113_spill] sm:$0xff] }
 0x269   :  { %v233_v18 = vadd.f32 %v196_v31, %v99_v42  ;;  %v1258_v62 = vsel %vm644_vm3, %v12077_v46, %v12076_v3  ;;  %v685_v32 = vadd.f32 %v673_v38, %v503_v7  ;;  %v674_v25 = vmul.f32 %v5948_v40, %v650_v36  ;;  %v6907_v42 = vld [vmem:[%s11458_s0 + $0x50] sm:$0x3f]  ;;  %v5996_v40 = vld [vmem:[%s11459_s1 + $0xe] ss:$0 sm:$0xff]  ;;  %v12080_v7 = vld [vmem:[#allocation10_spill] sm:$0xff] }
 0x26a   :  { %v330_v45 = vsel %vm322_vm1, %v328_v41, %v11504_v33  ;;  %v1083_v22 = vmul.f32 %v5972_v61, %v1059_v20  ;;  %v157_v31 = vmul.f32 %v6907_v42, %v9081_v39  ;;  %v291_v5 = vmul.f32 %v6907_v42, %v5923_v24  ;;  %v12078_v56 = vld [vmem:[#allocation112_spill] sm:$0xff]  ;;  %v12081_v38 = vld [vmem:[#allocation147_spill] sm:$0xff]  ;;  %v12083_v33 = vld [vmem:[#allocation5_spill] sm:$0xff] }
 0x26b   :  { %2500 = vadd.xlane.f32.xlu0 %v2481_v19  ;;  %v1060_v54 = vsel %vm644_vm3, %v12079_v27, %v12078_v56  ;;  %v1398_v41 = vsel %vm1393_vm4, %v12081_v38, %v12080_v7  ;;  %v896_v36 = vadd.f32 %v884_v43, %v685_v32  ;;  %v885_v20 = vmul.f32 %v5960_v49, %v861_v60  ;;  %v12082_v27 = vld [vmem:[#allocation4_spill] sm:$0xff]  ;;  %v6008_v7 = vld [vmem:[%s11459_s1 + $0x26] ss:$0 sm:$0xff]  ;;  %v12084_v43 = vld [vmem:[#allocation167_spill] sm:$0xff] }
 0x26c   :  { %v462_v19 = vrot.slane %v423_v26, 6  ;;  %v1282_v3 = vmul.f32 %v5984_v30, %v1258_v62  ;;  %v9248_v46 = vpop.permute.xlu1 %1765  ;;  %v9250_v39 = vpop.permute.xlu0 %1763  ;;  %v9252_v24 = vadd.f32 %v330_v45, %v233_v18  ;;  %v100_v56 = vmul.f32 %v9111_v10, %v5899_v4  ;;  %v12085_v49 = vld [vmem:[#allocation168_spill] sm:$0xff]  ;;  %v12087_v10 = vld [vmem:[#allocation149_spill] sm:$0xff]  ;;  %v12089_v17 = vld [vmem:[#allocation190_spill] sm:$0xff] }
 0x26d   :  { %v1259_v2 = vsel %vm644_vm3, %v12083_v33, %v12082_v27  ;;  %v1537_v26 = vsel %vm1393_vm4, %v12085_v49, %v12084_v43  ;;  %v686_v60 = vadd.f32 %v674_v25, %v504_v63  ;;  %v1095_v62 = vadd.f32 %v1083_v22, %v896_v36  ;;  %v6020_v33 = vld [vmem:[%s11459_s1 + $0x3e] ss:$0 sm:$0xff] }
 0x26e   :  { %v1084_v32 = vmul.f32 %v5972_v61, %v1060_v54  ;;  %v1422_v38 = vmul.f32 %v5996_v40, %v1398_v41  ;;  %v197_v18 = vrot.slane %v157_v31, 2  ;;  %v331_v45 = vrot.slane %v291_v5, 4  ;;  %v12088_v27 = vld [vmem:[#allocation189_spill] sm:$0xff]  ;;  %v12092_v41 = vld [vmem:[#allocation170_spill] sm:$0xff] }
 0x26f   :  { %v1399_v4 = vsel %vm1393_vm4, %v12087_v10, %v12086_v58  ;;  %v1676_v55 = vsel %vm1393_vm4, %v12089_v17, %v12088_v27  ;;  %v897_v28 = vadd.f32 %v885_v20, %v686_v60  ;;  %v1294_v43 = vadd.f32 %v1282_v3, %v1095_v62  ;;  %v12091_v5 = vld [vmem:[#allocation169_spill] sm:$0xff]  ;;  %v12097_v27 = vld [vmem:[#allocation26_spill] sm:$0xff] }
 0x270   :  { %v1283_v63 = vmul.f32 %v5984_v30, %v1259_v2  ;;  %v1561_v25 = vmul.f32 %v6008_v7, %v1537_v26  ;;  %v9273_v54 = vpop.permute.xlu1 %1769  ;;  %v9275_v61 = vpop.permute.xlu0 %1767  ;;  %v12090_v22 = vrot.slane %v9196_v35, 6  ;;  %v9283_v31 = vmul.f32 %v6907_v42, %v9168_v8  ;;  %v6032_v2 = vld [vmem:[%s11459_s1 + $0x56] ss:$0 sm:$0xff]  ;;  %v12094_v36 = vld [vmem:[#allocation205_spill] sm:$0xff] }
 0x271   :  { %v1538_v17 = vsel %vm1393_vm4, %v12092_v41, %v12091_v5  ;;  %v12093_v30 = vld [vmem:[#allocation204_spill] sm:$0xff]  ;;  %v1096_v3 = vadd.f32 %v1084_v32, %v897_v28  ;;  %v1434_v49 = vadd.f32 %v1422_v38, %v1294_v43  ;;  %v1423_v8 = vmul.f32 %v5996_v40, %v1399_v4  ;;  %v6056_v5 = vld [vmem:[%s11459_s1 + $0x2c] ss:$0 sm:$0xff] }
 0x272   :  { %v9280_v58 = vsel %vm456_vm2, %v462_v19, %v12090_v22  ;;  %v1815_v20 = vsel %vm1393_vm4, %v12094_v36, %v12093_v30  ;;  %v5910_v19 = vld [vmem:[%s11459_s1 + $0x18] ss:$0 sm:$0xff]  ;;  %v1700_v42 = vmul.f32 %v6020_v33, %v1676_v55  ;;  %v12095_v26 = vrot.slane %v9115_v9, 2  ;;  %v12098_v22 = vld [vmem:[#allocation191_spill] sm:$0xff]  ;;  %v6044_v32 = vld [vmem:[%s11459_s1 + $0x14] ss:$0 sm:$0xff] }
 0x273   :  { %v12096_v62 = vrot.slane %v9163_v29, 4  ;;  %v1677_v28 = vsel %vm1393_vm4, %v12098_v22, %v12097_v27  ;;  %v1955_v55 = vsel %vm1950_vm5, %v8647_v34, %v8645_v47  ;;  %v1295_v9 = vadd.f32 %v1283_v63, %v1096_v3  ;;  %v9321_v4 = vld [vmem:[%s11458_s0 + $0x10] sm:$0xff]  ;;  %v6909_v47 = vld [vmem:[%s11458_s0] sm:$0xff] }
 0x274   :  { %v198_v60 = vsel %vm188_vm0, %v12095_v26, %v197_v18  ;;  %v1573_v40 = vadd.f32 %v1561_v25, %v1434_v49  ;;  %v1562_v38 = vmul.f32 %v6008_v7, %v1538_v17  ;;  %v1839_v18 = vmul.f32 %v6032_v2, %v1815_v20  ;;  %v9314_v29 = vpop.permute.xlu1 %2052  ;;  %v12099_v63 = vld [vmem:[#allocation206_spill] sm:$0xff]  ;;  %v12100_v7 = vld [vmem:[#allocation207_spill] sm:$0xff] }
 0x275   :  { %v9303_v10 = vsel %vm322_vm1, %v12096_v62, %v331_v45  ;;  %v9316_v45 = vpop.permute.xlu0 %2050  ;;  %v9324_v43 = vmul.f32 %v9321_v4, %v5910_v19  ;;  %v152_v34 = vmul.f32 %v6909_v47, %v5910_v19  ;;  %v1816_v25 = vsel %vm1393_vm4, %v12100_v7, %v12099_v63  ;;  %v6068_v62 = vld [vmem:[%s11459_s1 + $0x44] ss:$0 sm:$0xff] }
 0x276   :  { %v2094_v41 = vsel %vm1950_vm5, %v8898_v1, %v8896_v48  ;;  %v1435_v17 = vadd.f32 %v1423_v8, %v1295_v9  ;;  %v1712_v30 = vadd.f32 %v1700_v42, %v1573_v40  ;;  %v1701_v36 = vmul.f32 %v6020_v33, %v1677_v28  ;;  %v5898_v48 = vld [vmem:[%s11459_s1] ss:$0 sm:$0xff]  ;;  %v5922_v1 = vld [vmem:[%s11459_s1 + $0x30] ss:$0 sm:$0xff] }
 0x277   :  { %v1979_v20 = vmul.f32 %v6044_v32, %v1955_v55  ;;  %v234_v3 = vadd.f32 %v198_v60, %v100_v56  ;;  %v465_v49 = vrot.slane %v9283_v31, 6  ;;  %v1956_v26 = vsel %vm1950_vm5, %v8691_v53, %v8689_v52  ;;  %v6910_v60 = vld [vmem:[%s11458_s0 + $0x20] sm:$0x3f]  ;;  %v12101_v28 = vld [vmem:[#allocation32_spill] sm:$0xff] }
 0x278   :  { %v2233_v27 = vsel %vm1950_vm5, %v9181_v59, %v9179_v11  ;;  %v1574_v56 = vadd.f32 %v1562_v38, %v1435_v17  ;;  %v1851_v33 = vadd.f32 %v1839_v18, %v1712_v30  ;;  %v1840_v31 = vmul.f32 %v6032_v2, %v1816_v25  ;;  %v9354_v53 = vpop.permute.xlu1 %2056  ;;  %v5934_v11 = vld [vmem:[%s11459_s1 + $0x48] ss:$0 sm:$0xff] }
 0x279   :  { %v2118_v52 = vmul.f32 %v6056_v5, %v2094_v41  ;;  %v9356_v8 = vpop.permute.xlu0 %2054  ;;  %v190_v42 = vrot.slane %v9324_v43, 2  ;;  %v189_v59 = vrot.slane %v152_v34, 2  ;;  %v154_v22 = vmul.f32 %v6910_v60, %v5910_v19  ;;  %v6080_v19 = vld [vmem:[%s11459_s1 + $0x5c] ss:$0 sm:$0xff] }
 0x27a   :  { %v2095_v2 = vsel %vm1950_vm5, %v12101_v28, %v8940_v51  ;;  %v1713_v55 = vadd.f32 %v1701_v36, %v1574_v56  ;;  %v1991_v9 = vadd.f32 %v1979_v20, %v1851_v33  ;;  %v1980_v40 = vmul.f32 %v6044_v32, %v1956_v26 }
 0x27b   :  { %v2257_v38 = vmul.f32 %v6068_v62, %v2233_v27  ;;  %v287_v18 = vmul.f32 %v9321_v4, %v5922_v1  ;;  %v97_v43 = vmul.f32 %v6909_v47, %v5898_v48  ;;  %v286_v63 = vmul.f32 %v6909_v47, %v5922_v1 }
 0x27c   :  { %v2234_v34 = vsel %vm1950_vm5, %v9217_v21, %v9215_v50  ;;  %v9376_v7 = vmul.f32 %v9321_v4, %v5934_v11  ;;  %v1852_v51 = vadd.f32 %v1840_v31, %v1713_v55  ;;  %v2130_v25 = vadd.f32 %v2118_v52, %v1991_v9  ;;  %v2339_v32 = vpop.permute.xlu1 %2338 }
 0x27d   :  { %v2119_v41 = vmul.f32 %v6056_v5, %v2095_v2  ;;  %v2337_v17 = vpop.permute.xlu0 %2336  ;;  %v191_v30 = vsel %vm188_vm0, %v189_v59, %v190_v42  ;;  %v192_v36 = vrot.slane %v154_v22, 2  ;;  %v288_v20 = vmul.f32 %v6910_v60, %v5922_v1  ;;  %v6086_v5 = vld [vmem:[%s11460_s2 + $0x2] ss:$0 sm:$0xff] }
 0x27e   :  { %v2372_v26 = vsel %vm1950_vm5, %v2337_v17, %v2339_v32  ;;  %v1992_v27 = vadd.f32 %v1980_v40, %v1852_v51  ;;  %v2269_v50 = vadd.f32 %v2257_v38, %v2130_v25  ;;  %v2258_v21 = vmul.f32 %v6068_v62, %v2234_v34  ;;  %v12105_v32 = vld [vmem:[#allocation107_spill] sm:$0xff]  ;;  %v12106_v17 = vld [vmem:[#allocation108_spill] sm:$0xff] }
 0x27f   :  { %v2396_v56 = vmul.f32 %v6080_v19, %v2372_v26  ;;  %v368_v33 = vadd.f32 %v9303_v10, %v234_v3  ;;  %v324_v28 = vrot.slane %v287_v18, 4  ;;  %v323_v16 = vrot.slane %v286_v63, 4 }
 0x280   :  { %v420_v13 = vmul.f32 %v6909_v47, %v5934_v11  ;;  %v12102_v31 = vrot.slane %v9196_v35, 6  ;;  %v231_v1 = vadd.f32 %v191_v30, %v97_v43  ;;  %v2131_v59 = vadd.f32 %v2119_v41, %v1992_v27  ;;  %v2343_v2 = vpop.permute.xlu1 %2342  ;;  %v5947_v35 = vld [vmem:[%s11459_s1 + $0x7] ss:$0 sm:$0xff] }
 0x281   :  { %v2408_v22 = vadd.f32 %v2396_v56, %v2269_v50  ;;  %v2341_v55 = vpop.permute.xlu0 %2340  ;;  %v458_v62 = vrot.slane %v9376_v7, 6  ;;  %v98_v10 = vmul.f32 %v9321_v4, %v5898_v48  ;;  %v326_v3 = vrot.slane %v288_v20, 4  ;;  %v12104_v43 = vld [vmem:[#allocation106_spill] sm:$0xff]  ;;  %v12110_v50 = vld [vmem:[#allocation127_spill] sm:$0xff] }
 0x282   :  { %v466_v52 = vsel %vm456_vm2, %v12102_v31, %v465_v49  ;;  %v2373_v47 = vsel %vm1950_vm5, %v2341_v55, %v2343_v2  ;;  %v193_v9 = vsel %vm188_vm0, %v190_v42, %v192_v36  ;;  %v2270_v40 = vadd.f32 %v2258_v21, %v2131_v59  ;;  %v12103_v49 = vld [vmem:[#allocation105_spill] sm:$0xff]  ;;  %v12109_v27 = vld [vmem:[#allocation126_spill] sm:$0xff]  ;;  %v5971_v31 = vld [vmem:[%s11459_s1 + $0x37] ss:$0 sm:$0xff] }
 0x283   :  { %v2397_v38 = vmul.f32 %v6080_v19, %v2373_v47  ;;  %v9391_v18 = vadd.f32 %v6086_v5, %v2408_v22  ;;  %v647_v63 = vsel %vm644_vm3, %v12104_v43, %v12103_v49  ;;  %v325_v34 = vsel %vm322_vm1, %v323_v16, %v324_v28  ;;  %v5959_v16 = vld [vmem:[%s11459_s1 + $0x1f] ss:$0 sm:$0xff]  ;;  %v12112_v59 = vld [vmem:[#allocation144_spill] sm:$0xff]  ;;  %v12116_v49 = vld [vmem:[#allocation166_spill] sm:$0xff] }
 0x284   :  { %v457_v4 = vrot.slane %v420_v13, 6  ;;  %v422_v48 = vmul.f32 %v6910_v60, %v5934_v11  ;;  %v501_v7 = vadd.f32 %v9280_v58, %v9252_v24  ;;  %v9402_v51 = vpop.permute.xlu1 %1904  ;;  %v502_v41 = vadd.f32 %v466_v52, %v368_v33  ;;  %v12107_v13 = vld [vmem:[#allocation124_spill] sm:$0xff]  ;;  %v12108_v24 = vld [vmem:[#allocation125_spill] sm:$0xff]  ;;  %v12111_v52 = vld [vmem:[#allocation143_spill] sm:$0xff] }
 0x285   :  { %v2409_v42 = vadd.f32 %v2397_v38, %v2270_v40  ;;  %v9404_v19 = vpop.permute.xlu0 %1902  ;;  %v2478_v25 = vsel %vm9061_vm11, %v9391_v18, 0.0  ;;  %v648_v30 = vsel %vm644_vm3, %v12106_v17, %v12105_v32  ;;  %v858_v58 = vsel %vm644_vm3, %v12108_v24, %v12107_v13  ;;  %v12114_v55 = vld [vmem:[#allocation140_spill] sm:$0xff]  ;;  %v5983_v38 = vld [vmem:[%s11459_s1 + $0x4f] ss:$0 sm:$0xff]  ;;  %v5995_v13 = vld [vmem:[%s11459_s1 + $0xd] ss:$0 sm:$0xff] }
 0x286   :  { %v232_v11 = vadd.f32 %v193_v9, %v98_v10  ;;  %2494 = vadd.xlane.f32.xlu1 %v2478_v25  ;;  %v671_v60 = vmul.f32 %v5947_v35, %v647_v63  ;;  %v365_v36 = vadd.f32 %v325_v34, %v231_v1  ;;  %v327_v20 = vsel %vm322_vm1, %v324_v28, %v326_v3  ;;  %v5946_v28 = vld [vmem:[%s11459_s1 + $0x6] ss:$0 sm:$0xff]  ;;  %v12119_v24 = vld [vmem:[#allocation185_spill] sm:$0xff] }
 0x287   :  { %v9419_v26 = vadd.f32 %v6086_v5, %v2409_v42  ;;  %v859_v21 = vsel %vm644_vm3, %v12110_v50, %v12109_v27  ;;  %v459_v56 = vsel %vm456_vm2, %v457_v4, %v458_v62  ;;  %v460_v33 = vrot.slane %v422_v48, 6  ;;  %v12113_v5 = vld [vmem:[#allocation139_spill] sm:$0xff]  ;;  %v12117_v48 = vld [vmem:[#allocation145_spill] sm:$0xff]  ;;  %v12118_v42 = vld [vmem:[#allocation146_spill] sm:$0xff] }
 0x288   :  { %v1057_v22 = vsel %vm644_vm3, %v12112_v59, %v12111_v52  ;;  %v672_v1 = vmul.f32 %v5947_v35, %v648_v30  ;;  %v882_v2 = vmul.f32 %v5959_v16, %v858_v58  ;;  %v645_v10 = vsel %vm644_vm3, %v12114_v55, %v12113_v5  ;;  %v9437_v3 = vpop.permute.xlu1 %1908  ;;  %v12115_v35 = vld [vmem:[#allocation13_spill] sm:$0xff]  ;;  %v12120_v58 = vld [vmem:[#allocation186_spill] sm:$0xff] }
 0x289   :  { %v9439_v47 = vpop.permute.xlu0 %1906  ;;  %v2479_v9 = vsel %vm9125_vm13, %v9419_v26, 0.0  ;;  %v366_v40 = vadd.f32 %v327_v20, %v232_v11  ;;  %v1256_v43 = vsel %vm644_vm3, %v12116_v49, %v12115_v35  ;;  %v683_v63 = vadd.f32 %v671_v60, %v501_v7  ;;  %v12122_v60 = vld [vmem:[#allocation142_spill] sm:$0xff]  ;;  %v12126_v5 = vld [vmem:[#allocation201_spill] sm:$0xff]  ;;  %v12127_v49 = vld [vmem:[#allocation187_spill] sm:$0xff] }
 0x28a   :  { %2496 = vadd.xlane.f32.xlu0 %v2479_v9  ;;  %v883_v34 = vmul.f32 %v5959_v16, %v859_v21  ;;  %v1081_v4 = vmul.f32 %v5971_v31, %v1057_v22  ;;  %v1058_v25 = vsel %vm644_vm3, %v12118_v42, %v12117_v48  ;;  %v499_v32 = vadd.f32 %v459_v56, %v365_v36  ;;  %v12121_v16 = vld [vmem:[#allocation141_spill] sm:$0xff]  ;;  %v12123_v52 = vld [vmem:[#allocation14_spill] sm:$0xff]  ;;  %v12125_v22 = vld [vmem:[#allocation200_spill] sm:$0xff] }
 0x28b   :  { %v669_v17 = vmul.f32 %v5946_v28, %v645_v10  ;;  %v461_v30 = vsel %vm456_vm2, %v458_v62, %v460_v33  ;;  %v1396_v11 = vsel %vm1393_vm4, %v12120_v58, %v12119_v24  ;;  %v684_v20 = vadd.f32 %v672_v1, %v502_v41  ;;  %v12124_v62 = vld [vmem:[#allocation15_spill] sm:$0xff]  ;;  %v6007_v59 = vld [vmem:[%s11459_s1 + $0x25] ss:$0 sm:$0xff]  ;;  %v12129_v48 = vld [vmem:[#allocation220_spill] sm:$0xff] }
 0x28c   :  { %v894_v7 = vadd.f32 %v882_v2, %v683_v63  ;;  %v646_v27 = vsel %vm644_vm3, %v12122_v60, %v12121_v16  ;;  %v1280_v50 = vmul.f32 %v5983_v38, %v1256_v43  ;;  %v2192_v21 = vpop.permute.xlu1 %2191  ;;  %v1082_v56 = vmul.f32 %v5971_v31, %v1058_v25  ;;  %v12128_v31 = vld [vmem:[#allocation188_spill] sm:$0xff]  ;;  %v6019_v63 = vld [vmem:[%s11459_s1 + $0x3d] ss:$0 sm:$0xff]  ;;  %v12135_v60 = vld [vmem:[#allocation202_spill] sm:$0xff] }
 0x28d   :  { %v2190_v36 = vpop.permute.xlu0 %2189  ;;  %v1257_v33 = vsel %vm644_vm3, %v12124_v62, %v12123_v52  ;;  %v1535_v41 = vsel %vm1393_vm4, %v12126_v5, %v12125_v22  ;;  %v895_v1 = vadd.f32 %v883_v34, %v684_v20  ;;  %v500_v2 = vadd.f32 %v461_v30, %v366_v40  ;;  %v12130_v42 = vld [vmem:[#allocation221_spill] sm:$0xff]  ;;  %v12131_v34 = vld [vmem:[#allocation162_spill] sm:$0xff]  ;;  %v12133_v20 = vld [vmem:[#allocation164_spill] sm:$0xff] }
 0x28e   :  { %v1093_v55 = vadd.f32 %v1081_v4, %v894_v7  ;;  %v1420_v10 = vmul.f32 %v5995_v13, %v1396_v11  ;;  %v681_v9 = vadd.f32 %v669_v17, %v499_v32  ;;  %v670_v35 = vmul.f32 %v5946_v28, %v646_v27  ;;  %v5958_v40 = vld [vmem:[%s11459_s1 + $0x1e] ss:$0 sm:$0xff]  ;;  %v12132_v4 = vld [vmem:[#allocation163_spill] sm:$0xff]  ;;  %v6031_v62 = vld [vmem:[%s11459_s1 + $0x55] ss:$0 sm:$0xff] }
 0x28f   :  { %v1397_v43 = vsel %vm1393_vm4, %v12128_v31, %v12127_v49  ;;  %v1674_v25 = vsel %vm1393_vm4, %v12130_v42, %v12129_v48  ;;  %v856_v28 = vsel %vm644_vm3, %v12132_v4, %v12131_v34  ;;  %v1281_v17 = vmul.f32 %v5983_v38, %v1257_v33  ;;  %v12134_v7 = vld [vmem:[#allocation165_spill] sm:$0xff]  ;;  %v12136_v27 = vld [vmem:[#allocation203_spill] sm:$0xff]  ;;  %v12137_v22 = vld [vmem:[#allocation24_spill] sm:$0xff] }
 0x290   :  { %v1292_v32 = vadd.f32 %v1280_v50, %v1093_v55  ;;  %v1559_v30 = vmul.f32 %v6007_v59, %v1535_v41  ;;  %v2196_v24 = vpop.permute.xlu1 %2195  ;;  %v1094_v11 = vadd.f32 %v1082_v56, %v895_v1  ;;  %v857_v16 = vsel %vm644_vm3, %v12134_v7, %v12133_v20  ;;  %v12138_v5 = vld [vmem:[#allocation25_spill] sm:$0xff]  ;;  %v5970_v50 = vld [vmem:[%s11459_s1 + $0x36] ss:$0 sm:$0xff]  ;;  %v12139_v56 = vld [vmem:[#allocation2_spill] sm:$0xff] }
 0x291   :  { %v2194_v58 = vpop.permute.xlu0 %2193  ;;  %v1536_v52 = vsel %vm1393_vm4, %v12136_v27, %v12135_v60  ;;  %v1813_v38 = vsel %vm1393_vm4, %v12138_v5, %v12137_v22  ;;  %v12140_v33 = vld [vmem:[#allocation111_spill] sm:$0xff]  ;;  %v1421_v55 = vmul.f32 %v5995_v13, %v1397_v43  ;;  %v1698_v49 = vmul.f32 %v6019_v63, %v1674_v25  ;;  %v12142_v34 = vld [vmem:[#allocation17_spill] sm:$0xff]  ;;  %v6043_v20 = vld [vmem:[%s11459_s1 + $0x13] ss:$0 sm:$0xff] }
 0x292   :  { %v1055_v41 = vsel %vm644_vm3, %v12140_v33, %v12139_v56  ;;  %v1432_v1 = vadd.f32 %v1420_v10, %v1292_v32  ;;  %v682_v31 = vadd.f32 %v670_v35, %v500_v2  ;;  %v880_v48 = vmul.f32 %v5958_v40, %v856_v28  ;;  %v12141_v42 = vld [vmem:[#allocation19_spill] sm:$0xff]  ;;  %v12144_v28 = vld [vmem:[#allocation28_spill] sm:$0xff] }
 0x293   :  { %v1675_v4 = vsel %vm1393_vm4, %v12142_v34, %v12141_v42  ;;  %v1953_v7 = vsel %vm1950_vm5, %v9096_v0, %v9094_v12  ;;  %v1293_v60 = vadd.f32 %v1281_v17, %v1094_v11  ;;  %v1560_v22 = vmul.f32 %v6007_v59, %v1536_v52  ;;  %v12143_v25 = vld [vmem:[#allocation27_spill] sm:$0xff]  ;;  %v12146_v52 = vld [vmem:[#allocation184_spill] sm:$0xff] }
 0x294   :  { %v1571_v27 = vadd.f32 %v1559_v30, %v1432_v1  ;;  %v1837_v10 = vmul.f32 %v6031_v62, %v1813_v38  ;;  %v9514_v13 = vpop.permute.xlu1 %2044  ;;  %v881_v35 = vmul.f32 %v5958_v40, %v857_v16  ;;  %v1079_v43 = vmul.f32 %v5970_v50, %v1055_v41  ;;  %v6055_v5 = vld [vmem:[%s11459_s1 + $0x2b] ss:$0 sm:$0xff]  ;;  %v12147_v16 = vld [vmem:[#allocation196_spill] sm:$0xff]  ;;  %v12148_v38 = vld [vmem:[#allocation197_spill] sm:$0xff] }
 0x295   :  { %v9516_v2 = vpop.permute.xlu0 %2042  ;;  %v1814_v32 = vsel %vm1393_vm4, %v12144_v28, %v12143_v25  ;;  %v2092_v12 = vsel %vm1950_vm5, %v9316_v45, %v9314_v29  ;;  %v1433_v0 = vadd.f32 %v1421_v55, %v1293_v60  ;;  %v1699_v17 = vmul.f32 %v6019_v63, %v1675_v4  ;;  %v12145_v11 = vld [vmem:[#allocation183_spill] sm:$0xff]  ;;  %v6067_v29 = vld [vmem:[%s11459_s1 + $0x43] ss:$0 sm:$0xff] }
 0x296   :  { %v1710_v59 = vadd.f32 %v1698_v49, %v1571_v27  ;;  %v1977_v30 = vmul.f32 %v6043_v20, %v1953_v7  ;;  %v1056_v40 = vsel %vm644_vm3, %v12146_v52, %v12145_v11  ;;  %v1254_v56 = vsel %vm644_vm3, %v12148_v38, %v12147_v16  ;;  %v5982_v63 = vld [vmem:[%s11459_s1 + $0x4e] ss:$0 sm:$0xff]  ;;  %v12150_v7 = vld [vmem:[#allocation217_spill] sm:$0xff]  ;;  %v12156_v11 = vld [vmem:[#allocation16_spill] sm:$0xff] }
 0x297   :  { %v1954_v33 = vsel %vm1950_vm5, %v9143_v23, %v9141_v57  ;;  %v2231_v45 = vsel %vm1950_vm5, %v2190_v36, %v2192_v21  ;;  %v1572_v41 = vadd.f32 %v1560_v22, %v1433_v0  ;;  %v1838_v55 = vmul.f32 %v6031_v62, %v1814_v32  ;;  %v12149_v23 = vld [vmem:[#allocation216_spill] sm:$0xff]  ;;  %v5994_v36 = vld [vmem:[%s11459_s1 + $0xc] ss:$0 sm:$0xff] }
 0x298   :  { %v1849_v1 = vadd.f32 %v1837_v10, %v1710_v59  ;;  %v2116_v49 = vmul.f32 %v6055_v5, %v2092_v12  ;;  %v9543_v42 = vpop.permute.xlu1 %2048  ;;  %v892_v4 = vadd.f32 %v880_v48, %v681_v9  ;;  %v893_v57 = vadd.f32 %v881_v35, %v682_v31  ;;  %v6079_v48 = vld [vmem:[%s11459_s1 + $0x5b] ss:$0 sm:$0xff]  ;;  %v12151_v35 = vld [vmem:[#allocation198_spill] sm:$0xff]  ;;  %v12152_v32 = vld [vmem:[#allocation199_spill] sm:$0xff] }
 0x299   :  { %v9545_v34 = vpop.permute.xlu0 %2046  ;;  %v1394_v60 = vsel %vm1393_vm4, %v12150_v7, %v12149_v23  ;;  %v2093_v21 = vsel %vm1950_vm5, %v9356_v8, %v9354_v53  ;;  %v1711_v62 = vadd.f32 %v1699_v17, %v1572_v41  ;;  %v1978_v22 = vmul.f32 %v6043_v20, %v1954_v33  ;;  %v12158_v7 = vld [vmem:[#allocation20_spill] sm:$0xff] }
 0x29a   :  { %v1989_v27 = vadd.f32 %v1977_v30, %v1849_v1  ;;  %v2255_v10 = vmul.f32 %v6067_v29, %v2231_v45  ;;  %v1091_v25 = vadd.f32 %v1079_v43, %v892_v4  ;;  %v1080_v28 = vmul.f32 %v5970_v50, %v1056_v40  ;;  %v12153_v30 = vld [vmem:[#allocation218_spill] sm:$0xff]  ;;  %v12154_v43 = vld [vmem:[#allocation219_spill] sm:$0xff]  ;;  %v6018_v1 = vld [vmem:[%s11459_s1 + $0x3c] ss:$0 sm:$0xff] }
 0x29b   :  { %v1278_v9 = vmul.f32 %v5982_v63, %v1254_v56  ;;  %v2232_v31 = vsel %vm1950_vm5, %v2194_v58, %v2196_v24  ;;  %v1255_v53 = vsel %vm644_vm3, %v12152_v32, %v12151_v35  ;;  %v1850_v8 = vadd.f32 %v1838_v55, %v1711_v62  ;;  %v6006_v24 = vld [vmem:[%s11459_s1 + $0x24] ss:$0 sm:$0xff]  ;;  %v12157_v55 = vld [vmem:[#allocation35_spill] sm:$0xff]  ;;  %v6085_v4 = vld [vmem:[%s11460_s2 + $0x1] ss:$0 sm:$0xff] }
 0x29c   :  { %v2128_v12 = vadd.f32 %v2116_v49, %v1989_v27  ;;  %v2117_v0 = vmul.f32 %v6055_v5, %v2093_v21  ;;  %v2331_v59 = vpop.permute.xlu1 %2330  ;;  %v1418_v20 = vmul.f32 %v5994_v36, %v1394_v60  ;;  %v1395_v50 = vsel %vm1393_vm4, %v12154_v43, %v12153_v30  ;;  %v12155_v58 = vld [vmem:[#allocation18_spill] sm:$0xff]  ;;  %v12159_v60 = vld [vmem:[#allocation21_spill] sm:$0xff] }
 0x29d   :  { %v2329_v17 = vpop.permute.xlu0 %2328  ;;  %v1533_v52 = vsel %vm1393_vm4, %v12156_v11, %v12155_v58  ;;  %v1990_v16 = vadd.f32 %v1978_v22, %v1850_v8  ;;  %v2256_v5 = vmul.f32 %v6067_v29, %v2232_v31  ;;  %v1092_v33 = vadd.f32 %v1080_v28, %v893_v57  ;;  %v6042_v8 = vld [vmem:[%s11459_s1 + $0x12] ss:$0 sm:$0xff] }
 0x29e   :  { %v2370_v40 = vsel %vm1950_vm5, %v2329_v17, %v2331_v59  ;;  %v2267_v38 = vadd.f32 %v2255_v10, %v2128_v12  ;;  %v1290_v45 = vadd.f32 %v1278_v9, %v1091_v25  ;;  %v1279_v41 = vmul.f32 %v5982_v63, %v1255_v53  ;;  %v6030_v10 = vld [vmem:[%s11459_s1 + $0x54] ss:$0 sm:$0xff] }
 0x29f   :  { %v2394_v56 = vmul.f32 %v6079_v48, %v2370_v40  ;;  %v1672_v49 = vsel %vm1393_vm4, %v12157_v55, %v9023_v37  ;;  %v1557_v23 = vmul.f32 %v6006_v24, %v1533_v52  ;;  %v1534_v29 = vsel %vm1393_vm4, %v12159_v60, %v12158_v7 }
 0x2a0   :  { %v2129_v57 = vadd.f32 %v2117_v0, %v1990_v16  ;;  %v2335_v63 = vpop.permute.xlu1 %2334  ;;  %v1430_v27 = vadd.f32 %v1418_v20, %v1290_v45  ;;  %v1419_v22 = vmul.f32 %v5994_v36, %v1395_v50  ;;  %v1811_v37 = vsel %vm1393_vm4, %v9250_v39, %v9248_v46  ;;  %v6078_v45 = vld [vmem:[%s11459_s1 + $0x5a] ss:$0 sm:$0xff] }
 0x2a1   :  { %v2406_v21 = vadd.f32 %v2394_v56, %v2267_v38  ;;  %v2333_v62 = vpop.permute.xlu0 %2332  ;;  %v1696_v28 = vmul.f32 %v6018_v1, %v1672_v49  ;;  %v1291_v32 = vadd.f32 %v1279_v41, %v1092_v33  ;;  %v1558_v53 = vmul.f32 %v6006_v24, %v1534_v29  ;;  %v6084_v29 = vld [vmem:[%s11460_s2] ss:$0 sm:$0xff] }
 0x2a2   :  { %v2371_v25 = vsel %vm1950_vm5, %v2333_v62, %v2335_v63  ;;  %v2268_v9 = vadd.f32 %v2256_v5, %v2129_v57  ;;  %v1673_v36 = vsel %vm1393_vm4, %v9055_v15, %v9053_v44  ;;  %v1951_v46 = vsel %vm1950_vm5, %v9404_v19, %v9402_v51  ;;  %v6054_v15 = vld [vmem:[%s11459_s1 + $0x2a] ss:$0 sm:$0xff] }
 0x2a3   :  { %v2395_v31 = vmul.f32 %v6079_v48, %v2371_v25  ;;  %v9592_v35 = vadd.f32 %v6085_v4, %v2406_v21  ;;  %v1569_v39 = vadd.f32 %v1557_v23, %v1430_v27  ;;  %v1835_v12 = vmul.f32 %v6030_v10, %v1811_v37 }
 0x2a4   :  { %v2184_v48 = vpop.permute.xlu1 %2183  ;;  %v1431_v20 = vadd.f32 %v1419_v22, %v1291_v32  ;;  %v1812_v44 = vsel %vm1393_vm4, %v9275_v61, %v9273_v54  ;;  %v2090_v51 = vsel %vm1950_vm5, %v9516_v2, %v9514_v13  ;;  %v1697_v30 = vmul.f32 %v6018_v1, %v1673_v36  ;;  %v6066_v54 = vld [vmem:[%s11459_s1 + $0x42] ss:$0 sm:$0xff] }
 0x2a5   :  { %v2407_v0 = vadd.f32 %v2395_v31, %v2268_v9  ;;  %v2182_v59 = vpop.permute.xlu0 %2181  ;;  %v2476_v17 = vsel %vm9061_vm11, %v9592_v35, 0.0  ;;  %v1708_v19 = vadd.f32 %v1696_v28, %v1569_v39  ;;  %v1975_v43 = vmul.f32 %v6042_v8, %v1951_v46 }
 0x2a6   :  { %2490 = vadd.xlane.f32.xlu1 %v2476_v17  ;;  %v1570_v24 = vadd.f32 %v1558_v53, %v1431_v20  ;;  %v1952_v58 = vsel %vm1950_vm5, %v9439_v47, %v9437_v3  ;;  %v2229_v61 = vsel %vm1950_vm5, %v2182_v59, %v2184_v48  ;;  %v1836_v52 = vmul.f32 %v6030_v10, %v1812_v44 }
 0x2a7   :  { %v9615_v50 = vadd.f32 %v6085_v4, %v2407_v0  ;;  %v1847_v11 = vadd.f32 %v1835_v12, %v1708_v19  ;;  %v2114_v13 = vmul.f32 %v6054_v15, %v2090_v51  ;;  %v2091_v38 = vsel %vm1950_vm5, %v9545_v34, %v9543_v42 }
 0x2a8   :  { %v2188_v2 = vpop.permute.xlu1 %2187  ;;  %v1709_v3 = vadd.f32 %v1697_v30, %v1570_v24  ;;  %v1976_v5 = vmul.f32 %v6042_v8, %v1952_v58  ;;  %v2253_v56 = vmul.f32 %v6066_v54, %v2229_v61  ;;  %v2115_v55 = vmul.f32 %v6054_v15, %v2091_v38  ;;  %v12161_v38 = vld [vmem:[#allocation36_spill] sm:$0xff] }
 0x2a9   :  { %v2186_v40 = vpop.permute.xlu0 %2185  ;;  %v2477_v16 = vsel %vm9125_vm13, %v9615_v50, 0.0  ;;  %v1987_v47 = vadd.f32 %v1975_v43, %v1847_v11 }
 0x2aa   :  { %2492 = vadd.xlane.f32.xlu0 %v2477_v16  ;;  %v2230_v33 = vsel %vm1950_vm5, %v2186_v40, %v2188_v2  ;;  %v1848_v41 = vadd.f32 %v1836_v52, %v1709_v3  ;;  %v12160_v40 = vld [vmem:[#allocation38_spill] sm:$0xff] }
 0x2ab   :  { %v2126_v1 = vadd.f32 %v2114_v13, %v1987_v47  ;;  %v2254_v34 = vmul.f32 %v6066_v54, %v2230_v33 }
 0x2ac   :  { %v2323_v49 = vpop.permute.xlu1 %2322  ;;  %v1988_v7 = vadd.f32 %v1976_v5, %v1848_v41 }
 0x2ad   :  { %v2321_v4 = vpop.permute.xlu0 %2320  ;;  %v2265_v42 = vadd.f32 %v2253_v56, %v2126_v1 }
 0x2ae   :  { %v2368_v23 = vsel %vm1950_vm5, %v2321_v4, %v2323_v49  ;;  %v2127_v57 = vadd.f32 %v2115_v55, %v1988_v7  ;;  %v12162_v55 = vld [vmem:[#allocation39_spill] sm:$0xff]  ;;  %v12163_v4 = vld [vmem:[#allocation37_spill] sm:$0xff] }
 0x2af   :  { %v2392_v60 = vmul.f32 %v6078_v45, %v2368_v23 }
 0x2b0   :  { %v2266_v22 = vadd.f32 %v2254_v34, %v2127_v57  ;;  %v12164_v57 = vld [vmem:[#allocation41_spill] sm:$0xff] }
 0x2b1   :  { %v2404_v21 = vadd.f32 %v2392_v60, %v2265_v42 }
 0x2b2   :  { %v2327_v63 = vpop.permute.xlu1 %2326  ;;  %v2325_v62 = vpop.permute.xlu0 %2324 }
 0x2b3   :  { %v2369_v27 = vsel %vm1950_vm5, %v2325_v62, %v2327_v63  ;;  %v9639_v37 = vadd.f32 %v6084_v29, %v2404_v21  ;;  %v12165_v63 = vld [vmem:[#allocation40_spill] sm:$0xff] }
 0x2b4   :  { %v2393_v10 = vmul.f32 %v6078_v45, %v2369_v27 }
 0x2b5   :  { %v2474_v28 = vsel %vm9061_vm11, %v9639_v37, 0.0 }
 0x2b6   :  { %v2405_v25 = vadd.f32 %v2393_v10, %v2266_v22  ;;  %2486 = vadd.xlane.f32.xlu1 %v2474_v28 }
 0x2b8   :  { %v9644_v9 = vadd.f32 %v6084_v29, %v2405_v25 }
 0x2ba   :  { %v2475_v31 = vsel %vm9125_vm13, %v9644_v9, 0.0 }
 0x2bb   :  { %2488 = vadd.xlane.f32.xlu0 %v2475_v31 }
 0x2e8   :  { %v2507_v32 = vpop.xlane.xlu0 %2506 }
 0x2ec   :  { %v2503_v53 = vpop.xlane.xlu0 %2502 }
 0x2ed   :  { %v2509_v36 = vpop.xlane.xlu1 %2508 }
 0x2ee   :  { %v2545_v8 = vadd.f32 %v2509_v36, %v2507_v32 }
 0x2f0   :  { %v2546_v46 = vrot.slane %v2545_v8, 4  ;;  %v2505_v39 = vpop.xlane.xlu0 %2504 }
 0x2f1   :  { %v2538_v12 = vadd.f32 %v2505_v39, %v2503_v53  ;;  %v2499_v17 = vpop.xlane.xlu1 %2498 }
 0x2f2   :  { %v2547_v0 = vadd.f32 %v2546_v46, %v2545_v8 }
 0x2f3   :  { %v2539_v48 = vrot.slane %v2538_v12, 4 }
 0x2f4   :  { %v2548_v59 = vrot.slane %v2547_v0, 2  ;;  %v2501_v20 = vpop.xlane.xlu0 %2500 }
 0x2f5   :  { %v2540_v44 = vadd.f32 %v2539_v48, %v2538_v12  ;;  %v2531_v15 = vadd.f32 %v2501_v20, %v2499_v17 }
 0x2f6   :  { %v2549_v51 = vadd.f32 %v2548_v59, %v2547_v0 }
 0x2f7   :  { %v2541_v19 = vrot.slane %v2540_v44, 2  ;;  %v2532_v30 = vrot.slane %v2531_v15, 4 }
 0x2f8   :  { %v2550_v43 = vrot.slane %v2549_v51, 1 }
 0x2f9   :  { %v2542_v24 = vadd.f32 %v2541_v19, %v2540_v44  ;;  %v2533_v58 = vadd.f32 %v2532_v30, %v2531_v15 }
 0x2fa   :  { %v2551_v54 = vadd.f32 %v2550_v43, %v2549_v51 }
 0x2fb   :  { %v2543_v61 = vrot.slane %v2542_v24, 1  ;;  %v2534_v11 = vrot.slane %v2533_v58, 2 }
 0x2fc   :  { %v9649_v52 = vmul.f32 0.00086805556, %v2551_v54 }
 0x2fd   :  { %v2544_v13 = vadd.f32 %v2543_v61, %v2542_v24  ;;  %v2535_v2 = vadd.f32 %v2534_v11, %v2533_v58 }
 0x2fe   :  { %v2569_v16 = vsub.f32 %v12160_v40, %v9649_v52  ;;  %v2568_v3 = vsub.f32 %v12161_v38, %v9649_v52 }
 0x2ff   :  { %v9655_v47 = vmul.f32 0.00086805556, %v2544_v13  ;;  %v2536_v5 = vrot.slane %v2535_v2, 1 }
 0x300   :  { %v2581_v56 = vsel %vm9125_vm13, %v2569_v16, 0.0  ;;  %v2580_v33 = vsel %vm9061_vm11, %v2568_v3, 0.0 }
 0x301   :  { %v2537_v45 = vadd.f32 %v2536_v5, %v2535_v2  ;;  %v2593_v41 = vmul.f32 %v2581_v56, %v2581_v56  ;;  %v2592_v1 = vmul.f32 %v2580_v33, %v2580_v33  ;;  %v2567_v49 = vsub.f32 %v12162_v55, %v9655_v47 }
 0x302   :  { %v2566_v23 = vsub.f32 %v12163_v4, %v9655_v47 }
 0x303   :  { %v9665_v7 = vmul.f32 0.00086805556, %v2537_v45  ;;  %2616 = vadd.xlane.f32.xlu0 %v2593_v41  ;;  %2614 = vadd.xlane.f32.xlu1 %v2592_v1  ;;  %v2579_v42 = vsel %vm9125_vm13, %v2567_v49, 0.0 }
 0x304   :  { %v2591_v34 = vmul.f32 %v2579_v42, %v2579_v42  ;;  %v2578_v60 = vsel %vm9061_vm11, %v2566_v23, 0.0 }
 0x305   :  { %v2590_v29 = vmul.f32 %v2578_v60, %v2578_v60  ;;  %v2565_v21 = vsub.f32 %v12164_v57, %v9665_v7  ;;  %v2564_v62 = vsub.f32 %v12165_v63, %v9665_v7 }
 0x307   :  { %2612 = vadd.xlane.f32.xlu0 %v2591_v34  ;;  %2610 = vadd.xlane.f32.xlu1 %v2590_v29  ;;  %v2577_v27 = vsel %vm9125_vm13, %v2565_v21, 0.0  ;;  %v2576_v22 = vsel %vm9061_vm11, %v2564_v62, 0.0 }
 0x308   :  { %v2589_v10 = vmul.f32 %v2577_v27, %v2577_v27  ;;  %v2588_v25 = vmul.f32 %v2576_v22, %v2576_v22 }
 0x30b   :  { %2608 = vadd.xlane.f32.xlu0 %v2589_v10  ;;  %2606 = vadd.xlane.f32.xlu1 %v2588_v25 }
 0x30f   :  { %v2495_v28 = vpop.xlane.xlu1 %2494 }
 0x313   :  { %v2497_v31 = vpop.xlane.xlu0 %2496 }
 0x314   :  { %v2524_v32 = vadd.f32 %v2497_v31, %v2495_v28  ;;  %v2818_v31 = vld [vmem:[%s11461_s3] sm:$0xff] }
 0x316   :  { %v2525_v53 = vrot.slane %v2524_v32, 4 }
 0x318   :  { %v2526_v36 = vadd.f32 %v2525_v53, %v2524_v32  ;;  %v2851_v32 = vsel %vm1393_vm4, %v2818_v31, 0 }
 0x31a   :  { %v2527_v8 = vrot.slane %v2526_v36, 2 }
 0x31c   :  { %v2528_v46 = vadd.f32 %v2527_v8, %v2526_v36  ;;  %v9713_v8 = vand.u32 4294901760, %v2851_v32 }
 0x31e   :  { %v2529_v39 = vrot.slane %v2528_v46, 1  ;;  %12166 = vst [vmem:[#allocation42_spill] sm:$0xff] %v9713_v8  ;;  %6510 = vmatprep.mubr.f32.mxu1 %v9713_v8 }
 0x320   :  { %v2530_v12 = vadd.f32 %v2529_v39, %v2528_v46  ;;  %v9716_v39 = vsub.f32 %v2851_v32, %v9713_v8  ;;  %v6101_v32 = vld [vmem:[%s11460_s2 + $0x11] sm:$0x1] }
 0x322   :  { %v9679_v0 = vmul.f32 0.00086805556, %v2530_v12 }
 0x324   :  { %v2563_v48 = vsub.f32 %v9419_v26, %v9679_v0  ;;  %v2562_v59 = vsub.f32 %v9391_v18, %v9679_v0 }
 0x326   :  { %v2575_v17 = vsel %vm9125_vm13, %v2563_v48, 0.0  ;;  %v2574_v20 = vsel %vm9061_vm11, %v2562_v59, 0.0 }
 0x327   :  { %v2587_v44 = vmul.f32 %v2575_v17, %v2575_v17  ;;  %v2586_v15 = vmul.f32 %v2574_v20, %v2574_v20  ;;  %v11519_v17 = vand.u32 4294901760, %v9716_v39 }
 0x329   :  { %2604 = vadd.xlane.f32.xlu0 %v2587_v44  ;;  %2602 = vadd.xlane.f32.xlu1 %v2586_v15  ;;  %v3026_v15 = vsub.f32 %v9716_v39, %v11519_v17 }
 0x32f   :  { %v2491_v51 = vpop.xlane.xlu1 %2490 }
 0x333   :  { %v2493_v19 = vpop.xlane.xlu0 %2492 }
 0x334   :  { %v2517_v30 = vadd.f32 %v2493_v19, %v2491_v51 }
 0x336   :  { %v2518_v43 = vrot.slane %v2517_v30, 4 }
 0x338   :  { %v2519_v24 = vadd.f32 %v2518_v43, %v2517_v30 }
 0x33a   :  { %v2520_v58 = vrot.slane %v2519_v24, 2 }
 0x33c   :  { %v2521_v54 = vadd.f32 %v2520_v58, %v2519_v24  ;;  %v3027_v24 = vand.u32 4294901760, %v3026_v15 }
 0x33e   :  { %v2522_v61 = vrot.slane %v2521_v54, 1  ;;  %6438 = vmatprep.mubr.f32.mxu0 %v3027_v24 }
 0x33f   :  { %v2487_v2 = vpop.xlane.xlu1 %2486 }
 0x340   :  { %v2523_v11 = vadd.f32 %v2522_v61, %v2521_v54 }
 0x342   :  { %v9689_v13 = vmul.f32 0.00086805556, %v2523_v11 }
 0x344   :  { %v2489_v16 = vpop.xlane.xlu0 %2488  ;;  %v2561_v5 = vsub.f32 %v9615_v50, %v9689_v13  ;;  %v2560_v56 = vsub.f32 %v9592_v35, %v9689_v13 }
 0x345   :  { %v2510_v3 = vadd.f32 %v2489_v16, %v2487_v2 }
 0x346   :  { %v2573_v45 = vsel %vm9125_vm13, %v2561_v5, 0.0  ;;  %v2572_v41 = vsel %vm9061_vm11, %v2560_v56, 0.0 }
 0x347   :  { %v2511_v33 = vrot.slane %v2510_v3, 4  ;;  %v2585_v1 = vmul.f32 %v2573_v45, %v2573_v45  ;;  %v2584_v49 = vmul.f32 %v2572_v41, %v2572_v41 }
 0x349   :  { %v2512_v23 = vadd.f32 %v2511_v33, %v2510_v3  ;;  %2600 = vadd.xlane.f32.xlu0 %v2585_v1  ;;  %2598 = vadd.xlane.f32.xlu1 %v2584_v49 }
 0x34b   :  { %v2513_v42 = vrot.slane %v2512_v23, 2 }
 0x34d   :  { %v2514_v34 = vadd.f32 %v2513_v42, %v2512_v23 }
 0x34f   :  { %v2515_v60 = vrot.slane %v2514_v34, 1 }
 0x351   :  { %v2516_v29 = vadd.f32 %v2515_v60, %v2514_v34 }
 0x353   :  { %v9699_v21 = vmul.f32 0.00086805556, %v2516_v29 }
 0x355   :  { %v2559_v62 = vsub.f32 %v9644_v9, %v9699_v21  ;;  %v2558_v27 = vsub.f32 %v9639_v37, %v9699_v21 }
 0x357   :  { %v2571_v22 = vsel %vm9125_vm13, %v2559_v62, 0.0  ;;  %v2570_v10 = vsel %vm9061_vm11, %v2558_v27, 0.0 }
 0x358   :  { %v2583_v25 = vmul.f32 %v2571_v22, %v2571_v22  ;;  %v2582_v28 = vmul.f32 %v2570_v10, %v2570_v10  ;;  %v6095_v22 = vld [vmem:[%s11460_s2 + $0xb] sm:$0x1] }
 0x35a   :  { %2596 = vadd.xlane.f32.xlu0 %v2583_v25  ;;  %2594 = vadd.xlane.f32.xlu1 %v2582_v28  ;;  %v12167_v25 = vld [vmem:[#allocation31_spill] sm:$0xff] }
 0x35b   :  { %v9727_v28 = vsub.s32 0, %v12167_v25 }
 0x35d   :  { %12168 = vst [vmem:[#allocation43_spill] sm:$0xff] %v9727_v28 }
 0x38c   :  { %v2617_v53 = vpop.xlane.xlu0 %2616  ;;  %v2615_v36 = vpop.xlane.xlu1 %2614 }
 0x38d   :  { %v2653_v46 = vadd.f32 %v2617_v53, %v2615_v36  ;;  %v6094_v53 = vld [vmem:[%s11460_s2 + $0xa] sm:$0x1] }
 0x38f   :  { %v2654_v12 = vrot.slane %v2653_v46, 4 }
 0x390   :  { %v2613_v48 = vpop.xlane.xlu0 %2612  ;;  %v2611_v59 = vpop.xlane.xlu1 %2610 }
 0x391   :  { %v2655_v20 = vadd.f32 %v2654_v12, %v2653_v46  ;;  %v2646_v44 = vadd.f32 %v2613_v48, %v2611_v59 }
 0x393   :  { %v2656_v51 = vrot.slane %v2655_v20, 2  ;;  %v2647_v19 = vrot.slane %v2646_v44, 4 }
 0x394   :  { %v2609_v30 = vpop.xlane.xlu0 %2608  ;;  %v2607_v43 = vpop.xlane.xlu1 %2606 }
 0x395   :  { %v2657_v58 = vadd.f32 %v2656_v51, %v2655_v20  ;;  %v2648_v54 = vadd.f32 %v2647_v19, %v2646_v44  ;;  %v2639_v61 = vadd.f32 %v2609_v30, %v2607_v43  ;;  %v6100_v20 = vld [vmem:[%s11460_s2 + $0x10] sm:$0x1]  ;;  %v6093_v44 = vld [vmem:[%s11460_s2 + $0x9] sm:$0x1] }
 0x397   :  { %v2658_v11 = vrot.slane %v2657_v58, 1  ;;  %v2649_v2 = vrot.slane %v2648_v54, 2  ;;  %v2640_v16 = vrot.slane %v2639_v61, 4 }
 0x399   :  { %v2659_v3 = vadd.f32 %v2658_v11, %v2657_v58  ;;  %v2650_v5 = vadd.f32 %v2649_v2, %v2648_v54  ;;  %v2641_v56 = vadd.f32 %v2640_v16, %v2639_v61  ;;  %v6099_v2 = vld [vmem:[%s11460_s2 + $0xf] sm:$0x1] }
 0x39b   :  { %v2665_v33 = vmul.f32 0.00086805556, %v2659_v3  ;;  %v2651_v45 = vrot.slane %v2650_v5, 1  ;;  %v2642_v41 = vrot.slane %v2641_v56, 2 }
 0x39d   :  { %v2671_v1 = vadd.f32 1e-05, %v2665_v33  ;;  %v2652_v49 = vadd.f32 %v2651_v45, %v2650_v5  ;;  %v2643_v23 = vadd.f32 %v2642_v41, %v2641_v56 }
 0x39f   :  { %6849 = vrsqrt.f32 %v2671_v1  ;;  %v2664_v42 = vmul.f32 0.00086805556, %v2652_v49  ;;  %v2644_v34 = vrot.slane %v2643_v23, 1 }
 0x3a1   :  { %v2670_v60 = vadd.f32 1e-05, %v2664_v42  ;;  %v2645_v29 = vadd.f32 %v2644_v34, %v2643_v23 }
 0x3a3   :  { %6851 = vrsqrt.f32 %v2670_v60  ;;  %v2663_v62 = vmul.f32 0.00086805556, %v2645_v29 }
 0x3a5   :  { %v2669_v27 = vadd.f32 1e-05, %v2663_v62 }
 0x3a7   :  { %6853 = vrsqrt.f32 %v2669_v27 }
 0x3ac   :  { %v6850_v10 = vpop.eup %6849 }
 0x3ad   :  { %v2690_v31 = vmul.f32 %v6850_v10, %v6095_v22 }
 0x3af   :  { %v2703_v36 = vmul.f32 %v2690_v31, %v9649_v52  ;;  %v2739_v12 = vrot.slane %v2690_v31, %v9727_v28 }
 0x3b0   :  { %v6852_v46 = vpop.eup %6851 }
 0x3b1   :  { %v2709_v48 = vsub.f32 %v6101_v32, %v2703_v36  ;;  %v2689_v59 = vmul.f32 %v6852_v46, %v6094_v53  ;;  %v2756_v24 = vmul.f32 %v2739_v12, %v12161_v38  ;;  %v2757_v58 = vmul.f32 %v2739_v12, %v12160_v40 }
 0x3b2   :  { %v2605_v52 = vpop.xlane.xlu0 %2604  ;;  %v2603_v30 = vpop.xlane.xlu1 %2602 }
 0x3b3   :  { %v2787_v15 = vrot.slane %v2709_v48, %v9727_v28  ;;  %v2702_v51 = vmul.f32 %v2689_v59, %v9655_v47  ;;  %v2735_v19 = vrot.slane %v2689_v59, %v9727_v28  ;;  %v2632_v54 = vadd.f32 %v2605_v52, %v2603_v30 }
 0x3b4   :  { %v6854_v43 = vpop.eup %6853 }
 0x3b5   :  { %v2708_v61 = vsub.f32 %v6100_v20, %v2702_v51  ;;  %v2688_v11 = vmul.f32 %v6854_v43, %v6093_v44  ;;  %v2633_v16 = vrot.slane %v2632_v54, 4  ;;  %v2805_v3 = vadd.f32 %v2787_v15, %v2757_v58 }
 0x3b6   :  { %v2804_v5 = vadd.f32 %v2787_v15, %v2756_v24  ;;  %v2754_v47 = vmul.f32 %v2735_v19, %v12163_v4  ;;  %v2755_v40 = vmul.f32 %v2735_v19, %v12162_v55 }
 0x3b7   :  { %v2783_v56 = vrot.slane %v2708_v61, %v9727_v28  ;;  %v2701_v33 = vmul.f32 %v2688_v11, %v9665_v7  ;;  %v2731_v38 = vrot.slane %v2688_v11, %v9727_v28  ;;  %v2634_v45 = vadd.f32 %v2633_v16, %v2632_v54 }
 0x3b8   :  { %v2817_v41 = vsel %vm9125_vm13, %v2805_v3, 0.0  ;;  %v2816_v1 = vsel %vm9061_vm11, %v2804_v5, 0.0 }
 0x3b9   :  { %v2707_v49 = vsub.f32 %v6099_v2, %v2701_v33  ;;  %v9760_v23 = vand.u32 4294901760, %v2817_v41  ;;  %v2635_v42 = vrot.slane %v2634_v45, 2  ;;  %v9762_v4 = vand.u32 4294901760, %v2816_v1 }
 0x3ba   :  { %v2803_v34 = vadd.f32 %v2783_v56, %v2755_v40  ;;  %v2802_v60 = vadd.f32 %v2783_v56, %v2754_v47  ;;  %v2752_v7 = vmul.f32 %v2731_v38, %v12165_v63  ;;  %v2753_v29 = vmul.f32 %v2731_v38, %v12164_v57 }
 0x3bb   :  { %v2779_v55 = vrot.slane %v2707_v49, %v9727_v28  ;;  %6414 = vmatprep.subr.mxu0 %v9760_v23  ;;  %v9769_v62 = vsub.f32 %v2817_v41, %v9760_v23  ;;  %v2636_v27 = vadd.f32 %v2635_v42, %v2634_v45  ;;  %v9777_v63 = vsub.f32 %v2816_v1, %v9762_v4  ;;  %v6092_v1 = vld [vmem:[%s11460_s2 + $0x8] sm:$0x1] }
 0x3bc   :  { %6415 = vmatpush3.msra.mxu0 %v9760_v23  ;;  %v2815_v22 = vsel %vm9125_vm13, %v2803_v34, 0.0  ;;  %v2814_v10 = vsel %vm9061_vm11, %v2802_v60, 0.0 }
 0x3bd   :  { %6416 = vmatprep.subr.mxu0 %v9762_v4  ;;  %v9780_v57 = vand.u32 4294901760, %v2815_v22  ;;  %v9782_v25 = vand.u32 4294901760, %v2814_v10  ;;  %v2801_v31 = vadd.f32 %v2779_v55, %v2753_v29  ;;  %v9785_v32 = vand.u32 4294901760, %v9769_v62  ;;  %v6098_v29 = vld [vmem:[%s11460_s2 + $0xe] sm:$0x1] }
 0x3be   :  { %v2637_v53 = vrot.slane %v2636_v27, 1  ;;  %6417 = vmatpush3.msra.mxu0 %v9762_v4  ;;  %v2800_v36 = vadd.f32 %v2779_v55, %v2752_v7  ;;  %v9789_v46 = vand.u32 4294901760, %v9777_v63 }
 0x3bf   :  { %6418 = vmatprep.subr.mxu0 %v9780_v57  ;;  %v2813_v12 = vsel %vm9125_vm13, %v2801_v31, 0.0  ;;  %v3355_v48 = vsub.f32 %v9769_v62, %v9785_v32  ;;  %v9797_v59 = vsub.f32 %v2815_v22, %v9780_v57  ;;  %v9800_v20 = vsub.f32 %v2814_v10, %v9782_v25 }
 0x3c0   :  { %v2638_v44 = vadd.f32 %v2637_v53, %v2636_v27  ;;  %6419 = vmatpush3.msra.mxu0 %v9780_v57  ;;  %v9803_v15 = vand.u32 4294901760, %v2813_v12  ;;  %v2812_v51 = vsel %vm9061_vm11, %v2800_v36, 0.0  ;;  %v3362_v19 = vsub.f32 %v9777_v63, %v9789_v46 }
 0x3c1   :  { %6420 = vmatprep.subr.mxu0 %v9782_v25  ;;  %v3356_v52 = vand.u32 4294901760, %v3355_v48  ;;  %v9810_v30 = vand.u32 4294901760, %v2812_v51  ;;  %v9813_v43 = vand.u32 4294901760, %v9797_v59  ;;  %v9816_v24 = vand.u32 4294901760, %v9800_v20 }
 0x3c2   :  { %12169 = vst [vmem:[#allocation44_spill] sm:$0xff] %v9803_v15  ;;  %v2662_v58 = vmul.f32 0.00086805556, %v2638_v44  ;;  %6421 = vmatpush3.msra.mxu0 %v9782_v25  ;;  %v9820_v54 = vsub.f32 %v2813_v12, %v9803_v15  ;;  %v3363_v61 = vand.u32 4294901760, %v3362_v19 }
 0x3c3   :  { %6422 = vmatprep.subr.mxu0 %v9803_v15  ;;  %6486 = vmatprep.subr.mxu1 %v3356_v52  ;;  %v3369_v11 = vsub.f32 %v9797_v59, %v9813_v43  ;;  %v3376_v2 = vsub.f32 %v9800_v20, %v9816_v24  ;;  %v9828_v16 = vsub.f32 %v2812_v51, %v9810_v30 }
 0x3c4   :  { %v2668_v3 = vadd.f32 1e-05, %v2662_v58  ;;  %6423 = vmatpush3.msra.mxu0 %v9803_v15  ;;  %6487 = vmatpush3.msra.mxu1 %v3356_v52  ;;  %v9832_v5 = vand.u32 4294901760, %v9820_v54 }
 0x3c5   :  { %6424 = vmatprep.subr.mxu0 %v9810_v30  ;;  %6488 = vmatprep.subr.mxu1 %v3363_v61  ;;  %v3370_v47 = vand.u32 4294901760, %v3369_v11  ;;  %v9836_v56 = vand.u32 4294901760, %v9828_v16  ;;  %v3377_v38 = vand.u32 4294901760, %v3376_v2 }
 0x3c6   :  { %6855 = vrsqrt.f32 %v2668_v3  ;;  %6425 = vmatpush3.msra.mxu0 %v9810_v30  ;;  %6489 = vmatpush3.msra.mxu1 %v3363_v61  ;;  %v3383_v33 = vsub.f32 %v9820_v54, %v9832_v5 }
 0x3c7   :  { %6490 = vmatprep.subr.mxu1 %v3370_v47  ;;  %v3390_v40 = vsub.f32 %v9828_v16, %v9836_v56 }
 0x3c8   :  { %6491 = vmatpush3.msra.mxu1 %v3370_v47  ;;  %v3384_v45 = vand.u32 4294901760, %v3383_v33 }
 0x3c9   :  { %6492 = vmatprep.subr.mxu1 %v3377_v38  ;;  %v3391_v41 = vand.u32 4294901760, %v3390_v40 }
 0x3ca   :  { %6493 = vmatpush3.msra.mxu1 %v3377_v38 }
 0x3cb   :  { %6494 = vmatprep.subr.mxu1 %v3384_v45 }
 0x3cc   :  { %6495 = vmatpush3.msra.mxu1 %v3384_v45 }
 0x3cd   :  { %6496 = vmatprep.subr.mxu1 %v3391_v41 }
 0x3ce   :  { %6497 = vmatpush3.msra.mxu1 %v3391_v41 }
 0x3d2   :  { %v2601_v42 = vpop.xlane.xlu0 %2600  ;;  %v2599_v34 = vpop.xlane.xlu1 %2598 }
 0x3d3   :  { %v6856_v49 = vpop.eup %6855  ;;  %v2625_v7 = vadd.f32 %v2601_v42, %v2599_v34 }
 0x3d4   :  { %v2687_v60 = vmul.f32 %v6856_v49, %v6092_v1 }
 0x3d5   :  { %v2626_v22 = vrot.slane %v2625_v7, 4 }
 0x3d6   :  { %v2700_v55 = vmul.f32 %v2687_v60, %v9679_v0  ;;  %v2727_v27 = vrot.slane %v2687_v60, %v9727_v28 }
 0x3d7   :  { %v2627_v31 = vadd.f32 %v2626_v22, %v2625_v7 }
 0x3d8   :  { %v2706_v10 = vsub.f32 %v6098_v29, %v2700_v55  ;;  %v2750_v53 = vmul.f32 %v2727_v27, %v9391_v18  ;;  %v2751_v36 = vmul.f32 %v2727_v27, %v9419_v26 }
 0x3d9   :  { %v2628_v48 = vrot.slane %v2627_v31, 2 }
 0x3da   :  { %v2775_v12 = vrot.slane %v2706_v10, %v9727_v28  ;;  %v6091_v10 = vld [vmem:[%s11460_s2 + $0x7] sm:$0x1] }
 0x3db   :  { %v2629_v44 = vadd.f32 %v2628_v48, %v2627_v31  ;;  %v6097_v48 = vld [vmem:[%s11460_s2 + $0xd] sm:$0x1] }
 0x3dc   :  { %v2799_v51 = vadd.f32 %v2775_v12, %v2751_v36  ;;  %v2798_v19 = vadd.f32 %v2775_v12, %v2750_v53 }
 0x3dd   :  { %v2630_v52 = vrot.slane %v2629_v44, 1 }
 0x3de   :  { %v2811_v58 = vsel %vm9125_vm13, %v2799_v51, 0.0  ;;  %v2810_v0 = vsel %vm9061_vm11, %v2798_v19, 0.0 }
 0x3df   :  { %v9858_v61 = vand.u32 4294901760, %v2811_v58  ;;  %v9860_v11 = vand.u32 4294901760, %v2810_v0  ;;  %v2631_v18 = vadd.f32 %v2630_v52, %v2629_v44 }
 0x3e1   :  { %6426 = vmatprep.subr.mxu0 %v9858_v61  ;;  %v9864_v26 = vsub.f32 %v2811_v58, %v9858_v61  ;;  %v9867_v2 = vsub.f32 %v2810_v0, %v9860_v11  ;;  %v2661_v3 = vmul.f32 0.00086805556, %v2631_v18  ;;  %v2819_v18 = vld [vmem:[%s11461_s3 + $0x8] sm:$0xff] }
 0x3e2   :  { %6427 = vmatpush3.msra.mxu0 %v9858_v61 }
 0x3e3   :  { %v2597_v47 = vpop.xlane.xlu0 %2596  ;;  %6428 = vmatprep.subr.mxu0 %v9860_v11  ;;  %v2595_v33 = vpop.xlane.xlu1 %2594  ;;  %v9872_v38 = vand.u32 4294901760, %v9864_v26  ;;  %v9875_v40 = vand.u32 4294901760, %v9867_v2  ;;  %v2667_v45 = vadd.f32 1e-05, %v2661_v3  ;;  %v2820_v3 = vld [vmem:[%s11461_s3 + $0x10] sm:$0xff] }
 0x3e4   :  { %v2618_v41 = vadd.f32 %v2597_v47, %v2595_v33  ;;  %6429 = vmatpush3.msra.mxu0 %v9860_v11  ;;  %v2854_v33 = vsel %vm1393_vm4, %v2819_v18, 0 }
 0x3e5   :  { %12170 = vst [vmem:[#allocation45_spill] sm:$0xff] %v9875_v40  ;;  %v3397_v1 = vsub.f32 %v9864_v26, %v9872_v38  ;;  %v3404_v49 = vsub.f32 %v9867_v2, %v9875_v40  ;;  %6857 = vrsqrt.f32 %v2667_v45 }
 0x3e6   :  { %v2619_v42 = vrot.slane %v2618_v41, 4 }
 0x3e7   :  { %v3398_v34 = vand.u32 4294901760, %v3397_v1  ;;  %v3405_v7 = vand.u32 4294901760, %v3404_v49 }
 0x3e8   :  { %v2620_v60 = vadd.f32 %v2619_v42, %v2618_v41  ;;  %v2821_v41 = vld [vmem:[%s11461_s3 + $0x18] sm:$0xff]  ;;  %v9912_v42 = vand.u32 4294901760, %v2854_v33 }
 0x3e9   :  { %6498 = vmatprep.subr.mxu1 %v3398_v34 }
 0x3ea   :  { %v2621_v29 = vrot.slane %v2620_v60, 2  ;;  %6499 = vmatpush3.msra.mxu1 %v3398_v34  ;;  %12171 = vst [vmem:[#allocation46_spill] sm:$0xff] %v9912_v42  ;;  %v6090_v34 = vld [vmem:[%s11460_s2 + $0x6] sm:$0x1] }
 0x3eb   :  { %6500 = vmatprep.subr.mxu1 %v3405_v7 }
 0x3ec   :  { %v2622_v55 = vadd.f32 %v2621_v29, %v2620_v60  ;;  %6501 = vmatpush3.msra.mxu1 %v3405_v7 }
 0x3ee   :  { %v2623_v27 = vrot.slane %v2622_v55, 1 }
 0x3f0   :  { %v2624_v22 = vadd.f32 %v2623_v27, %v2622_v55  ;;  %v2860_v55 = vsel %vm1393_vm4, %v2821_v41, 0  ;;  %v2822_v27 = vld [vmem:[%s11461_s3 + $0x20] sm:$0xff] }
 0x3f2   :  { %v2660_v31 = vmul.f32 0.00086805556, %v2624_v22  ;;  %v6858_v53 = vpop.eup %6857 }
 0x3f3   :  { %v2686_v36 = vmul.f32 %v6858_v53, %v6091_v10 }
 0x3f4   :  { %v2666_v12 = vadd.f32 1e-05, %v2660_v31 }
 0x3f5   :  { %v2699_v44 = vmul.f32 %v2686_v36, %v9689_v13  ;;  %v2723_v51 = vrot.slane %v2686_v36, %v9727_v28  ;;  %v9940_v36 = vsub.f32 %v2854_v33, %v9912_v42 }
 0x3f6   :  { %6859 = vrsqrt.f32 %v2666_v12  ;;  %v9942_v12 = vand.u32 4294901760, %v2860_v55 }
 0x3f7   :  { %v2705_v19 = vsub.f32 %v6097_v48, %v2699_v44  ;;  %v2748_v52 = vmul.f32 %v2723_v51, %v9592_v35  ;;  %v2749_v58 = vmul.f32 %v2723_v51, %v9615_v50  ;;  %v2857_v50 = vsel %vm1393_vm4, %v2820_v3, 0  ;;  %v2823_v48 = vld [vmem:[%s11461_s3 + $0x28] sm:$0xff] }
 0x3f8   :  { %v9924_v29 = vand.u32 4294901760, %v2857_v50  ;;  %12175 = vst [vmem:[#allocation50_spill] sm:$0xff] %v9942_v12  ;;  %v6096_v44 = vld [vmem:[%s11460_s2 + $0xc] sm:$0x1]  ;;  %v11518_v33 = vand.u32 4294901760, %v9940_v36 }
 0x3f9   :  { %v2771_v0 = vrot.slane %v2705_v19, %v9727_v28 }
 0x3fa   :  { %12172 = vst [vmem:[#allocation47_spill] sm:$0xff] %v9924_v29 }
 0x3fb   :  { %v2797_v47 = vadd.f32 %v2771_v0, %v2749_v58  ;;  %v2796_v13 = vadd.f32 %v2771_v0, %v2748_v52  ;;  %v9955_v52 = vsub.f32 %v2857_v50, %v9924_v29  ;;  %v2863_v58 = vsel %vm1393_vm4, %v2822_v27, 0 }
 0x3fd   :  { %v2809_v45 = vsel %vm9125_vm13, %v2797_v47, 0.0  ;;  %v2808_v35 = vsel %vm9061_vm11, %v2796_v13, 0.0  ;;  %v2866_v47 = vsel %vm1393_vm4, %v2823_v48, 0  ;;  %v11517_v41 = vand.u32 4294901760, %v9955_v52  ;;  %v2825_v48 = vld [vmem:[%s11461_s3 + $0x38] sm:$0xff] }
 0x3fe   :  { %v9908_v1 = vand.u32 4294901760, %v2809_v45  ;;  %v9910_v49 = vand.u32 4294901760, %v2808_v35 }
 0x400   :  { %6430 = vmatprep.subr.mxu0 %v9908_v1  ;;  %v9919_v60 = vsub.f32 %v2809_v45, %v9908_v1  ;;  %v9922_v7 = vsub.f32 %v2808_v35, %v9910_v49  ;;  %v9962_v45 = vand.u32 4294901760, %v2863_v58  ;;  %v2824_v35 = vld [vmem:[%s11461_s3 + $0x30] sm:$0xff] }
 0x401   :  { %6431 = vmatpush3.msra.mxu0 %v9908_v1 }
 0x402   :  { %6432 = vmatprep.subr.mxu0 %v9910_v49  ;;  %v9933_v10 = vand.u32 4294901760, %v9919_v60  ;;  %v9936_v31 = vand.u32 4294901760, %v9922_v7  ;;  %12176 = vst [vmem:[#allocation51_spill] sm:$0xff] %v9962_v45 }
 0x403   :  { %v6860_v22 = vpop.eup %6859  ;;  %6433 = vmatpush3.msra.mxu0 %v9910_v49 }
 0x404   :  { %12173 = vst [vmem:[#allocation48_spill] sm:$0xff] %v9933_v10  ;;  %12174 = vst [vmem:[#allocation49_spill] sm:$0xff] %v9936_v31  ;;  %v2685_v53 = vmul.f32 %v6860_v22, %v6090_v34  ;;  %v3411_v51 = vsub.f32 %v9919_v60, %v9933_v10  ;;  %v3418_v19 = vsub.f32 %v9922_v7, %v9936_v31  ;;  %v2830_v31 = vld [vmem:[%s11461_s3 + $0x60] sm:$0xff] }
 0x406   :  { %v2698_v0 = vmul.f32 %v2685_v53, %v9699_v21  ;;  %v2719_v18 = vrot.slane %v2685_v53, %v9727_v28  ;;  %v3412_v3 = vand.u32 4294901760, %v3411_v51  ;;  %v3419_v50 = vand.u32 4294901760, %v3418_v19 }
 0x407   :  { %v9969_v21 = vsub.f32 %v2860_v55, %v9942_v12  ;;  %v9974_v53 = vand.u32 4294901760, %v2866_v47  ;;  %v3046_v19 = vsub.f32 %v9955_v52, %v11517_v41 }
 0x408   :  { %v2704_v13 = vsub.f32 %v6096_v44, %v2698_v0  ;;  %6502 = vmatprep.subr.mxu1 %v3412_v3  ;;  %v2746_v34 = vmul.f32 %v2719_v18, %v9639_v37  ;;  %v2747_v27 = vmul.f32 %v2719_v18, %v9644_v9  ;;  %v2869_v44 = vsel %vm1393_vm4, %v2824_v35, 0 }
 0x409   :  { %6503 = vmatpush3.msra.mxu1 %v3412_v3  ;;  %12177 = vst [vmem:[#allocation52_spill] sm:$0xff] %v9974_v53  ;;  %v3036_v37 = vsub.f32 %v9940_v36, %v11518_v33  ;;  %v9984_v9 = vsub.f32 %v2863_v58, %v9962_v45  ;;  %v11520_v0 = vand.u32 4294901760, %v9969_v21  ;;  %v2872_v18 = vsel %vm1393_vm4, %v2825_v48, 0  ;;  %v2826_v58 = vld [vmem:[%s11461_s3 + $0x40] sm:$0xff]  ;;  %v2828_v33 = vld [vmem:[%s11461_s3 + $0x50] sm:$0xff] }
 0x40a   :  { %v2767_v22 = vrot.slane %v2704_v13, %v9727_v28  ;;  %6504 = vmatprep.subr.mxu1 %v3419_v50  ;;  %v9996_v35 = vsub.f32 %v2866_v47, %v9974_v53  ;;  %v10008_v48 = vand.u32 4294901760, %v2872_v18  ;;  %v3047_v41 = vand.u32 4294901760, %v3046_v19 }
 0x40b   :  { %6505 = vmatpush3.msra.mxu1 %v3419_v50  ;;  %v9998_v50 = vand.u32 4294901760, %v2869_v44  ;;  %v11525_v14 = vand.u32 4294901760, %v9984_v9  ;;  %v3056_v47 = vsub.f32 %v9969_v21, %v11520_v0 }
 0x40c   :  { %v2795_v51 = vadd.f32 %v2767_v22, %v2747_v27  ;;  %v2794_v55 = vadd.f32 %v2767_v22, %v2746_v34  ;;  %v3037_v22 = vand.u32 4294901760, %v3036_v37  ;;  %12179 = vst [vmem:[#allocation54_spill] sm:$0xff] %v10008_v48  ;;  %v2875_v37 = vsel %vm1393_vm4, %v2826_v58, 0 }
 0x40d   :  { %12178 = vst [vmem:[#allocation53_spill] sm:$0xff] %v9998_v50  ;;  %v10027_v17 = vsub.f32 %v2869_v44, %v9998_v50  ;;  %v3066_v19 = vsub.f32 %v9984_v9, %v11525_v14  ;;  %v10042_v58 = vsub.f32 %v2872_v18, %v10008_v48  ;;  %v10044_v44 = vand.u32 4294901760, %v2875_v37  ;;  %v2829_v18 = vld [vmem:[%s11461_s3 + $0x58] sm:$0xff] }
 0x40e   :  { %v2807_v3 = vsel %vm9125_vm13, %v2795_v51, 0.0  ;;  %v2806_v13 = vsel %vm9061_vm11, %v2794_v55, 0.0  ;;  %v3057_v28 = vand.u32 4294901760, %v3056_v47  ;;  %v12183_v14 = vand.u32 4294901760, %v9996_v35 }
 0x40f   :  { %v10003_v34 = vand.u32 4294901760, %v2807_v3  ;;  %v10005_v27 = vand.u32 4294901760, %v2806_v13  ;;  %12182 = vst [vmem:[#allocation57_spill] sm:$0xff] %v10044_v44  ;;  %v3067_v10 = vand.u32 4294901760, %v3066_v19  ;;  %v11536_v40 = vand.u32 4294901760, %v10042_v58 }
 0x411   :  { %6434 = vmatprep.subr.mxu0 %v10003_v34  ;;  %v10018_v51 = vsub.f32 %v2807_v3, %v10003_v34  ;;  %v10021_v55 = vsub.f32 %v2806_v13, %v10005_v27  ;;  %v2878_v13 = vsel %vm1393_vm4, %v2827_v6, 0 }
 0x412   :  { %6435 = vmatpush3.msra.mxu0 %v10003_v34  ;;  %v10062_v47 = vand.u32 4294901760, %v2878_v13 }
 0x413   :  { %6436 = vmatprep.subr.mxu0 %v10005_v27  ;;  %v10031_v0 = vand.u32 4294901760, %v10018_v51  ;;  %v10034_v3 = vand.u32 4294901760, %v10021_v55 }
 0x414   :  { %6437 = vmatpush3.msra.mxu0 %v10005_v27  ;;  %12184 = vst [vmem:[#allocation58_spill] sm:$0xff] %v10062_v47 }
 0x415   :  { %12180 = vst [vmem:[#allocation55_spill] sm:$0xff] %v10031_v0  ;;  %12181 = vst [vmem:[#allocation56_spill] sm:$0xff] %v10034_v3  ;;  %6439 = vmatmul.mubr.f32.vlgmr.msra.gmra.mxu0 %v3037_v22  ;;  %6558 = vmatprep.subr.mxu0 %v9769_v62  ;;  %v3425_v6 = vsub.f32 %v10018_v51, %v10031_v0  ;;  %v3432_v8 = vsub.f32 %v10021_v55, %v10034_v3  ;;  %v2881_v3 = vsel %vm1393_vm4, %v2828_v33, 0 }
 0x416   :  { %6559 = vmatpush3.msra.mxu0 %v9769_v62  ;;  %6441 = vmatprep.mubr.f32.mxu0 %v3047_v41  ;;  %v3076_v22 = vsub.f32 %v9996_v35, %v12183_v14  ;;  %v10069_v62 = vsub.f32 %v2875_v37, %v10044_v44  ;;  %v2884_v41 = vsel %vm1393_vm4, %v2829_v18, 0  ;;  %v10080_v37 = vsub.f32 %v2878_v13, %v10062_v47 }
 0x417   :  { %6560 = vmatprep.subr.mxu0 %v9777_v63  ;;  %v3426_v0 = vand.u32 4294901760, %v3425_v6  ;;  %v3433_v14 = vand.u32 4294901760, %v3432_v8  ;;  %v10082_v6 = vand.u32 4294901760, %v2881_v3  ;;  %v10085_v8 = vand.u32 4294901760, %v2884_v41 }
 0x418   :  { %6561 = vmatpush3.msra.mxu0 %v9777_v63  ;;  %v3077_v33 = vand.u32 4294901760, %v3076_v22  ;;  %v12185_v63 = vand.u32 4294901760, %v10027_v17  ;;  %12186 = vst [vmem:[#allocation59_spill] sm:$0xff] %v10080_v37  ;;  %v11537_v13 = vand.u32 4294901760, %v10069_v62  ;;  %v2887_v18 = vsel %vm1393_vm4, %v2830_v31, 0 }
 0x419   :  { %6442 = vmatmul.mubr.f32.gmra.mxu0 %v3057_v28  ;;  %6506 = vmatprep.subr.mxu1 %v3426_v0  ;;  %12187 = vst [vmem:[#allocation60_spill] sm:$0xff] %v10082_v6  ;;  %12188 = vst [vmem:[#allocation61_spill] sm:$0xff] %v10085_v8  ;;  %v2831_v28 = vld [vmem:[%s11461_s3 + $0x68] sm:$0xff]  ;;  %v11538_v22 = vand.u32 4294901760, %v10080_v37  ;;  %v10111_v31 = vand.u32 4294901760, %v2887_v18 }
 0x41a   :  { %6562 = vmatprep.subr.mxu0 %v9797_v59  ;;  %6507 = vmatpush3.msra.mxu1 %v3426_v0  ;;  %v3086_v19 = vsub.f32 %v10027_v17, %v12185_v63  ;;  %v3096_v0 = vsub.f32 %v10042_v58, %v11536_v40  ;;  %v10100_v63 = vsub.f32 %v2881_v3, %v10082_v6  ;;  %v2832_v40 = vld [vmem:[%s11461_s3 + $0x70] sm:$0xff]  ;;  %v2833_v3 = vld [vmem:[%s11461_s3 + $0x78] sm:$0xff] }
 0x41b   :  { %6563 = vmatpush3.msra.mxu0 %v9797_v59  ;;  %6508 = vmatprep.subr.mxu1 %v3433_v14  ;;  %12191 = vst [vmem:[#allocation64_spill] sm:$0xff] %v10111_v31 }
 0x41c   :  { %6564 = vmatprep.subr.mxu0 %v9800_v20  ;;  %6444 = vmatprep.mubr.f32.mxu0 %v3067_v10  ;;  %v3087_v59 = vand.u32 4294901760, %v3086_v19  ;;  %12189 = vst [vmem:[#allocation62_spill] sm:$0xff] %v10100_v63  ;;  %v2890_v10 = vsel %vm1393_vm4, %v2831_v28, 0  ;;  %v2893_v19 = vsel %vm1393_vm4, %v2832_v40, 0 }
 0x41d   :  { %6509 = vmatpush3.msra.mxu1 %v3433_v14  ;;  %6565 = vmatpush3.msra.mxu0 %v9800_v20  ;;  %v10109_v20 = vsub.f32 %v2884_v41, %v10085_v8  ;;  %v3097_v14 = vand.u32 4294901760, %v3096_v0  ;;  %v10123_v41 = vand.u32 4294901760, %v2890_v10  ;;  %v2896_v0 = vsel %vm1393_vm4, %v2833_v3, 0  ;;  %v2835_v3 = vld [vmem:[%s11461_s3 + $0x88] sm:$0xff] }
 0x41e   :  { %6445 = vmatmul.mubr.f32.gmra.mxu0 %v3077_v33  ;;  %6511 = vmatmul.mubr.f32.vlgmr.msra.gmra.mxu1 %v9912_v42  ;;  %v3106_v33 = vsub.f32 %v10069_v62, %v11537_v13  ;;  %v2834_v13 = vld [vmem:[%s11461_s3 + $0x80] sm:$0xff]  ;;  %v10142_v28 = vand.u32 4294901760, %v2893_v19  ;;  %v10152_v40 = vand.u32 4294901760, %v2896_v0 }
 0x41f   :  { %6566 = vmatprep.subr.mxu0 %v9820_v54  ;;  %6630 = vmatprep.subr.mxu1 %v9760_v23  ;;  %12190 = vst [vmem:[#allocation63_spill] sm:$0xff] %v10109_v20  ;;  %12192 = vst [vmem:[#allocation67_spill] sm:$0xff] %v10123_v41 }
 0x420   :  { %6567 = vmatpush3.msra.mxu0 %v9820_v54  ;;  %6631 = vmatpush3.msra.mxu1 %v9760_v23  ;;  %v3116_v54 = vsub.f32 %v10080_v37, %v11538_v22  ;;  %v3107_v22 = vand.u32 4294901760, %v3106_v33  ;;  %12194 = vst [vmem:[#allocation69_spill] sm:$0xff] %v10142_v28  ;;  %12195 = vst [vmem:[#allocation70_spill] sm:$0xff] %v10152_v40  ;;  %v12196_v33 = vand.u32 4294901760, %v10100_v63 }
 0x421   :  { %6568 = vmatprep.subr.mxu0 %v9828_v16  ;;  %6632 = vmatprep.subr.mxu1 %v9762_v4 }
 0x422   :  { %6447 = vmatprep.mubr.f32.mxu0 %v3087_v59  ;;  %6513 = vmatprep.mubr.f32.mxu1 %v9924_v29  ;;  %v10139_v59 = vsub.f32 %v2887_v18, %v10111_v31  ;;  %v2899_v18 = vsel %vm1393_vm4, %v2834_v13, 0  ;;  %v2836_v29 = vld [vmem:[%s11461_s3 + $0x90] sm:$0xff] }
 0x423   :  { %6569 = vmatpush3.msra.mxu0 %v9828_v16  ;;  %6633 = vmatpush3.msra.mxu1 %v9762_v4  ;;  %v10150_v16 = vsub.f32 %v2890_v10, %v10123_v41  ;;  %v12197_v10 = vand.u32 4294901760, %v10109_v20  ;;  %v10174_v42 = vand.u32 4294901760, %v2899_v18 }
 0x424   :  { %12193 = vst [vmem:[#allocation68_spill] sm:$0xff] %v10139_v59  ;;  %6448 = vmatmul.mubr.f32.gmra.mxu0 %v3097_v14  ;;  %6514 = vmatmul.mubr.f32.gmra.mxu1 %v9942_v12  ;;  %v3117_v14 = vand.u32 4294901760, %v3116_v54  ;;  %v3126_v12 = vsub.f32 %v10100_v63, %v12196_v33  ;;  %v2902_v54 = vsel %vm1393_vm4, %v2835_v3, 0  ;;  %v10172_v33 = vsub.f32 %v2893_v19, %v10142_v28  ;;  %v2837_v63 = vld [vmem:[%s11461_s3 + $0x98] sm:$0xff]  ;;  %v2838_v19 = vld [vmem:[%s11461_s3 + $0xa0] sm:$0xff] }
 0x425   :  { %6570 = vmatprep.subr.mxu0 %v9864_v26  ;;  %6634 = vmatprep.subr.mxu1 %v9780_v57  ;;  %v3136_v13 = vsub.f32 %v10109_v20, %v12197_v10  ;;  %12199 = vst [vmem:[#allocation72_spill] sm:$0xff] %v10174_v42  ;;  %v10183_v3 = vsub.f32 %v2896_v0, %v10152_v40  ;;  %v12201_v0 = vand.u32 4294901760, %v10139_v59 }
 0x426   :  { %6571 = vmatpush3.msra.mxu0 %v9864_v26  ;;  %6635 = vmatpush3.msra.mxu1 %v9780_v57  ;;  %12198 = vst [vmem:[#allocation71_spill] sm:$0xff] %v10172_v33  ;;  %v3127_v26 = vand.u32 4294901760, %v3126_v12  ;;  %v2840_v12 = vld [vmem:[%s11461_s3 + $0xb0] sm:$0xff] }
 0x427   :  { %6572 = vmatprep.subr.mxu0 %v9867_v2  ;;  %6636 = vmatprep.subr.mxu1 %v9782_v25  ;;  %12200 = vst [vmem:[#allocation77_spill] sm:$0xff] %v10183_v3  ;;  %v3146_v10 = vsub.f32 %v10139_v59, %v12201_v0  ;;  %v12203_v59 = vand.u32 4294901760, %v10150_v16  ;;  %v2917_v37 = vsel %vm1393_vm4, %v2840_v12, 0 }
 0x428   :  { %6450 = vmatprep.mubr.f32.mxu0 %v3107_v22  ;;  %6516 = vmatprep.mubr.f32.mxu1 %v9962_v45  ;;  %v2905_v22 = vsel %vm1393_vm4, %v2836_v29, 0  ;;  %v10190_v45 = vand.u32 4294901760, %v2902_v54  ;;  %v2908_v29 = vsel %vm1393_vm4, %v2837_v63, 0  ;;  %v2911_v63 = vsel %vm1393_vm4, %v2838_v19, 0 }
 0x429   :  { %6573 = vmatpush3.msra.mxu0 %v9867_v2  ;;  %6637 = vmatpush3.msra.mxu1 %v9782_v25  ;;  %v3137_v2 = vand.u32 4294901760, %v3136_v13  ;;  %v10210_v0 = vand.u32 4294901760, %v2905_v22  ;;  %v3156_v20 = vsub.f32 %v10150_v16, %v12203_v59  ;;  %v10223_v13 = vand.u32 4294901760, %v2908_v29  ;;  %v2841_v59 = vld [vmem:[%s11461_s3 + $0xb8] sm:$0xff] }
 0x42a   :  { %6451 = vmatmul.mubr.f32.gmra.mxu0 %v3117_v14  ;;  %6517 = vmatmul.mubr.f32.gmra.mxu1 %v9974_v53  ;;  %v2839_v14 = vld [vmem:[%s11461_s3 + $0xa8] sm:$0xff]  ;;  %v10208_v53 = vsub.f32 %v2899_v18, %v10174_v42  ;;  %v10221_v18 = vsub.f32 %v2902_v54, %v10190_v45  ;;  %v12205_v54 = vand.u32 4294901760, %v10172_v33 }
 0x42b   :  { %6574 = vmatprep.subr.mxu0 %v9919_v60  ;;  %6638 = vmatprep.subr.mxu1 %v9803_v15  ;;  %v2914_v19 = vsel %vm1393_vm4, %v2839_v14, 0 }
 0x42c   :  { %6575 = vmatpush3.msra.mxu0 %v9919_v60  ;;  %6639 = vmatpush3.msra.mxu1 %v9803_v15  ;;  %12202 = vst [vmem:[#allocation78_spill] sm:$0xff] %v10208_v53  ;;  %12204 = vst [vmem:[#allocation79_spill] sm:$0xff] %v10221_v18  ;;  %v10229_v15 = vand.u32 4294901760, %v2911_v63  ;;  %v3166_v14 = vsub.f32 %v10172_v33, %v12205_v54  ;;  %v2842_v60 = vld [vmem:[%s11461_s3 + $0xc0] sm:$0xff]  ;;  %v2920_v33 = vsel %vm1393_vm4, %v2841_v59, 0  ;;  %v12210_v12 = vand.u32 4294901760, %v10208_v53 }
 0x42d   :  { %6576 = vmatprep.subr.mxu0 %v9922_v7  ;;  %6640 = vmatprep.subr.mxu1 %v9810_v30  ;;  %v2843_v59 = vld [vmem:[%s11461_s3 + $0xc8] sm:$0xff] }
 0x42e   :  { %6453 = vmatprep.mubr.f32.mxu0 %v3127_v26  ;;  %6519 = vmatprep.mubr.f32.mxu1 %v9998_v50  ;;  %v3147_v26 = vand.u32 4294901760, %v3146_v10  ;;  %v10249_v10 = vand.u32 4294901760, %v2917_v37  ;;  %v10258_v50 = vsub.f32 %v2908_v29, %v10223_v13  ;;  %v3186_v29 = vsub.f32 %v10208_v53, %v12210_v12 }
 0x42f   :  { %6577 = vmatpush3.msra.mxu0 %v9922_v7  ;;  %6641 = vmatpush3.msra.mxu1 %v9810_v30  ;;  %v10240_v7 = vsub.f32 %v2905_v22, %v10210_v0  ;;  %v12207_v22 = vand.u32 4294901760, %v10183_v3  ;;  %v2926_v53 = vsel %vm1393_vm4, %v2843_v59, 0 }
 0x430   :  { %6454 = vmatmul.mubr.f32.gmra.mxu0 %v3137_v2  ;;  %6520 = vmatmul.mubr.f32.gmra.mxu1 %v10008_v48  ;;  %v3157_v2 = vand.u32 4294901760, %v3156_v20  ;;  %v10247_v48 = vand.u32 4294901760, %v2914_v19  ;;  %12208 = vst [vmem:[#allocation81_spill] sm:$0xff] %v10258_v50  ;;  %v10264_v20 = vsub.f32 %v2911_v63, %v10229_v15  ;;  %v10324_v59 = vand.u32 4294901760, %v2926_v53 }
 0x431   :  { %12206 = vst [vmem:[#allocation80_spill] sm:$0xff] %v10240_v7  ;;  %6578 = vmatprep.subr.mxu0 %v10018_v51  ;;  %6642 = vmatprep.subr.mxu1 %v9858_v61  ;;  %v3176_v54 = vsub.f32 %v10183_v3, %v12207_v22  ;;  %v3167_v22 = vand.u32 4294901760, %v3166_v14  ;;  %v2844_v14 = vld [vmem:[%s11461_s3 + $0xd0] sm:$0xff] }
 0x432   :  { %6579 = vmatpush3.msra.mxu0 %v10018_v51  ;;  %6643 = vmatpush3.msra.mxu1 %v9858_v61  ;;  %12209 = vst [vmem:[#allocation82_spill] sm:$0xff] %v10264_v20  ;;  %v2923_v51 = vsel %vm1393_vm4, %v2842_v60, 0  ;;  %v10278_v63 = vsub.f32 %v2914_v19, %v10247_v48  ;;  %v10281_v60 = vsub.f32 %v2917_v37, %v10249_v10  ;;  %v2929_v19 = vsel %vm1393_vm4, %v2844_v14, 0 }
 0x433   :  { %6580 = vmatprep.subr.mxu0 %v10021_v55  ;;  %6644 = vmatprep.subr.mxu1 %v9860_v11  ;;  %v3177_v12 = vand.u32 4294901760, %v3176_v54  ;;  %v12214_v54 = vand.u32 4294901760, %v10240_v7 }
 0x434   :  { %6456 = vmatprep.mubr.f32.mxu0 %v3147_v26  ;;  %6522 = vmatprep.mubr.f32.mxu1 %v10044_v44  ;;  %12211 = vst [vmem:[#allocation83_spill] sm:$0xff] %v10278_v63  ;;  %12212 = vst [vmem:[#allocation84_spill] sm:$0xff] %v10281_v60  ;;  %v10283_v26 = vand.u32 4294901760, %v2920_v33  ;;  %v10293_v44 = vand.u32 4294901760, %v2923_v51 }
 0x435   :  { %6581 = vmatpush3.msra.mxu0 %v10021_v55  ;;  %6645 = vmatpush3.msra.mxu1 %v9860_v11  ;;  %v12213_v55 = vand.u32 4294901760, %v10221_v18 }
 0x436   :  { %6457 = vmatmul.mubr.f32.gmra.mxu0 %v3157_v2  ;;  %6523 = vmatmul.mubr.f32.gmra.mxu1 %v10062_v47  ;;  %v3187_v2 = vand.u32 4294901760, %v3186_v29  ;;  %v2845_v47 = vld [vmem:[%s11461_s3 + $0xd8] sm:$0xff]  ;;  %v2846_v29 = vld [vmem:[%s11461_s3 + $0xe0] sm:$0xff] }
 0x437   :  { %v3196_v3 = vsub.f32 %v10221_v18, %v12213_v55  ;;  %6646 = vmatprep.subr.mxu1 %v9908_v1  ;;  %6702 = vmatprep.subr.mxu0 %v9785_v32  ;;  %v3206_v55 = vsub.f32 %v10240_v7, %v12214_v54  ;;  %v12215_v54 = vand.u32 4294901760, %v10258_v50  ;;  %v10331_v18 = vand.u32 4294901760, %v2929_v19 }
 0x438   :  { %6647 = vmatpush3.msra.mxu1 %v9908_v1  ;;  %6459 = vmatprep.mubr.f32.mxu0 %v3167_v22  ;;  %v10312_v22 = vsub.f32 %v2920_v33, %v10283_v26  ;;  %v12216_v33 = vand.u32 4294901760, %v10264_v20 }
 0x439   :  { %6648 = vmatprep.subr.mxu1 %v9910_v49  ;;  %6525 = vmatprep.mubr.f32.mxu1 %v10082_v6  ;;  %v3197_v14 = vand.u32 4294901760, %v3196_v3  ;;  %v3216_v7 = vsub.f32 %v10258_v50, %v12215_v54  ;;  %v10322_v6 = vsub.f32 %v2923_v51, %v10293_v44  ;;  %v2932_v3 = vsel %vm1393_vm4, %v2845_v47, 0  ;;  %v2847_v54 = vld [vmem:[%s11461_s3 + $0xe8] sm:$0xff] }
 0x43a   :  { %6649 = vmatpush3.msra.mxu1 %v9910_v49  ;;  %6460 = vmatmul.mubr.f32.gmra.mxu0 %v3177_v12  ;;  %v3226_v37 = vsub.f32 %v10264_v20, %v12216_v33  ;;  %v3207_v12 = vand.u32 4294901760, %v3206_v55  ;;  %v2935_v51 = vsel %vm1393_vm4, %v2846_v29, 0  ;;  %v12217_v33 = vand.u32 4294901760, %v10278_v63  ;;  %v2848_v55 = vld [vmem:[%s11461_s3 + $0xf0] sm:$0xff] }
 0x43b   :  { %6526 = vmatmul.mubr.f32.gmra.mxu1 %v10085_v8  ;;  %6650 = vmatprep.subr.mxu1 %v10003_v34  ;;  %v12218_v47 = vand.u32 4294901760, %v10281_v60  ;;  %v3217_v29 = vand.u32 4294901760, %v3216_v7  ;;  %v10354_v50 = vsub.f32 %v2926_v53, %v10324_v59  ;;  %v2941_v53 = vsel %vm1393_vm4, %v2848_v55, 0  ;;  %v2849_v7 = vld [vmem:[%s11461_s3 + $0xf8] sm:$0xff] }
 0x43c   :  { %6651 = vmatpush3.msra.mxu1 %v10003_v34  ;;  %6462 = vmatprep.mubr.f32.mxu0 %v3187_v2  ;;  %v3236_v8 = vsub.f32 %v10278_v63, %v12217_v33  ;;  %v10356_v33 = vand.u32 4294901760, %v2932_v3  ;;  %v10361_v2 = vsub.f32 %v2929_v19, %v10331_v18  ;;  %v12220_v63 = vand.u32 4294901760, %v10322_v6 }
 0x43d   :  { %6652 = vmatprep.subr.mxu1 %v10005_v27  ;;  %6528 = vmatprep.mubr.f32.mxu1 %v10111_v31  ;;  %v3246_v20 = vsub.f32 %v10281_v60, %v12218_v47  ;;  %v3227_v47 = vand.u32 4294901760, %v3226_v37  ;;  %v10363_v60 = vand.u32 4294901760, %v2935_v51  ;;  %v12219_v37 = vand.u32 4294901760, %v10312_v22 }
 0x43e   :  { %6653 = vmatpush3.msra.mxu1 %v10005_v27  ;;  %6463 = vmatmul.mubr.f32.gmra.mxu0 %v3197_v14  ;;  %v2938_v14 = vsel %vm1393_vm4, %v2847_v54, 0  ;;  %v3237_v31 = vand.u32 4294901760, %v3236_v8  ;;  %v3266_v54 = vsub.f32 %v10322_v6, %v12220_v63 }
 0x43f   :  { %6529 = vmatmul.mubr.f32.gmra.mxu1 %v10123_v41  ;;  %6774 = vmatprep.subr.mxu1 %v9760_v23  ;;  %v3247_v41 = vand.u32 4294901760, %v3246_v20  ;;  %v3256_v19 = vsub.f32 %v10312_v22, %v12219_v37  ;;  %v10381_v55 = vand.u32 4294901760, %v2938_v14  ;;  %v10386_v20 = vsub.f32 %v2935_v51, %v10363_v60 }
 0x440   :  { %6465 = vmatprep.mubr.f32.mxu0 %v3207_v12  ;;  %6531 = vmatprep.mubr.f32.mxu1 %v10142_v28  ;;  %v11599_v12 = vand.u32 4294901760, %v10354_v50  ;;  %v10379_v28 = vsub.f32 %v2932_v3, %v10356_v33  ;;  %v2944_v37 = vsel %vm1393_vm4, %v2849_v7, 0  ;;  %v3267_v51 = vand.u32 4294901760, %v3266_v54 }
 0x441   :  { %v3257_v63 = vand.u32 4294901760, %v3256_v19  ;;  %v10399_v8 = vand.u32 4294901760, %v2944_v37  ;;  %v12221_v7 = vand.u32 4294901760, %v10361_v2 }
 0x442   :  { %6466 = vmatmul.mubr.f32.gmra.mxu0 %v3217_v29  ;;  %v10388_v29 = vand.u32 4294901760, %v2941_v53  ;;  %v3276_v3 = vsub.f32 %v10354_v50, %v11599_v12 }
 0x443   :  { %6532 = vmatmul.mubr.f32.gmra.mxu1 %v10152_v40  ;;  %6468 = vmatprep.mubr.f32.mxu0 %v3227_v47  ;;  %v11600_v40 = vand.u32 4294901760, %v10379_v28  ;;  %v10397_v47 = vsub.f32 %v2938_v14, %v10381_v55  ;;  %v3286_v19 = vsub.f32 %v10361_v2, %v12221_v7  ;;  %v10415_v54 = vsub.f32 %v2944_v37, %v10399_v8 }
 0x444   :  { %6534 = vmatprep.mubr.f32.mxu1 %v10174_v42  ;;  %v10407_v42 = vsub.f32 %v2941_v53, %v10388_v29  ;;  %v3277_v14 = vand.u32 4294901760, %v3276_v3 }
 0x445   :  { %v3296_v12 = vsub.f32 %v10379_v28, %v11600_v40  ;;  %v3287_v7 = vand.u32 4294901760, %v3286_v19  ;;  %v3335_v37 = vand.u32 4294901760, %v10415_v54 }
 0x446   :  { %6469 = vmatmul.mubr.f32.gmra.mxu0 %v3237_v31  ;;  %v11601_v31 = vand.u32 4294901760, %v10386_v20 }
 0x447   :  { %6535 = vmatmul.mubr.f32.gmra.mxu1 %v10190_v45  ;;  %6471 = vmatprep.mubr.f32.mxu0 %v3247_v41  ;;  %v3315_v41 = vand.u32 4294901760, %v10397_v47  ;;  %v3297_v3 = vand.u32 4294901760, %v3296_v12  ;;  %v3336_v12 = vsub.f32 %v10415_v54, %v3335_v37 }
 0x448   :  { %6537 = vmatprep.mubr.f32.mxu1 %v10210_v0  ;;  %v3306_v53 = vsub.f32 %v10386_v20, %v11601_v31 }
 0x449   :  { %v3316_v40 = vsub.f32 %v10397_v47, %v3315_v41 }
 0x44a   :  { %6472 = vmatmul.mubr.f32.gmra.mxu0 %v3257_v63  ;;  %v3325_v63 = vand.u32 4294901760, %v10407_v42 }
 0x44b   :  { %6538 = vmatmul.mubr.f32.gmra.mxu1 %v10223_v13  ;;  %6474 = vmatprep.mubr.f32.mxu0 %v3267_v51  ;;  %v3307_v51 = vand.u32 4294901760, %v3306_v53  ;;  %v3317_v31 = vand.u32 4294901760, %v3316_v40  ;;  %v12248_v53 = vld [vmem:[#allocation79_spill] sm:$0xff] }
 0x44c   :  { %6540 = vmatprep.mubr.f32.mxu1 %v10229_v15  ;;  %v3326_v19 = vsub.f32 %v10407_v42, %v3325_v63 }
 0x44e   :  { %6475 = vmatmul.mubr.f32.gmra.mxu0 %v3277_v14  ;;  %v3327_v14 = vand.u32 4294901760, %v3326_v19  ;;  %v12252_v19 = vld [vmem:[#allocation81_spill] sm:$0xff] }
 0x44f   :  { %6541 = vmatmul.mubr.f32.gmra.mxu1 %v10247_v48  ;;  %6477 = vmatprep.mubr.f32.mxu0 %v3287_v7  ;;  %v3337_v7 = vand.u32 4294901760, %v3336_v12  ;;  %v12254_v12 = vld [vmem:[#allocation82_spill] sm:$0xff] }
 0x450   :  { %6543 = vmatprep.mubr.f32.mxu1 %v10249_v10 }
 0x452   :  { %6478 = vmatmul.mubr.f32.gmra.mxu0 %v3297_v3  ;;  %v12250_v3 = vld [vmem:[#allocation80_spill] sm:$0xff] }
 0x453   :  { %6544 = vmatmul.mubr.f32.gmra.mxu1 %v10283_v26  ;;  %6480 = vmatprep.mubr.f32.mxu0 %v3307_v51 }
 0x454   :  { %6546 = vmatprep.mubr.f32.mxu1 %v10293_v44 }
 0x456   :  { %6481 = vmatmul.mubr.f32.gmra.mxu0 %v3317_v31  ;;  %v12246_v31 = vld [vmem:[#allocation78_spill] sm:$0xff] }
 0x457   :  { %6547 = vmatmul.mubr.f32.gmra.mxu1 %v10324_v59  ;;  %6483 = vmatprep.mubr.f32.mxu0 %v3327_v14  ;;  %v12255_v14 = vand.u32 4294901760, %v12246_v31 }
 0x458   :  { %6549 = vmatprep.mubr.f32.mxu1 %v10331_v18 }
 0x45a   :  { %6484 = vmatmul.mubr.f32.gmra.mxu0 %v3337_v7  ;;  %v12258_v7 = vld [vmem:[#allocation84_spill] sm:$0xff] }
 0x45b   :  { %6550 = vmatmul.mubr.f32.gmra.mxu1 %v10356_v33  ;;  %6582 = vmatprep.mubr.f32.mxu0 %v9716_v39 }
 0x45c   :  { %6552 = vmatprep.mubr.f32.mxu1 %v10363_v60 }
 0x45e   :  { %6583 = vmatmul.mubr.f32.vlgmr.msra.gmra.mxu0 %v9940_v36 }
 0x45f   :  { %6553 = vmatmul.mubr.f32.gmra.mxu1 %v10381_v55  ;;  %6703 = vmatpush3.msra.mxu0 %v9785_v32  ;;  %v12222_v32 = vand.u32 4294901760, %v9716_v39  ;;  %v12224_v39 = vand.u32 4294901760, %v9955_v52 }
 0x460   :  { %6704 = vmatprep.subr.mxu0 %v9789_v46  ;;  %6555 = vmatprep.mubr.f32.mxu1 %v10388_v29 }
 0x461   :  { %6705 = vmatpush3.msra.mxu0 %v9789_v46  ;;  %6585 = vmatprep.mubr.f32.mxu0 %v9955_v52  ;;  %v12223_v46 = vand.u32 4294901760, %v9940_v36  ;;  %v12234_v36 = vand.u32 4294901760, %v10027_v17  ;;  %v12235_v52 = vld [vmem:[#allocation55_spill] sm:$0xff] }
 0x462   :  { %6706 = vmatprep.subr.mxu0 %v9813_v43  ;;  %6586 = vmatmul.mubr.f32.gmra.mxu0 %v9969_v21 }
 0x463   :  { %6556 = vmatmul.mubr.f32.gmra.mxu1 %v10399_v8  ;;  %6707 = vmatpush3.msra.mxu0 %v9813_v43  ;;  %v12226_v43 = vld [vmem:[#allocation45_spill] sm:$0xff] }
 0x464   :  { %6708 = vmatprep.subr.mxu0 %v9816_v24  ;;  %6588 = vmatprep.mubr.f32.mxu0 %v9984_v9 }
 0x465   :  { %6709 = vmatpush3.msra.mxu0 %v9816_v24  ;;  %6654 = vmatprep.mubr.f32.mxu1 %v12222_v32  ;;  %v12228_v24 = vld [vmem:[#allocation48_spill] sm:$0xff]  ;;  %v12259_v32 = vand.u32 4294901760, %v12250_v3 }
 0x466   :  { %6710 = vmatprep.subr.mxu0 %v9832_v5  ;;  %6589 = vmatmul.mubr.f32.gmra.mxu0 %v9996_v35 }
 0x467   :  { %6655 = vmatmul.mubr.f32.vlgmr.msra.gmra.mxu1 %v12223_v46  ;;  %6711 = vmatpush3.msra.mxu0 %v9832_v5  ;;  %v12229_v5 = vld [vmem:[#allocation44_spill] sm:$0xff]  ;;  %v12260_v46 = vand.u32 4294901760, %v12252_v19 }
 0x468   :  { %6775 = vmatpush3.msra.mxu1 %v9760_v23  ;;  %6712 = vmatprep.subr.mxu0 %v9836_v56  ;;  %v12225_v23 = vand.u32 4294901760, %v9969_v21  ;;  %v12236_v21 = vld [vmem:[#allocation63_spill] sm:$0xff] }
 0x469   :  { %6776 = vmatprep.subr.mxu1 %v9762_v4  ;;  %6713 = vmatpush3.msra.mxu0 %v9836_v56  ;;  %v12230_v56 = vld [vmem:[#allocation59_spill] sm:$0xff]  ;;  %v12245_v40 = vand.u32 4294901760, %v12236_v21 }
 0x46a   :  { %6777 = vmatpush3.msra.mxu1 %v9762_v4  ;;  %6591 = vmatprep.mubr.f32.mxu0 %v10027_v17  ;;  %v12227_v4 = vand.u32 4294901760, %v9984_v9  ;;  %v12237_v9 = vand.u32 4294901760, %v10042_v58  ;;  %v12239_v17 = vld [vmem:[#allocation68_spill] sm:$0xff] }
 0x46b   :  { %6657 = vmatprep.mubr.f32.mxu1 %v12224_v39  ;;  %6714 = vmatprep.subr.mxu0 %v9872_v38  ;;  %v12261_v39 = vand.u32 4294901760, %v12254_v12 }
 0x46c   :  { %6778 = vmatprep.subr.mxu1 %v9780_v57  ;;  %6592 = vmatmul.mubr.f32.gmra.mxu0 %v10042_v58  ;;  %v12241_v58 = vand.u32 4294901760, %v12230_v56 }
 0x46d   :  { %6658 = vmatmul.mubr.f32.gmra.mxu1 %v12225_v23  ;;  %6715 = vmatpush3.msra.mxu0 %v9872_v38  ;;  %v12232_v38 = vld [vmem:[#allocation49_spill] sm:$0xff] }
 0x46e   :  { %6779 = vmatpush3.msra.mxu1 %v9780_v57  ;;  %6716 = vmatprep.subr.mxu0 %v12226_v43  ;;  %v12231_v57 = vand.u32 4294901760, %v9996_v35  ;;  %v12238_v35 = vld [vmem:[#allocation56_spill] sm:$0xff] }
 0x46f   :  { %6780 = vmatprep.subr.mxu1 %v9782_v25  ;;  %6717 = vmatpush3.msra.mxu0 %v12226_v43  ;;  %v12263_v43 = vand.u32 4294901760, %v12258_v7 }
 0x470   :  { %6781 = vmatpush3.msra.mxu1 %v9782_v25  ;;  %6594 = vmatprep.mubr.f32.mxu0 %v10069_v62  ;;  %v12233_v25 = vld [vmem:[#allocation62_spill] sm:$0xff] }
 0x471   :  { %6660 = vmatprep.mubr.f32.mxu1 %v12227_v4  ;;  %6718 = vmatprep.subr.mxu0 %v12228_v24  ;;  %v12264_v4 = vand.u32 4294901760, %v10312_v22 }
 0x472   :  { %6782 = vmatprep.subr.mxu1 %v12229_v5  ;;  %6595 = vmatmul.mubr.f32.gmra.mxu0 %v12230_v56  ;;  %v12267_v56 = vand.u32 4294901760, %v10361_v2 }
 0x473   :  { %6661 = vmatmul.mubr.f32.gmra.mxu1 %v12231_v57  ;;  %6719 = vmatpush3.msra.mxu0 %v12228_v24  ;;  %v12265_v24 = vand.u32 4294901760, %v10322_v6  ;;  %v12269_v57 = vld [vmem:[#allocation42_spill] sm:$0xff] }
 0x474   :  { %6783 = vmatpush3.msra.mxu1 %v12229_v5  ;;  %6720 = vmatprep.subr.mxu0 %v12232_v38  ;;  %v12266_v5 = vand.u32 4294901760, %v10354_v50 }
 0x475   :  { %6784 = vmatprep.subr.mxu1 %v9810_v30  ;;  %6721 = vmatpush3.msra.mxu0 %v12232_v38  ;;  %v12271_v38 = vld [vmem:[#allocation46_spill] sm:$0xff] }
 0x476   :  { %6785 = vmatpush3.msra.mxu1 %v9810_v30  ;;  %6597 = vmatprep.mubr.f32.mxu0 %v12233_v25  ;;  %v12240_v30 = vand.u32 4294901760, %v10069_v62  ;;  %v12244_v62 = vld [vmem:[#allocation77_spill] sm:$0xff] }
 0x477   :  { %6663 = vmatprep.mubr.f32.mxu1 %v12234_v36  ;;  %6722 = vmatprep.subr.mxu0 %v12235_v52  ;;  %v12283_v36 = vld [vmem:[#allocation67_spill] sm:$0xff] }
 0x478   :  { %6786 = vmatprep.subr.mxu1 %v9858_v61  ;;  %6598 = vmatmul.mubr.f32.gmra.mxu0 %v12236_v21  ;;  %v12285_v21 = vld [vmem:[#allocation70_spill] sm:$0xff] }
 0x479   :  { %6664 = vmatmul.mubr.f32.gmra.mxu1 %v12237_v9  ;;  %6723 = vmatpush3.msra.mxu0 %v12235_v52  ;;  %v12284_v52 = vld [vmem:[#allocation69_spill] sm:$0xff]  ;;  %v12286_v9 = vld [vmem:[#allocation72_spill] sm:$0xff] }
 0x47a   :  { %6787 = vmatpush3.msra.mxu1 %v9858_v61  ;;  %6724 = vmatprep.subr.mxu0 %v12238_v35  ;;  %v12242_v61 = vld [vmem:[#allocation71_spill] sm:$0xff] }
 0x47b   :  { %6788 = vmatprep.subr.mxu1 %v9860_v11  ;;  %6725 = vmatpush3.msra.mxu0 %v12238_v35  ;;  %v12251_v51 = vand.u32 4294901760, %v12242_v61 }
 0x47c   :  { %6789 = vmatpush3.msra.mxu1 %v9860_v11  ;;  %6600 = vmatprep.mubr.f32.mxu0 %v12239_v17  ;;  %v12243_v11 = vand.u32 4294901760, %v12233_v25  ;;  %v12282_v25 = vld [vmem:[#allocation64_spill] sm:$0xff] }
 0x47d   :  { %6666 = vmatprep.mubr.f32.mxu1 %v12240_v30  ;;  %6790 = vmatprep.subr.mxu1 %v9908_v1 }
 0x47e   :  { %6601 = vmatmul.mubr.f32.gmra.mxu0 %v10150_v16  ;;  %6667 = vmatmul.mubr.f32.gmra.mxu1 %v12241_v58 }
 0x47f   :  { %6791 = vmatpush3.msra.mxu1 %v9908_v1  ;;  %6603 = vmatprep.mubr.f32.mxu0 %v12242_v61  ;;  %v12247_v1 = vand.u32 4294901760, %v12239_v17 }
 0x480   :  { %6792 = vmatprep.subr.mxu1 %v9910_v49  ;;  %6669 = vmatprep.mubr.f32.mxu1 %v12243_v11 }
 0x481   :  { %6793 = vmatpush3.msra.mxu1 %v9910_v49  ;;  %v12249_v49 = vand.u32 4294901760, %v10150_v16  ;;  %v12257_v16 = vand.u32 4294901760, %v12248_v53 }
 0x482   :  { %6794 = vmatprep.subr.mxu1 %v10003_v34  ;;  %6604 = vmatmul.mubr.f32.gmra.mxu0 %v12244_v62 }
 0x483   :  { %6670 = vmatmul.mubr.f32.gmra.mxu1 %v12245_v40  ;;  %6606 = vmatprep.mubr.f32.mxu0 %v12246_v31 }
 0x484   :  { %6795 = vmatpush3.msra.mxu1 %v10003_v34  ;;  %6672 = vmatprep.mubr.f32.mxu1 %v12247_v1  ;;  %v12253_v34 = vand.u32 4294901760, %v12244_v62 }
 0x485   :  { %6796 = vmatprep.subr.mxu1 %v10005_v27 }
 0x486   :  { %6797 = vmatpush3.msra.mxu1 %v10005_v27  ;;  %6607 = vmatmul.mubr.f32.gmra.mxu0 %v12248_v53  ;;  %v12256_v27 = vld [vmem:[#allocation83_spill] sm:$0xff] }
 0x487   :  { %6673 = vmatmul.mubr.f32.gmra.mxu1 %v12249_v49  ;;  %6609 = vmatprep.mubr.f32.mxu0 %v12250_v3  ;;  %v12262_v23 = vand.u32 4294901760, %v12256_v27 }
 0x488   :  { %6675 = vmatprep.mubr.f32.mxu1 %v12251_v51 }
 0x48a   :  { %6610 = vmatmul.mubr.f32.gmra.mxu0 %v12252_v19 }
 0x48b   :  { %6676 = vmatmul.mubr.f32.gmra.mxu1 %v12253_v34  ;;  %6612 = vmatprep.mubr.f32.mxu0 %v12254_v12 }
 0x48c   :  { %6678 = vmatprep.mubr.f32.mxu1 %v12255_v14 }
 0x48e   :  { %6613 = vmatmul.mubr.f32.gmra.mxu0 %v12256_v27 }
 0x48f   :  { %6679 = vmatmul.mubr.f32.gmra.mxu1 %v12257_v16  ;;  %6615 = vmatprep.mubr.f32.mxu0 %v12258_v7 }
 0x490   :  { %6681 = vmatprep.mubr.f32.mxu1 %v12259_v32 }
 0x492   :  { %6616 = vmatmul.mubr.f32.gmra.mxu0 %v10312_v22  ;;  %v12268_v22 = vand.u32 4294901760, %v10379_v28 }
 0x493   :  { %6682 = vmatmul.mubr.f32.gmra.mxu1 %v12260_v46  ;;  %6618 = vmatprep.mubr.f32.mxu0 %v10322_v6  ;;  %v12270_v6 = vand.u32 4294901760, %v10386_v20 }
 0x494   :  { %6684 = vmatprep.mubr.f32.mxu1 %v12261_v39 }
 0x496   :  { %6619 = vmatmul.mubr.f32.gmra.mxu0 %v10354_v50  ;;  %v12272_v50 = vld [vmem:[#allocation47_spill] sm:$0xff] }
 0x497   :  { %6685 = vmatmul.mubr.f32.gmra.mxu1 %v12262_v23  ;;  %6621 = vmatprep.mubr.f32.mxu0 %v10361_v2  ;;  %v12273_v2 = vld [vmem:[#allocation50_spill] sm:$0xff] }
 0x498   :  { %6687 = vmatprep.mubr.f32.mxu1 %v12263_v43 }
 0x49a   :  { %6622 = vmatmul.mubr.f32.gmra.mxu0 %v10379_v28  ;;  %v12274_v28 = vld [vmem:[#allocation51_spill] sm:$0xff] }
 0x49b   :  { %6688 = vmatmul.mubr.f32.gmra.mxu1 %v12264_v4  ;;  %6624 = vmatprep.mubr.f32.mxu0 %v10386_v20  ;;  %v12275_v20 = vld [vmem:[#allocation52_spill] sm:$0xff] }
 0x49c   :  { %6690 = vmatprep.mubr.f32.mxu1 %v12265_v24 }
 0x49e   :  { %6625 = vmatmul.mubr.f32.gmra.mxu0 %v10397_v47  ;;  %v12276_v47 = vld [vmem:[#allocation53_spill] sm:$0xff] }
 0x49f   :  { %6691 = vmatmul.mubr.f32.gmra.mxu1 %v12266_v5  ;;  %6627 = vmatprep.mubr.f32.mxu0 %v10407_v42  ;;  %v12278_v42 = vld [vmem:[#allocation57_spill] sm:$0xff] }
 0x4a0   :  { %6693 = vmatprep.mubr.f32.mxu1 %v12267_v56 }
 0x4a2   :  { %6628 = vmatmul.mubr.f32.gmra.mxu0 %v10415_v54  ;;  %v12279_v54 = vld [vmem:[#allocation58_spill] sm:$0xff] }
 0x4a3   :  { %6694 = vmatmul.mubr.f32.gmra.mxu1 %v12268_v22  ;;  %6726 = vmatprep.mubr.f32.mxu0 %v12269_v57 }
 0x4a4   :  { %6696 = vmatprep.mubr.f32.mxu1 %v12270_v6 }
 0x4a6   :  { %6727 = vmatmul.mubr.f32.vlgmr.msra.gmra.mxu0 %v12271_v38 }
 0x4a7   :  { %6697 = vmatmul.mubr.f32.gmra.mxu1 %v3315_v41  ;;  %6729 = vmatprep.mubr.f32.mxu0 %v12272_v50  ;;  %v12277_v41 = vld [vmem:[#allocation54_spill] sm:$0xff] }
 0x4a8   :  { %6699 = vmatprep.mubr.f32.mxu1 %v3325_v63  ;;  %v12280_v63 = vld [vmem:[#allocation60_spill] sm:$0xff] }
 0x4aa   :  { %6730 = vmatmul.mubr.f32.gmra.mxu0 %v12273_v2 }
 0x4ab   :  { %6700 = vmatmul.mubr.f32.gmra.mxu1 %v3335_v37  ;;  %6732 = vmatprep.mubr.f32.mxu0 %v12274_v28  ;;  %v12281_v37 = vld [vmem:[#allocation61_spill] sm:$0xff] }
 0x4ac   :  { %6798 = vmatprep.mubr.f32.mxu1 %v12269_v57 }
 0x4ae   :  { %6733 = vmatmul.mubr.f32.gmra.mxu0 %v12275_v20 }
 0x4af   :  { %6799 = vmatmul.mubr.f32.vlgmr.msra.gmra.mxu1 %v12271_v38  ;;  %6735 = vmatprep.mubr.f32.mxu0 %v12276_v47 }
 0x4b0   :  { %6801 = vmatprep.mubr.f32.mxu1 %v12272_v50 }
 0x4b2   :  { %6736 = vmatmul.mubr.f32.gmra.mxu0 %v12277_v41 }
 0x4b3   :  { %6802 = vmatmul.mubr.f32.gmra.mxu1 %v12273_v2  ;;  %6738 = vmatprep.mubr.f32.mxu0 %v12278_v42 }
 0x4b4   :  { %6804 = vmatprep.mubr.f32.mxu1 %v12274_v28 }
 0x4b6   :  { %6739 = vmatmul.mubr.f32.gmra.mxu0 %v12279_v54 }
 0x4b7   :  { %6805 = vmatmul.mubr.f32.gmra.mxu1 %v12275_v20  ;;  %6741 = vmatprep.mubr.f32.mxu0 %v12280_v63 }
 0x4b8   :  { %6807 = vmatprep.mubr.f32.mxu1 %v12276_v47 }
 0x4ba   :  { %6742 = vmatmul.mubr.f32.gmra.mxu0 %v12281_v37 }
 0x4bb   :  { %6808 = vmatmul.mubr.f32.gmra.mxu1 %v12277_v41  ;;  %6744 = vmatprep.mubr.f32.mxu0 %v12282_v25 }
 0x4bc   :  { %6810 = vmatprep.mubr.f32.mxu1 %v12278_v42 }
 0x4be   :  { %6745 = vmatmul.mubr.f32.gmra.mxu0 %v12283_v36 }
 0x4bf   :  { %6811 = vmatmul.mubr.f32.gmra.mxu1 %v12279_v54  ;;  %6747 = vmatprep.mubr.f32.mxu0 %v12284_v52 }
 0x4c0   :  { %6813 = vmatprep.mubr.f32.mxu1 %v12280_v63 }
 0x4c2   :  { %6748 = vmatmul.mubr.f32.gmra.mxu0 %v12285_v21 }
 0x4c3   :  { %6814 = vmatmul.mubr.f32.gmra.mxu1 %v12281_v37  ;;  %6750 = vmatprep.mubr.f32.mxu0 %v12286_v9 }
 0x4c4   :  { %6816 = vmatprep.mubr.f32.mxu1 %v12282_v25 }
 0x4c6   :  { %6751 = vmatmul.mubr.f32.gmra.mxu0 %v10190_v45 }
 0x4c7   :  { %6817 = vmatmul.mubr.f32.gmra.mxu1 %v12283_v36  ;;  %6753 = vmatprep.mubr.f32.mxu0 %v10210_v0 }
 0x4c8   :  { %6819 = vmatprep.mubr.f32.mxu1 %v12284_v52 }
 0x4ca   :  { %6754 = vmatmul.mubr.f32.gmra.mxu0 %v10223_v13 }
 0x4cb   :  { %6820 = vmatmul.mubr.f32.gmra.mxu1 %v12285_v21  ;;  %6756 = vmatprep.mubr.f32.mxu0 %v10229_v15 }
 0x4cc   :  { %6822 = vmatprep.mubr.f32.mxu1 %v12286_v9 }
 0x4ce   :  { %6757 = vmatmul.mubr.f32.gmra.mxu0 %v10247_v48 }
 0x4cf   :  { %6823 = vmatmul.mubr.f32.gmra.mxu1 %v10190_v45  ;;  %6759 = vmatprep.mubr.f32.mxu0 %v10249_v10 }
 0x4d0   :  { %6825 = vmatprep.mubr.f32.mxu1 %v10210_v0 }
 0x4d2   :  { %6760 = vmatmul.mubr.f32.gmra.mxu0 %v10283_v26 }
 0x4d3   :  { %6826 = vmatmul.mubr.f32.gmra.mxu1 %v10223_v13  ;;  %6762 = vmatprep.mubr.f32.mxu0 %v10293_v44 }
 0x4d4   :  { %6828 = vmatprep.mubr.f32.mxu1 %v10229_v15 }
 0x4d5   :  { %v6440_v35 = vpop.f32.mrf.mxu0 }
 0x4d6   :  { %6763 = vmatmul.mubr.f32.gmra.mxu0 %v10324_v59 }
 0x4d7   :  { %6829 = vmatmul.mubr.f32.gmra.mxu1 %v10247_v48  ;;  %6765 = vmatprep.mubr.f32.mxu0 %v10331_v18  ;;  %v3029_v45 = vpop.f32.mrf.mxu0 }
 0x4d8   :  { %6831 = vmatprep.mubr.f32.mxu1 %v10249_v10 }
 0x4d9   :  { %v6443_v17 = vpop.f32.mrf.mxu0 }
 0x4da   :  { %6766 = vmatmul.mubr.f32.gmra.mxu0 %v10356_v33 }
 0x4db   :  { %6832 = vmatmul.mubr.f32.gmra.mxu1 %v10283_v26  ;;  %6768 = vmatprep.mubr.f32.mxu0 %v10363_v60  ;;  %v3049_v13 = vpop.f32.mrf.mxu0 }
 0x4dc   :  { %6834 = vmatprep.mubr.f32.mxu1 %v10293_v44 }
 0x4de   :  { %6769 = vmatmul.mubr.f32.gmra.mxu0 %v10381_v55  ;;  %v6446_v15 = vpop.f32.mrf.mxu0  ;;  %v6512_v0 = vpop.f32.mrf.mxu1 }
 0x4df   :  { %6835 = vmatmul.mubr.f32.gmra.mxu1 %v10324_v59  ;;  %6771 = vmatprep.mubr.f32.mxu0 %v10388_v29  ;;  %v10643_v48 = vadd.f32 %v6512_v0, %v6440_v35 }
 0x4e0   :  { %6837 = vmatprep.mubr.f32.mxu1 %v10331_v18  ;;  %v3069_v10 = vpop.f32.mrf.mxu0  ;;  %v3470_v30 = vpop.f32.mrf.mxu1 }
 0x4e1   :  { %v10646_v26 = vadd.f32 %v3470_v30, %v3029_v45 }
 0x4e2   :  { %6772 = vmatmul.mubr.f32.gmra.mxu0 %v10399_v8 }
 0x4e3   :  { %6838 = vmatmul.mubr.f32.gmra.mxu1 %v10356_v33 }
 0x4e4   :  { %6840 = vmatprep.mubr.f32.mxu1 %v10363_v60  ;;  %v6449_v44 = vpop.f32.mrf.mxu0  ;;  %v6515_v58 = vpop.f32.mrf.mxu1 }
 0x4e5   :  { %v10651_v61 = vadd.f32 %v6515_v58, %v6443_v17 }
 0x4e6   :  { %v3089_v59 = vpop.f32.mrf.mxu0  ;;  %v3482_v11 = vpop.f32.mrf.mxu1 }
 0x4e7   :  { %6841 = vmatmul.mubr.f32.gmra.mxu1 %v10381_v55  ;;  %v10654_v62 = vadd.f32 %v3482_v11, %v3049_v13 }
 0x4e8   :  { %6843 = vmatprep.mubr.f32.mxu1 %v10388_v29 }
 0x4ea   :  { %v6452_v18 = vpop.f32.mrf.mxu0  ;;  %v6518_v40 = vpop.f32.mrf.mxu1 }
 0x4eb   :  { %6844 = vmatmul.mubr.f32.gmra.mxu1 %v10399_v8  ;;  %v10658_v31 = vadd.f32 %v6518_v40, %v6446_v15 }
 0x4ec   :  { %v3109_v33 = vpop.f32.mrf.mxu0  ;;  %v3494_v60 = vpop.f32.mrf.mxu1 }
 0x4ed   :  { %v10660_v1 = vadd.f32 %v3494_v60, %v3069_v10 }
 0x4f0   :  { %v6455_v53 = vpop.f32.mrf.mxu0  ;;  %v6521_v49 = vpop.f32.mrf.mxu1 }
 0x4f1   :  { %v10662_v3 = vadd.f32 %v6521_v49, %v6449_v44 }
 0x4f2   :  { %v3129_v51 = vpop.f32.mrf.mxu0  ;;  %v3506_v55 = vpop.f32.mrf.mxu1 }
 0x4f3   :  { %v10664_v19 = vadd.f32 %v3506_v55, %v3089_v59 }
 0x4f6   :  { %v6458_v34 = vpop.f32.mrf.mxu0  ;;  %v6524_v29 = vpop.f32.mrf.mxu1 }
 0x4f7   :  { %v10666_v12 = vadd.f32 %v6524_v29, %v6452_v18 }
 0x4f8   :  { %v3149_v14 = vpop.f32.mrf.mxu0  ;;  %v3518_v8 = vpop.f32.mrf.mxu1 }
 0x4f9   :  { %v10668_v27 = vadd.f32 %v3518_v8, %v3109_v33 }
 0x4fa   :  { %v6461_v16 = vpop.f32.mrf.mxu0 }
 0x4fb   :  { %v6527_v7 = vpop.f32.mrf.mxu1 }
 0x4fc   :  { %v10670_v32 = vadd.f32 %v6527_v7, %v6455_v53  ;;  %v3169_v46 = vpop.f32.mrf.mxu0 }
 0x4fd   :  { %v3530_v39 = vpop.f32.mrf.mxu1 }
 0x4fe   :  { %v10672_v23 = vadd.f32 %v3530_v39, %v3129_v51  ;;  %v6464_v43 = vpop.f32.mrf.mxu0 }
 0x4ff   :  { %v6530_v4 = vpop.f32.mrf.mxu1 }
 0x500   :  { %v10674_v24 = vadd.f32 %v6530_v4, %v6458_v34  ;;  %v3189_v5 = vpop.f32.mrf.mxu0 }
 0x501   :  { %v3542_v56 = vpop.f32.mrf.mxu1 }
 0x502   :  { %v10676_v22 = vadd.f32 %v3542_v56, %v3149_v14  ;;  %v6467_v57 = vpop.f32.mrf.mxu0 }
 0x503   :  { %v6533_v6 = vpop.f32.mrf.mxu1 }
 0x504   :  { %v10678_v38 = vadd.f32 %v6533_v6, %v6461_v16  ;;  %v3209_v50 = vpop.f32.mrf.mxu0 }
 0x505   :  { %v3554_v2 = vpop.f32.mrf.mxu1 }
 0x506   :  { %v10680_v28 = vadd.f32 %v3554_v2, %v3169_v46  ;;  %v6470_v20 = vpop.f32.mrf.mxu0 }
 0x507   :  { %v6536_v47 = vpop.f32.mrf.mxu1 }
 0x508   :  { %v10682_v41 = vadd.f32 %v6536_v47, %v6464_v43  ;;  %v3229_v42 = vpop.f32.mrf.mxu0 }
 0x509   :  { %v3566_v54 = vpop.f32.mrf.mxu1 }
 0x50a   :  { %v10684_v63 = vadd.f32 %v3566_v54, %v3189_v5  ;;  %v6473_v37 = vpop.f32.mrf.mxu0 }
 0x50b   :  { %v6539_v25 = vpop.f32.mrf.mxu1 }
 0x50c   :  { %12287 = vst [vmem:[#allocation85_spill] sm:$0xff] %v10684_v63  ;;  %v10686_v36 = vadd.f32 %v6539_v25, %v6467_v57  ;;  %v3249_v52 = vpop.f32.mrf.mxu0 }
 0x50d   :  { %v3578_v21 = vpop.f32.mrf.mxu1 }
 0x50e   :  { %12288 = vst [vmem:[#allocation86_spill] sm:$0xff] %v10686_v36  ;;  %v10688_v9 = vadd.f32 %v3578_v21, %v3209_v50  ;;  %v6476_v35 = vpop.f32.mrf.mxu0 }
 0x50f   :  { %v6542_v45 = vpop.f32.mrf.mxu1 }
 0x510   :  { %12289 = vst [vmem:[#allocation129_spill] sm:$0xff] %v10688_v9  ;;  %v10690_v17 = vadd.f32 %v6542_v45, %v6470_v20  ;;  %v3269_v13 = vpop.f32.mrf.mxu0 }
 0x511   :  { %v3590_v15 = vpop.f32.mrf.mxu1 }
 0x512   :  { %12290 = vst [vmem:[#allocation130_spill] sm:$0xff] %v10690_v17  ;;  %v10692_v0 = vadd.f32 %v3590_v15, %v3229_v42  ;;  %v6479_v10 = vpop.f32.mrf.mxu0 }
 0x513   :  { %v6545_v30 = vpop.f32.mrf.mxu1 }
 0x514   :  { %12291 = vst [vmem:[#allocation87_spill] sm:$0xff] %v10692_v0  ;;  %v10694_v44 = vadd.f32 %v6545_v30, %v6473_v37  ;;  %v3289_v58 = vpop.f32.mrf.mxu0 }
 0x515   :  { %v3602_v59 = vpop.f32.mrf.mxu1 }
 0x516   :  { %12292 = vst [vmem:[#allocation88_spill] sm:$0xff] %v10694_v44  ;;  %v10696_v11 = vadd.f32 %v3602_v59, %v3249_v52  ;;  %v6482_v18 = vpop.f32.mrf.mxu0 }
 0x517   :  { %v6548_v40 = vpop.f32.mrf.mxu1 }
 0x518   :  { %12293 = vst [vmem:[#allocation93_spill] sm:$0xff] %v10696_v11  ;;  %v10698_v33 = vadd.f32 %v6548_v40, %v6476_v35  ;;  %v3309_v60 = vpop.f32.mrf.mxu0 }
 0x519   :  { %v3614_v53 = vpop.f32.mrf.mxu1 }
 0x51a   :  { %12294 = vst [vmem:[#allocation94_spill] sm:$0xff] %v10698_v33  ;;  %v10700_v49 = vadd.f32 %v3614_v53, %v3269_v13  ;;  %v6485_v51 = vpop.f32.mrf.mxu0 }
 0x51b   :  { %v6551_v55 = vpop.f32.mrf.mxu1 }
 0x51c   :  { %12295 = vst [vmem:[#allocation95_spill] sm:$0xff] %v10700_v49  ;;  %v10702_v34 = vadd.f32 %v6551_v55, %v6479_v10  ;;  %v3329_v29 = vpop.f32.mrf.mxu0 }
 0x51d   :  { %v3626_v14 = vpop.f32.mrf.mxu1 }
 0x51e   :  { %12296 = vst [vmem:[#allocation96_spill] sm:$0xff] %v10702_v34  ;;  %v10704_v8 = vadd.f32 %v3626_v14, %v3289_v58  ;;  %v10706_v16 = vpop.f32.mrf.mxu0 }
 0x51f   :  { %v6554_v7 = vpop.f32.mrf.mxu1 }
 0x520   :  { %12297 = vst [vmem:[#allocation97_spill] sm:$0xff] %v10704_v8  ;;  %v10708_v46 = vadd.f32 %v6554_v7, %v6482_v18  ;;  %v10710_v39 = vpop.f32.mrf.mxu0 }
 0x521   :  { %v3638_v43 = vpop.f32.mrf.mxu1 }
 0x522   :  { %12298 = vst [vmem:[#allocation98_spill] sm:$0xff] %v10708_v46  ;;  %v10712_v4 = vadd.f32 %v3638_v43, %v3309_v60  ;;  %v10714_v5 = vpop.f32.mrf.mxu0 }
 0x523   :  { %v6557_v56 = vpop.f32.mrf.mxu1 }
 0x524   :  { %12299 = vst [vmem:[#allocation11_spill] sm:$0xff] %v10712_v4  ;;  %v10716_v57 = vadd.f32 %v6557_v56, %v6485_v51  ;;  %v10718_v6 = vpop.f32.mrf.mxu0 }
 0x525   :  { %v3650_v50 = vpop.f32.mrf.mxu1 }
 0x526   :  { %12300 = vst [vmem:[#allocation12_spill] sm:$0xff] %v10716_v57  ;;  %v10720_v2 = vadd.f32 %v3650_v50, %v3329_v29  ;;  %v10722_v20 = vpop.f32.mrf.mxu0 }
 0x527   :  { %v10724_v47 = vpop.f32.mrf.mxu1 }
 0x528   :  { %12301 = vst [vmem:[#allocation99_spill] sm:$0xff] %v10720_v2  ;;  %v10726_v42 = vpop.f32.mrf.mxu0 }
 0x529   :  { %v10728_v54 = vpop.f32.mrf.mxu1 }
 0x52c   :  { %v10730_v37 = vpop.f32.mrf.mxu0 }
 0x52d   :  { %v10732_v25 = vpop.f32.mrf.mxu1 }
 0x52e   :  { %v10734_v52 = vpop.f32.mrf.mxu0 }
 0x52f   :  { %v10736_v21 = vpop.f32.mrf.mxu1 }
 0x532   :  { %v10738_v35 = vpop.f32.mrf.mxu0 }
 0x533   :  { %v10740_v45 = vpop.f32.mrf.mxu1 }
 0x534   :  { %v10742_v13 = vpop.f32.mrf.mxu0 }
 0x535   :  { %v10744_v15 = vpop.f32.mrf.mxu1 }
 0x538   :  { %v10746_v10 = vpop.f32.mrf.mxu0 }
 0x539   :  { %v10748_v30 = vpop.f32.mrf.mxu1 }
 0x53a   :  { %v10750_v58 = vpop.f32.mrf.mxu0 }
 0x53b   :  { %v10752_v59 = vpop.f32.mrf.mxu1 }
 0x53e   :  { %v10754_v18 = vpop.f32.mrf.mxu0  ;;  %v10756_v40 = vpop.f32.mrf.mxu1 }
 0x540   :  { %v10758_v60 = vpop.f32.mrf.mxu0  ;;  %v10760_v53 = vpop.f32.mrf.mxu1 }
 0x542   :  { %v10762_v51 = vpop.f32.mrf.mxu0 }
 0x543   :  { %v10764_v55 = vpop.f32.mrf.mxu1 }
 0x544   :  { %v10766_v29 = vpop.f32.mrf.mxu0 }
 0x545   :  { %v10768_v14 = vpop.f32.mrf.mxu1 }
 0x546   :  { %v10770_v7 = vpop.f32.mrf.mxu0 }
 0x547   :  { %v10772_v43 = vpop.f32.mrf.mxu1 }
 0x548   :  { %v10774_v56 = vpop.f32.mrf.mxu0 }
 0x549   :  { %12302 = vst [vmem:[#allocation100_spill] sm:$0xff] %v10774_v56  ;;  %v10776_v50 = vpop.f32.mrf.mxu1 }
 0x54a   :  { %v10778_v2 = vpop.f32.mrf.mxu0 }
 0x54b   :  { %12303 = vst [vmem:[#allocation101_spill] sm:$0xff] %v10778_v2  ;;  %v10780_v57 = vpop.f32.mrf.mxu1 }
 0x54c   :  { %v10782_v4 = vpop.f32.mrf.mxu0 }
 0x54d   :  { %12304 = vst [vmem:[#allocation102_spill] sm:$0xff] %v10782_v4  ;;  %v10784_v46 = vpop.f32.mrf.mxu1 }
 0x54e   :  { %v10786_v8 = vpop.f32.mrf.mxu0 }
 0x54f   :  { %12305 = vst [vmem:[#allocation103_spill] sm:$0xff] %v10786_v8  ;;  %v10788_v34 = vpop.f32.mrf.mxu1 }
 0x550   :  { %12306 = vst [vmem:[#allocation104_spill] sm:$0xff] %v10788_v34  ;;  %v10790_v49 = vpop.f32.mrf.mxu0 }
 0x551   :  { %12307 = vst [vmem:[#allocation114_spill] sm:$0xff] %v10790_v49  ;;  %v10792_v33 = vpop.f32.mrf.mxu1 }
 0x552   :  { %12308 = vst [vmem:[#allocation115_spill] sm:$0xff] %v10792_v33  ;;  %v10794_v11 = vpop.f32.mrf.mxu0 }
 0x553   :  { %12309 = vst [vmem:[#allocation116_spill] sm:$0xff] %v10794_v11  ;;  %v10796_v44 = vpop.f32.mrf.mxu1 }
 0x554   :  { %12310 = vst [vmem:[#allocation117_spill] sm:$0xff] %v10796_v44  ;;  %v10798_v0 = vpop.f32.mrf.mxu0 }
 0x555   :  { %12311 = vst [vmem:[#allocation118_spill] sm:$0xff] %v10798_v0  ;;  %v10800_v17 = vpop.f32.mrf.mxu1 }
 0x556   :  { %12312 = vst [vmem:[#allocation119_spill] sm:$0xff] %v10800_v17  ;;  %v10802_v9 = vpop.f32.mrf.mxu0 }
 0x557   :  { %12313 = vst [vmem:[#allocation120_spill] sm:$0xff] %v10802_v9  ;;  %v10804_v4 = vpop.f32.mrf.mxu1 }
 0x558   :  { %12314 = vst [vmem:[#allocation121_spill] sm:$0xff] %v10804_v4  ;;  %v10806_v2 = vpop.f32.mrf.mxu0 }
 0x559   :  { %12315 = vst [vmem:[#allocation22_spill] sm:$0xff] %v10806_v2  ;;  %v10808_v8 = vpop.f32.mrf.mxu1 }
 0x55a   :  { %12316 = vst [vmem:[#allocation23_spill] sm:$0xff] %v10808_v8  ;;  %v10810_v36 = vpop.f32.mrf.mxu0 }
 0x55b   :  { %12317 = vst [vmem:[#allocation150_spill] sm:$0xff] %v10810_v36  ;;  %v10812_v49 = vpop.f32.mrf.mxu1 }
 0x55c   :  { %12318 = vst [vmem:[#allocation151_spill] sm:$0xff] %v10812_v49  ;;  %v10814_v33 = vpop.f32.mrf.mxu0 }
 0x55d   :  { %12319 = vst [vmem:[#allocation122_spill] sm:$0xff] %v10814_v33  ;;  %v10816_v11 = vpop.f32.mrf.mxu1 }
 0x55e   :  { %12320 = vst [vmem:[#allocation123_spill] sm:$0xff] %v10816_v11  ;;  %v10818_v44 = vpop.f32.mrf.mxu0 }
 0x55f   :  { %12321 = vst [vmem:[#allocation6_spill] sm:$0xff] %v10818_v44  ;;  %v10820_v0 = vpop.f32.mrf.mxu1  ;;  %v3760_v44 = vadd.f32 %v10706_v16, %v10643_v48  ;;  %v6102_v48 = vld [vmem:[%s11462_s4] ss:$0 sm:$0xff] }
 0x560   :  { %12322 = vst [vmem:[#allocation7_spill] sm:$0xff] %v10820_v0  ;;  %v10822_v17 = vpop.f32.mrf.mxu0 }
 0x561   :  { %12323 = vst [vmem:[#allocation8_spill] sm:$0xff] %v10822_v17  ;;  %v10824_v9 = vpop.f32.mrf.mxu1 }
 0x562   :  { %12324 = vst [vmem:[#allocation9_spill] sm:$0xff] %v10824_v9  ;;  %v10826_v4 = vpop.f32.mrf.mxu0 }
 0x563   :  { %12325 = vst [vmem:[#allocation131_spill] sm:$0xff] %v10826_v4  ;;  %v10828_v2 = vpop.f32.mrf.mxu1  ;;  %v3753_v4 = vadd.f32 %v10710_v39, %v10646_v26  ;;  %v3767_v26 = vadd.f32 %v10718_v6, %v10654_v62 }
 0x564   :  { %12326 = vst [vmem:[#allocation132_spill] sm:$0xff] %v10828_v2  ;;  %v10830_v8 = vpop.f32.mrf.mxu0  ;;  %v4063_v2 = vadd.f32 %v10724_v47, %v3760_v44 }
 0x565   :  { %12327 = vst [vmem:[#allocation133_spill] sm:$0xff] %v10830_v8  ;;  %v10832_v36 = vpop.f32.mrf.mxu1 }
 0x566   :  { %12328 = vst [vmem:[#allocation134_spill] sm:$0xff] %v10832_v36  ;;  %v6728_v49 = vpop.f32.mrf.mxu0  ;;  %v4055_v36 = vadd.f32 %v10728_v54, %v3753_v4 }
 0x567   :  { %v10834_v33 = vpop.f32.mrf.mxu1 }
 0x568   :  { %12329 = vst [vmem:[#allocation135_spill] sm:$0xff] %v10834_v33  ;;  %v4409_v11 = vpop.f32.mrf.mxu0  ;;  %v3774_v33 = vadd.f32 %v10714_v5, %v10651_v61  ;;  %v3788_v61 = vadd.f32 %v10722_v20, %v10658_v31 }
 0x569   :  { %v10836_v34 = vpop.f32.mrf.mxu1  ;;  %v4410_v16 = vadd.f32 %v4409_v11, %v4055_v36 }
 0x56a   :  { %12330 = vst [vmem:[#allocation136_spill] sm:$0xff] %v10836_v34  ;;  %v6731_v17 = vpop.f32.mrf.mxu0  ;;  %v4416_v34 = vadd.f32 %v6728_v49, %v4063_v2  ;;  %v4079_v44 = vadd.f32 %v10732_v25, %v3774_v33  ;;  %v4071_v49 = vadd.f32 %v10736_v21, %v3767_v26  ;;  %v4095_v36 = vadd.f32 %v10740_v45, %v3788_v61 }
 0x56b   :  { %v10840_v0 = vpop.f32.mrf.mxu1 }
 0x56c   :  { %12331 = vst [vmem:[#allocation137_spill] sm:$0xff] %v10840_v0  ;;  %v4421_v8 = vpop.f32.mrf.mxu0  ;;  %v4428_v4 = vadd.f32 %v6731_v17, %v4079_v44  ;;  %v3781_v0 = vadd.f32 %v10726_v42, %v10660_v1 }
 0x56d   :  { %v10845_v9 = vpop.f32.mrf.mxu1  ;;  %v4422_v11 = vadd.f32 %v4421_v8, %v4071_v49  ;;  %v3795_v8 = vadd.f32 %v10734_v52, %v10664_v19 }
 0x56e   :  { %12332 = vst [vmem:[#allocation138_spill] sm:$0xff] %v10845_v9  ;;  %v6734_v56 = vpop.f32.mrf.mxu0  ;;  %v4087_v1 = vadd.f32 %v10744_v15, %v3781_v0 }
 0x56f   :  { %v6800_v63 = vpop.f32.mrf.mxu1  ;;  %v4440_v20 = vadd.f32 %v6734_v56, %v4095_v36  ;;  %v3816_v56 = vadd.f32 %v10738_v35, %v10666_v12  ;;  %v4103_v19 = vadd.f32 %v10752_v59, %v3795_v8  ;;  %v3823_v36 = vadd.f32 %v10750_v58, %v10672_v23 }
 0x570   :  { %v4685_v39 = vadd.f32 %v6800_v63, %v4416_v34  ;;  %v4433_v47 = vpop.f32.mrf.mxu0  ;;  %v6103_v63 = vld [vmem:[%s11462_s4 + $0x1] ss:$0 sm:$0xff]  ;;  %v3802_v34 = vadd.f32 %v10730_v37, %v10662_v3 }
 0x571   :  { %v4678_v5 = vpop.f32.mrf.mxu1  ;;  %v4434_v37 = vadd.f32 %v4433_v47, %v4087_v1  ;;  %v3809_v47 = vadd.f32 %v10742_v13, %v10668_v27  ;;  %v4127_v12 = vadd.f32 %v10756_v40, %v3816_v56  ;;  %v4135_v23 = vadd.f32 %v10768_v14, %v3823_v36  ;;  %v12337_v36 = vld [vmem:[#allocation101_spill] sm:$0xff] }
 0x572   :  { %v10859_v2 = vadd.f32 %v6102_v48, %v4685_v39  ;;  %v4679_v54 = vadd.f32 %v4678_v5, %v4410_v16  ;;  %v6737_v9 = vpop.f32.mrf.mxu0  ;;  %v4111_v3 = vadd.f32 %v10748_v30, %v3802_v34  ;;  %v6105_v5 = vld [vmem:[%s11462_s4 + $0x3] ss:$0 sm:$0xff] }
 0x573   :  { %v6803_v62 = vpop.f32.mrf.mxu1  ;;  %v4119_v27 = vadd.f32 %v10760_v53, %v3809_v47  ;;  %v3872_v47 = vadd.f32 %v10770_v7, %v10682_v41 }
 0x574   :  { %v10867_v31 = vadd.f32 %v6102_v48, %v4679_v54  ;;  %v4697_v33 = vadd.f32 %v6803_v62, %v4428_v4  ;;  %5014 = vadd.xlane.f32.xlu0 %v10859_v2  ;;  %v4445_v17 = vpop.f32.mrf.mxu0  ;;  %v6104_v48 = vld [vmem:[%s11462_s4 + $0x2] ss:$0 sm:$0xff]  ;;  %v4452_v52 = vadd.f32 %v6737_v9, %v4111_v3  ;;  %v3830_v4 = vadd.f32 %v10746_v10, %v10670_v32 }
 0x575   :  { %v4690_v6 = vpop.f32.mrf.mxu1  ;;  %v4446_v35 = vadd.f32 %v4445_v17, %v4103_v19 }
 0x576   :  { %v10873_v42 = vadd.f32 %v6103_v63, %v4697_v33  ;;  %v4691_v25 = vadd.f32 %v4690_v6, %v4422_v11  ;;  %5012 = vadd.xlane.f32.xlu1 %v10867_v31  ;;  %v6740_v21 = vpop.f32.mrf.mxu0  ;;  %v6106_v33 = vld [vmem:[%s11462_s4 + $0x4] ss:$0 sm:$0xff]  ;;  %v4143_v32 = vadd.f32 %v10764_v55, %v3830_v4  ;;  %v3844_v6 = vadd.f32 %v10754_v18, %v10674_v24 }
 0x577   :  { %v6806_v45 = vpop.f32.mrf.mxu1  ;;  %v4464_v13 = vadd.f32 %v6740_v21, %v4127_v12  ;;  %v3837_v21 = vadd.f32 %v10758_v60, %v10676_v22 }
 0x578   :  { %v10882_v26 = vadd.f32 %v6103_v63, %v4691_v25  ;;  %v4709_v0 = vadd.f32 %v6806_v45, %v4440_v20  ;;  %5018 = vadd.xlane.f32.xlu0 %v10873_v42  ;;  %v4457_v15 = vpop.f32.mrf.mxu0  ;;  %v6107_v45 = vld [vmem:[%s11462_s4 + $0x5] ss:$0 sm:$0xff]  ;;  %v4159_v24 = vadd.f32 %v10772_v43, %v3844_v6 }
 0x579   :  { %v4702_v44 = vpop.f32.mrf.mxu1  ;;  %v4458_v10 = vadd.f32 %v4457_v15, %v4119_v27  ;;  %v4151_v22 = vadd.f32 %v10776_v50, %v3837_v21  ;;  %v12335_v27 = vld [vmem:[#allocation104_spill] sm:$0xff]  ;;  %v6110_v21 = vld [vmem:[%s11462_s4 + $0x8] ss:$0 sm:$0xff] }
 0x57a   :  { %v10888_v16 = vadd.f32 %v6104_v48, %v4709_v0  ;;  %v4703_v39 = vadd.f32 %v4702_v44, %v4434_v37  ;;  %5016 = vadd.xlane.f32.xlu1 %v10882_v26  ;;  %v6743_v30 = vpop.f32.mrf.mxu0  ;;  %v3858_v37 = vadd.f32 %v10762_v51, %v10678_v38  ;;  %v3851_v44 = vadd.f32 %v10766_v29, %v10680_v28 }
 0x57b   :  { %v6809_v61 = vpop.f32.mrf.mxu1  ;;  %v4476_v58 = vadd.f32 %v6743_v30, %v4143_v32  ;;  %v4191_v41 = vadd.f32 %v12335_v27, %v3872_v47  ;;  %v12338_v32 = vld [vmem:[#allocation115_spill] sm:$0xff] }
 0x57c   :  { %v10897_v49 = vadd.f32 %v6104_v48, %v4703_v39  ;;  %v4721_v9 = vadd.f32 %v6809_v61, %v4452_v52  ;;  %5022 = vadd.xlane.f32.xlu0 %v10888_v16  ;;  %v4469_v59 = vpop.f32.mrf.mxu0  ;;  %v6108_v52 = vld [vmem:[%s11462_s4 + $0x6] ss:$0 sm:$0xff]  ;;  %v4175_v38 = vadd.f32 %v10780_v57, %v3858_v37  ;;  %v4167_v28 = vadd.f32 %v10784_v46, %v3851_v44 }
 0x57d   :  { %v4714_v54 = vpop.f32.mrf.mxu1  ;;  %v4470_v18 = vadd.f32 %v4469_v59, %v4135_v23  ;;  %v12339_v23 = vld [vmem:[#allocation129_spill] sm:$0xff]  ;;  %v12342_v37 = vld [vmem:[#allocation130_spill] sm:$0xff] }
 0x57e   :  { %v10903_v62 = vadd.f32 %v6105_v5, %v4721_v9  ;;  %v4715_v63 = vadd.f32 %v4714_v54, %v4446_v35  ;;  %5020 = vadd.xlane.f32.xlu1 %v10897_v49  ;;  %v6746_v40 = vpop.f32.mrf.mxu0  ;;  %v12333_v35 = vld [vmem:[#allocation85_spill] sm:$0xff]  ;;  %v12334_v9 = vld [vmem:[#allocation100_spill] sm:$0xff]  ;;  %v6109_v54 = vld [vmem:[%s11462_s4 + $0x7] ss:$0 sm:$0xff] }
 0x57f   :  { %v6812_v11 = vpop.f32.mrf.mxu1  ;;  %v4488_v60 = vadd.f32 %v6746_v40, %v4159_v24  ;;  %v3865_v59 = vadd.f32 %v12334_v9, %v12333_v35  ;;  %v12336_v40 = vld [vmem:[#allocation86_spill] sm:$0xff] }
 0x580   :  { %v10912_v17 = vadd.f32 %v6105_v5, %v4715_v63  ;;  %v4733_v53 = vadd.f32 %v6812_v11, %v4464_v13  ;;  %5026 = vadd.xlane.f32.xlu0 %v10903_v62  ;;  %v4481_v34 = vpop.f32.mrf.mxu0  ;;  %v3886_v11 = vadd.f32 %v12337_v36, %v12336_v40 }
 0x581   :  { %v4726_v1 = vpop.f32.mrf.mxu1  ;;  %v4482_v51 = vadd.f32 %v4481_v34, %v4151_v22 }
 0x582   :  { %v10918_v20 = vadd.f32 %v6106_v33, %v4733_v53  ;;  %v4727_v25 = vadd.f32 %v4726_v1, %v4458_v10  ;;  %5024 = vadd.xlane.f32.xlu1 %v10912_v17  ;;  %v6749_v55 = vpop.f32.mrf.mxu0  ;;  %v4183_v10 = vadd.f32 %v12338_v32, %v3865_v59  ;;  %v12349_v59 = vld [vmem:[#allocation88_spill] sm:$0xff] }
 0x583   :  { %v6815_v8 = vpop.f32.mrf.mxu1  ;;  %v4500_v29 = vadd.f32 %v6749_v55, %v4175_v38 }
 0x584   :  { %v10927_v48 = vadd.f32 %v6106_v33, %v4727_v25  ;;  %v4745_v14 = vadd.f32 %v6815_v8, %v4476_v58  ;;  %5030 = vadd.xlane.f32.xlu0 %v10918_v20  ;;  %v4493_v3 = vpop.f32.mrf.mxu0  ;;  %v12340_v58 = vld [vmem:[#allocation102_spill] sm:$0xff]  ;;  %v12341_v8 = vld [vmem:[#allocation117_spill] sm:$0xff] }
 0x585   :  { %v4738_v0 = vpop.f32.mrf.mxu1  ;;  %v4494_v7 = vadd.f32 %v4493_v3, %v4167_v28  ;;  %v3879_v25 = vadd.f32 %v12340_v58, %v12339_v23  ;;  %v12348_v28 = vld [vmem:[#allocation121_spill] sm:$0xff] }
 0x586   :  { %v10933_v15 = vadd.f32 %v6107_v45, %v4745_v14  ;;  %v4739_v56 = vadd.f32 %v4738_v0, %v4470_v18  ;;  %5028 = vadd.xlane.f32.xlu1 %v10927_v48  ;;  %v6752_v43 = vpop.f32.mrf.mxu0  ;;  %v12343_v0 = vld [vmem:[#allocation103_spill] sm:$0xff] }
 0x587   :  { %v6818_v19 = vpop.f32.mrf.mxu1  ;;  %v4512_v53 = vadd.f32 %v6752_v43, %v4191_v41  ;;  %v3900_v22 = vadd.f32 %v12343_v0, %v12342_v37  ;;  %v12351_v41 = vld [vmem:[#allocation23_spill] sm:$0xff] }
 0x588   :  { %v10942_v39 = vadd.f32 %v6107_v45, %v4739_v56  ;;  %v4757_v50 = vadd.f32 %v6818_v19, %v4488_v60  ;;  %5034 = vadd.xlane.f32.xlu0 %v10933_v15  ;;  %v4505_v30 = vpop.f32.mrf.mxu0  ;;  %v4207_v45 = vadd.f32 %v12341_v8, %v3886_v11  ;;  %v12344_v56 = vld [vmem:[#allocation119_spill] sm:$0xff]  ;;  %v12357_v8 = vld [vmem:[#allocation120_spill] sm:$0xff] }
 0x589   :  { %v4750_v61 = vpop.f32.mrf.mxu1  ;;  %v4506_v24 = vadd.f32 %v4505_v30, %v4183_v10  ;;  %v4199_v43 = vadd.f32 %v12344_v56, %v3879_v25 }
 0x58a   :  { %v10948_v5 = vadd.f32 %v6108_v52, %v4757_v50  ;;  %v4751_v12 = vadd.f32 %v4750_v61, %v4482_v51  ;;  %5032 = vadd.xlane.f32.xlu1 %v10942_v39  ;;  %v6755_v57 = vpop.f32.mrf.mxu0  ;;  %v12346_v51 = vld [vmem:[#allocation87_spill] sm:$0xff]  ;;  %v12347_v50 = vld [vmem:[#allocation114_spill] sm:$0xff] }
 0x58b   :  { %v6821_v4 = vpop.f32.mrf.mxu1  ;;  %v4524_v44 = vadd.f32 %v6755_v57, %v4207_v45  ;;  %v3893_v30 = vadd.f32 %v12347_v50, %v12346_v51  ;;  %v6111_v61 = vld [vmem:[%s11462_s4 + $0x9] ss:$0 sm:$0xff]  ;;  %v6113_v51 = vld [vmem:[%s11462_s4 + $0xb] ss:$0 sm:$0xff] }
 0x58c   :  { %v10957_v13 = vadd.f32 %v6108_v52, %v4751_v12  ;;  %v4769_v46 = vadd.f32 %v6821_v4, %v4500_v29  ;;  %5038 = vadd.xlane.f32.xlu0 %v10948_v5  ;;  %v4517_v63 = vpop.f32.mrf.mxu0  ;;  %v4223_v29 = vadd.f32 %v12348_v28, %v3900_v22  ;;  %v12350_v4 = vld [vmem:[#allocation116_spill] sm:$0xff]  ;;  %v12362_v50 = vld [vmem:[#allocation7_spill] sm:$0xff] }
 0x58d   :  { %v4762_v33 = vpop.f32.mrf.mxu1  ;;  %v4518_v12 = vadd.f32 %v4517_v63, %v4199_v43  ;;  %v12353_v63 = vld [vmem:[#allocation93_spill] sm:$0xff]  ;;  %v12361_v43 = vld [vmem:[#allocation22_spill] sm:$0xff] }
 0x58e   :  { %v10963_v34 = vadd.f32 %v6109_v54, %v4769_v46  ;;  %v4763_v6 = vadd.f32 %v4762_v33, %v4494_v7  ;;  %5036 = vadd.xlane.f32.xlu1 %v10957_v13  ;;  %v6758_v1 = vpop.f32.mrf.mxu0  ;;  %v4215_v7 = vadd.f32 %v12351_v41, %v3893_v30  ;;  %v12354_v33 = vld [vmem:[#allocation118_spill] sm:$0xff] }
 0x58f   :  { %v6824_v55 = vpop.f32.mrf.mxu1  ;;  %v4536_v46 = vadd.f32 %v6758_v1, %v4223_v29  ;;  %v3907_v32 = vadd.f32 %v12354_v33, %v12353_v63  ;;  %v12363_v29 = vld [vmem:[#allocation96_spill] sm:$0xff] }
 0x590   :  { %v10972_v18 = vadd.f32 %v6109_v54, %v4763_v6  ;;  %v4781_v14 = vadd.f32 %v6824_v55, %v4512_v53  ;;  %5042 = vadd.xlane.f32.xlu0 %v10963_v34  ;;  %v4529_v3 = vpop.f32.mrf.mxu0  ;;  %v3914_v54 = vadd.f32 %v12350_v4, %v12349_v59  ;;  %v6112_v53 = vld [vmem:[%s11462_s4 + $0xa] ss:$0 sm:$0xff]  ;;  %v12365_v4 = vld [vmem:[#allocation9_spill] sm:$0xff] }
 0x591   :  { %v4774_v60 = vpop.f32.mrf.mxu1  ;;  %v12355_v6 = vld [vmem:[#allocation151_spill] sm:$0xff]  ;;  %v4530_v58 = vadd.f32 %v4529_v3, %v4215_v7 }
 0x592   :  { %v10978_v19 = vadd.f32 %v6110_v21, %v4781_v14  ;;  %v4775_v52 = vadd.f32 %v4774_v60, %v4506_v24  ;;  %5040 = vadd.xlane.f32.xlu1 %v10972_v18  ;;  %v6761_v38 = vpop.f32.mrf.mxu0  ;;  %v4239_v23 = vadd.f32 %v12355_v6, %v3914_v54  ;;  %v12358_v14 = vld [vmem:[#allocation123_spill] sm:$0xff] }
 0x593   :  { %v6827_v47 = vpop.f32.mrf.mxu1  ;;  %v4231_v37 = vadd.f32 %v12358_v14, %v3907_v32  ;;  %v12360_v3 = vld [vmem:[#allocation95_spill] sm:$0xff] }
 0x594   :  { %12345 = vst [vmem:[#allocation152_spill] sm:$0xff] %v10978_v19  ;;  %v10987_v35 = vadd.f32 %v6110_v21, %v4775_v52  ;;  %v4793_v57 = vadd.f32 %v6827_v47, %v4524_v44  ;;  %5046 = vadd.xlane.f32.xlu0 %v10978_v19  ;;  %v4541_v9 = vpop.f32.mrf.mxu0  ;;  %v12356_v21 = vld [vmem:[#allocation94_spill] sm:$0xff]  ;;  %v4548_v0 = vadd.f32 %v6761_v38, %v4239_v23  ;;  %v6114_v32 = vld [vmem:[%s11462_s4 + $0xc] ss:$0 sm:$0xff] }
 0x595   :  { %v4786_v27 = vpop.f32.mrf.mxu1  ;;  %v3928_v45 = vadd.f32 %v12357_v8, %v12356_v21  ;;  %v3921_v44 = vadd.f32 %v12361_v43, %v12360_v3  ;;  %v4542_v47 = vadd.f32 %v4541_v9, %v4231_v37  ;;  %v12366_v9 = vld [vmem:[#allocation97_spill] sm:$0xff]  ;;  %v12372_v3 = vld [vmem:[#allocation11_spill] sm:$0xff] }
 0x596   :  { %v10993_v40 = vadd.f32 %v6111_v61, %v4793_v57  ;;  %v4787_v36 = vadd.f32 %v4786_v27, %v4518_v12  ;;  %5044 = vadd.xlane.f32.xlu1 %v10987_v35  ;;  %v6764_v11 = vpop.f32.mrf.mxu0  ;;  %v12364_v12 = vld [vmem:[#allocation150_spill] sm:$0xff] }
 0x597   :  { %v6830_v10 = vpop.f32.mrf.mxu1  ;;  %v4255_v30 = vadd.f32 %v12362_v50, %v3928_v45  ;;  %v3942_v57 = vadd.f32 %v12364_v12, %v12363_v29  ;;  %v4247_v54 = vadd.f32 %v12365_v4, %v3921_v44  ;;  %v12376_v29 = vld [vmem:[#allocation131_spill] sm:$0xff]  ;;  %v12377_v4 = vld [vmem:[#allocation136_spill] sm:$0xff] }
 0x598   :  { %12352 = vst [vmem:[#allocation153_spill] sm:$0xff] %v10993_v40  ;;  %v11002_v25 = vadd.f32 %v6111_v61, %v4787_v36  ;;  %v4805_v1 = vadd.f32 %v6830_v10, %v4536_v46  ;;  %5050 = vadd.xlane.f32.xlu0 %v10993_v40  ;;  %v4553_v55 = vpop.f32.mrf.mxu0  ;;  %v12367_v36 = vld [vmem:[#allocation122_spill] sm:$0xff]  ;;  %v12368_v10 = vld [vmem:[#allocation132_spill] sm:$0xff] }
 0x599   :  { %v4798_v24 = vpop.f32.mrf.mxu1  ;;  %v4560_v27 = vadd.f32 %v6764_v11, %v4255_v30  ;;  %v3935_v63 = vadd.f32 %v12367_v36, %v12366_v9  ;;  %v4554_v6 = vadd.f32 %v4553_v55, %v4247_v54  ;;  %v12373_v55 = vld [vmem:[#allocation8_spill] sm:$0xff]  ;;  %v12379_v36 = vld [vmem:[#allocation99_spill] sm:$0xff] }
 0x59a   :  { %v11008_v22 = vadd.f32 %v6112_v53, %v4805_v1  ;;  %v4799_v60 = vadd.f32 %v4798_v24, %v4530_v58  ;;  %5048 = vadd.xlane.f32.xlu1 %v11002_v25  ;;  %v6767_v56 = vpop.f32.mrf.mxu0  ;;  %v12369_v58 = vld [vmem:[#allocation98_spill] sm:$0xff]  ;;  %v3949_v43 = vadd.f32 %v12373_v55, %v12372_v3 }
 0x59b   :  { %v6833_v52 = vpop.f32.mrf.mxu1  ;;  %v12370_v1 = vld [vmem:[#allocation6_spill] sm:$0xff] }
 0x59c   :  { %12359 = vst [vmem:[#allocation154_spill] sm:$0xff] %v11008_v22  ;;  %v11017_v61 = vadd.f32 %v6112_v53, %v4799_v60  ;;  %v4817_v38 = vadd.f32 %v6833_v52, %v4548_v0  ;;  %5054 = vadd.xlane.f32.xlu0 %v11008_v22  ;;  %v4565_v28 = vpop.f32.mrf.mxu0  ;;  %v4271_v53 = vadd.f32 %v12368_v10, %v3942_v57  ;;  %v12371_v24 = vld [vmem:[#allocation134_spill] sm:$0xff]  ;;  %v6115_v52 = vld [vmem:[%s11462_s4 + $0xd] ss:$0 sm:$0xff]  ;;  %v12381_v10 = vld [vmem:[#allocation137_spill] sm:$0xff] }
 0x59d   :  { %v4810_v59 = vpop.f32.mrf.mxu1  ;;  %v3956_v21 = vadd.f32 %v12370_v1, %v12369_v58  ;;  %v4263_v14 = vadd.f32 %v12371_v24, %v3935_v63  ;;  %v4279_v54 = vadd.f32 %v12377_v4, %v3949_v43 }
 0x59e   :  { %v11023_v41 = vadd.f32 %v6113_v51, %v4817_v38  ;;  %v4811_v7 = vadd.f32 %v4810_v59, %v4542_v47  ;;  %5052 = vadd.xlane.f32.xlu1 %v11017_v61  ;;  %v6770_v46 = vpop.f32.mrf.mxu0  ;;  %v4572_v37 = vadd.f32 %v6767_v56, %v4271_v53  ;;  %v12375_v56 = vld [vmem:[#allocation12_spill] sm:$0xff] }
 0x59f   :  { %v6836_v33 = vpop.f32.mrf.mxu1  ;;  %v4566_v30 = vadd.f32 %v4565_v28, %v4263_v14  ;;  %v3970_v12 = vadd.f32 %v12376_v29, %v12375_v56  ;;  %v12380_v28 = vld [vmem:[#allocation133_spill] sm:$0xff] }
 0x5a0   :  { %v11032_v23 = vadd.f32 %v6113_v51, %v4811_v7  ;;  %v4829_v11 = vadd.f32 %v6836_v33, %v4560_v27  ;;  %5058 = vadd.xlane.f32.xlu0 %v11023_v41  ;;  %v4577_v8 = vpop.f32.mrf.mxu0  ;;  %v12374_v51 = vld [vmem:[#allocation135_spill] sm:$0xff]  ;;  %v3963_v63 = vadd.f32 %v12380_v28, %v12379_v36 }
 0x5a1   :  { %v4822_v45 = vpop.f32.mrf.mxu1  ;;  %v4287_v50 = vadd.f32 %v12374_v51, %v3956_v21  ;;  %v4303_v53 = vadd.f32 %v12381_v10, %v3970_v12  ;;  %v12383_v21 = vld [vmem:[#allocation138_spill] sm:$0xff] }
 0x5a2   :  { %v11038_v0 = vadd.f32 %v6114_v32, %v4829_v11  ;;  %v4823_v60 = vadd.f32 %v4822_v45, %v4554_v6  ;;  %5056 = vadd.xlane.f32.xlu1 %v11032_v23  ;;  %v6773_v57 = vpop.f32.mrf.mxu0  ;;  %v4578_v6 = vadd.f32 %v4577_v8, %v4279_v54  ;;  %v4295_v45 = vadd.f32 %v12383_v21, %v3963_v63  ;;  %v6117_v8 = vld [vmem:[%s11462_s4 + $0xf] ss:$0 sm:$0xff] }
 0x5a3   :  { %v6839_v44 = vpop.f32.mrf.mxu1  ;;  %v4584_v27 = vadd.f32 %v6770_v46, %v4287_v50  ;;  %v4596_v24 = vadd.f32 %v6773_v57, %v4303_v53 }
 0x5a4   :  { %v11047_v47 = vadd.f32 %v6114_v32, %v4823_v60  ;;  %v4841_v38 = vadd.f32 %v6839_v44, %v4572_v37  ;;  %5062 = vadd.xlane.f32.xlu0 %v11038_v0  ;;  %v6116_v32 = vld [vmem:[%s11462_s4 + $0xe] ss:$0 sm:$0xff]  ;;  %v4589_v46 = vpop.f32.mrf.mxu0 }
 0x5a5   :  { %v4834_v59 = vpop.f32.mrf.mxu1  ;;  %v4590_v3 = vadd.f32 %v4589_v46, %v4295_v45 }
 0x5a6   :  { %v11053_v7 = vadd.f32 %v6115_v52, %v4841_v38  ;;  %v4835_v9 = vadd.f32 %v4834_v59, %v4566_v30  ;;  %5060 = vadd.xlane.f32.xlu1 %v11047_v47 }
 0x5a7   :  { %v6842_v33 = vpop.f32.mrf.mxu1 }
 0x5a8   :  { %12378 = vst [vmem:[#allocation155_spill] sm:$0xff] %v11053_v7  ;;  %v11062_v11 = vadd.f32 %v6115_v52, %v4835_v9  ;;  %v4853_v58 = vadd.f32 %v6842_v33, %v4584_v27  ;;  %5066 = vadd.xlane.f32.xlu0 %v11053_v7 }
 0x5a9   :  { %v4846_v1 = vpop.f32.mrf.mxu1 }
 0x5aa   :  { %12382 = vst [vmem:[#allocation65_spill] sm:$0xff] %v11062_v11  ;;  %v11066_v14 = vadd.f32 %v6116_v32, %v4853_v58  ;;  %v4847_v37 = vadd.f32 %v4846_v1, %v4578_v6  ;;  %5064 = vadd.xlane.f32.xlu1 %v11062_v11 }
 0x5ab   :  { %v6845_v60 = vpop.f32.mrf.mxu1 }
 0x5ac   :  { %12384 = vst [vmem:[#allocation66_spill] sm:$0xff] %v11066_v14  ;;  %v11072_v55 = vadd.f32 %v6116_v32, %v4847_v37  ;;  %v4865_v43 = vadd.f32 %v6845_v60, %v4596_v24  ;;  %5070 = vadd.xlane.f32.xlu0 %v11066_v14 }
 0x5ad   :  { %v4858_v44 = vpop.f32.mrf.mxu1 }
 0x5ae   :  { %12385 = vst [vmem:[#allocation156_spill] sm:$0xff] %v11072_v55  ;;  %v11075_v52 = vadd.f32 %v6117_v8, %v4865_v43  ;;  %v4859_v51 = vadd.f32 %v4858_v44, %v4590_v3  ;;  %5068 = vadd.xlane.f32.xlu1 %v11072_v55 }
 0x5b0   :  { %12386 = vst [vmem:[#allocation157_spill] sm:$0xff] %v11075_v52  ;;  %v11078_v50 = vadd.f32 %v6117_v8, %v4859_v51  ;;  %5074 = vadd.xlane.f32.xlu0 %v11075_v52 }
 0x5b2   :  { %12387 = vst [vmem:[#allocation158_spill] sm:$0xff] %v11078_v50  ;;  %5072 = vadd.xlane.f32.xlu1 %v11078_v50 }
 0x5fd   :  { %v5015_v30 = vpop.xlane.xlu0 %5014 }
 0x5ff   :  { %v5013_v38 = vpop.xlane.xlu1 %5012 }
 0x600   :  { %v5076_v56 = vadd.f32 %v5015_v30, %v5013_v38 }
 0x601   :  { %v5019_v29 = vpop.xlane.xlu0 %5018 }
 0x602   :  { %v5077_v12 = vrot.slane %v5076_v56, 4 }
 0x603   :  { %v5017_v57 = vpop.xlane.xlu1 %5016 }
 0x604   :  { %v5078_v59 = vadd.f32 %v5077_v12, %v5076_v56  ;;  %v5083_v4 = vadd.f32 %v5019_v29, %v5017_v57 }
 0x605   :  { %v5023_v54 = vpop.xlane.xlu0 %5022 }
 0x606   :  { %v5079_v27 = vrot.slane %v5078_v59, 2  ;;  %v5084_v9 = vrot.slane %v5083_v4, 4 }
 0x607   :  { %v5021_v36 = vpop.xlane.xlu1 %5020 }
 0x608   :  { %v5080_v28 = vadd.f32 %v5079_v27, %v5078_v59  ;;  %v5085_v63 = vadd.f32 %v5084_v9, %v5083_v4  ;;  %v5090_v33 = vadd.f32 %v5023_v54, %v5021_v36 }
 0x609   :  { %v5027_v32 = vpop.xlane.xlu0 %5026 }
 0x60a   :  { %v5081_v10 = vrot.slane %v5080_v28, 1  ;;  %v5086_v53 = vrot.slane %v5085_v63, 2  ;;  %v5091_v6 = vrot.slane %v5090_v33, 4 }
 0x60b   :  { %v5025_v58 = vpop.xlane.xlu1 %5024 }
 0x60c   :  { %v5082_v46 = vadd.f32 %v5081_v10, %v5080_v28  ;;  %v5087_v1 = vadd.f32 %v5086_v53, %v5085_v63  ;;  %v5092_v21 = vadd.f32 %v5091_v6, %v5090_v33  ;;  %v5097_v45 = vadd.f32 %v5027_v32, %v5025_v58 }
 0x60d   :  { %v5031_v24 = vpop.xlane.xlu0 %5030 }
 0x60e   :  { %v11082_v37 = vmul.f32 0.00048828125, %v5082_v46  ;;  %v5088_v60 = vrot.slane %v5087_v1, 1  ;;  %v5093_v8 = vrot.slane %v5092_v21, 2  ;;  %v5098_v3 = vrot.slane %v5097_v45, 4 }
 0x60f   :  { %v5029_v43 = vpop.xlane.xlu1 %5028 }
 0x610   :  { %v5089_v44 = vadd.f32 %v5088_v60, %v5087_v1  ;;  %v5094_v51 = vadd.f32 %v5093_v8, %v5092_v21  ;;  %v5099_v30 = vadd.f32 %v5098_v3, %v5097_v45  ;;  %v5104_v38 = vadd.f32 %v5031_v24, %v5029_v43 }
 0x611   :  { %v5035_v56 = vpop.xlane.xlu0 %5034  ;;  %v5205_v29 = vsub.f32 %v10859_v2, %v11082_v37  ;;  %v5204_v12 = vsub.f32 %v10867_v31, %v11082_v37 }
 0x612   :  { %v11088_v57 = vmul.f32 0.00048828125, %v5089_v44  ;;  %v5095_v59 = vrot.slane %v5094_v51, 1  ;;  %v5100_v4 = vrot.slane %v5099_v30, 2  ;;  %v5105_v54 = vrot.slane %v5104_v38, 4 }
 0x613   :  { %v5033_v27 = vpop.xlane.xlu1 %5032  ;;  %v5237_v9 = vmul.f32 %v5205_v29, %v5205_v29  ;;  %v5236_v36 = vmul.f32 %v5204_v12, %v5204_v12 }
 0x614   :  { %v5096_v28 = vadd.f32 %v5095_v59, %v5094_v51  ;;  %v5101_v63 = vadd.f32 %v5100_v4, %v5099_v30  ;;  %v5106_v33 = vadd.f32 %v5105_v54, %v5104_v38  ;;  %v5111_v32 = vadd.f32 %v5035_v56, %v5033_v27 }
 0x615   :  { %5270 = vadd.xlane.f32.xlu0 %v5237_v9  ;;  %5268 = vadd.xlane.f32.xlu1 %v5236_v36  ;;  %v5039_v10 = vpop.xlane.xlu0 %5038  ;;  %v5207_v53 = vsub.f32 %v10873_v42, %v11088_v57  ;;  %v5206_v6 = vsub.f32 %v10882_v26, %v11088_v57 }
 0x616   :  { %v11094_v58 = vmul.f32 0.00048828125, %v5096_v28  ;;  %v5102_v46 = vrot.slane %v5101_v63, 1  ;;  %v5107_v1 = vrot.slane %v5106_v33, 2  ;;  %v5112_v21 = vrot.slane %v5111_v32, 4 }
 0x617   :  { %v5037_v45 = vpop.xlane.xlu1 %5036  ;;  %v5239_v24 = vmul.f32 %v5207_v53, %v5207_v53  ;;  %v5238_v60 = vmul.f32 %v5206_v6, %v5206_v6 }
 0x618   :  { %v5103_v8 = vadd.f32 %v5102_v46, %v5101_v63  ;;  %v5108_v3 = vadd.f32 %v5107_v1, %v5106_v33  ;;  %v5113_v43 = vadd.f32 %v5112_v21, %v5111_v32  ;;  %v5118_v44 = vadd.f32 %v5039_v10, %v5037_v45 }
 0x619   :  { %5274 = vadd.xlane.f32.xlu0 %v5239_v24  ;;  %5272 = vadd.xlane.f32.xlu1 %v5238_v60  ;;  %v5043_v51 = vpop.xlane.xlu0 %5042  ;;  %v5209_v30 = vsub.f32 %v10888_v16, %v11094_v58  ;;  %v5208_v38 = vsub.f32 %v10897_v49, %v11094_v58 }
 0x61a   :  { %v11100_v56 = vmul.f32 0.00048828125, %v5103_v8  ;;  %v5109_v29 = vrot.slane %v5108_v3, 1  ;;  %v5114_v12 = vrot.slane %v5113_v43, 2  ;;  %v5119_v59 = vrot.slane %v5118_v44, 4 }
 0x61b   :  { %v5041_v4 = vpop.xlane.xlu1 %5040  ;;  %v5241_v54 = vmul.f32 %v5209_v30, %v5209_v30  ;;  %v5240_v27 = vmul.f32 %v5208_v38, %v5208_v38 }
 0x61c   :  { %v5110_v9 = vadd.f32 %v5109_v29, %v5108_v3  ;;  %v5115_v36 = vadd.f32 %v5114_v12, %v5113_v43  ;;  %v5120_v28 = vadd.f32 %v5119_v59, %v5118_v44  ;;  %v5125_v63 = vadd.f32 %v5043_v51, %v5041_v4 }
 0x61d   :  { %5278 = vadd.xlane.f32.xlu0 %v5241_v54  ;;  %5276 = vadd.xlane.f32.xlu1 %v5240_v27  ;;  %v5047_v33 = vpop.xlane.xlu0 %5046  ;;  %v5211_v32 = vsub.f32 %v10903_v62, %v11100_v56  ;;  %v5210_v10 = vsub.f32 %v10912_v17, %v11100_v56 }
 0x61e   :  { %v11106_v53 = vmul.f32 0.00048828125, %v5110_v9  ;;  %v5116_v6 = vrot.slane %v5115_v36, 1  ;;  %v5121_v46 = vrot.slane %v5120_v28, 2  ;;  %v5126_v1 = vrot.slane %v5125_v63, 4 }
 0x61f   :  { %v5045_v21 = vpop.xlane.xlu1 %5044  ;;  %v5243_v45 = vmul.f32 %v5211_v32, %v5211_v32  ;;  %v5242_v24 = vmul.f32 %v5210_v10, %v5210_v10 }
 0x620   :  { %v5117_v60 = vadd.f32 %v5116_v6, %v5115_v36  ;;  %v5122_v8 = vadd.f32 %v5121_v46, %v5120_v28  ;;  %v5127_v3 = vadd.f32 %v5126_v1, %v5125_v63  ;;  %v5132_v43 = vadd.f32 %v5047_v33, %v5045_v21 }
 0x621   :  { %5282 = vadd.xlane.f32.xlu0 %v5243_v45  ;;  %5280 = vadd.xlane.f32.xlu1 %v5242_v24  ;;  %v5051_v44 = vpop.xlane.xlu0 %5050  ;;  %v5213_v51 = vsub.f32 %v10918_v20, %v11106_v53  ;;  %v5212_v30 = vsub.f32 %v10927_v48, %v11106_v53 }
 0x622   :  { %v11112_v38 = vmul.f32 0.00048828125, %v5117_v60  ;;  %v5123_v29 = vrot.slane %v5122_v8, 1  ;;  %v5128_v12 = vrot.slane %v5127_v3, 2  ;;  %v5133_v59 = vrot.slane %v5132_v43, 4 }
 0x623   :  { %v5049_v4 = vpop.xlane.xlu1 %5048  ;;  %v5245_v54 = vmul.f32 %v5213_v51, %v5213_v51  ;;  %v5244_v27 = vmul.f32 %v5212_v30, %v5212_v30 }
 0x624   :  { %v5124_v9 = vadd.f32 %v5123_v29, %v5122_v8  ;;  %v5129_v36 = vadd.f32 %v5128_v12, %v5127_v3  ;;  %v5134_v28 = vadd.f32 %v5133_v59, %v5132_v43  ;;  %v5139_v63 = vadd.f32 %v5051_v44, %v5049_v4 }
 0x625   :  { %5286 = vadd.xlane.f32.xlu0 %v5245_v54  ;;  %5284 = vadd.xlane.f32.xlu1 %v5244_v27  ;;  %v5055_v33 = vpop.xlane.xlu0 %5054  ;;  %v5215_v32 = vsub.f32 %v10933_v15, %v11112_v38  ;;  %v5214_v10 = vsub.f32 %v10942_v39, %v11112_v38 }
 0x626   :  { %v11118_v6 = vmul.f32 0.00048828125, %v5124_v9  ;;  %v5130_v46 = vrot.slane %v5129_v36, 1  ;;  %v5135_v1 = vrot.slane %v5134_v28, 2  ;;  %v5140_v21 = vrot.slane %v5139_v63, 4 }
 0x627   :  { %v5053_v45 = vpop.xlane.xlu1 %5052  ;;  %v5247_v24 = vmul.f32 %v5215_v32, %v5215_v32  ;;  %v5246_v60 = vmul.f32 %v5214_v10, %v5214_v10 }
 0x628   :  { %v5131_v8 = vadd.f32 %v5130_v46, %v5129_v36  ;;  %v5136_v3 = vadd.f32 %v5135_v1, %v5134_v28  ;;  %v5141_v43 = vadd.f32 %v5140_v21, %v5139_v63  ;;  %v5146_v44 = vadd.f32 %v5055_v33, %v5053_v45 }
 0x629   :  { %5290 = vadd.xlane.f32.xlu0 %v5247_v24  ;;  %5288 = vadd.xlane.f32.xlu1 %v5246_v60  ;;  %v5059_v51 = vpop.xlane.xlu0 %5058  ;;  %v5217_v30 = vsub.f32 %v10948_v5, %v11118_v6  ;;  %v5216_v29 = vsub.f32 %v10957_v13, %v11118_v6 }
 0x62a   :  { %v11124_v12 = vmul.f32 0.00048828125, %v5131_v8  ;;  %v5137_v59 = vrot.slane %v5136_v3, 1  ;;  %v5142_v4 = vrot.slane %v5141_v43, 2  ;;  %v5147_v54 = vrot.slane %v5146_v44, 4 }
 0x62b   :  { %v5057_v27 = vpop.xlane.xlu1 %5056  ;;  %v5249_v9 = vmul.f32 %v5217_v30, %v5217_v30  ;;  %v5248_v36 = vmul.f32 %v5216_v29, %v5216_v29 }
 0x62c   :  { %v5138_v28 = vadd.f32 %v5137_v59, %v5136_v3  ;;  %v5143_v63 = vadd.f32 %v5142_v4, %v5141_v43  ;;  %v5148_v33 = vadd.f32 %v5147_v54, %v5146_v44  ;;  %v5153_v32 = vadd.f32 %v5059_v51, %v5057_v27 }
 0x62d   :  { %5294 = vadd.xlane.f32.xlu0 %v5249_v9  ;;  %5292 = vadd.xlane.f32.xlu1 %v5248_v36  ;;  %v5063_v10 = vpop.xlane.xlu0 %5062  ;;  %v5219_v46 = vsub.f32 %v10963_v34, %v11124_v12  ;;  %v5218_v1 = vsub.f32 %v10972_v18, %v11124_v12 }
 0x62e   :  { %v11130_v21 = vmul.f32 0.00048828125, %v5138_v28  ;;  %v5144_v45 = vrot.slane %v5143_v63, 1  ;;  %v5149_v24 = vrot.slane %v5148_v33, 2  ;;  %v5154_v60 = vrot.slane %v5153_v32, 4 }
 0x62f   :  { %v5061_v8 = vpop.xlane.xlu1 %5060  ;;  %v5251_v30 = vmul.f32 %v5219_v46, %v5219_v46  ;;  %v5250_v3 = vmul.f32 %v5218_v1, %v5218_v1 }
 0x630   :  { %v5145_v43 = vadd.f32 %v5144_v45, %v5143_v63  ;;  %v5150_v44 = vadd.f32 %v5149_v24, %v5148_v33  ;;  %v5155_v51 = vadd.f32 %v5154_v60, %v5153_v32  ;;  %v5160_v29 = vadd.f32 %v5063_v10, %v5061_v8 }
 0x631   :  { %5298 = vadd.xlane.f32.xlu0 %v5251_v30  ;;  %5296 = vadd.xlane.f32.xlu1 %v5250_v3  ;;  %v5067_v59 = vpop.xlane.xlu0 %5066  ;;  %v5221_v4 = vsub.f32 %v10978_v19, %v11130_v21  ;;  %v5220_v54 = vsub.f32 %v10987_v35, %v11130_v21 }
 0x632   :  { %v11136_v27 = vmul.f32 0.00048828125, %v5145_v43  ;;  %v5151_v9 = vrot.slane %v5150_v44, 1  ;;  %v5156_v36 = vrot.slane %v5155_v51, 2  ;;  %v5161_v28 = vrot.slane %v5160_v29, 4 }
 0x633   :  { %v5065_v46 = vpop.xlane.xlu1 %5064  ;;  %v5253_v1 = vmul.f32 %v5221_v4, %v5221_v4  ;;  %v5252_v63 = vmul.f32 %v5220_v54, %v5220_v54 }
 0x634   :  { %v5152_v33 = vadd.f32 %v5151_v9, %v5150_v44  ;;  %v5157_v32 = vadd.f32 %v5156_v36, %v5155_v51  ;;  %v5162_v10 = vadd.f32 %v5161_v28, %v5160_v29  ;;  %v5167_v45 = vadd.f32 %v5067_v59, %v5065_v46 }
 0x635   :  { %5302 = vadd.xlane.f32.xlu0 %v5253_v1  ;;  %5300 = vadd.xlane.f32.xlu1 %v5252_v63  ;;  %v5071_v24 = vpop.xlane.xlu0 %5070  ;;  %v5223_v60 = vsub.f32 %v10993_v40, %v11136_v27  ;;  %v5222_v8 = vsub.f32 %v11002_v25, %v11136_v27 }
 0x636   :  { %v11142_v30 = vmul.f32 0.00048828125, %v5152_v33  ;;  %v5158_v3 = vrot.slane %v5157_v32, 1  ;;  %v5163_v43 = vrot.slane %v5162_v10, 2  ;;  %v5168_v19 = vrot.slane %v5167_v45, 4 }
 0x637   :  { %v5069_v4 = vpop.xlane.xlu1 %5068  ;;  %v5255_v54 = vmul.f32 %v5223_v60, %v5223_v60  ;;  %v5254_v44 = vmul.f32 %v5222_v8, %v5222_v8 }
 0x638   :  { %v5159_v51 = vadd.f32 %v5158_v3, %v5157_v32  ;;  %v5164_v29 = vadd.f32 %v5163_v43, %v5162_v10  ;;  %v5169_v59 = vadd.f32 %v5168_v19, %v5167_v45  ;;  %v5174_v9 = vadd.f32 %v5071_v24, %v5069_v4 }
 0x639   :  { %5306 = vadd.xlane.f32.xlu0 %v5255_v54  ;;  %5304 = vadd.xlane.f32.xlu1 %v5254_v44  ;;  %v5225_v36 = vsub.f32 %v11008_v22, %v11142_v30  ;;  %v5224_v28 = vsub.f32 %v11017_v61, %v11142_v30  ;;  %v5075_v40 = vpop.xlane.xlu0 %5074 }
 0x63a   :  { %v11148_v46 = vmul.f32 0.00048828125, %v5159_v51  ;;  %v5165_v1 = vrot.slane %v5164_v29, 1  ;;  %v5170_v63 = vrot.slane %v5169_v59, 2  ;;  %v5175_v33 = vrot.slane %v5174_v9, 4 }
 0x63b   :  { %v5073_v60 = vpop.xlane.xlu1 %5072  ;;  %v5257_v8 = vmul.f32 %v5225_v36, %v5225_v36  ;;  %v5256_v32 = vmul.f32 %v5224_v28, %v5224_v28 }
 0x63c   :  { %v5166_v10 = vadd.f32 %v5165_v1, %v5164_v29  ;;  %v5171_v19 = vadd.f32 %v5170_v63, %v5169_v59  ;;  %v5176_v45 = vadd.f32 %v5175_v33, %v5174_v9  ;;  %v5181_v24 = vadd.f32 %v5075_v40, %v5073_v60 }
 0x63d   :  { %5310 = vadd.xlane.f32.xlu0 %v5257_v8  ;;  %5308 = vadd.xlane.f32.xlu1 %v5256_v32  ;;  %v5227_v3 = vsub.f32 %v11023_v41, %v11148_v46  ;;  %v5226_v43 = vsub.f32 %v11032_v23, %v11148_v46 }
 0x63e   :  { %v11154_v4 = vmul.f32 0.00048828125, %v5166_v10  ;;  %v5172_v54 = vrot.slane %v5171_v19, 1  ;;  %v5177_v44 = vrot.slane %v5176_v45, 2  ;;  %v5182_v51 = vrot.slane %v5181_v24, 4 }
 0x63f   :  { %v5259_v22 = vmul.f32 %v5227_v3, %v5227_v3  ;;  %v5258_v36 = vmul.f32 %v5226_v43, %v5226_v43 }
 0x640   :  { %v5173_v28 = vadd.f32 %v5172_v54, %v5171_v19  ;;  %v5178_v29 = vadd.f32 %v5177_v44, %v5176_v45  ;;  %v5183_v59 = vadd.f32 %v5182_v51, %v5181_v24  ;;  %v5229_v40 = vsub.f32 %v11038_v0, %v11154_v4 }
 0x641   :  { %5314 = vadd.xlane.f32.xlu0 %v5259_v22  ;;  %5312 = vadd.xlane.f32.xlu1 %v5258_v36  ;;  %v5228_v9 = vsub.f32 %v11047_v47, %v11154_v4 }
 0x642   :  { %v11160_v1 = vmul.f32 0.00048828125, %v5173_v28  ;;  %v5179_v63 = vrot.slane %v5178_v29, 1  ;;  %v5184_v33 = vrot.slane %v5183_v59, 2  ;;  %v5261_v60 = vmul.f32 %v5229_v40, %v5229_v40 }
 0x643   :  { %v5260_v8 = vmul.f32 %v5228_v9, %v5228_v9 }
 0x644   :  { %v5180_v32 = vadd.f32 %v5179_v63, %v5178_v29  ;;  %v5185_v10 = vadd.f32 %v5184_v33, %v5183_v59  ;;  %v5231_v19 = vsub.f32 %v11053_v7, %v11160_v1  ;;  %v5230_v45 = vsub.f32 %v11062_v11, %v11160_v1 }
 0x645   :  { %5318 = vadd.xlane.f32.xlu0 %v5261_v60  ;;  %5316 = vadd.xlane.f32.xlu1 %v5260_v8 }
 0x646   :  { %v11166_v22 = vmul.f32 0.00048828125, %v5180_v32  ;;  %v5186_v24 = vrot.slane %v5185_v10, 1  ;;  %v5263_v3 = vmul.f32 %v5231_v19, %v5231_v19  ;;  %v5262_v43 = vmul.f32 %v5230_v45, %v5230_v45 }
 0x648   :  { %12388 = vst [vmem:[#allocation159_spill] sm:$0xff] %v11166_v22  ;;  %v5187_v54 = vadd.f32 %v5186_v24, %v5185_v10  ;;  %v5233_v44 = vsub.f32 %v11066_v14, %v11166_v22  ;;  %v5232_v51 = vsub.f32 %v11072_v55, %v11166_v22 }
 0x649   :  { %5322 = vadd.xlane.f32.xlu0 %v5263_v3  ;;  %5320 = vadd.xlane.f32.xlu1 %v5262_v43 }
 0x64a   :  { %v11172_v36 = vmul.f32 0.00048828125, %v5187_v54  ;;  %v5265_v28 = vmul.f32 %v5233_v44, %v5233_v44  ;;  %v5264_v29 = vmul.f32 %v5232_v51, %v5232_v51 }
 0x64c   :  { %12389 = vst [vmem:[#allocation160_spill] sm:$0xff] %v11172_v36  ;;  %v5235_v59 = vsub.f32 %v11075_v52, %v11172_v36  ;;  %v5234_v40 = vsub.f32 %v11078_v50, %v11172_v36 }
 0x64d   :  { %5326 = vadd.xlane.f32.xlu0 %v5265_v28  ;;  %5324 = vadd.xlane.f32.xlu1 %v5264_v29 }
 0x64e   :  { %v5267_v9 = vmul.f32 %v5235_v59, %v5235_v59  ;;  %v5266_v63 = vmul.f32 %v5234_v40, %v5234_v40 }
 0x651   :  { %5330 = vadd.xlane.f32.xlu0 %v5267_v9  ;;  %5328 = vadd.xlane.f32.xlu1 %v5266_v63 }
 0x69e   :  { %v5271_v33 = vpop.xlane.xlu0 %5270  ;;  %v5269_v60 = vpop.xlane.xlu1 %5268 }
 0x69f   :  { %v5332_v8 = vadd.f32 %v5271_v33, %v5269_v60 }
 0x6a1   :  { %v5333_v32 = vrot.slane %v5332_v8, 4 }
 0x6a2   :  { %v5275_v10 = vpop.xlane.xlu0 %5274  ;;  %v5273_v19 = vpop.xlane.xlu1 %5272 }
 0x6a3   :  { %v5334_v45 = vadd.f32 %v5333_v32, %v5332_v8  ;;  %v5339_v24 = vadd.f32 %v5275_v10, %v5273_v19 }
 0x6a5   :  { %v5335_v3 = vrot.slane %v5334_v45, 2  ;;  %v5340_v43 = vrot.slane %v5339_v24, 4 }
 0x6a6   :  { %v5279_v54 = vpop.xlane.xlu0 %5278  ;;  %v5277_v44 = vpop.xlane.xlu1 %5276 }
 0x6a7   :  { %v5336_v51 = vadd.f32 %v5335_v3, %v5334_v45  ;;  %v5341_v52 = vadd.f32 %v5340_v43, %v5339_v24  ;;  %v5346_v28 = vadd.f32 %v5279_v54, %v5277_v44 }
 0x6a9   :  { %v5337_v29 = vrot.slane %v5336_v51, 1  ;;  %v5342_v59 = vrot.slane %v5341_v52, 2  ;;  %v5347_v40 = vrot.slane %v5346_v28, 4 }
 0x6aa   :  { %v5283_v9 = vpop.xlane.xlu0 %5282  ;;  %v5281_v63 = vpop.xlane.xlu1 %5280 }
 0x6ab   :  { %v5338_v50 = vadd.f32 %v5337_v29, %v5336_v51  ;;  %v5343_v36 = vadd.f32 %v5342_v59, %v5341_v52  ;;  %v5348_v33 = vadd.f32 %v5347_v40, %v5346_v28  ;;  %v5353_v60 = vadd.f32 %v5283_v9, %v5281_v63 }
 0x6ad   :  { %v5444_v14 = vmul.f32 0.00048828125, %v5338_v50  ;;  %v5344_v55 = vrot.slane %v5343_v36, 1  ;;  %v5349_v8 = vrot.slane %v5348_v33, 2  ;;  %v5354_v32 = vrot.slane %v5353_v60, 4 }
 0x6ae   :  { %v5287_v10 = vpop.xlane.xlu0 %5286  ;;  %v5285_v19 = vpop.xlane.xlu1 %5284 }
 0x6af   :  { %v5460_v7 = vadd.f32 1e-05, %v5444_v14  ;;  %v5345_v11 = vadd.f32 %v5344_v55, %v5343_v36  ;;  %v5350_v45 = vadd.f32 %v5349_v8, %v5348_v33  ;;  %v5355_v24 = vadd.f32 %v5354_v32, %v5353_v60 }
 0x6b0   :  { %v5360_v3 = vadd.f32 %v5287_v10, %v5285_v19 }
 0x6b1   :  { %6861 = vrsqrt.f32 %v5460_v7  ;;  %v5445_v43 = vmul.f32 0.00048828125, %v5345_v11  ;;  %v5351_v54 = vrot.slane %v5350_v45, 1  ;;  %v5356_v44 = vrot.slane %v5355_v24, 2 }
 0x6b2   :  { %v5361_v22 = vrot.slane %v5360_v3, 4  ;;  %v5291_v51 = vpop.xlane.xlu0 %5290  ;;  %v5289_v52 = vpop.xlane.xlu1 %5288 }
 0x6b3   :  { %v5461_v28 = vadd.f32 1e-05, %v5445_v43  ;;  %v5352_v29 = vadd.f32 %v5351_v54, %v5350_v45  ;;  %v5357_v50 = vadd.f32 %v5356_v44, %v5355_v24  ;;  %v5367_v59 = vadd.f32 %v5291_v51, %v5289_v52  ;;  %v6118_v52 = vld [vmem:[%s11462_s4 + $0x10] sm:$0x1] }
 0x6b4   :  { %v5362_v40 = vadd.f32 %v5361_v22, %v5360_v3 }
 0x6b5   :  { %6863 = vrsqrt.f32 %v5461_v28  ;;  %v5446_v9 = vmul.f32 0.00048828125, %v5352_v29  ;;  %v5358_v63 = vrot.slane %v5357_v50, 1  ;;  %v5368_v14 = vrot.slane %v5367_v59, 4 }
 0x6b6   :  { %v5363_v55 = vrot.slane %v5362_v40, 2  ;;  %v5295_v36 = vpop.xlane.xlu0 %5294  ;;  %v5293_v33 = vpop.xlane.xlu1 %5292 }
 0x6b7   :  { %v5462_v60 = vadd.f32 1e-05, %v5446_v9  ;;  %v5359_v7 = vadd.f32 %v5358_v63, %v5357_v50  ;;  %v5369_v11 = vadd.f32 %v5368_v14, %v5367_v59  ;;  %v5374_v8 = vadd.f32 %v5295_v36, %v5293_v33 }
 0x6b8   :  { %v5364_v32 = vadd.f32 %v5363_v55, %v5362_v40 }
 0x6b9   :  { %6865 = vrsqrt.f32 %v5462_v60  ;;  %v5447_v10 = vmul.f32 0.00048828125, %v5359_v7  ;;  %v5370_v19 = vrot.slane %v5369_v11, 2  ;;  %v5375_v43 = vrot.slane %v5374_v8, 4  ;;  %v6134_v7 = vld [vmem:[%s11462_s4 + $0x20] sm:$0x1] }
 0x6ba   :  { %v5365_v45 = vrot.slane %v5364_v32, 1  ;;  %v5299_v24 = vpop.xlane.xlu0 %5298  ;;  %v5297_v54 = vpop.xlane.xlu1 %5296 }
 0x6bb   :  { %v5463_v22 = vadd.f32 1e-05, %v5447_v10  ;;  %v5371_v3 = vadd.f32 %v5370_v19, %v5369_v11  ;;  %v5376_v44 = vadd.f32 %v5375_v43, %v5374_v8  ;;  %v5381_v51 = vadd.f32 %v5299_v24, %v5297_v54  ;;  %v6119_v11 = vld [vmem:[%s11462_s4 + $0x11] sm:$0x1]  ;;  %v12390_v19 = vld [vmem:[#allocation43_spill] sm:$0xff] }
 0x6bc   :  { %v5366_v28 = vadd.f32 %v5365_v45, %v5364_v32 }
 0x6bd   :  { %6867 = vrsqrt.f32 %v5463_v22  ;;  %v5372_v29 = vrot.slane %v5371_v3, 1  ;;  %v5377_v50 = vrot.slane %v5376_v44, 2  ;;  %v5382_v59 = vrot.slane %v5381_v51, 4 }
 0x6be   :  { %v6862_v40 = vpop.eup %6861  ;;  %v5448_v9 = vmul.f32 0.00048828125, %v5366_v28  ;;  %v5303_v63 = vpop.xlane.xlu0 %5302 }
 0x6bf   :  { %v5301_v14 = vpop.xlane.xlu1 %5300  ;;  %v5509_v55 = vmul.f32 %v6862_v40, %v6118_v52  ;;  %v5373_v36 = vadd.f32 %v5372_v29, %v5371_v3  ;;  %v5378_v33 = vadd.f32 %v5377_v50, %v5376_v44  ;;  %v5383_v60 = vadd.f32 %v5382_v59, %v5381_v51 }
 0x6c0   :  { %v5464_v8 = vadd.f32 1e-05, %v5448_v9  ;;  %v5388_v32 = vadd.f32 %v5303_v63, %v5301_v14 }
 0x6c1   :  { %v5542_v10 = vmul.f32 %v5509_v55, %v11082_v37  ;;  %v5593_v43 = vrot.slane %v5509_v55, %v12390_v19  ;;  %v5449_v45 = vmul.f32 0.00048828125, %v5373_v36  ;;  %v5379_v24 = vrot.slane %v5378_v33, 1  ;;  %v6135_v37 = vld [vmem:[%s11462_s4 + $0x21] sm:$0x1] }
 0x6c2   :  { %v6864_v54 = vpop.eup %6863  ;;  %6869 = vrsqrt.f32 %v5464_v8  ;;  %v5384_v22 = vrot.slane %v5383_v60, 2  ;;  %v5389_v3 = vrot.slane %v5388_v32, 4  ;;  %v5307_v44 = vpop.xlane.xlu0 %5306 }
 0x6c3   :  { %v5305_v51 = vpop.xlane.xlu1 %5304  ;;  %v5558_v52 = vsub.f32 %v6134_v7, %v5542_v10  ;;  %v5670_v28 = vmul.f32 %v5593_v43, %v10867_v31  ;;  %v5671_v29 = vmul.f32 %v5593_v43, %v10859_v2  ;;  %v5510_v50 = vmul.f32 %v6864_v54, %v6119_v11  ;;  %v6120_v31 = vld [vmem:[%s11462_s4 + $0x12] sm:$0x1] }
 0x6c4   :  { %v5465_v59 = vadd.f32 1e-05, %v5449_v45  ;;  %v5380_v40 = vadd.f32 %v5379_v24, %v5378_v33  ;;  %v5385_v9 = vadd.f32 %v5384_v22, %v5383_v60  ;;  %v5390_v63 = vadd.f32 %v5389_v3, %v5388_v32  ;;  %v6121_v22 = vld [vmem:[%s11462_s4 + $0x13] sm:$0x1] }
 0x6c5   :  { %v5721_v14 = vrot.slane %v5558_v52, %v12390_v19  ;;  %v5543_v55 = vmul.f32 %v5510_v50, %v11088_v57  ;;  %v5597_v36 = vrot.slane %v5510_v50, %v12390_v19  ;;  %v11200_v2 = vadd.f32 %v5307_v44, %v5305_v51 }
 0x6c6   :  { %v6866_v7 = vpop.eup %6865  ;;  %6871 = vrsqrt.f32 %v5465_v59  ;;  %v5450_v11 = vmul.f32 0.00048828125, %v5380_v40  ;;  %v5386_v8 = vrot.slane %v5385_v9, 1  ;;  %v5391_v10 = vrot.slane %v5390_v63, 2  ;;  %v5311_v33 = vpop.xlane.xlu0 %5310 }
 0x6c7   :  { %v5309_v60 = vpop.xlane.xlu1 %5308  ;;  %v5798_v32 = vadd.f32 %v5721_v14, %v5670_v28  ;;  %v5799_v43 = vadd.f32 %v5721_v14, %v5671_v29  ;;  %v5559_v45 = vsub.f32 %v6135_v37, %v5543_v55  ;;  %v5672_v57 = vmul.f32 %v5597_v36, %v10882_v26  ;;  %v6136_v28 = vld [vmem:[%s11462_s4 + $0x22] sm:$0x1] }
 0x6c8   :  { %v5673_v24 = vmul.f32 %v5597_v36, %v10873_v42  ;;  %v5511_v54 = vmul.f32 %v6866_v7, %v6120_v31  ;;  %v5466_v3 = vadd.f32 1e-05, %v5450_v11  ;;  %v5387_v44 = vadd.f32 %v5386_v8, %v5385_v9  ;;  %v6137_v11 = vld [vmem:[%s11462_s4 + $0x23] sm:$0x1] }
 0x6c9   :  { %v5830_v51 = vmax.f32 %v5798_v32, 0.0  ;;  %v5831_v52 = vmax.f32 %v5799_v43, 0.0  ;;  %v5725_v50 = vrot.slane %v5559_v45, %v12390_v19  ;;  %v5392_v29 = vadd.f32 %v5391_v10, %v5390_v63 }
 0x6ca   :  { %v6868_v37 = vpop.eup %6867  ;;  %v5544_v26 = vmul.f32 %v5511_v54, %v11094_v58  ;;  %v5601_v42 = vrot.slane %v5511_v54, %v12390_v19  ;;  %6873 = vrsqrt.f32 %v5466_v3  ;;  %v5451_v59 = vmul.f32 0.00048828125, %v5387_v44  ;;  %v5315_v40 = vpop.xlane.xlu0 %5314 }
 0x6cb   :  { %v5313_v14 = vpop.xlane.xlu1 %5312  ;;  %5862 = vst [vmem:[%s11463_s5] sm:$0xff] %v5830_v51  ;;  %5863 = vst [vmem:[%s11463_s5 + $0x8] sm:$0xff] %v5831_v52  ;;  %v5800_v9 = vadd.f32 %v5725_v50, %v5672_v57  ;;  %v5801_v55 = vadd.f32 %v5725_v50, %v5673_v24  ;;  %v5512_v63 = vmul.f32 %v6868_v37, %v6121_v22  ;;  %v5393_v36 = vrot.slane %v5392_v29, 1  ;;  %v6122_v57 = vld [vmem:[%s11462_s4 + $0x14] sm:$0x1] }
 0x6cc   :  { %v5560_v31 = vsub.f32 %v6136_v28, %v5544_v26  ;;  %v5674_v58 = vmul.f32 %v5601_v42, %v10897_v49  ;;  %v5675_v7 = vmul.f32 %v5601_v42, %v10888_v16  ;;  %v5467_v8 = vadd.f32 1e-05, %v5451_v59  ;;  %v6138_v42 = vld [vmem:[%s11462_s4 + $0x24] sm:$0x1]  ;;  %v6123_v59 = vld [vmem:[%s11462_s4 + $0x15] sm:$0x1] }
 0x6cd   :  { %v5832_v10 = vmax.f32 %v5800_v9, 0.0  ;;  %v5833_v32 = vmax.f32 %v5801_v55, 0.0  ;;  %v5545_v43 = vmul.f32 %v5512_v63, %v11100_v56  ;;  %v5605_v45 = vrot.slane %v5512_v63, %v12390_v19 }
 0x6ce   :  { %v5729_v24 = vrot.slane %v5560_v31, %v12390_v19  ;;  %6875 = vrsqrt.f32 %v5467_v8  ;;  %v5394_v49 = vadd.f32 %v5393_v36, %v5392_v29  ;;  %v5396_v16 = vrot.slane %v11200_v2, 4  ;;  %v5319_v54 = vpop.xlane.xlu0 %5318 }
 0x6cf   :  { %v5317_v22 = vpop.xlane.xlu1 %5316  ;;  %v6870_v3 = vpop.eup %6869  ;;  %5864 = vst [vmem:[%s11463_s5 + $0x10] sm:$0xff] %v5832_v10  ;;  %5865 = vst [vmem:[%s11463_s5 + $0x18] sm:$0xff] %v5833_v32  ;;  %v5561_v56 = vsub.f32 %v6137_v11, %v5545_v43  ;;  %v5676_v44 = vmul.f32 %v5605_v45, %v10912_v17  ;;  %v5677_v51 = vmul.f32 %v5605_v45, %v10903_v62  ;;  %v6139_v45 = vld [vmem:[%s11462_s4 + $0x25] sm:$0x1] }
 0x6d0   :  { %v5402_v52 = vadd.f32 %v5311_v33, %v5309_v60  ;;  %v5802_v50 = vadd.f32 %v5729_v24, %v5674_v58  ;;  %v5803_v28 = vadd.f32 %v5729_v24, %v5675_v7  ;;  %v5513_v29 = vmul.f32 %v6870_v3, %v6122_v57 }
 0x6d1   :  { %v5452_v37 = vmul.f32 0.00048828125, %v5394_v49  ;;  %v5733_v26 = vrot.slane %v5561_v56, %v12390_v19  ;;  %v5397_v9 = vadd.f32 %v5396_v16, %v11200_v2  ;;  %v5409_v55 = vadd.f32 %v5315_v40, %v5313_v14 }
 0x6d2   :  { %v5403_v17 = vrot.slane %v5402_v52, 4  ;;  %v5834_v62 = vmax.f32 %v5802_v50, 0.0  ;;  %v5835_v33 = vmax.f32 %v5803_v28, 0.0  ;;  %v5546_v60 = vmul.f32 %v5513_v29, %v11106_v53  ;;  %v5323_v8 = vpop.xlane.xlu0 %5322 }
 0x6d3   :  { %v5609_v63 = vrot.slane %v5513_v29, %v12390_v19  ;;  %v6872_v36 = vpop.eup %6871  ;;  %v5804_v31 = vadd.f32 %v5733_v26, %v5676_v44  ;;  %v5805_v58 = vadd.f32 %v5733_v26, %v5677_v51  ;;  %v5468_v7 = vadd.f32 1e-05, %v5452_v37  ;;  %v5321_v10 = vpop.xlane.xlu1 %5320 }
 0x6d4   :  { %v5398_v11 = vrot.slane %v5397_v9, 2  ;;  %5866 = vst [vmem:[%s11463_s5 + $0x20] sm:$0xff] %v5834_v62  ;;  %5867 = vst [vmem:[%s11463_s5 + $0x28] sm:$0xff] %v5835_v33  ;;  %v5562_v2 = vsub.f32 %v6138_v42, %v5546_v60  ;;  %v5514_v14 = vmul.f32 %v6872_v36, %v6123_v59  ;;  %v5410_v44 = vrot.slane %v5409_v55, 4  ;;  %v6125_v42 = vld [vmem:[%s11462_s4 + $0x17] sm:$0x1] }
 0x6d5   :  { %v5678_v40 = vmul.f32 %v5609_v63, %v10927_v48  ;;  %v5679_v53 = vmul.f32 %v5609_v63, %v10918_v20  ;;  %v5836_v32 = vmax.f32 %v5804_v31, 0.0  ;;  %v5837_v43 = vmax.f32 %v5805_v58, 0.0  ;;  %v6124_v20 = vld [vmem:[%s11462_s4 + $0x16] sm:$0x1] }
 0x6d6   :  { %6877 = vrsqrt.f32 %v5468_v7  ;;  %v5399_v57 = vadd.f32 %v5398_v11, %v5397_v9  ;;  %v5737_v24 = vrot.slane %v5562_v2, %v12390_v19  ;;  %v5547_v49 = vmul.f32 %v5514_v14, %v11112_v38 }
 0x6d7   :  { %v5613_v16 = vrot.slane %v5514_v14, %v12390_v19  ;;  %v5404_v48 = vadd.f32 %v5403_v17, %v5402_v52  ;;  %v6874_v3 = vpop.eup %6873  ;;  %5868 = vst [vmem:[%s11463_s5 + $0x30] sm:$0xff] %v5836_v32  ;;  %5869 = vst [vmem:[%s11463_s5 + $0x38] sm:$0xff] %v5837_v43  ;;  %v5416_v51 = vadd.f32 %v5319_v54, %v5317_v22  ;;  %v6140_v22 = vld [vmem:[%s11462_s4 + $0x26] sm:$0x1] }
 0x6d8   :  { %v5400_v56 = vrot.slane %v5399_v57, 1  ;;  %v11272_v38 = vadd.f32 %v5323_v8, %v5321_v10  ;;  %v5806_v50 = vadd.f32 %v5737_v24, %v5678_v40  ;;  %v5807_v28 = vadd.f32 %v5737_v24, %v5679_v53  ;;  %v6141_v40 = vld [vmem:[%s11462_s4 + $0x27] sm:$0x1]  ;;  %v5327_v24 = vpop.xlane.xlu0 %5326 }
 0x6d9   :  { %v5563_v29 = vsub.f32 %v6139_v45, %v5547_v49  ;;  %v5680_v37 = vmul.f32 %v5613_v16, %v10942_v39  ;;  %v5681_v52 = vmul.f32 %v5613_v16, %v10933_v15  ;;  %v5515_v26 = vmul.f32 %v6874_v3, %v6124_v20  ;;  %v6126_v16 = vld [vmem:[%s11462_s4 + $0x18] sm:$0x1] }
 0x6da   :  { %v5401_v59 = vadd.f32 %v5400_v56, %v5399_v57  ;;  %v5405_v9 = vrot.slane %v5404_v48, 2  ;;  %v5838_v17 = vmax.f32 %v5806_v50, 0.0  ;;  %v5839_v62 = vmax.f32 %v5807_v28, 0.0 }
 0x6db   :  { %v5741_v54 = vrot.slane %v5563_v29, %v12390_v19  ;;  %v5411_v33 = vadd.f32 %v5410_v44, %v5409_v55  ;;  %v6876_v60 = vpop.eup %6875  ;;  %v5548_v39 = vmul.f32 %v5515_v26, %v11118_v6  ;;  %v5617_v15 = vrot.slane %v5515_v26, %v12390_v19 }
 0x6dc   :  { %v5453_v63 = vmul.f32 0.00048828125, %v5401_v59  ;;  %v5406_v36 = vadd.f32 %v5405_v9, %v5404_v48  ;;  %5870 = vst [vmem:[%s11463_s5 + $0x40] sm:$0xff] %v5838_v17  ;;  %5871 = vst [vmem:[%s11463_s5 + $0x48] sm:$0xff] %v5839_v62  ;;  %v5516_v7 = vmul.f32 %v6876_v60, %v6125_v42  ;;  %v5417_v20 = vrot.slane %v5416_v51, 4  ;;  %v6142_v17 = vld [vmem:[%s11462_s4 + $0x28] sm:$0x1] }
 0x6dd   :  { %v5808_v31 = vadd.f32 %v5741_v54, %v5680_v37  ;;  %v5809_v58 = vadd.f32 %v5741_v54, %v5681_v52  ;;  %v5412_v11 = vrot.slane %v5411_v33, 2  ;;  %v5564_v55 = vsub.f32 %v6140_v22, %v5548_v39 }
 0x6de   :  { %v5682_v2 = vmul.f32 %v5617_v15, %v10957_v13  ;;  %v5683_v6 = vmul.f32 %v5617_v15, %v10948_v5  ;;  %v5469_v53 = vadd.f32 1e-05, %v5453_v63  ;;  %v5549_v10 = vmul.f32 %v5516_v7, %v11124_v12  ;;  %v5325_v13 = vpop.xlane.xlu1 %5324 }
 0x6df   :  { %v5840_v14 = vmax.f32 %v5808_v31, 0.0  ;;  %v5841_v8 = vmax.f32 %v5809_v58, 0.0  ;;  %v5621_v32 = vrot.slane %v5516_v7, %v12390_v19  ;;  %v5745_v43 = vrot.slane %v5564_v55, %v12390_v19  ;;  %v5331_v31 = vpop.xlane.xlu0 %5330 }
 0x6e0   :  { %6879 = vrsqrt.f32 %v5469_v53  ;;  %v5407_v45 = vrot.slane %v5406_v36, 1  ;;  %v5413_v57 = vadd.f32 %v5412_v11, %v5411_v33  ;;  %v5565_v5 = vsub.f32 %v6141_v40, %v5549_v10 }
 0x6e1   :  { %5872 = vst [vmem:[%s11463_s5 + $0x50] sm:$0xff] %v5840_v14  ;;  %5873 = vst [vmem:[%s11463_s5 + $0x58] sm:$0xff] %v5841_v8  ;;  %v5684_v12 = vmul.f32 %v5621_v32, %v10972_v18  ;;  %v5685_v49 = vmul.f32 %v5621_v32, %v10963_v34  ;;  %v5810_v48 = vadd.f32 %v5745_v43, %v5682_v2  ;;  %v5424_v37 = vrot.slane %v11272_v38, 4  ;;  %v6127_v8 = vld [vmem:[%s11462_s4 + $0x19] sm:$0x1] }
 0x6e2   :  { %v5811_v3 = vadd.f32 %v5745_v43, %v5683_v6  ;;  %v5408_v56 = vadd.f32 %v5407_v45, %v5406_v36  ;;  %v5414_v44 = vrot.slane %v5413_v57, 1  ;;  %v5749_v28 = vrot.slane %v5565_v5, %v12390_v19  ;;  %v5329_v58 = vpop.xlane.xlu1 %5328  ;;  %v12391_v6 = vld [vmem:[#allocation152_spill] sm:$0xff] }
 0x6e3   :  { %v6878_v50 = vpop.eup %6877  ;;  %v5418_v29 = vadd.f32 %v5417_v20, %v5416_v51  ;;  %v5430_v52 = vadd.f32 %v5327_v24, %v5325_v13  ;;  %v5842_v26 = vmax.f32 %v5810_v48, 0.0  ;;  %v5425_v60 = vadd.f32 %v5424_v37, %v11272_v38 }
 0x6e4   :  { %v5843_v18 = vmax.f32 %v5811_v3, 0.0  ;;  %v5517_v42 = vmul.f32 %v6878_v50, %v6126_v16  ;;  %v5454_v34 = vmul.f32 0.00048828125, %v5408_v56  ;;  %v5812_v59 = vadd.f32 %v5749_v28, %v5684_v12  ;;  %v6143_v3 = vld [vmem:[%s11462_s4 + $0x29] sm:$0x1] }
 0x6e5   :  { %v5813_v9 = vadd.f32 %v5749_v28, %v5685_v49  ;;  %v5415_v62 = vadd.f32 %v5414_v44, %v5413_v57  ;;  %v5419_v54 = vrot.slane %v5418_v29, 2  ;;  %5874 = vst [vmem:[%s11463_s5 + $0x60] sm:$0xff] %v5842_v26  ;;  %v5426_v55 = vrot.slane %v5425_v60, 2 }
 0x6e6   :  { %5875 = vst [vmem:[%s11463_s5 + $0x68] sm:$0xff] %v5843_v18  ;;  %v5550_v51 = vmul.f32 %v5517_v42, %v11130_v21  ;;  %v5625_v22 = vrot.slane %v5517_v42, %v12390_v19  ;;  %v5470_v33 = vadd.f32 1e-05, %v5454_v34  ;;  %v5844_v39 = vmax.f32 %v5812_v59, 0.0  ;;  %v6128_v34 = vld [vmem:[%s11462_s4 + $0x1a] sm:$0x1] }
 0x6e7   :  { %v5845_v15 = vmax.f32 %v5813_v9, 0.0  ;;  %v5455_v63 = vmul.f32 0.00048828125, %v5415_v62  ;;  %v5420_v36 = vadd.f32 %v5419_v54, %v5418_v29  ;;  %v5431_v38 = vrot.slane %v5430_v52, 4  ;;  %v12392_v62 = vld [vmem:[#allocation153_spill] sm:$0xff] }
 0x6e8   :  { %v5566_v7 = vsub.f32 %v6142_v17, %v5550_v51  ;;  %6881 = vrsqrt.f32 %v5470_v33  ;;  %5876 = vst [vmem:[%s11463_s5 + $0x70] sm:$0xff] %v5844_v39  ;;  %v5686_v2 = vmul.f32 %v5625_v22, %v10987_v35  ;;  %v5687_v40 = vmul.f32 %v5625_v22, %v12391_v6 }
 0x6e9   :  { %5877 = vst [vmem:[%s11463_s5 + $0x78] sm:$0xff] %v5845_v15  ;;  %v5471_v21 = vadd.f32 1e-05, %v5455_v63  ;;  %v5421_v11 = vrot.slane %v5420_v36, 1  ;;  %v5437_v14 = vadd.f32 %v5331_v31, %v5329_v58  ;;  %v5427_v32 = vadd.f32 %v5426_v55, %v5425_v60  ;;  %v6129_v63 = vld [vmem:[%s11462_s4 + $0x1b] sm:$0x1] }
 0x6ea   :  { %v5753_v53 = vrot.slane %v5566_v7, %v12390_v19  ;;  %v5432_v43 = vadd.f32 %v5431_v38, %v5430_v52 }
 0x6eb   :  { %6883 = vrsqrt.f32 %v5471_v21  ;;  %v5422_v10 = vadd.f32 %v5421_v11, %v5420_v36  ;;  %v5438_v24 = vrot.slane %v5437_v14, 4  ;;  %v5428_v12 = vrot.slane %v5427_v32, 1 }
 0x6ec   :  { %v5814_v45 = vadd.f32 %v5753_v53, %v5686_v2  ;;  %v5815_v57 = vadd.f32 %v5753_v53, %v5687_v40  ;;  %v5433_v35 = vrot.slane %v5432_v43, 2  ;;  %v6145_v40 = vld [vmem:[%s11462_s4 + $0x2b] sm:$0x1] }
 0x6ed   :  { %v6880_v13 = vpop.eup %6879  ;;  %v5456_v5 = vmul.f32 0.00048828125, %v5422_v10  ;;  %v5439_v48 = vadd.f32 %v5438_v24, %v5437_v14  ;;  %v5429_v44 = vadd.f32 %v5428_v12, %v5427_v32  ;;  %v12393_v10 = vld [vmem:[#allocation154_spill] sm:$0xff] }
 0x6ee   :  { %v5846_v49 = vmax.f32 %v5814_v45, 0.0  ;;  %v5847_v16 = vmax.f32 %v5815_v57, 0.0  ;;  %v5518_v20 = vmul.f32 %v6880_v13, %v6127_v8  ;;  %v5434_v50 = vadd.f32 %v5433_v35, %v5432_v43  ;;  %v6130_v45 = vld [vmem:[%s11462_s4 + $0x1c] sm:$0x1] }
 0x6ef   :  { %v5472_v56 = vadd.f32 1e-05, %v5456_v5  ;;  %v5440_v37 = vrot.slane %v5439_v48, 2  ;;  %v5457_v52 = vmul.f32 0.00048828125, %v5429_v44 }
 0x6f0   :  { %5878 = vst [vmem:[%s11463_s5 + $0x80] sm:$0xff] %v5846_v49  ;;  %5879 = vst [vmem:[%s11463_s5 + $0x88] sm:$0xff] %v5847_v16  ;;  %v5551_v28 = vmul.f32 %v5518_v20, %v11136_v27  ;;  %v5629_v29 = vrot.slane %v5518_v20, %v12390_v19  ;;  %v5435_v26 = vrot.slane %v5434_v50, 1  ;;  %v6146_v20 = vld [vmem:[%s11462_s4 + $0x2c] sm:$0x1] }
 0x6f1   :  { %6885 = vrsqrt.f32 %v5472_v56  ;;  %v5441_v42 = vadd.f32 %v5440_v37, %v5439_v48  ;;  %v5473_v59 = vadd.f32 1e-05, %v5457_v52 }
 0x6f2   :  { %v5567_v18 = vsub.f32 %v6143_v3, %v5551_v28  ;;  %v5436_v9 = vadd.f32 %v5435_v26, %v5434_v50  ;;  %v5688_v17 = vmul.f32 %v5629_v29, %v11002_v25  ;;  %v5689_v54 = vmul.f32 %v5629_v29, %v12392_v62  ;;  %v6144_v25 = vld [vmem:[%s11462_s4 + $0x2a] sm:$0x1] }
 0x6f3   :  { %v5442_v51 = vrot.slane %v5441_v42, 1  ;;  %6887 = vrsqrt.f32 %v5473_v59 }
 0x6f4   :  { %v5757_v27 = vrot.slane %v5567_v18, %v12390_v19  ;;  %v5458_v33 = vmul.f32 0.00048828125, %v5436_v9 }
 0x6f5   :  { %v6882_v22 = vpop.eup %6881  ;;  %v5443_v36 = vadd.f32 %v5442_v51, %v5441_v42  ;;  %v6147_v42 = vld [vmem:[%s11462_s4 + $0x2d] sm:$0x1] }
 0x6f6   :  { %v5816_v60 = vadd.f32 %v5757_v27, %v5688_v17  ;;  %v5817_v39 = vadd.f32 %v5757_v27, %v5689_v54  ;;  %v5519_v15 = vmul.f32 %v6882_v22, %v6128_v34  ;;  %v5474_v31 = vadd.f32 1e-05, %v5458_v33  ;;  %v12394_v33 = vld [vmem:[#allocation159_spill] sm:$0xff] }
 0x6f7   :  { %v5459_v2 = vmul.f32 0.00048828125, %v5443_v36  ;;  %v12396_v36 = vld [vmem:[#allocation155_spill] sm:$0xff] }
 0x6f8   :  { %v6884_v58 = vpop.eup %6883  ;;  %v5848_v7 = vmax.f32 %v5816_v60, 0.0  ;;  %v5849_v21 = vmax.f32 %v5817_v39, 0.0  ;;  %v5552_v11 = vmul.f32 %v5519_v15, %v11142_v30  ;;  %v5633_v55 = vrot.slane %v5519_v15, %v12390_v19  ;;  %v12395_v15 = vld [vmem:[#allocation65_spill] sm:$0xff] }
 0x6f9   :  { %v5520_v38 = vmul.f32 %v6884_v58, %v6129_v63  ;;  %6889 = vrsqrt.f32 %v5474_v31  ;;  %v5475_v14 = vadd.f32 1e-05, %v5459_v2  ;;  %v6149_v2 = vld [vmem:[%s11462_s4 + $0x2f] sm:$0x1] }
 0x6fa   :  { %5880 = vst [vmem:[%s11463_s5 + $0x90] sm:$0xff] %v5848_v7  ;;  %5881 = vst [vmem:[%s11463_s5 + $0x98] sm:$0xff] %v5849_v21  ;;  %v5568_v6 = vsub.f32 %v6144_v25, %v5552_v11  ;;  %v5690_v8 = vmul.f32 %v5633_v55, %v11017_v61  ;;  %v5691_v32 = vmul.f32 %v5633_v55, %v12393_v10  ;;  %v12397_v55 = vld [vmem:[#allocation156_spill] sm:$0xff] }
 0x6fb   :  { %v5553_v30 = vmul.f32 %v5520_v38, %v11148_v46  ;;  %v5637_v53 = vrot.slane %v5520_v38, %v12390_v19  ;;  %6891 = vrsqrt.f32 %v5475_v14 }
 0x6fc   :  { %v5761_v43 = vrot.slane %v5568_v6, %v12390_v19  ;;  %v12398_v6 = vld [vmem:[#allocation66_spill] sm:$0xff] }
 0x6fd   :  { %v5569_v57 = vsub.f32 %v6145_v40, %v5553_v30  ;;  %v5692_v46 = vmul.f32 %v5637_v53, %v11032_v23  ;;  %v5693_v12 = vmul.f32 %v5637_v53, %v11023_v41  ;;  %v6131_v23 = vld [vmem:[%s11462_s4 + $0x1d] sm:$0x1]  ;;  %v12399_v53 = vld [vmem:[#allocation160_spill] sm:$0xff] }
 0x6fe   :  { %v6886_v24 = vpop.eup %6885  ;;  %v5818_v13 = vadd.f32 %v5761_v43, %v5690_v8  ;;  %v5819_v5 = vadd.f32 %v5761_v43, %v5691_v32 }
 0x6ff   :  { %v5765_v35 = vrot.slane %v5569_v57, %v12390_v19  ;;  %v5521_v61 = vmul.f32 %v6886_v24, %v6130_v45  ;;  %v12400_v24 = vld [vmem:[#allocation158_spill] sm:$0xff] }
 0x700   :  { %v5850_v49 = vmax.f32 %v5818_v13, 0.0  ;;  %v5851_v16 = vmax.f32 %v5819_v5, 0.0  ;;  %v6888_v41 = vpop.eup %6887 }
 0x701   :  { %v5820_v48 = vadd.f32 %v5765_v35, %v5692_v46  ;;  %v5821_v3 = vadd.f32 %v5765_v35, %v5693_v12  ;;  %v5554_v56 = vmul.f32 %v5521_v61, %v11154_v4  ;;  %v5641_v44 = vrot.slane %v5521_v61, %v12390_v19  ;;  %v6132_v4 = vld [vmem:[%s11462_s4 + $0x1e] sm:$0x1] }
 0x702   :  { %5882 = vst [vmem:[%s11463_s5 + $0xa0] sm:$0xff] %v5850_v49  ;;  %5883 = vst [vmem:[%s11463_s5 + $0xa8] sm:$0xff] %v5851_v16  ;;  %v5522_v37 = vmul.f32 %v6888_v41, %v6131_v23  ;;  %v12401_v12 = vld [vmem:[#allocation157_spill] sm:$0xff] }
 0x703   :  { %v5852_v50 = vmax.f32 %v5820_v48, 0.0  ;;  %v5853_v28 = vmax.f32 %v5821_v3, 0.0  ;;  %v5570_v29 = vsub.f32 %v6146_v20, %v5554_v56  ;;  %v5694_v52 = vmul.f32 %v5641_v44, %v11047_v47  ;;  %v6148_v47 = vld [vmem:[%s11462_s4 + $0x2e] sm:$0x1] }
 0x704   :  { %v5695_v26 = vmul.f32 %v5641_v44, %v11038_v0  ;;  %v5555_v59 = vmul.f32 %v5522_v37, %v11160_v1  ;;  %v5645_v9 = vrot.slane %v5522_v37, %v12390_v19  ;;  %v6133_v0 = vld [vmem:[%s11462_s4 + $0x1f] sm:$0x1] }
 0x705   :  { %5884 = vst [vmem:[%s11463_s5 + $0xb0] sm:$0xff] %v5852_v50  ;;  %5885 = vst [vmem:[%s11463_s5 + $0xb8] sm:$0xff] %v5853_v28  ;;  %v5769_v18 = vrot.slane %v5570_v29, %v12390_v19 }
 0x706   :  { %v6890_v34 = vpop.eup %6889  ;;  %v5571_v27 = vsub.f32 %v6147_v42, %v5555_v59  ;;  %v5696_v63 = vmul.f32 %v5645_v9, %v12395_v15  ;;  %v5697_v25 = vmul.f32 %v5645_v9, %v12396_v36 }
 0x707   :  { %v5822_v17 = vadd.f32 %v5769_v18, %v5694_v52  ;;  %v5823_v62 = vadd.f32 %v5769_v18, %v5695_v26  ;;  %v5523_v54 = vmul.f32 %v6890_v34, %v6132_v4 }
 0x708   :  { %v6892_v39 = vpop.eup %6891  ;;  %v5773_v31 = vrot.slane %v5571_v27, %v12390_v19 }
 0x709   :  { %v5854_v51 = vmax.f32 %v5822_v17, 0.0  ;;  %v5855_v22 = vmax.f32 %v5823_v62, 0.0  ;;  %v5556_v60 = vmul.f32 %v5523_v54, %v12394_v33  ;;  %v5649_v1 = vrot.slane %v5523_v54, %v12390_v19 }
 0x70a   :  { %v5524_v7 = vmul.f32 %v6892_v39, %v6133_v0  ;;  %v5824_v21 = vadd.f32 %v5773_v31, %v5696_v63  ;;  %v5825_v11 = vadd.f32 %v5773_v31, %v5697_v25 }
 0x70b   :  { %5886 = vst [vmem:[%s11463_s5 + $0xc0] sm:$0xff] %v5854_v51  ;;  %5887 = vst [vmem:[%s11463_s5 + $0xc8] sm:$0xff] %v5855_v22  ;;  %v5572_v58 = vsub.f32 %v6148_v47, %v5556_v60  ;;  %v5698_v38 = vmul.f32 %v5649_v1, %v12397_v55  ;;  %v5699_v40 = vmul.f32 %v5649_v1, %v12398_v6 }
 0x70c   :  { %v5557_v14 = vmul.f32 %v5524_v7, %v12399_v53  ;;  %v5653_v8 = vrot.slane %v5524_v7, %v12390_v19  ;;  %v5856_v10 = vmax.f32 %v5824_v21, 0.0  ;;  %v5857_v32 = vmax.f32 %v5825_v11, 0.0 }
 0x70d   :  { %v5777_v30 = vrot.slane %v5572_v58, %v12390_v19 }
 0x70e   :  { %v5573_v57 = vsub.f32 %v6149_v2, %v5557_v14  ;;  %5888 = vst [vmem:[%s11463_s5 + $0xd0] sm:$0xff] %v5856_v10  ;;  %5889 = vst [vmem:[%s11463_s5 + $0xd8] sm:$0xff] %v5857_v32  ;;  %v5700_v13 = vmul.f32 %v5653_v8, %v12400_v24  ;;  %v5701_v35 = vmul.f32 %v5653_v8, %v12401_v12 }
 0x70f   :  { %v5826_v43 = vadd.f32 %v5777_v30, %v5698_v38  ;;  %v5827_v45 = vadd.f32 %v5777_v30, %v5699_v40 }
 0x710   :  { %v5781_v61 = vrot.slane %v5573_v57, %v12390_v19 }
 0x711   :  { %v5858_v5 = vmax.f32 %v5826_v43, 0.0  ;;  %v5859_v46 = vmax.f32 %v5827_v45, 0.0 }
 0x712   :  { %v5828_v49 = vadd.f32 %v5781_v61, %v5700_v13  ;;  %v5829_v16 = vadd.f32 %v5781_v61, %v5701_v35 }
 0x713   :  { %5890 = vst [vmem:[%s11463_s5 + $0xe0] sm:$0xff] %v5858_v5  ;;  %5891 = vst [vmem:[%s11463_s5 + $0xe8] sm:$0xff] %v5859_v46 }
 0x714   :  { %v5860_v20 = vmax.f32 %v5828_v49, 0.0  ;;  %v5861_v48 = vmax.f32 %v5829_v16, 0.0 }
 0x716   :  { %5892 = vst [vmem:[%s11463_s5 + $0xf0] sm:$0xff] %v5860_v20  ;;  %5893 = vst [vmem:[%s11463_s5 + $0xf8] sm:$0xff] %v5861_v48 }

</bundles_post_ra>
